<compile_context>
chip_gen: v5e
topology: v5e:2x2
jax: 0.10.0
libtpu: 0.0.40
codegen_flags: <defaults>
</compile_context>

<pallas_src>
import math
from functools import partial

import jax
import jax.numpy as jnp
from jax.experimental import pallas as pl
from jax.experimental.pallas import tpu as pltpu


# ----------------------------------------------------------------------------
# Kernels
# ----------------------------------------------------------------------------
def make_conv_stats_kernel(m, offsets):
    """3x3 valid conv + bias as a few large-M MXU matmuls on a row-flattened
    image, fused with per-image BN statistics (masked sum / sum-of-squares).

    x_ref    : (1, L, K)        row-flattened (padded) input
    w_ref    : (T, K, Cout)     one (K, Cout) tap matrix per offset
    b_ref    : (1, Cout)
    mask_ref : (m, 1)           1.0 on valid output columns, 0.0 on garbage
    o_ref    : (1, m, Cout)     conv output in flat (hout*win) layout
    s_ref    : (1, 2, Cout)     [sum, sum_of_squares] over valid positions
    """

    def kernel(x_ref, w_ref, b_ref, mask_ref, o_ref, s_ref):
        acc = jnp.dot(x_ref[0, offsets[0]:offsets[0] + m, :], w_ref[0],
                      preferred_element_type=jnp.float32)
        for t in range(1, len(offsets)):
            off = offsets[t]
            acc = acc + jnp.dot(x_ref[0, off:off + m, :], w_ref[t],
                                preferred_element_type=jnp.float32)
        acc = acc + b_ref[...]                                  # bias added once
        o_ref[0] = acc                                          # single full-tile store

        masked = acc * mask_ref[...]                            # zero the garbage columns
        s1 = jnp.sum(masked, axis=0, keepdims=True)             # (1, Cout)
        s2 = jnp.sum(masked * acc, axis=0, keepdims=True)       # (1, Cout) (mask is 0/1)
        s_ref[0] = jnp.concatenate([s1, s2], axis=0)            # (2, Cout), one store

    return kernel


def make_bn_pool_kernel(hout, win, cout):
    """Fused (x*scale + shift) -> ReLU -> MaxPool2d(2,2) on one image.

    Input is (1, hout, win, C) (columns >= wout are garbage and never selected).
    Output is (1, hp, win-1, C) where column j = max over W-pair (j, j+1); the
    stride-2 selection of even columns is done in glue (data movement only).
    """
    hp = hout // 2

    def kernel(x_ref, scale_ref, shift_ref, o_ref):
        x = x_ref[0]                                            # (hout, win, C)
        y = jnp.maximum(x * scale_ref[...] + shift_ref[...], 0.0)
        y = y[:2 * hp]                                          # drop odd H tail (floor pool)
        y = y.reshape(hp, 2, win, cout)                         # split leading dim (layout-safe)
        yh = jnp.maximum(y[:, 0], y[:, 1])                      # H-pool -> (hp, win, C)
        o_ref[0] = jnp.maximum(yh[:, :win - 1, :], yh[:, 1:, :])  # W-pair max, one store

    return kernel


def fc_kernel(x_ref, w_ref, b_ref, o_ref):
    o_ref[...] = jnp.dot(x_ref[...], w_ref[...],
                         preferred_element_type=jnp.float32) + b_ref[...]


# ----------------------------------------------------------------------------
# Per-layer wrapper: conv(+stats) -> BN(batch stats) + ReLU + MaxPool
# ----------------------------------------------------------------------------
def layer_forward(x_nhwc, w, b, gamma, beta, *, fold_taps, eps=1e-5):
    n, hin, win, cin = x_nhwc.shape
    cout = w.shape[-1]
    hout, wout = hin - 2, win - 2
    hp, wp = hout // 2, wout // 2
    m = hout * win                                   # full-width (padded) output length

    # Row-flattened input, padded so every shifted tap window stays in bounds.
    xflat = jnp.pad(x_nhwc.reshape(n, hin * win, cin), ((0, 0), (0, 8), (0, 0)))
    tap_offsets = tuple(dy * win + dx for dy in range(3) for dx in range(3))

    if fold_taps:
        # Tiny cin (layer 1): fold the 9 taps into the contraction dim in glue
        # (im2col, K = 9*cin) so the conv is one full-rate matmul per image.
        x_in = jnp.concatenate([xflat[:, o:o + m, :] for o in tap_offsets], axis=-1)
        w_taps = w.reshape(1, 9 * cin, cout)
        offsets = (0,)
    else:
        x_in = xflat
        w_taps = w.reshape(9, cin, cout)
        offsets = tap_offsets

    # 1.0 on valid output columns (x < wout) of the row-flattened layout.
    mask = ((jnp.arange(m) % win) < wout).astype(jnp.float32).reshape(m, 1)

    l, k = x_in.shape[1], x_in.shape[2]
    conv_pad, stats = pl.pallas_call(
        make_conv_stats_kernel(m, offsets),
        out_shape=(jax.ShapeDtypeStruct((n, m, cout), jnp.float32),
                   jax.ShapeDtypeStruct((n, 2, cout), jnp.float32)),
        grid=(n,),
        in_specs=[
            pl.BlockSpec((1, l, k), lambda i: (i, 0, 0)),
            pl.BlockSpec(w_taps.shape, lambda i: (0, 0, 0)),
            pl.BlockSpec((1, cout), lambda i: (0, 0)),
            pl.BlockSpec((m, 1), lambda i: (0, 0)),
        ],
        out_specs=(pl.BlockSpec((1, m, cout), lambda i: (i, 0, 0)),
                   pl.BlockSpec((1, 2, cout), lambda i: (i, 0, 0))),
        compiler_params=pltpu.CompilerParams(dimension_semantics=("parallel",)),
    )(x_in, w_taps, b, mask)

    # Training-mode BN: batch mean / biased variance over valid positions (tiny glue math).
    s = jnp.sum(stats, axis=0)                       # (2, Cout)
    count = float(n * hout * wout)
    mean = s[0:1] / count
    var = s[1:2] / count - mean * mean
    scale = gamma / jnp.sqrt(var + eps)
    shift = beta - mean * scale

    conv4d = conv_pad.reshape(n, hout, win, cout)    # contiguous reshape, free in glue
    pooled_wide = pl.pallas_call(
        make_bn_pool_kernel(hout, win, cout),
        out_shape=jax.ShapeDtypeStruct((n, hp, win - 1, cout), jnp.float32),
        grid=(n,),
        in_specs=[
            pl.BlockSpec((1, hout, win, cout), lambda i: (i, 0, 0, 0)),
            pl.BlockSpec((1, cout), lambda i: (0, 0)),
            pl.BlockSpec((1, cout), lambda i: (0, 0)),
        ],
        out_specs=pl.BlockSpec((1, hp, win - 1, cout), lambda i: (i, 0, 0, 0)),
        compiler_params=pltpu.CompilerParams(dimension_semantics=("parallel",)),
    )(conv4d, scale, shift)

    # Final stride-2 W-column selection (pure data movement) in glue.
    return pooled_wide[:, :, 0:2 * wp:2, :]          # (n, hp, wp, Cout)


# ----------------------------------------------------------------------------
# Full Conv3 forward
# ----------------------------------------------------------------------------
def conv3_forward(x, params, in_channels, img_size):
    # x.view(-1, C, H, W)  (PyTorch NCHW), then NCHW -> NHWC (glue)
    x = x.reshape(-1, in_channels, img_size[0], img_size[1]).astype(jnp.float32)
    n = x.shape[0]
    x = jnp.transpose(x, (0, 2, 3, 1))

    x = layer_forward(x, params["w1"], params["b1"], params["g1"], params["be1"],
                      fold_taps=True)     # cin=1: K=9 im2col, one matmul / image
    x = layer_forward(x, params["w2"], params["b2"], params["g2"], params["be2"],
                      fold_taps=False)
    x = layer_forward(x, params["w3"], params["b3"], params["g3"], params["be3"],
                      fold_taps=False)

    # flatten in NCHW order to match torch's x.view(N, -1)  (glue)
    x = jnp.transpose(x, (0, 3, 1, 2)).reshape(n, -1)
    fc_in = x.shape[1]

    num_classes = params["fc_w"].shape[1]
    logits = pl.pallas_call(
        fc_kernel,
        out_shape=jax.ShapeDtypeStruct((n, num_classes), jnp.float32),
        grid=(1,),
        in_specs=[
            pl.BlockSpec((n, fc_in), lambda i: (0, 0)),
            pl.BlockSpec(params["fc_w"].shape, lambda i: (0, 0)),
            pl.BlockSpec(params["fc_b"].shape, lambda i: (0, 0)),
        ],
        out_specs=pl.BlockSpec((n, num_classes), lambda i: (0, 0)),
        compiler_params=pltpu.CompilerParams(dimension_semantics=("arbitrary",)),
    )(x, params["fc_w"], params["fc_b"])
    return logits


# ----------------------------------------------------------------------------
# Deterministic parameter init (same shapes / distributions as Conv3._init_weights)
# ----------------------------------------------------------------------------
def init_params(key, in_channels, img_size, num_classes):
    k1, k2, k3, k4 = jax.random.split(key, 4)

    def conv_w(k, cin, cout):
        n_fan = 3 * 3 * cout
        return jax.random.normal(k, (3, 3, cin, cout), jnp.float32) * math.sqrt(2.0 / n_fan)

    w1 = conv_w(k1, in_channels, 64)
    w2 = conv_w(k2, 64, 64)
    w3 = conv_w(k3, 64, 64)

    # Actual flatten size after 3x [conv3x3(valid) -> pool2].  For 28x28 this
    # equals the original module's 64 * (img // 2**4)**2 formula (= 64).
    h, wd = img_size
    for _ in range(3):
        h, wd = (h - 2) // 2, (wd - 2) // 2
    fc_in = 64 * h * wd

    fc_w = jax.random.normal(k4, (fc_in, num_classes), jnp.float32) * 0.01   # (in, out)
    fc_b = jnp.ones((1, num_classes), jnp.float32)                           # torch: bias = ones

    zeros64 = jnp.zeros((1, 64), jnp.float32)
    ones64 = jnp.ones((1, 64), jnp.float32)
    return dict(
        w1=w1, b1=zeros64, g1=ones64, be1=zeros64,
        w2=w2, b2=zeros64, g2=ones64, be2=zeros64,
        w3=w3, b3=zeros64, g3=ones64, be3=zeros64,
        fc_w=fc_w, fc_b=fc_b,
    )


if __name__ == "__main__":
    in_channels, img_size, num_classes = 1, (28, 28), 5   # Omniglot-style config
    batch = 2

    x = jax.random.normal(jax.random.PRNGKey(0),
                          (batch, in_channels, img_size[0], img_size[1]), jnp.float32)
    params = init_params(jax.random.PRNGKey(1337), in_channels, img_size, num_classes)

    fwd = jax.jit(partial(conv3_forward, in_channels=in_channels, img_size=img_size))
    out = jax.block_until_ready(fwd(x, params))
    assert out.shape == (batch, num_classes), out.shape
    assert bool(jnp.all(jnp.isfinite(out)))
    print("KERNEL_OK")
</pallas_src>

<mosaic_0001>
module attributes {stable_mosaic.version = 11 : i64} {
  func.func @kernel(%arg0: i32, %arg1: memref<1x728x9xf32, #tpu.memory_space<vmem>>, %arg2: memref<1x9x64xf32, #tpu.memory_space<vmem>>, %arg3: memref<1x64xf32, #tpu.memory_space<vmem>>, %arg4: memref<728x1xf32, #tpu.memory_space<vmem>>, %arg5: memref<1x728x64xf32, #tpu.memory_space<vmem>>, %arg6: memref<1x2x64xf32, #tpu.memory_space<vmem>>) attributes {dimension_semantics = [#tpu.dimension_semantics<parallel>], iteration_bounds = array<i64: 2>, scalar_prefetch = 0 : i64, scratch_operands = 0 : i64, tpu.core_type = #tpu.core_type<tc>, window_params = [{transform_indices = @transform_0, window_bounds = array<i64: 1, 728, 9>}, {pipeline_mode = #tpu.pipeline_mode<synchronous>, transform_indices = @transform_1, window_bounds = array<i64: 1, 9, 64>}, {pipeline_mode = #tpu.pipeline_mode<synchronous>, transform_indices = @transform_2, window_bounds = array<i64: 1, 64>}, {pipeline_mode = #tpu.pipeline_mode<synchronous>, transform_indices = @transform_3, window_bounds = array<i64: 728, 1>}, {transform_indices = @transform_4, window_bounds = array<i64: 1, 728, 64>}, {transform_indices = @transform_5, window_bounds = array<i64: 1, 2, 64>}]} {
    %c0 = arith.constant 0 : index
    %c0_0 = arith.constant 0 : index
    %c0_1 = arith.constant 0 : index
    %0 = vector.load %arg1[%c0, %c0_0, %c0_1] : memref<1x728x9xf32, #tpu.memory_space<vmem>>, vector<1x728x9xf32>
    %1 = vector.shape_cast %0 : vector<1x728x9xf32> to vector<728x9xf32>
    %c0_2 = arith.constant 0 : index
    %c0_3 = arith.constant 0 : index
    %c0_4 = arith.constant 0 : index
    %2 = vector.load %arg2[%c0_2, %c0_3, %c0_4] : memref<1x9x64xf32, #tpu.memory_space<vmem>>, vector<1x9x64xf32>
    %3 = vector.shape_cast %2 : vector<1x9x64xf32> to vector<9x64xf32>
    %cst = arith.constant dense<0.000000e+00> : vector<728x64xf32>
    %4 = tpu.matmul %1, %3, %cst {dimension_numbers = #tpu.dot_dimension_numbers<[1], [0], [0], [1], [0, 0, 1, 1], [], []>} : vector<728x9xf32>, vector<9x64xf32>, vector<728x64xf32> -> vector<728x64xf32>
    %c0_5 = arith.constant 0 : index
    %c0_6 = arith.constant 0 : index
    %5 = vector.load %arg3[%c0_5, %c0_6] : memref<1x64xf32, #tpu.memory_space<vmem>>, vector<1x64xf32>
    %6 = vector.broadcast %5 : vector<1x64xf32> to vector<728x64xf32>
    %7 = arith.addf %4, %6 : vector<728x64xf32>
    %c0_7 = arith.constant 0 : index
    %c0_8 = arith.constant 0 : index
    %c0_9 = arith.constant 0 : index
    %8 = vector.load %arg5[%c0_7, %c0_8, %c0_9] : memref<1x728x64xf32, #tpu.memory_space<vmem>>, vector<1x728x64xf32>
    %9 = vector.shape_cast %8 : vector<1x728x64xf32> to vector<728x64xf32>
    %10 = vector.shape_cast %7 : vector<728x64xf32> to vector<1x728x64xf32>
    tpu.vector_store %arg5[%c0_7, %c0_8, %c0_9], %10 {strides = array<i32>} : memref<1x728x64xf32, #tpu.memory_space<vmem>>, vector<1x728x64xf32>,
    %c0_10 = arith.constant 0 : index
    %c0_11 = arith.constant 0 : index
    %11 = vector.load %arg4[%c0_10, %c0_11] : memref<728x1xf32, #tpu.memory_space<vmem>>, vector<728x1xf32>
    %12 = vector.broadcast %11 : vector<728x1xf32> to vector<728x64xf32>
    %13 = arith.mulf %7, %12 : vector<728x64xf32>
    %cst_12 = arith.constant dense<0.000000e+00> : vector<64xf32>
    %14 = vector.multi_reduction <add>, %13, %cst_12 [0] : vector<728x64xf32> to vector<64xf32>
    %15 = vector.shape_cast %14 : vector<64xf32> to vector<1x64xf32>
    %16 = arith.mulf %13, %7 : vector<728x64xf32>
    %cst_13 = arith.constant dense<0.000000e+00> : vector<64xf32>
    %17 = vector.multi_reduction <add>, %16, %cst_13 [0] : vector<728x64xf32> to vector<64xf32>
    %18 = vector.shape_cast %17 : vector<64xf32> to vector<1x64xf32>
    %19 = tpu.concatenate %15, %18 in 0 : vector<1x64xf32>, vector<1x64xf32> -> vector<2x64xf32>
    %c0_14 = arith.constant 0 : index
    %c0_15 = arith.constant 0 : index
    %c0_16 = arith.constant 0 : index
    %20 = vector.load %arg6[%c0_14, %c0_15, %c0_16] : memref<1x2x64xf32, #tpu.memory_space<vmem>>, vector<1x2x64xf32>
    %21 = vector.shape_cast %20 : vector<1x2x64xf32> to vector<2x64xf32>
    %22 = vector.shape_cast %19 : vector<2x64xf32> to vector<1x2x64xf32>
    tpu.vector_store %arg6[%c0_14, %c0_15, %c0_16], %22 {strides = array<i32>} : memref<1x2x64xf32, #tpu.memory_space<vmem>>, vector<1x2x64xf32>,
    return
  }
  func.func @transform_0(%arg0: i32) -> (i32, i32, i32) {
    %c0_i32 = arith.constant 0 : i32
    %c0_i32_0 = arith.constant 0 : i32
    %c0_i32_1 = arith.constant 0 : i32
    return %arg0, %c0_i32, %c0_i32_0 : i32, i32, i32
  }
  func.func @transform_1(%arg0: i32) -> (i32, i32, i32) {
    %c0_i32 = arith.constant 0 : i32
    %c0_i32_0 = arith.constant 0 : i32
    %c0_i32_1 = arith.constant 0 : i32
    %c0_i32_2 = arith.constant 0 : i32
    return %c0_i32, %c0_i32_0, %c0_i32_1 : i32, i32, i32
  }
  func.func @transform_2(%arg0: i32) -> (i32, i32) {
    %c0_i32 = arith.constant 0 : i32
    %c0_i32_0 = arith.constant 0 : i32
    %c0_i32_1 = arith.constant 0 : i32
    return %c0_i32, %c0_i32_0 : i32, i32
  }
  func.func @transform_3(%arg0: i32) -> (i32, i32) {
    %c0_i32 = arith.constant 0 : i32
    %c0_i32_0 = arith.constant 0 : i32
    %c0_i32_1 = arith.constant 0 : i32
    return %c0_i32, %c0_i32_0 : i32, i32
  }
  func.func @transform_4(%arg0: i32) -> (i32, i32, i32) {
    %c0_i32 = arith.constant 0 : i32
    %c0_i32_0 = arith.constant 0 : i32
    %c0_i32_1 = arith.constant 0 : i32
    return %arg0, %c0_i32, %c0_i32_0 : i32, i32, i32
  }
  func.func @transform_5(%arg0: i32) -> (i32, i32, i32) {
    %c0_i32 = arith.constant 0 : i32
    %c0_i32_0 = arith.constant 0 : i32
    %c0_i32_1 = arith.constant 0 : i32
    return %arg0, %c0_i32, %c0_i32_0 : i32, i32, i32
  }
}

module attributes {stable_mosaic.version = 11 : i64} {
  func.func @kernel(%arg0: i32, %arg1: memref<1x26x28x64xf32, #tpu.memory_space<vmem>>, %arg2: memref<1x64xf32, #tpu.memory_space<vmem>>, %arg3: memref<1x64xf32, #tpu.memory_space<vmem>>, %arg4: memref<1x13x27x64xf32, #tpu.memory_space<vmem>>) attributes {dimension_semantics = [#tpu.dimension_semantics<parallel>], iteration_bounds = array<i64: 2>, scalar_prefetch = 0 : i64, scratch_operands = 0 : i64, tpu.core_type = #tpu.core_type<tc>, window_params = [{transform_indices = @transform_0, window_bounds = array<i64: 1, 26, 28, 64>}, {pipeline_mode = #tpu.pipeline_mode<synchronous>, transform_indices = @transform_1, window_bounds = array<i64: 1, 64>}, {pipeline_mode = #tpu.pipeline_mode<synchronous>, transform_indices = @transform_2, window_bounds = array<i64: 1, 64>}, {transform_indices = @transform_3, window_bounds = array<i64: 1, 13, 27, 64>}]} {
    %c0 = arith.constant 0 : index
    %c0_0 = arith.constant 0 : index
    %c0_1 = arith.constant 0 : index
    %c0_2 = arith.constant 0 : index
    %0 = vector.load %arg1[%c0, %c0_0, %c0_1, %c0_2] : memref<1x26x28x64xf32, #tpu.memory_space<vmem>>, vector<1x26x28x64xf32>
    %1 = vector.shape_cast %0 : vector<1x26x28x64xf32> to vector<26x28x64xf32>
    %c0_3 = arith.constant 0 : index
    %c0_4 = arith.constant 0 : index
    %2 = vector.load %arg2[%c0_3, %c0_4] : memref<1x64xf32, #tpu.memory_space<vmem>>, vector<1x64xf32>
    %3 = vector.shape_cast %2 : vector<1x64xf32> to vector<1x1x64xf32>
    %4 = vector.broadcast %3 : vector<1x1x64xf32> to vector<26x28x64xf32>
    %5 = arith.mulf %1, %4 : vector<26x28x64xf32>
    %c0_5 = arith.constant 0 : index
    %c0_6 = arith.constant 0 : index
    %6 = vector.load %arg3[%c0_5, %c0_6] : memref<1x64xf32, #tpu.memory_space<vmem>>, vector<1x64xf32>
    %7 = vector.shape_cast %6 : vector<1x64xf32> to vector<1x1x64xf32>
    %8 = vector.broadcast %7 : vector<1x1x64xf32> to vector<26x28x64xf32>
    %9 = arith.addf %5, %8 : vector<26x28x64xf32>
    %cst = arith.constant 0.000000e+00 : f32
    %10 = vector.broadcast %cst : f32 to vector<26x28x64xf32>
    %11 = arith.maximumf %9, %10 : vector<26x28x64xf32>
    %12 = vector.shape_cast %11 : vector<26x28x64xf32> to vector<13x2x28x64xf32>
    %13 = vector.extract_strided_slice %12 {offsets = [0, 0, 0, 0], sizes = [13, 1, 28, 64], strides = [1, 1, 1, 1]} : vector<13x2x28x64xf32> to vector<13x1x28x64xf32>
    %14 = vector.shape_cast %13 : vector<13x1x28x64xf32> to vector<13x28x64xf32>
    %15 = vector.extract_strided_slice %12 {offsets = [0, 1, 0, 0], sizes = [13, 1, 28, 64], strides = [1, 1, 1, 1]} : vector<13x2x28x64xf32> to vector<13x1x28x64xf32>
    %16 = vector.shape_cast %15 : vector<13x1x28x64xf32> to vector<13x28x64xf32>
    %17 = arith.maximumf %14, %16 : vector<13x28x64xf32>
    %18 = vector.extract_strided_slice %17 {offsets = [0, 0, 0], sizes = [13, 27, 64], strides = [1, 1, 1]} : vector<13x28x64xf32> to vector<13x27x64xf32>
    %19 = vector.extract_strided_slice %17 {offsets = [0, 1, 0], sizes = [13, 27, 64], strides = [1, 1, 1]} : vector<13x28x64xf32> to vector<13x27x64xf32>
    %20 = arith.maximumf %18, %19 : vector<13x27x64xf32>
    %c0_7 = arith.constant 0 : index
    %c0_8 = arith.constant 0 : index
    %c0_9 = arith.constant 0 : index
    %c0_10 = arith.constant 0 : index
    %21 = vector.load %arg4[%c0_7, %c0_8, %c0_9, %c0_10] : memref<1x13x27x64xf32, #tpu.memory_space<vmem>>, vector<1x13x27x64xf32>
    %22 = vector.shape_cast %21 : vector<1x13x27x64xf32> to vector<13x27x64xf32>
    %23 = vector.shape_cast %20 : vector<13x27x64xf32> to vector<1x13x27x64xf32>
    tpu.vector_store %arg4[%c0_7, %c0_8, %c0_9, %c0_10], %23 {strides = array<i32>} : memref<1x13x27x64xf32, #tpu.memory_space<vmem>>, vector<1x13x27x64xf32>,
    return
  }
  func.func @transform_0(%arg0: i32) -> (i32, i32, i32, i32) {
    %c0_i32 = arith.constant 0 : i32
    %c0_i32_0 = arith.constant 0 : i32
    %c0_i32_1 = arith.constant 0 : i32
    %c0_i32_2 = arith.constant 0 : i32
    return %arg0, %c0_i32, %c0_i32_0, %c0_i32_1 : i32, i32, i32, i32
  }
  func.func @transform_1(%arg0: i32) -> (i32, i32) {
    %c0_i32 = arith.constant 0 : i32
    %c0_i32_0 = arith.constant 0 : i32
    %c0_i32_1 = arith.constant 0 : i32
    return %c0_i32, %c0_i32_0 : i32, i32
  }
  func.func @transform_2(%arg0: i32) -> (i32, i32) {
    %c0_i32 = arith.constant 0 : i32
    %c0_i32_0 = arith.constant 0 : i32
    %c0_i32_1 = arith.constant 0 : i32
    return %c0_i32, %c0_i32_0 : i32, i32
  }
  func.func @transform_3(%arg0: i32) -> (i32, i32, i32, i32) {
    %c0_i32 = arith.constant 0 : i32
    %c0_i32_0 = arith.constant 0 : i32
    %c0_i32_1 = arith.constant 0 : i32
    %c0_i32_2 = arith.constant 0 : i32
    return %arg0, %c0_i32, %c0_i32_0, %c0_i32_1 : i32, i32, i32, i32
  }
}

module attributes {stable_mosaic.version = 11 : i64} {
  func.func @kernel(%arg0: i32, %arg1: memref<1x177x64xf32, #tpu.memory_space<vmem>>, %arg2: memref<9x64x64xf32, #tpu.memory_space<vmem>>, %arg3: memref<1x64xf32, #tpu.memory_space<vmem>>, %arg4: memref<143x1xf32, #tpu.memory_space<vmem>>, %arg5: memref<1x143x64xf32, #tpu.memory_space<vmem>>, %arg6: memref<1x2x64xf32, #tpu.memory_space<vmem>>) attributes {dimension_semantics = [#tpu.dimension_semantics<parallel>], iteration_bounds = array<i64: 2>, scalar_prefetch = 0 : i64, scratch_operands = 0 : i64, tpu.core_type = #tpu.core_type<tc>, window_params = [{transform_indices = @transform_0, window_bounds = array<i64: 1, 177, 64>}, {pipeline_mode = #tpu.pipeline_mode<synchronous>, transform_indices = @transform_1, window_bounds = array<i64: 9, 64, 64>}, {pipeline_mode = #tpu.pipeline_mode<synchronous>, transform_indices = @transform_2, window_bounds = array<i64: 1, 64>}, {pipeline_mode = #tpu.pipeline_mode<synchronous>, transform_indices = @transform_3, window_bounds = array<i64: 143, 1>}, {transform_indices = @transform_4, window_bounds = array<i64: 1, 143, 64>}, {transform_indices = @transform_5, window_bounds = array<i64: 1, 2, 64>}]} {
    %c0 = arith.constant 0 : index
    %c0_0 = arith.constant 0 : index
    %c0_1 = arith.constant 0 : index
    %0 = vector.load %arg1[%c0, %c0_0, %c0_1] : memref<1x177x64xf32, #tpu.memory_space<vmem>>, vector<1x143x64xf32>
    %1 = vector.shape_cast %0 : vector<1x143x64xf32> to vector<143x64xf32>
    %c0_2 = arith.constant 0 : index
    %c0_3 = arith.constant 0 : index
    %c0_4 = arith.constant 0 : index
    %2 = vector.load %arg2[%c0_2, %c0_3, %c0_4] : memref<9x64x64xf32, #tpu.memory_space<vmem>>, vector<1x64x64xf32>
    %3 = vector.shape_cast %2 : vector<1x64x64xf32> to vector<64x64xf32>
    %cst = arith.constant dense<0.000000e+00> : vector<143x64xf32>
    %4 = tpu.matmul %1, %3, %cst {dimension_numbers = #tpu.dot_dimension_numbers<[1], [0], [0], [1], [0, 0, 1, 1], [], []>} : vector<143x64xf32>, vector<64x64xf32>, vector<143x64xf32> -> vector<143x64xf32>
    %c0_5 = arith.constant 0 : index
    %c1 = arith.constant 1 : index
    %c0_6 = arith.constant 0 : index
    %5 = vector.load %arg1[%c0_5, %c1, %c0_6] : memref<1x177x64xf32, #tpu.memory_space<vmem>>, vector<1x143x64xf32>
    %6 = vector.shape_cast %5 : vector<1x143x64xf32> to vector<143x64xf32>
    %c1_7 = arith.constant 1 : index
    %c0_8 = arith.constant 0 : index
    %c0_9 = arith.constant 0 : index
    %7 = vector.load %arg2[%c1_7, %c0_8, %c0_9] : memref<9x64x64xf32, #tpu.memory_space<vmem>>, vector<1x64x64xf32>
    %8 = vector.shape_cast %7 : vector<1x64x64xf32> to vector<64x64xf32>
    %cst_10 = arith.constant dense<0.000000e+00> : vector<143x64xf32>
    %9 = tpu.matmul %6, %8, %cst_10 {dimension_numbers = #tpu.dot_dimension_numbers<[1], [0], [0], [1], [0, 0, 1, 1], [], []>} : vector<143x64xf32>, vector<64x64xf32>, vector<143x64xf32> -> vector<143x64xf32>
    %10 = arith.addf %4, %9 : vector<143x64xf32>
    %c0_11 = arith.constant 0 : index
    %c2 = arith.constant 2 : index
    %c0_12 = arith.constant 0 : index
    %11 = vector.load %arg1[%c0_11, %c2, %c0_12] : memref<1x177x64xf32, #tpu.memory_space<vmem>>, vector<1x143x64xf32>
    %12 = vector.shape_cast %11 : vector<1x143x64xf32> to vector<143x64xf32>
    %c2_13 = arith.constant 2 : index
    %c0_14 = arith.constant 0 : index
    %c0_15 = arith.constant 0 : index
    %13 = vector.load %arg2[%c2_13, %c0_14, %c0_15] : memref<9x64x64xf32, #tpu.memory_space<vmem>>, vector<1x64x64xf32>
    %14 = vector.shape_cast %13 : vector<1x64x64xf32> to vector<64x64xf32>
    %cst_16 = arith.constant dense<0.000000e+00> : vector<143x64xf32>
    %15 = tpu.matmul %12, %14, %cst_16 {dimension_numbers = #tpu.dot_dimension_numbers<[1], [0], [0], [1], [0, 0, 1, 1], [], []>} : vector<143x64xf32>, vector<64x64xf32>, vector<143x64xf32> -> vector<143x64xf32>
    %16 = arith.addf %10, %15 : vector<143x64xf32>
    %c0_17 = arith.constant 0 : index
    %c13 = arith.constant 13 : index
    %c0_18 = arith.constant 0 : index
    %17 = vector.load %arg1[%c0_17, %c13, %c0_18] : memref<1x177x64xf32, #tpu.memory_space<vmem>>, vector<1x143x64xf32>
    %18 = vector.shape_cast %17 : vector<1x143x64xf32> to vector<143x64xf32>
    %c3 = arith.constant 3 : index
    %c0_19 = arith.constant 0 : index
    %c0_20 = arith.constant 0 : index
    %19 = vector.load %arg2[%c3, %c0_19, %c0_20] : memref<9x64x64xf32, #tpu.memory_space<vmem>>, vector<1x64x64xf32>
    %20 = vector.shape_cast %19 : vector<1x64x64xf32> to vector<64x64xf32>
    %cst_21 = arith.constant dense<0.000000e+00> : vector<143x64xf32>
    %21 = tpu.matmul %18, %20, %cst_21 {dimension_numbers = #tpu.dot_dimension_numbers<[1], [0], [0], [1], [0, 0, 1, 1], [], []>} : vector<143x64xf32>, vector<64x64xf32>, vector<143x64xf32> -> vector<143x64xf32>
    %22 = arith.addf %16, %21 : vector<143x64xf32>
    %c0_22 = arith.constant 0 : index
    %c14 = arith.constant 14 : index
    %c0_23 = arith.constant 0 : index
    %23 = vector.load %arg1[%c0_22, %c14, %c0_23] : memref<1x177x64xf32, #tpu.memory_space<vmem>>, vector<1x143x64xf32>
    %24 = vector.shape_cast %23 : vector<1x143x64xf32> to vector<143x64xf32>
    %c4 = arith.constant 4 : index
    %c0_24 = arith.constant 0 : index
    %c0_25 = arith.constant 0 : index
    %25 = vector.load %arg2[%c4, %c0_24, %c0_25] : memref<9x64x64xf32, #tpu.memory_space<vmem>>, vector<1x64x64xf32>
    %26 = vector.shape_cast %25 : vector<1x64x64xf32> to vector<64x64xf32>
    %cst_26 = arith.constant dense<0.000000e+00> : vector<143x64xf32>
    %27 = tpu.matmul %24, %26, %cst_26 {dimension_numbers = #tpu.dot_dimension_numbers<[1], [0], [0], [1], [0, 0, 1, 1], [], []>} : vector<143x64xf32>, vector<64x64xf32>, vector<143x64xf32> -> vector<143x64xf32>
    %28 = arith.addf %22, %27 : vector<143x64xf32>
    %c0_27 = arith.constant 0 : index
    %c15 = arith.constant 15 : index
    %c0_28 = arith.constant 0 : index
    %29 = vector.load %arg1[%c0_27, %c15, %c0_28] : memref<1x177x64xf32, #tpu.memory_space<vmem>>, vector<1x143x64xf32>
    %30 = vector.shape_cast %29 : vector<1x143x64xf32> to vector<143x64xf32>
    %c5 = arith.constant 5 : index
    %c0_29 = arith.constant 0 : index
    %c0_30 = arith.constant 0 : index
    %31 = vector.load %arg2[%c5, %c0_29, %c0_30] : memref<9x64x64xf32, #tpu.memory_space<vmem>>, vector<1x64x64xf32>
    %32 = vector.shape_cast %31 : vector<1x64x64xf32> to vector<64x64xf32>
    %cst_31 = arith.constant dense<0.000000e+00> : vector<143x64xf32>
    %33 = tpu.matmul %30, %32, %cst_31 {dimension_numbers = #tpu.dot_dimension_numbers<[1], [0], [0], [1], [0, 0, 1, 1], [], []>} : vector<143x64xf32>, vector<64x64xf32>, vector<143x64xf32> -> vector<143x64xf32>
    %34 = arith.addf %28, %33 : vector<143x64xf32>
    %c0_32 = arith.constant 0 : index
    %c26 = arith.constant 26 : index
    %c0_33 = arith.constant 0 : index
    %35 = vector.load %arg1[%c0_32, %c26, %c0_33] : memref<1x177x64xf32, #tpu.memory_space<vmem>>, vector<1x143x64xf32>
    %36 = vector.shape_cast %35 : vector<1x143x64xf32> to vector<143x64xf32>
    %c6 = arith.constant 6 : index
    %c0_34 = arith.constant 0 : index
    %c0_35 = arith.constant 0 : index
    %37 = vector.load %arg2[%c6, %c0_34, %c0_35] : memref<9x64x64xf32, #tpu.memory_space<vmem>>, vector<1x64x64xf32>
    %38 = vector.shape_cast %37 : vector<1x64x64xf32> to vector<64x64xf32>
    %cst_36 = arith.constant dense<0.000000e+00> : vector<143x64xf32>
    %39 = tpu.matmul %36, %38, %cst_36 {dimension_numbers = #tpu.dot_dimension_numbers<[1], [0], [0], [1], [0, 0, 1, 1], [], []>} : vector<143x64xf32>, vector<64x64xf32>, vector<143x64xf32> -> vector<143x64xf32>
    %40 = arith.addf %34, %39 : vector<143x64xf32>
    %c0_37 = arith.constant 0 : index
    %c27 = arith.constant 27 : index
    %c0_38 = arith.constant 0 : index
    %41 = vector.load %arg1[%c0_37, %c27, %c0_38] : memref<1x177x64xf32, #tpu.memory_space<vmem>>, vector<1x143x64xf32>
    %42 = vector.shape_cast %41 : vector<1x143x64xf32> to vector<143x64xf32>
    %c7 = arith.constant 7 : index
    %c0_39 = arith.constant 0 : index
    %c0_40 = arith.constant 0 : index
    %43 = vector.load %arg2[%c7, %c0_39, %c0_40] : memref<9x64x64xf32, #tpu.memory_space<vmem>>, vector<1x64x64xf32>
    %44 = vector.shape_cast %43 : vector<1x64x64xf32> to vector<64x64xf32>
    %cst_41 = arith.constant dense<0.000000e+00> : vector<143x64xf32>
    %45 = tpu.matmul %42, %44, %cst_41 {dimension_numbers = #tpu.dot_dimension_numbers<[1], [0], [0], [1], [0, 0, 1, 1], [], []>} : vector<143x64xf32>, vector<64x64xf32>, vector<143x64xf32> -> vector<143x64xf32>
    %46 = arith.addf %40, %45 : vector<143x64xf32>
    %c0_42 = arith.constant 0 : index
    %c28 = arith.constant 28 : index
    %c0_43 = arith.constant 0 : index
    %47 = vector.load %arg1[%c0_42, %c28, %c0_43] : memref<1x177x64xf32, #tpu.memory_space<vmem>>, vector<1x143x64xf32>
    %48 = vector.shape_cast %47 : vector<1x143x64xf32> to vector<143x64xf32>
    %c8 = arith.constant 8 : index
    %c0_44 = arith.constant 0 : index
    %c0_45 = arith.constant 0 : index
    %49 = vector.load %arg2[%c8, %c0_44, %c0_45] : memref<9x64x64xf32, #tpu.memory_space<vmem>>, vector<1x64x64xf32>
    %50 = vector.shape_cast %49 : vector<1x64x64xf32> to vector<64x64xf32>
    %cst_46 = arith.constant dense<0.000000e+00> : vector<143x64xf32>
    %51 = tpu.matmul %48, %50, %cst_46 {dimension_numbers = #tpu.dot_dimension_numbers<[1], [0], [0], [1], [0, 0, 1, 1], [], []>} : vector<143x64xf32>, vector<64x64xf32>, vector<143x64xf32> -> vector<143x64xf32>
    %52 = arith.addf %46, %51 : vector<143x64xf32>
    %c0_47 = arith.constant 0 : index
    %c0_48 = arith.constant 0 : index
    %53 = vector.load %arg3[%c0_47, %c0_48] : memref<1x64xf32, #tpu.memory_space<vmem>>, vector<1x64xf32>
    %54 = vector.broadcast %53 : vector<1x64xf32> to vector<143x64xf32>
    %55 = arith.addf %52, %54 : vector<143x64xf32>
    %c0_49 = arith.constant 0 : index
    %c0_50 = arith.constant 0 : index
    %c0_51 = arith.constant 0 : index
    %56 = vector.load %arg5[%c0_49, %c0_50, %c0_51] : memref<1x143x64xf32, #tpu.memory_space<vmem>>, vector<1x143x64xf32>
    %57 = vector.shape_cast %56 : vector<1x143x64xf32> to vector<143x64xf32>
    %58 = vector.shape_cast %55 : vector<143x64xf32> to vector<1x143x64xf32>
    tpu.vector_store %arg5[%c0_49, %c0_50, %c0_51], %58 {strides = array<i32>} : memref<1x143x64xf32, #tpu.memory_space<vmem>>, vector<1x143x64xf32>,
    %c0_52 = arith.constant 0 : index
    %c0_53 = arith.constant 0 : index
    %59 = vector.load %arg4[%c0_52, %c0_53] : memref<143x1xf32, #tpu.memory_space<vmem>>, vector<143x1xf32>
    %60 = vector.broadcast %59 : vector<143x1xf32> to vector<143x64xf32>
    %61 = arith.mulf %55, %60 : vector<143x64xf32>
    %cst_54 = arith.constant dense<0.000000e+00> : vector<64xf32>
    %62 = vector.multi_reduction <add>, %61, %cst_54 [0] : vector<143x64xf32> to vector<64xf32>
    %63 = vector.shape_cast %62 : vector<64xf32> to vector<1x64xf32>
    %64 = arith.mulf %61, %55 : vector<143x64xf32>
    %cst_55 = arith.constant dense<0.000000e+00> : vector<64xf32>
    %65 = vector.multi_reduction <add>, %64, %cst_55 [0] : vector<143x64xf32> to vector<64xf32>
    %66 = vector.shape_cast %65 : vector<64xf32> to vector<1x64xf32>
    %67 = tpu.concatenate %63, %66 in 0 : vector<1x64xf32>, vector<1x64xf32> -> vector<2x64xf32>
    %c0_56 = arith.constant 0 : index
    %c0_57 = arith.constant 0 : index
    %c0_58 = arith.constant 0 : index
    %68 = vector.load %arg6[%c0_56, %c0_57, %c0_58] : memref<1x2x64xf32, #tpu.memory_space<vmem>>, vector<1x2x64xf32>
    %69 = vector.shape_cast %68 : vector<1x2x64xf32> to vector<2x64xf32>
    %70 = vector.shape_cast %67 : vector<2x64xf32> to vector<1x2x64xf32>
    tpu.vector_store %arg6[%c0_56, %c0_57, %c0_58], %70 {strides = array<i32>} : memref<1x2x64xf32, #tpu.memory_space<vmem>>, vector<1x2x64xf32>,
    return
  }
  func.func @transform_0(%arg0: i32) -> (i32, i32, i32) {
    %c0_i32 = arith.constant 0 : i32
    %c0_i32_0 = arith.constant 0 : i32
    %c0_i32_1 = arith.constant 0 : i32
    return %arg0, %c0_i32, %c0_i32_0 : i32, i32, i32
  }
  func.func @transform_1(%arg0: i32) -> (i32, i32, i32) {
    %c0_i32 = arith.constant 0 : i32
    %c0_i32_0 = arith.constant 0 : i32
    %c0_i32_1 = arith.constant 0 : i32
    %c0_i32_2 = arith.constant 0 : i32
    return %c0_i32, %c0_i32_0, %c0_i32_1 : i32, i32, i32
  }
  func.func @transform_2(%arg0: i32) -> (i32, i32) {
    %c0_i32 = arith.constant 0 : i32
    %c0_i32_0 = arith.constant 0 : i32
    %c0_i32_1 = arith.constant 0 : i32
    return %c0_i32, %c0_i32_0 : i32, i32
  }
  func.func @transform_3(%arg0: i32) -> (i32, i32) {
    %c0_i32 = arith.constant 0 : i32
    %c0_i32_0 = arith.constant 0 : i32
    %c0_i32_1 = arith.constant 0 : i32
    return %c0_i32, %c0_i32_0 : i32, i32
  }
  func.func @transform_4(%arg0: i32) -> (i32, i32, i32) {
    %c0_i32 = arith.constant 0 : i32
    %c0_i32_0 = arith.constant 0 : i32
    %c0_i32_1 = arith.constant 0 : i32
    return %arg0, %c0_i32, %c0_i32_0 : i32, i32, i32
  }
  func.func @transform_5(%arg0: i32) -> (i32, i32, i32) {
    %c0_i32 = arith.constant 0 : i32
    %c0_i32_0 = arith.constant 0 : i32
    %c0_i32_1 = arith.constant 0 : i32
    return %arg0, %c0_i32, %c0_i32_0 : i32, i32, i32
  }
}

module attributes {stable_mosaic.version = 11 : i64} {
  func.func @kernel(%arg0: i32, %arg1: memref<1x11x13x64xf32, #tpu.memory_space<vmem>>, %arg2: memref<1x64xf32, #tpu.memory_space<vmem>>, %arg3: memref<1x64xf32, #tpu.memory_space<vmem>>, %arg4: memref<1x5x12x64xf32, #tpu.memory_space<vmem>>) attributes {dimension_semantics = [#tpu.dimension_semantics<parallel>], iteration_bounds = array<i64: 2>, scalar_prefetch = 0 : i64, scratch_operands = 0 : i64, tpu.core_type = #tpu.core_type<tc>, window_params = [{transform_indices = @transform_0, window_bounds = array<i64: 1, 11, 13, 64>}, {pipeline_mode = #tpu.pipeline_mode<synchronous>, transform_indices = @transform_1, window_bounds = array<i64: 1, 64>}, {pipeline_mode = #tpu.pipeline_mode<synchronous>, transform_indices = @transform_2, window_bounds = array<i64: 1, 64>}, {transform_indices = @transform_3, window_bounds = array<i64: 1, 5, 12, 64>}]} {
    %c0 = arith.constant 0 : index
    %c0_0 = arith.constant 0 : index
    %c0_1 = arith.constant 0 : index
    %c0_2 = arith.constant 0 : index
    %0 = vector.load %arg1[%c0, %c0_0, %c0_1, %c0_2] : memref<1x11x13x64xf32, #tpu.memory_space<vmem>>, vector<1x11x13x64xf32>
    %1 = vector.shape_cast %0 : vector<1x11x13x64xf32> to vector<11x13x64xf32>
    %c0_3 = arith.constant 0 : index
    %c0_4 = arith.constant 0 : index
    %2 = vector.load %arg2[%c0_3, %c0_4] : memref<1x64xf32, #tpu.memory_space<vmem>>, vector<1x64xf32>
    %3 = vector.shape_cast %2 : vector<1x64xf32> to vector<1x1x64xf32>
    %4 = vector.broadcast %3 : vector<1x1x64xf32> to vector<11x13x64xf32>
    %5 = arith.mulf %1, %4 : vector<11x13x64xf32>
    %c0_5 = arith.constant 0 : index
    %c0_6 = arith.constant 0 : index
    %6 = vector.load %arg3[%c0_5, %c0_6] : memref<1x64xf32, #tpu.memory_space<vmem>>, vector<1x64xf32>
    %7 = vector.shape_cast %6 : vector<1x64xf32> to vector<1x1x64xf32>
    %8 = vector.broadcast %7 : vector<1x1x64xf32> to vector<11x13x64xf32>
    %9 = arith.addf %5, %8 : vector<11x13x64xf32>
    %cst = arith.constant 0.000000e+00 : f32
    %10 = vector.broadcast %cst : f32 to vector<11x13x64xf32>
    %11 = arith.maximumf %9, %10 : vector<11x13x64xf32>
    %12 = vector.extract_strided_slice %11 {offsets = [0, 0, 0], sizes = [10, 13, 64], strides = [1, 1, 1]} : vector<11x13x64xf32> to vector<10x13x64xf32>
    %13 = vector.shape_cast %12 : vector<10x13x64xf32> to vector<5x2x13x64xf32>
    %14 = vector.extract_strided_slice %13 {offsets = [0, 0, 0, 0], sizes = [5, 1, 13, 64], strides = [1, 1, 1, 1]} : vector<5x2x13x64xf32> to vector<5x1x13x64xf32>
    %15 = vector.shape_cast %14 : vector<5x1x13x64xf32> to vector<5x13x64xf32>
    %16 = vector.extract_strided_slice %13 {offsets = [0, 1, 0, 0], sizes = [5, 1, 13, 64], strides = [1, 1, 1, 1]} : vector<5x2x13x64xf32> to vector<5x1x13x64xf32>
    %17 = vector.shape_cast %16 : vector<5x1x13x64xf32> to vector<5x13x64xf32>
    %18 = arith.maximumf %15, %17 : vector<5x13x64xf32>
    %19 = vector.extract_strided_slice %18 {offsets = [0, 0, 0], sizes = [5, 12, 64], strides = [1, 1, 1]} : vector<5x13x64xf32> to vector<5x12x64xf32>
    %20 = vector.extract_strided_slice %18 {offsets = [0, 1, 0], sizes = [5, 12, 64], strides = [1, 1, 1]} : vector<5x13x64xf32> to vector<5x12x64xf32>
    %21 = arith.maximumf %19, %20 : vector<5x12x64xf32>
    %c0_7 = arith.constant 0 : index
    %c0_8 = arith.constant 0 : index
    %c0_9 = arith.constant 0 : index
    %c0_10 = arith.constant 0 : index
    %22 = vector.load %arg4[%c0_7, %c0_8, %c0_9, %c0_10] : memref<1x5x12x64xf32, #tpu.memory_space<vmem>>, vector<1x5x12x64xf32>
    %23 = vector.shape_cast %22 : vector<1x5x12x64xf32> to vector<5x12x64xf32>
    %24 = vector.shape_cast %21 : vector<5x12x64xf32> to vector<1x5x12x64xf32>
    tpu.vector_store %arg4[%c0_7, %c0_8, %c0_9, %c0_10], %24 {strides = array<i32>} : memref<1x5x12x64xf32, #tpu.memory_space<vmem>>, vector<1x5x12x64xf32>,
    return
  }
  func.func @transform_0(%arg0: i32) -> (i32, i32, i32, i32) {
    %c0_i32 = arith.constant 0 : i32
    %c0_i32_0 = arith.constant 0 : i32
    %c0_i32_1 = arith.constant 0 : i32
    %c0_i32_2 = arith.constant 0 : i32
    return %arg0, %c0_i32, %c0_i32_0, %c0_i32_1 : i32, i32, i32, i32
  }
  func.func @transform_1(%arg0: i32) -> (i32, i32) {
    %c0_i32 = arith.constant 0 : i32
    %c0_i32_0 = arith.constant 0 : i32
    %c0_i32_1 = arith.constant 0 : i32
    return %c0_i32, %c0_i32_0 : i32, i32
  }
  func.func @transform_2(%arg0: i32) -> (i32, i32) {
    %c0_i32 = arith.constant 0 : i32
    %c0_i32_0 = arith.constant 0 : i32
    %c0_i32_1 = arith.constant 0 : i32
    return %c0_i32, %c0_i32_0 : i32, i32
  }
  func.func @transform_3(%arg0: i32) -> (i32, i32, i32, i32) {
    %c0_i32 = arith.constant 0 : i32
    %c0_i32_0 = arith.constant 0 : i32
    %c0_i32_1 = arith.constant 0 : i32
    %c0_i32_2 = arith.constant 0 : i32
    return %arg0, %c0_i32, %c0_i32_0, %c0_i32_1 : i32, i32, i32, i32
  }
}

module attributes {stable_mosaic.version = 11 : i64} {
  func.func @kernel(%arg0: i32, %arg1: memref<1x33x64xf32, #tpu.memory_space<vmem>>, %arg2: memref<9x64x64xf32, #tpu.memory_space<vmem>>, %arg3: memref<1x64xf32, #tpu.memory_space<vmem>>, %arg4: memref<15x1xf32, #tpu.memory_space<vmem>>, %arg5: memref<1x15x64xf32, #tpu.memory_space<vmem>>, %arg6: memref<1x2x64xf32, #tpu.memory_space<vmem>>) attributes {dimension_semantics = [#tpu.dimension_semantics<parallel>], iteration_bounds = array<i64: 2>, scalar_prefetch = 0 : i64, scratch_operands = 0 : i64, tpu.core_type = #tpu.core_type<tc>, window_params = [{transform_indices = @transform_0, window_bounds = array<i64: 1, 33, 64>}, {pipeline_mode = #tpu.pipeline_mode<synchronous>, transform_indices = @transform_1, window_bounds = array<i64: 9, 64, 64>}, {pipeline_mode = #tpu.pipeline_mode<synchronous>, transform_indices = @transform_2, window_bounds = array<i64: 1, 64>}, {pipeline_mode = #tpu.pipeline_mode<synchronous>, transform_indices = @transform_3, window_bounds = array<i64: 15, 1>}, {transform_indices = @transform_4, window_bounds = array<i64: 1, 15, 64>}, {transform_indices = @transform_5, window_bounds = array<i64: 1, 2, 64>}]} {
    %c0 = arith.constant 0 : index
    %c0_0 = arith.constant 0 : index
    %c0_1 = arith.constant 0 : index
    %0 = vector.load %arg1[%c0, %c0_0, %c0_1] : memref<1x33x64xf32, #tpu.memory_space<vmem>>, vector<1x15x64xf32>
    %1 = vector.shape_cast %0 : vector<1x15x64xf32> to vector<15x64xf32>
    %c0_2 = arith.constant 0 : index
    %c0_3 = arith.constant 0 : index
    %c0_4 = arith.constant 0 : index
    %2 = vector.load %arg2[%c0_2, %c0_3, %c0_4] : memref<9x64x64xf32, #tpu.memory_space<vmem>>, vector<1x64x64xf32>
    %3 = vector.shape_cast %2 : vector<1x64x64xf32> to vector<64x64xf32>
    %cst = arith.constant dense<0.000000e+00> : vector<15x64xf32>
    %4 = tpu.matmul %1, %3, %cst {dimension_numbers = #tpu.dot_dimension_numbers<[1], [0], [0], [1], [0, 0, 1, 1], [], []>} : vector<15x64xf32>, vector<64x64xf32>, vector<15x64xf32> -> vector<15x64xf32>
    %c0_5 = arith.constant 0 : index
    %c1 = arith.constant 1 : index
    %c0_6 = arith.constant 0 : index
    %5 = vector.load %arg1[%c0_5, %c1, %c0_6] : memref<1x33x64xf32, #tpu.memory_space<vmem>>, vector<1x15x64xf32>
    %6 = vector.shape_cast %5 : vector<1x15x64xf32> to vector<15x64xf32>
    %c1_7 = arith.constant 1 : index
    %c0_8 = arith.constant 0 : index
    %c0_9 = arith.constant 0 : index
    %7 = vector.load %arg2[%c1_7, %c0_8, %c0_9] : memref<9x64x64xf32, #tpu.memory_space<vmem>>, vector<1x64x64xf32>
    %8 = vector.shape_cast %7 : vector<1x64x64xf32> to vector<64x64xf32>
    %cst_10 = arith.constant dense<0.000000e+00> : vector<15x64xf32>
    %9 = tpu.matmul %6, %8, %cst_10 {dimension_numbers = #tpu.dot_dimension_numbers<[1], [0], [0], [1], [0, 0, 1, 1], [], []>} : vector<15x64xf32>, vector<64x64xf32>, vector<15x64xf32> -> vector<15x64xf32>
    %10 = arith.addf %4, %9 : vector<15x64xf32>
    %c0_11 = arith.constant 0 : index
    %c2 = arith.constant 2 : index
    %c0_12 = arith.constant 0 : index
    %11 = vector.load %arg1[%c0_11, %c2, %c0_12] : memref<1x33x64xf32, #tpu.memory_space<vmem>>, vector<1x15x64xf32>
    %12 = vector.shape_cast %11 : vector<1x15x64xf32> to vector<15x64xf32>
    %c2_13 = arith.constant 2 : index
    %c0_14 = arith.constant 0 : index
    %c0_15 = arith.constant 0 : index
    %13 = vector.load %arg2[%c2_13, %c0_14, %c0_15] : memref<9x64x64xf32, #tpu.memory_space<vmem>>, vector<1x64x64xf32>
    %14 = vector.shape_cast %13 : vector<1x64x64xf32> to vector<64x64xf32>
    %cst_16 = arith.constant dense<0.000000e+00> : vector<15x64xf32>
    %15 = tpu.matmul %12, %14, %cst_16 {dimension_numbers = #tpu.dot_dimension_numbers<[1], [0], [0], [1], [0, 0, 1, 1], [], []>} : vector<15x64xf32>, vector<64x64xf32>, vector<15x64xf32> -> vector<15x64xf32>
    %16 = arith.addf %10, %15 : vector<15x64xf32>
    %c0_17 = arith.constant 0 : index
    %c5 = arith.constant 5 : index
    %c0_18 = arith.constant 0 : index
    %17 = vector.load %arg1[%c0_17, %c5, %c0_18] : memref<1x33x64xf32, #tpu.memory_space<vmem>>, vector<1x15x64xf32>
    %18 = vector.shape_cast %17 : vector<1x15x64xf32> to vector<15x64xf32>
    %c3 = arith.constant 3 : index
    %c0_19 = arith.constant 0 : index
    %c0_20 = arith.constant 0 : index
    %19 = vector.load %arg2[%c3, %c0_19, %c0_20] : memref<9x64x64xf32, #tpu.memory_space<vmem>>, vector<1x64x64xf32>
    %20 = vector.shape_cast %19 : vector<1x64x64xf32> to vector<64x64xf32>
    %cst_21 = arith.constant dense<0.000000e+00> : vector<15x64xf32>
    %21 = tpu.matmul %18, %20, %cst_21 {dimension_numbers = #tpu.dot_dimension_numbers<[1], [0], [0], [1], [0, 0, 1, 1], [], []>} : vector<15x64xf32>, vector<64x64xf32>, vector<15x64xf32> -> vector<15x64xf32>
    %22 = arith.addf %16, %21 : vector<15x64xf32>
    %c0_22 = arith.constant 0 : index
    %c6 = arith.constant 6 : index
    %c0_23 = arith.constant 0 : index
    %23 = vector.load %arg1[%c0_22, %c6, %c0_23] : memref<1x33x64xf32, #tpu.memory_space<vmem>>, vector<1x15x64xf32>
    %24 = vector.shape_cast %23 : vector<1x15x64xf32> to vector<15x64xf32>
    %c4 = arith.constant 4 : index
    %c0_24 = arith.constant 0 : index
    %c0_25 = arith.constant 0 : index
    %25 = vector.load %arg2[%c4, %c0_24, %c0_25] : memref<9x64x64xf32, #tpu.memory_space<vmem>>, vector<1x64x64xf32>
    %26 = vector.shape_cast %25 : vector<1x64x64xf32> to vector<64x64xf32>
    %cst_26 = arith.constant dense<0.000000e+00> : vector<15x64xf32>
    %27 = tpu.matmul %24, %26, %cst_26 {dimension_numbers = #tpu.dot_dimension_numbers<[1], [0], [0], [1], [0, 0, 1, 1], [], []>} : vector<15x64xf32>, vector<64x64xf32>, vector<15x64xf32> -> vector<15x64xf32>
    %28 = arith.addf %22, %27 : vector<15x64xf32>
    %c0_27 = arith.constant 0 : index
    %c7 = arith.constant 7 : index
    %c0_28 = arith.constant 0 : index
    %29 = vector.load %arg1[%c0_27, %c7, %c0_28] : memref<1x33x64xf32, #tpu.memory_space<vmem>>, vector<1x15x64xf32>
    %30 = vector.shape_cast %29 : vector<1x15x64xf32> to vector<15x64xf32>
    %c5_29 = arith.constant 5 : index
    %c0_30 = arith.constant 0 : index
    %c0_31 = arith.constant 0 : index
    %31 = vector.load %arg2[%c5_29, %c0_30, %c0_31] : memref<9x64x64xf32, #tpu.memory_space<vmem>>, vector<1x64x64xf32>
    %32 = vector.shape_cast %31 : vector<1x64x64xf32> to vector<64x64xf32>
    %cst_32 = arith.constant dense<0.000000e+00> : vector<15x64xf32>
    %33 = tpu.matmul %30, %32, %cst_32 {dimension_numbers = #tpu.dot_dimension_numbers<[1], [0], [0], [1], [0, 0, 1, 1], [], []>} : vector<15x64xf32>, vector<64x64xf32>, vector<15x64xf32> -> vector<15x64xf32>
    %34 = arith.addf %28, %33 : vector<15x64xf32>
    %c0_33 = arith.constant 0 : index
    %c10 = arith.constant 10 : index
    %c0_34 = arith.constant 0 : index
    %35 = vector.load %arg1[%c0_33, %c10, %c0_34] : memref<1x33x64xf32, #tpu.memory_space<vmem>>, vector<1x15x64xf32>
    %36 = vector.shape_cast %35 : vector<1x15x64xf32> to vector<15x64xf32>
    %c6_35 = arith.constant 6 : index
    %c0_36 = arith.constant 0 : index
    %c0_37 = arith.constant 0 : index
    %37 = vector.load %arg2[%c6_35, %c0_36, %c0_37] : memref<9x64x64xf32, #tpu.memory_space<vmem>>, vector<1x64x64xf32>
    %38 = vector.shape_cast %37 : vector<1x64x64xf32> to vector<64x64xf32>
    %cst_38 = arith.constant dense<0.000000e+00> : vector<15x64xf32>
    %39 = tpu.matmul %36, %38, %cst_38 {dimension_numbers = #tpu.dot_dimension_numbers<[1], [0], [0], [1], [0, 0, 1, 1], [], []>} : vector<15x64xf32>, vector<64x64xf32>, vector<15x64xf32> -> vector<15x64xf32>
    %40 = arith.addf %34, %39 : vector<15x64xf32>
    %c0_39 = arith.constant 0 : index
    %c11 = arith.constant 11 : index
    %c0_40 = arith.constant 0 : index
    %41 = vector.load %arg1[%c0_39, %c11, %c0_40] : memref<1x33x64xf32, #tpu.memory_space<vmem>>, vector<1x15x64xf32>
    %42 = vector.shape_cast %41 : vector<1x15x64xf32> to vector<15x64xf32>
    %c7_41 = arith.constant 7 : index
    %c0_42 = arith.constant 0 : index
    %c0_43 = arith.constant 0 : index
    %43 = vector.load %arg2[%c7_41, %c0_42, %c0_43] : memref<9x64x64xf32, #tpu.memory_space<vmem>>, vector<1x64x64xf32>
    %44 = vector.shape_cast %43 : vector<1x64x64xf32> to vector<64x64xf32>
    %cst_44 = arith.constant dense<0.000000e+00> : vector<15x64xf32>
    %45 = tpu.matmul %42, %44, %cst_44 {dimension_numbers = #tpu.dot_dimension_numbers<[1], [0], [0], [1], [0, 0, 1, 1], [], []>} : vector<15x64xf32>, vector<64x64xf32>, vector<15x64xf32> -> vector<15x64xf32>
    %46 = arith.addf %40, %45 : vector<15x64xf32>
    %c0_45 = arith.constant 0 : index
    %c12 = arith.constant 12 : index
    %c0_46 = arith.constant 0 : index
    %47 = vector.load %arg1[%c0_45, %c12, %c0_46] : memref<1x33x64xf32, #tpu.memory_space<vmem>>, vector<1x15x64xf32>
    %48 = vector.shape_cast %47 : vector<1x15x64xf32> to vector<15x64xf32>
    %c8 = arith.constant 8 : index
    %c0_47 = arith.constant 0 : index
    %c0_48 = arith.constant 0 : index
    %49 = vector.load %arg2[%c8, %c0_47, %c0_48] : memref<9x64x64xf32, #tpu.memory_space<vmem>>, vector<1x64x64xf32>
    %50 = vector.shape_cast %49 : vector<1x64x64xf32> to vector<64x64xf32>
    %cst_49 = arith.constant dense<0.000000e+00> : vector<15x64xf32>
    %51 = tpu.matmul %48, %50, %cst_49 {dimension_numbers = #tpu.dot_dimension_numbers<[1], [0], [0], [1], [0, 0, 1, 1], [], []>} : vector<15x64xf32>, vector<64x64xf32>, vector<15x64xf32> -> vector<15x64xf32>
    %52 = arith.addf %46, %51 : vector<15x64xf32>
    %c0_50 = arith.constant 0 : index
    %c0_51 = arith.constant 0 : index
    %53 = vector.load %arg3[%c0_50, %c0_51] : memref<1x64xf32, #tpu.memory_space<vmem>>, vector<1x64xf32>
    %54 = vector.broadcast %53 : vector<1x64xf32> to vector<15x64xf32>
    %55 = arith.addf %52, %54 : vector<15x64xf32>
    %c0_52 = arith.constant 0 : index
    %c0_53 = arith.constant 0 : index
    %c0_54 = arith.constant 0 : index
    %56 = vector.load %arg5[%c0_52, %c0_53, %c0_54] : memref<1x15x64xf32, #tpu.memory_space<vmem>>, vector<1x15x64xf32>
    %57 = vector.shape_cast %56 : vector<1x15x64xf32> to vector<15x64xf32>
    %58 = vector.shape_cast %55 : vector<15x64xf32> to vector<1x15x64xf32>
    tpu.vector_store %arg5[%c0_52, %c0_53, %c0_54], %58 {strides = array<i32>} : memref<1x15x64xf32, #tpu.memory_space<vmem>>, vector<1x15x64xf32>,
    %c0_55 = arith.constant 0 : index
    %c0_56 = arith.constant 0 : index
    %59 = vector.load %arg4[%c0_55, %c0_56] : memref<15x1xf32, #tpu.memory_space<vmem>>, vector<15x1xf32>
    %60 = vector.broadcast %59 : vector<15x1xf32> to vector<15x64xf32>
    %61 = arith.mulf %55, %60 : vector<15x64xf32>
    %cst_57 = arith.constant dense<0.000000e+00> : vector<64xf32>
    %62 = vector.multi_reduction <add>, %61, %cst_57 [0] : vector<15x64xf32> to vector<64xf32>
    %63 = vector.shape_cast %62 : vector<64xf32> to vector<1x64xf32>
    %64 = arith.mulf %61, %55 : vector<15x64xf32>
    %cst_58 = arith.constant dense<0.000000e+00> : vector<64xf32>
    %65 = vector.multi_reduction <add>, %64, %cst_58 [0] : vector<15x64xf32> to vector<64xf32>
    %66 = vector.shape_cast %65 : vector<64xf32> to vector<1x64xf32>
    %67 = tpu.concatenate %63, %66 in 0 : vector<1x64xf32>, vector<1x64xf32> -> vector<2x64xf32>
    %c0_59 = arith.constant 0 : index
    %c0_60 = arith.constant 0 : index
    %c0_61 = arith.constant 0 : index
    %68 = vector.load %arg6[%c0_59, %c0_60, %c0_61] : memref<1x2x64xf32, #tpu.memory_space<vmem>>, vector<1x2x64xf32>
    %69 = vector.shape_cast %68 : vector<1x2x64xf32> to vector<2x64xf32>
    %70 = vector.shape_cast %67 : vector<2x64xf32> to vector<1x2x64xf32>
    tpu.vector_store %arg6[%c0_59, %c0_60, %c0_61], %70 {strides = array<i32>} : memref<1x2x64xf32, #tpu.memory_space<vmem>>, vector<1x2x64xf32>,
    return
  }
  func.func @transform_0(%arg0: i32) -> (i32, i32, i32) {
    %c0_i32 = arith.constant 0 : i32
    %c0_i32_0 = arith.constant 0 : i32
    %c0_i32_1 = arith.constant 0 : i32
    return %arg0, %c0_i32, %c0_i32_0 : i32, i32, i32
  }
  func.func @transform_1(%arg0: i32) -> (i32, i32, i32) {
    %c0_i32 = arith.constant 0 : i32
    %c0_i32_0 = arith.constant 0 : i32
    %c0_i32_1 = arith.constant 0 : i32
    %c0_i32_2 = arith.constant 0 : i32
    return %c0_i32, %c0_i32_0, %c0_i32_1 : i32, i32, i32
  }
  func.func @transform_2(%arg0: i32) -> (i32, i32) {
    %c0_i32 = arith.constant 0 : i32
    %c0_i32_0 = arith.constant 0 : i32
    %c0_i32_1 = arith.constant 0 : i32
    return %c0_i32, %c0_i32_0 : i32, i32
  }
  func.func @transform_3(%arg0: i32) -> (i32, i32) {
    %c0_i32 = arith.constant 0 : i32
    %c0_i32_0 = arith.constant 0 : i32
    %c0_i32_1 = arith.constant 0 : i32
    return %c0_i32, %c0_i32_0 : i32, i32
  }
  func.func @transform_4(%arg0: i32) -> (i32, i32, i32) {
    %c0_i32 = arith.constant 0 : i32
    %c0_i32_0 = arith.constant 0 : i32
    %c0_i32_1 = arith.constant 0 : i32
    return %arg0, %c0_i32, %c0_i32_0 : i32, i32, i32
  }
  func.func @transform_5(%arg0: i32) -> (i32, i32, i32) {
    %c0_i32 = arith.constant 0 : i32
    %c0_i32_0 = arith.constant 0 : i32
    %c0_i32_1 = arith.constant 0 : i32
    return %arg0, %c0_i32, %c0_i32_0 : i32, i32, i32
  }
}

module attributes {stable_mosaic.version = 11 : i64} {
  func.func @kernel(%arg0: i32, %arg1: memref<1x3x5x64xf32, #tpu.memory_space<vmem>>, %arg2: memref<1x64xf32, #tpu.memory_space<vmem>>, %arg3: memref<1x64xf32, #tpu.memory_space<vmem>>, %arg4: memref<1x1x4x64xf32, #tpu.memory_space<vmem>>) attributes {dimension_semantics = [#tpu.dimension_semantics<parallel>], iteration_bounds = array<i64: 2>, scalar_prefetch = 0 : i64, scratch_operands = 0 : i64, tpu.core_type = #tpu.core_type<tc>, window_params = [{transform_indices = @transform_0, window_bounds = array<i64: 1, 3, 5, 64>}, {pipeline_mode = #tpu.pipeline_mode<synchronous>, transform_indices = @transform_1, window_bounds = array<i64: 1, 64>}, {pipeline_mode = #tpu.pipeline_mode<synchronous>, transform_indices = @transform_2, window_bounds = array<i64: 1, 64>}, {transform_indices = @transform_3, window_bounds = array<i64: 1, 1, 4, 64>}]} {
    %c0 = arith.constant 0 : index
    %c0_0 = arith.constant 0 : index
    %c0_1 = arith.constant 0 : index
    %c0_2 = arith.constant 0 : index
    %0 = vector.load %arg1[%c0, %c0_0, %c0_1, %c0_2] : memref<1x3x5x64xf32, #tpu.memory_space<vmem>>, vector<1x3x5x64xf32>
    %1 = vector.shape_cast %0 : vector<1x3x5x64xf32> to vector<3x5x64xf32>
    %c0_3 = arith.constant 0 : index
    %c0_4 = arith.constant 0 : index
    %2 = vector.load %arg2[%c0_3, %c0_4] : memref<1x64xf32, #tpu.memory_space<vmem>>, vector<1x64xf32>
    %3 = vector.shape_cast %2 : vector<1x64xf32> to vector<1x1x64xf32>
    %4 = vector.broadcast %3 : vector<1x1x64xf32> to vector<3x5x64xf32>
    %5 = arith.mulf %1, %4 : vector<3x5x64xf32>
    %c0_5 = arith.constant 0 : index
    %c0_6 = arith.constant 0 : index
    %6 = vector.load %arg3[%c0_5, %c0_6] : memref<1x64xf32, #tpu.memory_space<vmem>>, vector<1x64xf32>
    %7 = vector.shape_cast %6 : vector<1x64xf32> to vector<1x1x64xf32>
    %8 = vector.broadcast %7 : vector<1x1x64xf32> to vector<3x5x64xf32>
    %9 = arith.addf %5, %8 : vector<3x5x64xf32>
    %cst = arith.constant 0.000000e+00 : f32
    %10 = vector.broadcast %cst : f32 to vector<3x5x64xf32>
    %11 = arith.maximumf %9, %10 : vector<3x5x64xf32>
    %12 = vector.extract_strided_slice %11 {offsets = [0, 0, 0], sizes = [2, 5, 64], strides = [1, 1, 1]} : vector<3x5x64xf32> to vector<2x5x64xf32>
    %13 = vector.shape_cast %12 : vector<2x5x64xf32> to vector<1x2x5x64xf32>
    %14 = vector.extract_strided_slice %13 {offsets = [0, 0, 0, 0], sizes = [1, 1, 5, 64], strides = [1, 1, 1, 1]} : vector<1x2x5x64xf32> to vector<1x1x5x64xf32>
    %15 = vector.shape_cast %14 : vector<1x1x5x64xf32> to vector<1x5x64xf32>
    %16 = vector.extract_strided_slice %13 {offsets = [0, 1, 0, 0], sizes = [1, 1, 5, 64], strides = [1, 1, 1, 1]} : vector<1x2x5x64xf32> to vector<1x1x5x64xf32>
    %17 = vector.shape_cast %16 : vector<1x1x5x64xf32> to vector<1x5x64xf32>
    %18 = arith.maximumf %15, %17 : vector<1x5x64xf32>
    %19 = vector.extract_strided_slice %18 {offsets = [0, 0, 0], sizes = [1, 4, 64], strides = [1, 1, 1]} : vector<1x5x64xf32> to vector<1x4x64xf32>
    %20 = vector.extract_strided_slice %18 {offsets = [0, 1, 0], sizes = [1, 4, 64], strides = [1, 1, 1]} : vector<1x5x64xf32> to vector<1x4x64xf32>
    %21 = arith.maximumf %19, %20 : vector<1x4x64xf32>
    %c0_7 = arith.constant 0 : index
    %c0_8 = arith.constant 0 : index
    %c0_9 = arith.constant 0 : index
    %c0_10 = arith.constant 0 : index
    %22 = vector.load %arg4[%c0_7, %c0_8, %c0_9, %c0_10] : memref<1x1x4x64xf32, #tpu.memory_space<vmem>>, vector<1x1x4x64xf32>
    %23 = vector.shape_cast %22 : vector<1x1x4x64xf32> to vector<1x4x64xf32>
    %24 = vector.shape_cast %21 : vector<1x4x64xf32> to vector<1x1x4x64xf32>
    tpu.vector_store %arg4[%c0_7, %c0_8, %c0_9, %c0_10], %24 {strides = array<i32>} : memref<1x1x4x64xf32, #tpu.memory_space<vmem>>, vector<1x1x4x64xf32>,
    return
  }
  func.func @transform_0(%arg0: i32) -> (i32, i32, i32, i32) {
    %c0_i32 = arith.constant 0 : i32
    %c0_i32_0 = arith.constant 0 : i32
    %c0_i32_1 = arith.constant 0 : i32
    %c0_i32_2 = arith.constant 0 : i32
    return %arg0, %c0_i32, %c0_i32_0, %c0_i32_1 : i32, i32, i32, i32
  }
  func.func @transform_1(%arg0: i32) -> (i32, i32) {
    %c0_i32 = arith.constant 0 : i32
    %c0_i32_0 = arith.constant 0 : i32
    %c0_i32_1 = arith.constant 0 : i32
    return %c0_i32, %c0_i32_0 : i32, i32
  }
  func.func @transform_2(%arg0: i32) -> (i32, i32) {
    %c0_i32 = arith.constant 0 : i32
    %c0_i32_0 = arith.constant 0 : i32
    %c0_i32_1 = arith.constant 0 : i32
    return %c0_i32, %c0_i32_0 : i32, i32
  }
  func.func @transform_3(%arg0: i32) -> (i32, i32, i32, i32) {
    %c0_i32 = arith.constant 0 : i32
    %c0_i32_0 = arith.constant 0 : i32
    %c0_i32_1 = arith.constant 0 : i32
    %c0_i32_2 = arith.constant 0 : i32
    return %arg0, %c0_i32, %c0_i32_0, %c0_i32_1 : i32, i32, i32, i32
  }
}

module attributes {stable_mosaic.version = 11 : i64} {
  func.func @fc_kernel(%arg0: i32, %arg1: memref<2x64xf32, #tpu.memory_space<vmem>>, %arg2: memref<64x5xf32, #tpu.memory_space<vmem>>, %arg3: memref<1x5xf32, #tpu.memory_space<vmem>>, %arg4: memref<2x5xf32, #tpu.memory_space<vmem>>) attributes {dimension_semantics = [#tpu.dimension_semantics<arbitrary>], iteration_bounds = array<i64: 1>, scalar_prefetch = 0 : i64, scratch_operands = 0 : i64, tpu.core_type = #tpu.core_type<tc>, window_params = [{pipeline_mode = #tpu.pipeline_mode<synchronous>, transform_indices = @transform_0, window_bounds = array<i64: 2, 64>}, {pipeline_mode = #tpu.pipeline_mode<synchronous>, transform_indices = @transform_1, window_bounds = array<i64: 64, 5>}, {pipeline_mode = #tpu.pipeline_mode<synchronous>, transform_indices = @transform_2, window_bounds = array<i64: 1, 5>}, {pipeline_mode = #tpu.pipeline_mode<synchronous>, transform_indices = @transform_3, window_bounds = array<i64: 2, 5>}]} {
    %c0 = arith.constant 0 : index
    %c0_0 = arith.constant 0 : index
    %0 = vector.load %arg1[%c0, %c0_0] : memref<2x64xf32, #tpu.memory_space<vmem>>, vector<2x64xf32>
    %c0_1 = arith.constant 0 : index
    %c0_2 = arith.constant 0 : index
    %1 = vector.load %arg2[%c0_1, %c0_2] : memref<64x5xf32, #tpu.memory_space<vmem>>, vector<64x5xf32>
    %cst = arith.constant dense<0.000000e+00> : vector<2x5xf32>
    %2 = tpu.matmul %0, %1, %cst {dimension_numbers = #tpu.dot_dimension_numbers<[1], [0], [0], [1], [0, 0, 1, 1], [], []>} : vector<2x64xf32>, vector<64x5xf32>, vector<2x5xf32> -> vector<2x5xf32>
    %c0_3 = arith.constant 0 : index
    %c0_4 = arith.constant 0 : index
    %3 = vector.load %arg3[%c0_3, %c0_4] : memref<1x5xf32, #tpu.memory_space<vmem>>, vector<1x5xf32>
    %4 = vector.broadcast %3 : vector<1x5xf32> to vector<2x5xf32>
    %5 = arith.addf %2, %4 : vector<2x5xf32>
    %c0_5 = arith.constant 0 : index
    %c0_6 = arith.constant 0 : index
    %6 = vector.load %arg4[%c0_5, %c0_6] : memref<2x5xf32, #tpu.memory_space<vmem>>, vector<2x5xf32>
    tpu.vector_store %arg4[%c0_5, %c0_6], %5 {strides = array<i32>} : memref<2x5xf32, #tpu.memory_space<vmem>>, vector<2x5xf32>,
    return
  }
  func.func @transform_0(%arg0: i32) -> (i32, i32) {
    %c0_i32 = arith.constant 0 : i32
    %c0_i32_0 = arith.constant 0 : i32
    %c0_i32_1 = arith.constant 0 : i32
    return %c0_i32, %c0_i32_0 : i32, i32
  }
  func.func @transform_1(%arg0: i32) -> (i32, i32) {
    %c0_i32 = arith.constant 0 : i32
    %c0_i32_0 = arith.constant 0 : i32
    %c0_i32_1 = arith.constant 0 : i32
    return %c0_i32, %c0_i32_0 : i32, i32
  }
  func.func @transform_2(%arg0: i32) -> (i32, i32) {
    %c0_i32 = arith.constant 0 : i32
    %c0_i32_0 = arith.constant 0 : i32
    %c0_i32_1 = arith.constant 0 : i32
    return %c0_i32, %c0_i32_0 : i32, i32
  }
  func.func @transform_3(%arg0: i32) -> (i32, i32) {
    %c0_i32 = arith.constant 0 : i32
    %c0_i32_0 = arith.constant 0 : i32
    %c0_i32_1 = arith.constant 0 : i32
    return %c0_i32, %c0_i32_0 : i32, i32
  }
}

</mosaic_0001>

<bundles_post_ra>
// kernel: conv3_forward.8
= control target key start
LH: loop header
LB: loop body
LE: loop exit
PB: predicated region body
PF: predicated region fallthrough
CT: control target
= control target key end

     0   :  { %s1055_s12 = smov 0   ;;  %s1559_s0 = inlined_call_operand.vmem [shape: f32[2,26,28,64], index: 0, kind: input, shape index: {}]   ;;  %s1560_s1 = inlined_call_operand.vmem [shape: f32[1,64], index: 1, kind: input, shape index: {}]   ;;  %s1561_s2 = inlined_call_operand.vmem [shape: f32[1,64], index: 2, kind: input, shape index: {}]   ;;  %s1562_s3 = inlined_call_operand.vmem [shape: f32[2,13,27,64], index: 3, kind: output, shape index: {}]  }
   0x1 LB: > { %s1004_s13 = sadd.s32 4294967295, %s1033_s12   ;;  %p1008_p0 = scmp.ge.s32.totalorder %s1033_s12, 1  ;;  %s1033_s12 = sphi %s1055_s12, %s13_s12  }
   0x2   : > { %p137_p1 = scmp.lt.s32.totalorder %s1033_s12, 3 }
   0x4   : > { %p138_p2 = pnand %p1008_p0, %p137_p1 }
   0x5   : > { %p161_p3 = scmp.lt.s32.totalorder (!%p138_p2), %s1004_s13, 1 }
   0x6   : > { %141 = sbr.rel (%p138_p2) target bundleno = 151 (0x97), region = 32 }
   0xb   : > { %s1564_s13 = smov (!%p161_p3, %s1004_s13), 1  ;;  %v1069_v0 = vld [vmem:[%s1560_s1] ss:$0 sm:$0xff]  ;;  %vm699_vm0 = vcmask 1046528   ;;  %vm895_vm1 = vcmask 523264   ;;  %vm899_vm2 = vcmask 518144  }
   0xc   : > { %s1013_s14 = smul.u32 832, %s1564_s13  ;;  %v1079_v1 = vld [vmem:[%s1561_s2] ss:$0 sm:$0xff] }
   0xd   : > { %s1014_s22 = smul.u32 416, %s1564_s13 }
   0xe   : > { %s1074_s19 = scalar_lea.vmem %s1559_s0, %s1013_s14 }
   0xf   : > { %v171_v2 = vld [vmem:[%s1074_s19] sm:$0xff]  ;;  %v172_v3 = vld [vmem:[%s1074_s19 + $0x8] sm:$0xff]  ;;  %v173_v9 = vld [vmem:[%s1074_s19 + $0x10] sm:$0xff]  ;;  %s1124_s25 = scalar_lea.vmem %s1562_s3, %s1014_s22 }
  0x10   : > { %v175_v4 = vld [vmem:[%s1074_s19 + $0x20] sm:$0xff]  ;;  %v176_v5 = vld [vmem:[%s1074_s19 + $0x28] sm:$0xff]  ;;  %v279_v6 = vmul.f32 %v1069_v0, %v171_v2  ;;  %v280_v7 = vmul.f32 %v1069_v0, %v172_v3  ;;  %v177_v10 = vld [vmem:[%s1074_s19 + $0x30] sm:$0xff]  ;;  %v281_v12 = vmul.f32 %v1069_v0, %v173_v9 }
  0x11   : > { %v283_v8 = vmul.f32 %v1069_v0, %v175_v4  ;;  %v284_v11 = vmul.f32 %v1069_v0, %v176_v5  ;;  %v285_v13 = vmul.f32 %v1069_v0, %v177_v10  ;;  %v174_v14 = vld [vmem:[%s1074_s19 + $0x18] sm:$0xf]  ;;  %v179_v24 = vld [vmem:[%s1074_s19 + $0x40] sm:$0xff]  ;;  %v180_v25 = vld [vmem:[%s1074_s19 + $0x48] sm:$0xff] }
  0x12   : > { %v178_v15 = vld [vmem:[%s1074_s19 + $0x38] sm:$0xf]  ;;  %v387_v16 = vadd.f32 %v1079_v1, %v279_v6  ;;  %v388_v17 = vadd.f32 %v1079_v1, %v280_v7  ;;  %v282_v19 = vmul.f32 %v1069_v0, %v174_v14  ;;  %v389_v21 = vadd.f32 %v1079_v1, %v281_v12  ;;  %v183_v30 = vld [vmem:[%s1074_s19 + $0x60] sm:$0xff]  ;;  %v184_v35 = vld [vmem:[%s1074_s19 + $0x68] sm:$0xff] }
  0x13   : > { %v391_v18 = vadd.f32 %v1079_v1, %v283_v8  ;;  %v392_v20 = vadd.f32 %v1079_v1, %v284_v11  ;;  %v393_v22 = vadd.f32 %v1079_v1, %v285_v13  ;;  %v286_v23 = vmul.f32 %v1069_v0, %v178_v15  ;;  %v181_v44 = vld [vmem:[%s1074_s19 + $0x50] sm:$0xff]  ;;  %v182_v62 = vld [vmem:[%s1074_s19 + $0x58] sm:$0xf]  ;;  %v187_v6 = vld [vmem:[%s1074_s19 + $0x80] sm:$0xff] }
  0x14   : > { %v491_v26 = vmax.f32 %v387_v16, 0.0  ;;  %v492_v27 = vmax.f32 %v388_v17, 0.0  ;;  %v390_v29 = vadd.f32 %v1079_v1, %v282_v19  ;;  %v493_v32 = vmax.f32 %v389_v21, 0.0  ;;  %v185_v53 = vld [vmem:[%s1074_s19 + $0x70] sm:$0xff]  ;;  %v186_v5 = vld [vmem:[%s1074_s19 + $0x78] sm:$0xf] }
  0x15   : > { %v495_v28 = vmax.f32 %v391_v18, 0.0  ;;  %v496_v31 = vmax.f32 %v392_v20, 0.0  ;;  %v497_v33 = vmax.f32 %v393_v22, 0.0  ;;  %v394_v34 = vadd.f32 %v1079_v1, %v286_v23  ;;  %v188_v11 = vld [vmem:[%s1074_s19 + $0x88] sm:$0xff]  ;;  %v191_v16 = vld [vmem:[%s1074_s19 + $0xa0] sm:$0xff] }
  0x16   : > { %v494_v37 = vmax.f32 %v390_v29, 0.0  ;;  %v287_v38 = vmul.f32 %v1069_v0, %v179_v24  ;;  %v288_v39 = vmul.f32 %v1069_v0, %v180_v25  ;;  %v291_v43 = vmul.f32 %v1069_v0, %v183_v30  ;;  %v192_v17 = vld [vmem:[%s1074_s19 + $0xa8] sm:$0xff]  ;;  %v189_v30 = vld [vmem:[%s1074_s19 + $0x90] sm:$0xff] }
  0x17   : > { %v595_v36 = vmax.f32 %v491_v26, %v495_v28  ;;  %v596_v40 = vmax.f32 %v492_v27, %v496_v31  ;;  %v597_v41 = vmax.f32 %v493_v32, %v497_v33  ;;  %v498_v42 = vmax.f32 %v394_v34, 0.0 }
  0x18   : > { %v292_v46 = vmul.f32 %v1069_v0, %v184_v35  ;;  %v395_v47 = vadd.f32 %v1079_v1, %v287_v38  ;;  %v396_v48 = vadd.f32 %v1079_v1, %v288_v39  ;;  %v399_v52 = vadd.f32 %v1079_v1, %v291_v43  ;;  %v193_v35 = vld [vmem:[%s1074_s19 + $0xb0] sm:$0xff] }
  0x19   : > { %v700_v45 = vrot.slane %v595_v36, 1  ;;  %v701_v49 = vrot.slane %v596_v40, 1  ;;  %v703_v50 = vrot.slane %v597_v41, 1  ;;  %v598_v51 = vmax.f32 %v494_v37, %v498_v42 }
  0x1a   : > { %v400_v54 = vadd.f32 %v1079_v1, %v292_v46  ;;  %v499_v55 = vmax.f32 %v395_v47, 0.0  ;;  %v500_v56 = vmax.f32 %v396_v48, 0.0  ;;  %v289_v57 = vmul.f32 %v1069_v0, %v181_v44 }
  0x1b   : > { %v702_v58 = vsel %vm699_vm0, %v700_v45, %v701_v49  ;;  %v704_v59 = vsel %vm699_vm0, %v701_v49, %v703_v50  ;;  %v705_v60 = vrot.slane %v598_v51, 1  ;;  %v503_v61 = vmax.f32 %v399_v52, 0.0 }
  0x1c   : > { %v843_v63 = vmax.f32 %v595_v36, %v702_v58  ;;  %v844_v2 = vmax.f32 %v596_v40, %v704_v59  ;;  %v504_v3 = vmax.f32 %v400_v54, 0.0  ;;  %v293_v4 = vmul.f32 %v1069_v0, %v185_v53  ;;  %v190_v40 = vld [vmem:[%s1074_s19 + $0x98] sm:$0xf] }
  0x1d   : > { %v706_v7 = vsel %vm699_vm0, %v703_v50, %v705_v60  ;;  %v846_v8 = vmax.f32 %v598_v51, %v705_v60  ;;  %v599_v9 = vmax.f32 %v499_v55, %v503_v61  ;;  %v397_v10 = vadd.f32 %v1079_v1, %v289_v57 }
  0x1e   : > { %896 = vst.msk [vmem:[%s1124_s25] sm:$0xff] %vm895_vm1, %v843_v63  ;;  %v845_v12 = vmax.f32 %v597_v41, %v706_v7  ;;  %v600_v13 = vmax.f32 %v500_v56, %v504_v3  ;;  %v401_v14 = vadd.f32 %v1079_v1, %v293_v4  ;;  %v290_v15 = vmul.f32 %v1069_v0, %v182_v62  ;;  %v194_v41 = vld [vmem:[%s1074_s19 + $0xb8] sm:$0xf]  ;;  %v195_v62 = vld [vmem:[%s1074_s19 + $0xc0] sm:$0xff]  ;;  %v196_v63 = vld [vmem:[%s1074_s19 + $0xc8] sm:$0xff] }
  0x1f   : > { %897 = vst.msk [vmem:[%s1124_s25 + $0x8] sm:$0xff] %vm895_vm1, %v844_v2  ;;  %v707_v18 = vrot.slane %v599_v9, 1  ;;  %v501_v19 = vmax.f32 %v397_v10, 0.0  ;;  %v294_v20 = vmul.f32 %v1069_v0, %v186_v5  ;;  %v295_v21 = vmul.f32 %v1069_v0, %v187_v6  ;;  %v199_v2 = vld [vmem:[%s1074_s19 + $0xe0] sm:$0xff]  ;;  %v200_v7 = vld [vmem:[%s1074_s19 + $0xe8] sm:$0xff] }
  0x20   : > { %898 = vst.msk [vmem:[%s1124_s25 + $0x10] sm:$0xff] %vm895_vm1, %v845_v12  ;;  %v708_v22 = vrot.slane %v600_v13, 1  ;;  %v505_v23 = vmax.f32 %v401_v14, 0.0  ;;  %v398_v24 = vadd.f32 %v1079_v1, %v290_v15  ;;  %v296_v25 = vmul.f32 %v1069_v0, %v188_v11  ;;  %v197_v12 = vld [vmem:[%s1074_s19 + $0xd0] sm:$0xff] }
  0x21   : > { %900 = vst.msk [vmem:[%s1124_s25 + $0x18] sm:$0x7] %vm899_vm2, %v846_v8  ;;  %v402_v26 = vadd.f32 %v1079_v1, %v294_v20  ;;  %v299_v27 = vmul.f32 %v1069_v0, %v191_v16  ;;  %v300_v28 = vmul.f32 %v1069_v0, %v192_v17  ;;  %v403_v29 = vadd.f32 %v1079_v1, %v295_v21  ;;  %v201_v17 = vld [vmem:[%s1074_s19 + $0xf0] sm:$0xff] }
  0x22   : > { %v709_v31 = vsel %vm699_vm0, %v707_v18, %v708_v22  ;;  %v601_v32 = vmax.f32 %v501_v19, %v505_v23  ;;  %v502_v33 = vmax.f32 %v398_v24, 0.0  ;;  %v404_v34 = vadd.f32 %v1079_v1, %v296_v25 }
  0x23   : > { %v847_v36 = vmax.f32 %v599_v9, %v709_v31  ;;  %v506_v37 = vmax.f32 %v402_v26, 0.0  ;;  %v407_v38 = vadd.f32 %v1079_v1, %v299_v27  ;;  %v408_v39 = vadd.f32 %v1079_v1, %v300_v28 }
  0x24   : > { %v710_v42 = vrot.slane %v601_v32, 1  ;;  %v507_v43 = vmax.f32 %v403_v29, 0.0  ;;  %v508_v44 = vmax.f32 %v404_v34, 0.0  ;;  %v297_v45 = vmul.f32 %v1069_v0, %v189_v30  ;;  %v198_v30 = vld [vmem:[%s1074_s19 + $0xd8] sm:$0xf] }
  0x25   : > { %901 = vst.msk [vmem:[%s1124_s25 + $0x20] sm:$0xff] %vm895_vm1, %v847_v36  ;;  %v602_v46 = vmax.f32 %v502_v33, %v506_v37  ;;  %v511_v47 = vmax.f32 %v407_v38, 0.0  ;;  %v512_v48 = vmax.f32 %v408_v39, 0.0  ;;  %v301_v49 = vmul.f32 %v1069_v0, %v193_v35  ;;  %v202_v35 = vld [vmem:[%s1074_s19 + $0xf8] sm:$0xf] }
  0x26   : > { %v711_v50 = vsel %vm699_vm0, %v708_v22, %v710_v42  ;;  %v405_v51 = vadd.f32 %v1079_v1, %v297_v45  ;;  %v298_v52 = vmul.f32 %v1069_v0, %v190_v40  ;;  %v302_v53 = vmul.f32 %v1069_v0, %v194_v41  ;;  %v203_v40 = vld [vmem:[%s1074_s19 + $0x100] sm:$0xff]  ;;  %v204_v41 = vld [vmem:[%s1074_s19 + $0x108] sm:$0xff] }
  0x27   : > { %v848_v54 = vmax.f32 %v600_v13, %v711_v50  ;;  %v712_v55 = vrot.slane %v602_v46, 1  ;;  %v603_v56 = vmax.f32 %v507_v43, %v511_v47  ;;  %v1171_v57 = vmax.f32 %v508_v44, %v512_v48 }
  0x28   : > { %v409_v58 = vadd.f32 %v1079_v1, %v301_v49  ;;  %v509_v59 = vmax.f32 %v405_v51, 0.0  ;;  %v406_v60 = vadd.f32 %v1079_v1, %v298_v52  ;;  %v410_v61 = vadd.f32 %v1079_v1, %v302_v53  ;;  %v208_v51 = vld [vmem:[%s1074_s19 + $0x128] sm:$0xff] }
  0x29   : > { %902 = vst.msk [vmem:[%s1124_s25 + $0x28] sm:$0xff] %vm895_vm1, %v848_v54  ;;  %v713_v3 = vsel %vm699_vm0, %v710_v42, %v712_v55  ;;  %v850_v4 = vmax.f32 %v602_v46, %v712_v55  ;;  %v714_v5 = vrot.slane %v603_v56, 1  ;;  %v715_v6 = vrot.slane %v1171_v57, 1  ;;  %v207_v46 = vld [vmem:[%s1074_s19 + $0x120] sm:$0xff] }
  0x2a   : > { %v849_v8 = vmax.f32 %v601_v32, %v713_v3  ;;  %v513_v9 = vmax.f32 %v409_v58, 0.0  ;;  %v510_v10 = vmax.f32 %v406_v60, 0.0  ;;  %v514_v11 = vmax.f32 %v410_v61, 0.0 }
  0x2b   : > { %904 = vst.msk [vmem:[%s1124_s25 + $0x38] sm:$0x7] %vm899_vm2, %v850_v4  ;;  %v716_v13 = vsel %vm699_vm0, %v714_v5, %v715_v6  ;;  %v303_v14 = vmul.f32 %v1069_v0, %v195_v62  ;;  %v304_v15 = vmul.f32 %v1069_v0, %v196_v63  ;;  %v307_v16 = vmul.f32 %v1069_v0, %v199_v2  ;;  %v205_v2 = vld [vmem:[%s1074_s19 + $0x110] sm:$0xff] }
  0x2c   : > { %903 = vst.msk [vmem:[%s1124_s25 + $0x30] sm:$0xff] %vm895_vm1, %v849_v8  ;;  %v851_v18 = vmax.f32 %v603_v56, %v716_v13  ;;  %v605_v19 = vmax.f32 %v509_v59, %v513_v9  ;;  %v606_v20 = vmax.f32 %v510_v10, %v514_v11  ;;  %v308_v21 = vmul.f32 %v1069_v0, %v200_v7  ;;  %v209_v7 = vld [vmem:[%s1074_s19 + $0x130] sm:$0xff]  ;;  %v206_v8 = vld [vmem:[%s1074_s19 + $0x118] sm:$0xf] }
  0x2d   : > { %v411_v22 = vadd.f32 %v1079_v1, %v303_v14  ;;  %v412_v23 = vadd.f32 %v1079_v1, %v304_v15  ;;  %v415_v24 = vadd.f32 %v1079_v1, %v307_v16  ;;  %v305_v25 = vmul.f32 %v1069_v0, %v197_v12 }
  0x2e   : > { %905 = vst.msk [vmem:[%s1124_s25 + $0x40] sm:$0xff] %vm895_vm1, %v851_v18  ;;  %v717_v26 = vrot.slane %v605_v19, 1  ;;  %v719_v27 = vrot.slane %v606_v20, 1  ;;  %v416_v28 = vadd.f32 %v1079_v1, %v308_v21  ;;  %v309_v29 = vmul.f32 %v1069_v0, %v201_v17  ;;  %v210_v17 = vld [vmem:[%s1074_s19 + $0x138] sm:$0xf] }
  0x2f   : > { %v515_v31 = vmax.f32 %v411_v22, 0.0  ;;  %v516_v32 = vmax.f32 %v412_v23, 0.0  ;;  %v519_v33 = vmax.f32 %v415_v24, 0.0  ;;  %v413_v34 = vadd.f32 %v1079_v1, %v305_v25 }
  0x30   : > { %v718_v36 = vsel %vm699_vm0, %v715_v6, %v717_v26  ;;  %v720_v37 = vsel %vm699_vm0, %v717_v26, %v719_v27  ;;  %v854_v38 = vmax.f32 %v606_v20, %v719_v27  ;;  %v520_v39 = vmax.f32 %v416_v28, 0.0 }
  0x31   : > { %v852_v42 = vmax.f32 %v1171_v57, %v718_v36  ;;  %v853_v43 = vmax.f32 %v605_v19, %v720_v37  ;;  %v607_v44 = vmax.f32 %v515_v31, %v519_v33  ;;  %v417_v45 = vadd.f32 %v1079_v1, %v309_v29  ;;  %v212_v31 = vld [vmem:[%s1074_s19 + $0x148] sm:$0xff] }
  0x32   : > { %908 = vst.msk [vmem:[%s1124_s25 + $0x58] sm:$0x7] %vm899_vm2, %v854_v38  ;;  %v608_v47 = vmax.f32 %v516_v32, %v520_v39  ;;  %v517_v48 = vmax.f32 %v413_v34, 0.0  ;;  %v306_v49 = vmul.f32 %v1069_v0, %v198_v30  ;;  %v310_v50 = vmul.f32 %v1069_v0, %v202_v35  ;;  %v211_v30 = vld [vmem:[%s1074_s19 + $0x140] sm:$0xff]  ;;  %v216_v37 = vld [vmem:[%s1074_s19 + $0x168] sm:$0xff] }
  0x33   : > { %906 = vst.msk [vmem:[%s1124_s25 + $0x48] sm:$0xff] %vm895_vm1, %v852_v42  ;;  %v721_v52 = vrot.slane %v607_v44, 1  ;;  %v521_v53 = vmax.f32 %v417_v45, 0.0  ;;  %v311_v54 = vmul.f32 %v1069_v0, %v203_v40  ;;  %v312_v55 = vmul.f32 %v1069_v0, %v204_v41  ;;  %v215_v32 = vld [vmem:[%s1074_s19 + $0x160] sm:$0xff] }
  0x34   : > { %907 = vst.msk [vmem:[%s1124_s25 + $0x50] sm:$0xff] %vm895_vm1, %v853_v43  ;;  %v722_v56 = vrot.slane %v608_v47, 1  ;;  %v414_v57 = vadd.f32 %v1079_v1, %v306_v49  ;;  %v418_v58 = vadd.f32 %v1079_v1, %v310_v50  ;;  %v315_v59 = vmul.f32 %v1069_v0, %v207_v46  ;;  %v213_v46 = vld [vmem:[%s1074_s19 + $0x150] sm:$0xff] }
  0x35   : > { %v609_v60 = vmax.f32 %v517_v48, %v521_v53  ;;  %v316_v61 = vmul.f32 %v1069_v0, %v208_v51  ;;  %v419_v62 = vadd.f32 %v1079_v1, %v311_v54  ;;  %v420_v63 = vadd.f32 %v1079_v1, %v312_v55  ;;  %v217_v51 = vld [vmem:[%s1074_s19 + $0x170] sm:$0xff] }
  0x36   : > { %v723_v3 = vsel %vm699_vm0, %v721_v52, %v722_v56  ;;  %v518_v4 = vmax.f32 %v414_v57, 0.0  ;;  %v522_v5 = vmax.f32 %v418_v58, 0.0  ;;  %v423_v6 = vadd.f32 %v1079_v1, %v315_v59 }
  0x37   : > { %v855_v9 = vmax.f32 %v607_v44, %v723_v3  ;;  %v724_v10 = vrot.slane %v609_v60, 1  ;;  %v424_v11 = vadd.f32 %v1079_v1, %v316_v61  ;;  %v523_v12 = vmax.f32 %v419_v62, 0.0 }
  0x38   : > { %v610_v13 = vmax.f32 %v518_v4, %v522_v5  ;;  %v524_v14 = vmax.f32 %v420_v63, 0.0  ;;  %v527_v15 = vmax.f32 %v423_v6, 0.0  ;;  %v313_v16 = vmul.f32 %v1069_v0, %v205_v2 }
  0x39   : > { %909 = vst.msk [vmem:[%s1124_s25 + $0x60] sm:$0xff] %vm895_vm1, %v855_v9  ;;  %v725_v18 = vsel %vm699_vm0, %v722_v56, %v724_v10  ;;  %v528_v19 = vmax.f32 %v424_v11, 0.0  ;;  %v317_v20 = vmul.f32 %v1069_v0, %v209_v7  ;;  %v314_v21 = vmul.f32 %v1069_v0, %v206_v8  ;;  %v218_v7 = vld [vmem:[%s1074_s19 + $0x178] sm:$0xf] }
  0x3a   : > { %v856_v22 = vmax.f32 %v608_v47, %v725_v18  ;;  %v726_v23 = vrot.slane %v610_v13, 1  ;;  %v611_v24 = vmax.f32 %v523_v12, %v527_v15  ;;  %v421_v25 = vadd.f32 %v1079_v1, %v313_v16  ;;  %v219_v12 = vld [vmem:[%s1074_s19 + $0x180] sm:$0xff] }
  0x3b   : > { %v612_v26 = vmax.f32 %v524_v14, %v528_v19  ;;  %v425_v27 = vadd.f32 %v1079_v1, %v317_v20  ;;  %v318_v28 = vmul.f32 %v1069_v0, %v210_v17  ;;  %v422_v29 = vadd.f32 %v1079_v1, %v314_v21  ;;  %v223_v18 = vld [vmem:[%s1074_s19 + $0x1a0] sm:$0xff]  ;;  %v224_v19 = vld [vmem:[%s1074_s19 + $0x1a8] sm:$0xff] }
  0x3c   : > { %910 = vst.msk [vmem:[%s1124_s25 + $0x68] sm:$0xff] %vm895_vm1, %v856_v22  ;;  %v727_v33 = vsel %vm699_vm0, %v724_v10, %v726_v23  ;;  %v858_v34 = vmax.f32 %v610_v13, %v726_v23  ;;  %v728_v35 = vrot.slane %v611_v24, 1  ;;  %v525_v36 = vmax.f32 %v421_v25, 0.0  ;;  %v220_v13 = vld [vmem:[%s1074_s19 + $0x188] sm:$0xff] }
  0x3d   : > { %v857_v38 = vmax.f32 %v609_v60, %v727_v33  ;;  %v729_v39 = vrot.slane %v612_v26, 1  ;;  %v529_v40 = vmax.f32 %v425_v27, 0.0  ;;  %v426_v41 = vadd.f32 %v1079_v1, %v318_v28  ;;  %v214_v60 = vld [vmem:[%s1074_s19 + $0x158] sm:$0xf] }
  0x3e   : > { %912 = vst.msk [vmem:[%s1124_s25 + $0x78] sm:$0x7] %vm899_vm2, %v858_v34  ;;  %v526_v42 = vmax.f32 %v422_v29, 0.0  ;;  %v319_v43 = vmul.f32 %v1069_v0, %v211_v30  ;;  %v320_v44 = vmul.f32 %v1069_v0, %v212_v31  ;;  %v323_v45 = vmul.f32 %v1069_v0, %v215_v32  ;;  %v221_v32 = vld [vmem:[%s1074_s19 + $0x190] sm:$0xff] }
  0x3f   : > { %911 = vst.msk [vmem:[%s1124_s25 + $0x70] sm:$0xff] %vm895_vm1, %v857_v38  ;;  %v730_v47 = vsel %vm699_vm0, %v728_v35, %v729_v39  ;;  %v613_v48 = vmax.f32 %v525_v36, %v529_v40  ;;  %v530_v49 = vmax.f32 %v426_v41, 0.0  ;;  %v324_v50 = vmul.f32 %v1069_v0, %v216_v37  ;;  %v225_v37 = vld [vmem:[%s1074_s19 + $0x1b0] sm:$0xff] }
  0x40   : > { %v859_v52 = vmax.f32 %v611_v24, %v730_v47  ;;  %v427_v53 = vadd.f32 %v1079_v1, %v319_v43  ;;  %v428_v54 = vadd.f32 %v1079_v1, %v320_v44  ;;  %v431_v55 = vadd.f32 %v1079_v1, %v323_v45  ;;  %v226_v47 = vld [vmem:[%s1074_s19 + $0x1b8] sm:$0xf] }
  0x41   : > { %v731_v56 = vrot.slane %v613_v48, 1  ;;  %v614_v57 = vmax.f32 %v526_v42, %v530_v49  ;;  %v432_v58 = vadd.f32 %v1079_v1, %v324_v50  ;;  %v321_v59 = vmul.f32 %v1069_v0, %v213_v46  ;;  %v222_v42 = vld [vmem:[%s1074_s19 + $0x198] sm:$0xf] }
  0x42   : > { %913 = vst.msk [vmem:[%s1124_s25 + $0x80] sm:$0xff] %vm895_vm1, %v859_v52  ;;  %v531_v61 = vmax.f32 %v427_v53, 0.0  ;;  %v532_v62 = vmax.f32 %v428_v54, 0.0  ;;  %v535_v63 = vmax.f32 %v431_v55, 0.0  ;;  %v325_v2 = vmul.f32 %v1069_v0, %v217_v51  ;;  %v227_v52 = vld [vmem:[%s1074_s19 + $0x1c0] sm:$0xff] }
  0x43   : > { %v732_v3 = vsel %vm699_vm0, %v729_v39, %v731_v56  ;;  %v733_v4 = vrot.slane %v614_v57, 1  ;;  %v536_v5 = vmax.f32 %v432_v58, 0.0  ;;  %v429_v6 = vadd.f32 %v1079_v1, %v321_v59 }
  0x44   : > { %v860_v8 = vmax.f32 %v612_v26, %v732_v3  ;;  %v615_v9 = vmax.f32 %v531_v61, %v535_v63  ;;  %v433_v10 = vadd.f32 %v1079_v1, %v325_v2  ;;  %v322_v11 = vmul.f32 %v1069_v0, %v214_v60  ;;  %v228_v2 = vld [vmem:[%s1074_s19 + $0x1c8] sm:$0xff]  ;;  %v231_v3 = vld [vmem:[%s1074_s19 + $0x1e0] sm:$0xff] }
  0x45   : > { %v734_v14 = vsel %vm699_vm0, %v731_v56, %v733_v4  ;;  %v862_v15 = vmax.f32 %v614_v57, %v733_v4  ;;  %v616_v16 = vmax.f32 %v532_v62, %v536_v5  ;;  %v533_v17 = vmax.f32 %v429_v6, 0.0  ;;  %v232_v4 = vld [vmem:[%s1074_s19 + $0x1e8] sm:$0xff] }
  0x46   : > { %914 = vst.msk [vmem:[%s1124_s25 + $0x88] sm:$0xff] %vm895_vm1, %v860_v8  ;;  %v861_v20 = vmax.f32 %v613_v48, %v734_v14  ;;  %v735_v21 = vrot.slane %v615_v9, 1  ;;  %v537_v22 = vmax.f32 %v433_v10, 0.0  ;;  %v326_v23 = vmul.f32 %v1069_v0, %v218_v7  ;;  %v229_v10 = vld [vmem:[%s1074_s19 + $0x1d0] sm:$0xff] }
  0x47   : > { %916 = vst.msk [vmem:[%s1124_s25 + $0x98] sm:$0x7] %vm899_vm2, %v862_v15  ;;  %v736_v24 = vrot.slane %v616_v16, 1  ;;  %v430_v25 = vadd.f32 %v1079_v1, %v322_v11  ;;  %v327_v26 = vmul.f32 %v1069_v0, %v219_v12  ;;  %v328_v27 = vmul.f32 %v1069_v0, %v220_v13 }
  0x48   : > { %915 = vst.msk [vmem:[%s1124_s25 + $0x90] sm:$0xff] %vm895_vm1, %v861_v20  ;;  %v617_v28 = vmax.f32 %v533_v17, %v537_v22  ;;  %v434_v29 = vadd.f32 %v1079_v1, %v326_v23  ;;  %v331_v30 = vmul.f32 %v1069_v0, %v223_v18  ;;  %v332_v31 = vmul.f32 %v1069_v0, %v224_v19  ;;  %v233_v19 = vld [vmem:[%s1074_s19 + $0x1f0] sm:$0xff] }
  0x49   : > { %v737_v33 = vsel %vm699_vm0, %v735_v21, %v736_v24  ;;  %v534_v34 = vmax.f32 %v430_v25, 0.0  ;;  %v435_v35 = vadd.f32 %v1079_v1, %v327_v26  ;;  %v436_v36 = vadd.f32 %v1079_v1, %v328_v27 }
  0x4a   : > { %v863_v38 = vmax.f32 %v615_v9, %v737_v33  ;;  %v738_v39 = vrot.slane %v617_v28, 1  ;;  %v538_v40 = vmax.f32 %v434_v29, 0.0  ;;  %v439_v41 = vadd.f32 %v1079_v1, %v331_v30  ;;  %v234_v33 = vld [vmem:[%s1074_s19 + $0x1f8] sm:$0xf] }
  0x4b   : > { %v440_v43 = vadd.f32 %v1079_v1, %v332_v31  ;;  %v539_v44 = vmax.f32 %v435_v35, 0.0  ;;  %v540_v45 = vmax.f32 %v436_v36, 0.0  ;;  %v329_v46 = vmul.f32 %v1069_v0, %v221_v32  ;;  %v230_v32 = vld [vmem:[%s1074_s19 + $0x1d8] sm:$0xf] }
  0x4c   : > { %917 = vst.msk [vmem:[%s1124_s25 + $0xa0] sm:$0xff] %vm895_vm1, %v863_v38  ;;  %v739_v48 = vsel %vm699_vm0, %v736_v24, %v738_v39  ;;  %v618_v49 = vmax.f32 %v534_v34, %v538_v40  ;;  %v543_v50 = vmax.f32 %v439_v41, 0.0  ;;  %v333_v51 = vmul.f32 %v1069_v0, %v225_v37 }
  0x4d   : > { %v864_v53 = vmax.f32 %v616_v16, %v739_v48  ;;  %v544_v54 = vmax.f32 %v440_v43, 0.0  ;;  %v437_v55 = vadd.f32 %v1079_v1, %v329_v46  ;;  %v330_v56 = vmul.f32 %v1069_v0, %v222_v42  ;;  %v235_v46 = vld [vmem:[%s1074_s19 + $0x200] sm:$0xff] }
  0x4e   : > { %v740_v57 = vrot.slane %v618_v49, 1  ;;  %v619_v58 = vmax.f32 %v539_v44, %v543_v50  ;;  %v441_v59 = vadd.f32 %v1079_v1, %v333_v51  ;;  %v334_v60 = vmul.f32 %v1069_v0, %v226_v47  ;;  %v236_v47 = vld [vmem:[%s1074_s19 + $0x208] sm:$0xff] }
  0x4f   : > { %918 = vst.msk [vmem:[%s1124_s25 + $0xa8] sm:$0xff] %vm895_vm1, %v864_v53  ;;  %v620_v61 = vmax.f32 %v540_v45, %v544_v54  ;;  %v541_v62 = vmax.f32 %v437_v55, 0.0  ;;  %v438_v63 = vadd.f32 %v1079_v1, %v330_v56  ;;  %v335_v5 = vmul.f32 %v1069_v0, %v227_v52  ;;  %v239_v52 = vld [vmem:[%s1074_s19 + $0x220] sm:$0xff]  ;;  %v240_v53 = vld [vmem:[%s1074_s19 + $0x228] sm:$0xff] }
  0x50   : > { %v741_v6 = vsel %vm699_vm0, %v738_v39, %v740_v57  ;;  %v866_v7 = vmax.f32 %v618_v49, %v740_v57  ;;  %v742_v8 = vrot.slane %v619_v58, 1  ;;  %v545_v9 = vmax.f32 %v441_v59, 0.0 }
  0x51   : > { %v865_v11 = vmax.f32 %v617_v28, %v741_v6  ;;  %v743_v12 = vrot.slane %v620_v61, 1  ;;  %v442_v13 = vadd.f32 %v1079_v1, %v334_v60  ;;  %v542_v14 = vmax.f32 %v438_v63, 0.0 }
  0x52   : > { %920 = vst.msk [vmem:[%s1124_s25 + $0xb8] sm:$0x7] %vm899_vm2, %v866_v7  ;;  %v621_v15 = vmax.f32 %v541_v62, %v545_v9  ;;  %v336_v16 = vmul.f32 %v1069_v0, %v228_v2  ;;  %v339_v17 = vmul.f32 %v1069_v0, %v231_v3  ;;  %v340_v18 = vmul.f32 %v1069_v0, %v232_v4  ;;  %v237_v4 = vld [vmem:[%s1074_s19 + $0x210] sm:$0xff] }
  0x53   : > { %919 = vst.msk [vmem:[%s1124_s25 + $0xb0] sm:$0xff] %vm895_vm1, %v865_v11  ;;  %v744_v20 = vsel %vm699_vm0, %v742_v8, %v743_v12  ;;  %v546_v21 = vmax.f32 %v442_v13, 0.0  ;;  %v443_v22 = vadd.f32 %v1079_v1, %v335_v5  ;;  %v337_v23 = vmul.f32 %v1069_v0, %v229_v10  ;;  %v241_v13 = vld [vmem:[%s1074_s19 + $0x230] sm:$0xff] }
  0x54   : > { %v867_v24 = vmax.f32 %v619_v58, %v744_v20  ;;  %v745_v25 = vrot.slane %v621_v15, 1  ;;  %v444_v26 = vadd.f32 %v1079_v1, %v336_v16  ;;  %v447_v27 = vadd.f32 %v1079_v1, %v339_v17 }
  0x55   : > { %v622_v28 = vmax.f32 %v542_v14, %v546_v21  ;;  %v448_v29 = vadd.f32 %v1079_v1, %v340_v18  ;;  %v547_v30 = vmax.f32 %v443_v22, 0.0  ;;  %v341_v31 = vmul.f32 %v1069_v0, %v233_v19  ;;  %v238_v14 = vld [vmem:[%s1074_s19 + $0x218] sm:$0xf] }
  0x56   : > { %921 = vst.msk [vmem:[%s1124_s25 + $0xc0] sm:$0xff] %vm895_vm1, %v867_v24  ;;  %v746_v34 = vsel %vm699_vm0, %v743_v12, %v745_v25  ;;  %v548_v35 = vmax.f32 %v444_v26, 0.0  ;;  %v551_v36 = vmax.f32 %v447_v27, 0.0  ;;  %v445_v37 = vadd.f32 %v1079_v1, %v337_v23 }
  0x57   : > { %v868_v38 = vmax.f32 %v620_v61, %v746_v34  ;;  %v747_v39 = vrot.slane %v622_v28, 1  ;;  %v552_v40 = vmax.f32 %v448_v29, 0.0  ;;  %v449_v41 = vadd.f32 %v1079_v1, %v341_v31  ;;  %v247_v34 = vld [vmem:[%s1074_s19 + $0x260] sm:$0xff] }
  0x58   : > { %v623_v42 = vmax.f32 %v547_v30, %v551_v36  ;;  %v549_v43 = vmax.f32 %v445_v37, 0.0  ;;  %v338_v44 = vmul.f32 %v1069_v0, %v230_v32  ;;  %v342_v45 = vmul.f32 %v1069_v0, %v234_v33  ;;  %v244_v33 = vld [vmem:[%s1074_s19 + $0x248] sm:$0xff] }
  0x59   : > { %922 = vst.msk [vmem:[%s1124_s25 + $0xc8] sm:$0xff] %vm895_vm1, %v868_v38  ;;  %v748_v48 = vsel %vm699_vm0, %v745_v25, %v747_v39  ;;  %v870_v49 = vmax.f32 %v622_v28, %v747_v39  ;;  %v624_v50 = vmax.f32 %v548_v35, %v552_v40  ;;  %v553_v51 = vmax.f32 %v449_v41, 0.0  ;;  %v243_v28 = vld [vmem:[%s1074_s19 + $0x240] sm:$0xff]  ;;  %v248_v39 = vld [vmem:[%s1074_s19 + $0x268] sm:$0xff] }
  0x5a   : > { %v869_v54 = vmax.f32 %v621_v15, %v748_v48  ;;  %v749_v55 = vrot.slane %v623_v42, 1  ;;  %v446_v56 = vadd.f32 %v1079_v1, %v338_v44  ;;  %v450_v57 = vadd.f32 %v1079_v1, %v342_v45  ;;  %v242_v15 = vld [vmem:[%s1074_s19 + $0x238] sm:$0xf]  ;;  %v245_v48 = vld [vmem:[%s1074_s19 + $0x250] sm:$0xff] }
  0x5b   : > { %924 = vst.msk [vmem:[%s1124_s25 + $0xd8] sm:$0x7] %vm899_vm2, %v870_v49  ;;  %v750_v58 = vrot.slane %v624_v50, 1  ;;  %v625_v59 = vmax.f32 %v549_v43, %v553_v51  ;;  %v343_v60 = vmul.f32 %v1069_v0, %v235_v46  ;;  %v344_v61 = vmul.f32 %v1069_v0, %v236_v47 }
  0x5c   : > { %923 = vst.msk [vmem:[%s1124_s25 + $0xd0] sm:$0xff] %vm895_vm1, %v869_v54  ;;  %v550_v62 = vmax.f32 %v446_v56, 0.0  ;;  %v554_v63 = vmax.f32 %v450_v57, 0.0  ;;  %v347_v2 = vmul.f32 %v1069_v0, %v239_v52  ;;  %v348_v3 = vmul.f32 %v1069_v0, %v240_v53  ;;  %v249_v53 = vld [vmem:[%s1074_s19 + $0x270] sm:$0xff] }
  0x5d   : > { %v751_v5 = vsel %vm699_vm0, %v749_v55, %v750_v58  ;;  %v752_v6 = vrot.slane %v625_v59, 1  ;;  %v451_v7 = vadd.f32 %v1079_v1, %v343_v60  ;;  %v452_v8 = vadd.f32 %v1079_v1, %v344_v61 }
  0x5e   : > { %v871_v9 = vmax.f32 %v623_v42, %v751_v5  ;;  %v626_v10 = vmax.f32 %v550_v62, %v554_v63  ;;  %v455_v11 = vadd.f32 %v1079_v1, %v347_v2  ;;  %v456_v12 = vadd.f32 %v1079_v1, %v348_v3  ;;  %v250_v63 = vld [vmem:[%s1074_s19 + $0x278] sm:$0xf] }
  0x5f   : > { %v753_v16 = vsel %vm699_vm0, %v750_v58, %v752_v6  ;;  %v555_v17 = vmax.f32 %v451_v7, 0.0  ;;  %v556_v18 = vmax.f32 %v452_v8, 0.0  ;;  %v345_v19 = vmul.f32 %v1069_v0, %v237_v4  ;;  %v246_v58 = vld [vmem:[%s1074_s19 + $0x258] sm:$0xf] }
  0x60   : > { %925 = vst.msk [vmem:[%s1124_s25 + $0xe0] sm:$0xff] %vm895_vm1, %v871_v9  ;;  %v872_v20 = vmax.f32 %v624_v50, %v753_v16  ;;  %v754_v21 = vrot.slane %v626_v10, 1  ;;  %v559_v22 = vmax.f32 %v455_v11, 0.0  ;;  %v560_v23 = vmax.f32 %v456_v12, 0.0 }
  0x61   : > { %v349_v24 = vmul.f32 %v1069_v0, %v241_v13  ;;  %v453_v25 = vadd.f32 %v1079_v1, %v345_v19  ;;  %v346_v26 = vmul.f32 %v1069_v0, %v238_v14  ;;  %v350_v27 = vmul.f32 %v1069_v0, %v242_v15  ;;  %v251_v14 = vld [vmem:[%s1074_s19 + $0x280] sm:$0xff]  ;;  %v252_v19 = vld [vmem:[%s1074_s19 + $0x288] sm:$0xff] }
  0x62   : > { %926 = vst.msk [vmem:[%s1124_s25 + $0xe8] sm:$0xff] %vm895_vm1, %v872_v20  ;;  %v755_v29 = vsel %vm699_vm0, %v752_v6, %v754_v21  ;;  %v874_v30 = vmax.f32 %v626_v10, %v754_v21  ;;  %v627_v31 = vmax.f32 %v555_v17, %v559_v22  ;;  %v628_v32 = vmax.f32 %v556_v18, %v560_v23  ;;  %v255_v20 = vld [vmem:[%s1074_s19 + $0x2a0] sm:$0xff]  ;;  %v256_v21 = vld [vmem:[%s1074_s19 + $0x2a8] sm:$0xff] }
  0x63   : > { %v873_v35 = vmax.f32 %v625_v59, %v755_v29  ;;  %v457_v36 = vadd.f32 %v1079_v1, %v349_v24  ;;  %v557_v37 = vmax.f32 %v453_v25, 0.0  ;;  %v454_v38 = vadd.f32 %v1079_v1, %v346_v26 }
  0x64   : > { %928 = vst.msk [vmem:[%s1124_s25 + $0xf8] sm:$0x7] %vm899_vm2, %v874_v30  ;;  %v756_v40 = vrot.slane %v627_v31, 1  ;;  %v757_v41 = vrot.slane %v628_v32, 1  ;;  %v458_v42 = vadd.f32 %v1079_v1, %v350_v27  ;;  %v351_v43 = vmul.f32 %v1069_v0, %v243_v28 }
  0x65   : > { %927 = vst.msk [vmem:[%s1124_s25 + $0xf0] sm:$0xff] %vm895_vm1, %v873_v35  ;;  %v561_v44 = vmax.f32 %v457_v36, 0.0  ;;  %v558_v45 = vmax.f32 %v454_v38, 0.0  ;;  %v352_v46 = vmul.f32 %v1069_v0, %v244_v33  ;;  %v355_v47 = vmul.f32 %v1069_v0, %v247_v34  ;;  %v253_v34 = vld [vmem:[%s1074_s19 + $0x290] sm:$0xff] }
  0x66   : > { %v758_v49 = vsel %vm699_vm0, %v756_v40, %v757_v41  ;;  %v562_v50 = vmax.f32 %v458_v42, 0.0  ;;  %v356_v51 = vmul.f32 %v1069_v0, %v248_v39  ;;  %v459_v52 = vadd.f32 %v1079_v1, %v351_v43  ;;  %v257_v39 = vld [vmem:[%s1074_s19 + $0x2b0] sm:$0xff] }
  0x67   : > { %v875_v54 = vmax.f32 %v627_v31, %v758_v49  ;;  %v629_v55 = vmax.f32 %v557_v37, %v561_v44  ;;  %v460_v56 = vadd.f32 %v1079_v1, %v352_v46  ;;  %v463_v57 = vadd.f32 %v1079_v1, %v355_v47  ;;  %v1443_v37 = vld [vmem:[%s1561_s2] ss:$0 sm:$0xff]  ;;  %v258_v49 = vld [vmem:[%s1074_s19 + $0x2b8] sm:$0xf] }
  0x68   : > { %v630_v59 = vmax.f32 %v558_v45, %v562_v50  ;;  %v464_v60 = vadd.f32 %v1079_v1, %v356_v51  ;;  %v563_v61 = vmax.f32 %v459_v52, 0.0  ;;  %v353_v62 = vmul.f32 %v1069_v0, %v245_v48  ;;  %v1453_v46 = vld [vmem:[%s1560_s1] ss:$0 sm:$0xff]  ;;  %v254_v48 = vld [vmem:[%s1074_s19 + $0x298] sm:$0xf] }
  0x69   : > { %929 = vst.msk [vmem:[%s1124_s25 + $0x100] sm:$0xff] %vm895_vm1, %v875_v54  ;;  %v759_v2 = vrot.slane %v629_v55, 1  ;;  %v564_v3 = vmax.f32 %v460_v56, 0.0  ;;  %v567_v4 = vmax.f32 %v463_v57, 0.0  ;;  %v357_v5 = vmul.f32 %v1069_v0, %v249_v53 }
  0x6a   : > { %v761_v6 = vrot.slane %v630_v59, 1  ;;  %v568_v7 = vmax.f32 %v464_v60, 0.0  ;;  %v461_v8 = vadd.f32 %v1079_v1, %v353_v62  ;;  %v354_v9 = vmul.f32 %v1069_v0, %v246_v58  ;;  %v259_v62 = vld [vmem:[%s1074_s19 + $0x2c0] sm:$0xff] }
  0x6b   : > { %v760_v10 = vsel %vm699_vm0, %v757_v41, %v759_v2  ;;  %v631_v11 = vmax.f32 %v563_v61, %v567_v4  ;;  %v465_v12 = vadd.f32 %v1079_v1, %v357_v5  ;;  %v358_v13 = vmul.f32 %v1069_v0, %v250_v63  ;;  %v260_v63 = vld [vmem:[%s1074_s19 + $0x2c8] sm:$0xff] }
  0x6c   : > { %v876_v15 = vmax.f32 %v628_v32, %v760_v10  ;;  %v762_v16 = vsel %vm699_vm0, %v759_v2, %v761_v6  ;;  %v878_v17 = vmax.f32 %v630_v59, %v761_v6  ;;  %v632_v18 = vmax.f32 %v564_v3, %v568_v7  ;;  %v263_v6 = vld [vmem:[%s1074_s19 + $0x2e0] sm:$0xff]  ;;  %v264_v7 = vld [vmem:[%s1074_s19 + $0x2e8] sm:$0xff] }
  0x6d   : > { %v877_v22 = vmax.f32 %v629_v55, %v762_v16  ;;  %v763_v23 = vrot.slane %v631_v11, 1  ;;  %v565_v24 = vmax.f32 %v461_v8, 0.0  ;;  %v569_v25 = vmax.f32 %v465_v12, 0.0 }
  0x6e   : > { %930 = vst.msk [vmem:[%s1124_s25 + $0x108] sm:$0xff] %vm895_vm1, %v876_v15  ;;  %v764_v26 = vrot.slane %v632_v18, 1  ;;  %v462_v27 = vadd.f32 %v1079_v1, %v354_v9  ;;  %v466_v28 = vadd.f32 %v1079_v1, %v358_v13  ;;  %v359_v29 = vmul.f32 %v1069_v0, %v251_v14 }
  0x6f   : > { %931 = vst.msk [vmem:[%s1124_s25 + $0x110] sm:$0xff] %vm895_vm1, %v877_v22  ;;  %v633_v30 = vmax.f32 %v565_v24, %v569_v25  ;;  %v360_v31 = vmul.f32 %v1069_v0, %v252_v19  ;;  %v363_v32 = vmul.f32 %v1069_v0, %v255_v20  ;;  %v364_v33 = vmul.f32 %v1069_v0, %v256_v21  ;;  %v261_v20 = vld [vmem:[%s1074_s19 + $0x2d0] sm:$0xff] }
  0x70   : > { %932 = vst.msk [vmem:[%s1124_s25 + $0x118] sm:$0x7] %vm899_vm2, %v878_v17  ;;  %v765_v35 = vsel %vm699_vm0, %v763_v23, %v764_v26  ;;  %v566_v36 = vmax.f32 %v462_v27, 0.0  ;;  %v570_v1 = vmax.f32 %v466_v28, 0.0  ;;  %v467_v38 = vadd.f32 %v1443_v37, %v359_v29  ;;  %v265_v25 = vld [vmem:[%s1074_s19 + $0x2f0] sm:$0xff] }
  0x71   : > { %v879_v40 = vmax.f32 %v631_v11, %v765_v35  ;;  %v766_v0 = vrot.slane %v633_v30, 1  ;;  %v468_v41 = vadd.f32 %v1443_v37, %v360_v31  ;;  %v471_v42 = vadd.f32 %v1443_v37, %v363_v32  ;;  %v266_v35 = vld [vmem:[%s1074_s19 + $0x2f8] sm:$0xf] }
  0x72   : > { %v634_v43 = vmax.f32 %v566_v36, %v570_v1  ;;  %v472_v44 = vadd.f32 %v1443_v37, %v364_v33  ;;  %v571_v45 = vmax.f32 %v467_v38, 0.0  ;;  %v361_v47 = vmul.f32 %v1453_v46, %v253_v34 }
  0x73   : > { %933 = vst.msk [vmem:[%s1124_s25 + $0x120] sm:$0xff] %vm895_vm1, %v879_v40  ;;  %v767_v50 = vsel %vm699_vm0, %v764_v26, %v766_v0  ;;  %v572_v51 = vmax.f32 %v468_v41, 0.0  ;;  %v575_v52 = vmax.f32 %v471_v42, 0.0  ;;  %v365_v53 = vmul.f32 %v1453_v46, %v257_v39 }
  0x74   : > { %v880_v54 = vmax.f32 %v632_v18, %v767_v50  ;;  %v768_v55 = vrot.slane %v634_v43, 1  ;;  %v576_v56 = vmax.f32 %v472_v44, 0.0  ;;  %v469_v57 = vadd.f32 %v1443_v37, %v361_v47 }
  0x75   : > { %v635_v58 = vmax.f32 %v571_v45, %v575_v52  ;;  %v473_v59 = vadd.f32 %v1443_v37, %v365_v53  ;;  %v362_v60 = vmul.f32 %v1453_v46, %v254_v48  ;;  %v366_v61 = vmul.f32 %v1453_v46, %v258_v49  ;;  %v267_v48 = vld [vmem:[%s1074_s19 + $0x300] sm:$0xff]  ;;  %v268_v49 = vld [vmem:[%s1074_s19 + $0x308] sm:$0xff] }
  0x76   : > { %934 = vst.msk [vmem:[%s1124_s25 + $0x128] sm:$0xff] %vm895_vm1, %v880_v54  ;;  %v769_v2 = vsel %vm699_vm0, %v766_v0, %v768_v55  ;;  %v882_v3 = vmax.f32 %v634_v43, %v768_v55  ;;  %v636_v4 = vmax.f32 %v572_v51, %v576_v56  ;;  %v573_v5 = vmax.f32 %v469_v57, 0.0  ;;  %v271_v54 = vld [vmem:[%s1074_s19 + $0x320] sm:$0xff]  ;;  %v272_v55 = vld [vmem:[%s1074_s19 + $0x328] sm:$0xff] }
  0x77   : > { %v881_v8 = vmax.f32 %v633_v30, %v769_v2  ;;  %v770_v9 = vrot.slane %v635_v58, 1  ;;  %v577_v10 = vmax.f32 %v473_v59, 0.0  ;;  %v470_v11 = vadd.f32 %v1443_v37, %v362_v60  ;;  %v262_v30 = vld [vmem:[%s1074_s19 + $0x2d8] sm:$0xf]  ;;  %v269_v2 = vld [vmem:[%s1074_s19 + $0x310] sm:$0xff] }
  0x78   : > { %936 = vst.msk [vmem:[%s1124_s25 + $0x138] sm:$0x7] %vm899_vm2, %v882_v3  ;;  %v771_v12 = vrot.slane %v636_v4, 1  ;;  %v474_v13 = vadd.f32 %v1443_v37, %v366_v61  ;;  %v367_v14 = vmul.f32 %v1453_v46, %v259_v62  ;;  %v368_v15 = vmul.f32 %v1453_v46, %v260_v63 }
  0x79   : > { %935 = vst.msk [vmem:[%s1124_s25 + $0x130] sm:$0xff] %vm895_vm1, %v881_v8  ;;  %v637_v16 = vmax.f32 %v573_v5, %v577_v10  ;;  %v574_v17 = vmax.f32 %v470_v11, 0.0  ;;  %v371_v18 = vmul.f32 %v1453_v46, %v263_v6  ;;  %v372_v19 = vmul.f32 %v1453_v46, %v264_v7  ;;  %v273_v7 = vld [vmem:[%s1074_s19 + $0x330] sm:$0xff] }
  0x7a   : > { %v772_v21 = vsel %vm699_vm0, %v770_v9, %v771_v12  ;;  %v578_v22 = vmax.f32 %v474_v13, 0.0  ;;  %v475_v23 = vadd.f32 %v1443_v37, %v367_v14  ;;  %v476_v24 = vadd.f32 %v1443_v37, %v368_v15 }
  0x7b   : > { %v883_v26 = vmax.f32 %v635_v58, %v772_v21  ;;  %v773_v27 = vrot.slane %v637_v16, 1  ;;  %v479_v28 = vadd.f32 %v1443_v37, %v371_v18  ;;  %v480_v29 = vadd.f32 %v1443_v37, %v372_v19  ;;  %v274_v21 = vld [vmem:[%s1074_s19 + $0x338] sm:$0xf] }
  0x7c   : > { %v638_v31 = vmax.f32 %v574_v17, %v578_v22  ;;  %v579_v32 = vmax.f32 %v475_v23, 0.0  ;;  %v580_v33 = vmax.f32 %v476_v24, 0.0  ;;  %v369_v34 = vmul.f32 %v1453_v46, %v261_v20 }
  0x7d   : > { %937 = vst.msk [vmem:[%s1124_s25 + $0x140] sm:$0xff] %vm895_vm1, %v883_v26  ;;  %v774_v36 = vsel %vm699_vm0, %v771_v12, %v773_v27  ;;  %v583_v1 = vmax.f32 %v479_v28, 0.0  ;;  %v584_v38 = vmax.f32 %v480_v29, 0.0  ;;  %v373_v39 = vmul.f32 %v1453_v46, %v265_v25 }
  0x7e   : > { %v884_v40 = vmax.f32 %v636_v4, %v774_v36  ;;  %v775_v0 = vrot.slane %v638_v31, 1  ;;  %v477_v41 = vadd.f32 %v1443_v37, %v369_v34  ;;  %v370_v42 = vmul.f32 %v1453_v46, %v262_v30 }
  0x7f   : > { %v639_v43 = vmax.f32 %v579_v32, %v583_v1  ;;  %v640_v44 = vmax.f32 %v580_v33, %v584_v38  ;;  %v481_v45 = vadd.f32 %v1443_v37, %v373_v39  ;;  %v374_v47 = vmul.f32 %v1453_v46, %v266_v35 }
  0x80   : > { %938 = vst.msk [vmem:[%s1124_s25 + $0x148] sm:$0xff] %vm895_vm1, %v884_v40  ;;  %v776_v50 = vsel %vm699_vm0, %v773_v27, %v775_v0  ;;  %v886_v51 = vmax.f32 %v638_v31, %v775_v0  ;;  %v581_v52 = vmax.f32 %v477_v41, 0.0  ;;  %v478_v53 = vadd.f32 %v1443_v37, %v370_v42 }
  0x81   : > { %v885_v56 = vmax.f32 %v637_v16, %v776_v50  ;;  %v777_v57 = vrot.slane %v639_v43, 1  ;;  %v778_v58 = vrot.slane %v640_v44, 1  ;;  %v585_v59 = vmax.f32 %v481_v45, 0.0  ;;  %v270_v16 = vld [vmem:[%s1074_s19 + $0x318] sm:$0xf] }
  0x82   : > { %940 = vst.msk [vmem:[%s1124_s25 + $0x158] sm:$0x7] %vm899_vm2, %v886_v51  ;;  %v482_v60 = vadd.f32 %v1443_v37, %v374_v47  ;;  %v582_v61 = vmax.f32 %v478_v53, 0.0  ;;  %v375_v62 = vmul.f32 %v1453_v46, %v267_v48  ;;  %v376_v63 = vmul.f32 %v1453_v46, %v268_v49 }
  0x83   : > { %939 = vst.msk [vmem:[%s1124_s25 + $0x150] sm:$0xff] %vm895_vm1, %v885_v56  ;;  %v779_v3 = vsel %vm699_vm0, %v777_v57, %v778_v58  ;;  %v641_v4 = vmax.f32 %v581_v52, %v585_v59  ;;  %v379_v5 = vmul.f32 %v1453_v46, %v271_v54  ;;  %v380_v6 = vmul.f32 %v1453_v46, %v272_v55 }
  0x84   : > { %v887_v8 = vmax.f32 %v639_v43, %v779_v3  ;;  %v586_v9 = vmax.f32 %v482_v60, 0.0  ;;  %v483_v10 = vadd.f32 %v1443_v37, %v375_v62  ;;  %v484_v11 = vadd.f32 %v1443_v37, %v376_v63 }
  0x85   : > { %v780_v12 = vrot.slane %v641_v4, 1  ;;  %v487_v13 = vadd.f32 %v1443_v37, %v379_v5  ;;  %v488_v14 = vadd.f32 %v1443_v37, %v380_v6  ;;  %v377_v15 = vmul.f32 %v1453_v46, %v269_v2 }
  0x86   : > { %941 = vst.msk [vmem:[%s1124_s25 + $0x160] sm:$0xff] %vm895_vm1, %v887_v8  ;;  %v642_v17 = vmax.f32 %v582_v61, %v586_v9  ;;  %v587_v18 = vmax.f32 %v483_v10, 0.0  ;;  %v588_v19 = vmax.f32 %v484_v11, 0.0  ;;  %v381_v20 = vmul.f32 %v1453_v46, %v273_v7 }
  0x87   : > { %v781_v22 = vsel %vm699_vm0, %v778_v58, %v780_v12  ;;  %v591_v23 = vmax.f32 %v487_v13, 0.0  ;;  %v592_v24 = vmax.f32 %v488_v14, 0.0  ;;  %v485_v25 = vadd.f32 %v1443_v37, %v377_v15 }
  0x88   : > { %v888_v26 = vmax.f32 %v640_v44, %v781_v22  ;;  %v782_v27 = vrot.slane %v642_v17, 1  ;;  %v489_v28 = vadd.f32 %v1443_v37, %v381_v20  ;;  %v378_v29 = vmul.f32 %v1453_v46, %v270_v16 }
  0x89   : > { %v643_v30 = vmax.f32 %v587_v18, %v591_v23  ;;  %v644_v31 = vmax.f32 %v588_v19, %v592_v24  ;;  %v589_v32 = vmax.f32 %v485_v25, 0.0  ;;  %v382_v33 = vmul.f32 %v1453_v46, %v274_v21 }
  0x8a   : > { %942 = vst.msk [vmem:[%s1124_s25 + $0x168] sm:$0xff] %vm895_vm1, %v888_v26  ;;  %v783_v34 = vsel %vm699_vm0, %v780_v12, %v782_v27  ;;  %v890_v35 = vmax.f32 %v642_v17, %v782_v27  ;;  %v593_v36 = vmax.f32 %v489_v28, 0.0  ;;  %v486_v1 = vadd.f32 %v1443_v37, %v378_v29 }
  0x8b   : > { %v889_v38 = vmax.f32 %v641_v4, %v783_v34  ;;  %v784_v39 = vrot.slane %v643_v30, 1  ;;  %v785_v40 = vrot.slane %v644_v31, 1  ;;  %v490_v0 = vadd.f32 %v1443_v37, %v382_v33 }
  0x8c   : > { %944 = vst.msk [vmem:[%s1124_s25 + $0x178] sm:$0x7] %vm899_vm2, %v890_v35  ;;  %v645_v41 = vmax.f32 %v589_v32, %v593_v36  ;;  %v590_v46 = vmax.f32 %v486_v1, 0.0 }
  0x8d   : > { %943 = vst.msk [vmem:[%s1124_s25 + $0x170] sm:$0xff] %vm895_vm1, %v889_v38  ;;  %v786_v42 = vsel %vm699_vm0, %v784_v39, %v785_v40  ;;  %v594_v43 = vmax.f32 %v490_v0, 0.0 }
  0x8e   : > { %v891_v44 = vmax.f32 %v643_v30, %v786_v42  ;;  %v787_v45 = vrot.slane %v645_v41, 1 }
  0x8f   : > { %v646_v47 = vmax.f32 %v590_v46, %v594_v43 }
  0x90   : > { %945 = vst.msk [vmem:[%s1124_s25 + $0x180] sm:$0xff] %vm895_vm1, %v891_v44  ;;  %v788_v48 = vsel %vm699_vm0, %v785_v40, %v787_v45 }
  0x91   : > { %v892_v49 = vmax.f32 %v644_v31, %v788_v48  ;;  %v789_v37 = vrot.slane %v646_v47, 1 }
  0x93   : > { %946 = vst.msk [vmem:[%s1124_s25 + $0x188] sm:$0xff] %vm895_vm1, %v892_v49  ;;  %v790_v50 = vsel %vm699_vm0, %v787_v45, %v789_v37  ;;  %v894_v51 = vmax.f32 %v646_v47, %v789_v37 }
  0x94   : > { %v893_v52 = vmax.f32 %v645_v41, %v790_v50 }
  0x95   : > { %948 = vst.msk [vmem:[%s1124_s25 + $0x198] sm:$0x7] %vm899_vm2, %v894_v51 }
  0x96   : > { %947 = vst.msk [vmem:[%s1124_s25 + $0x190] sm:$0xff] %vm895_vm1, %v893_v52 }
  0x97 PF: > { %s13_s12 = sadd.s32 1, %s1033_s12  }
  0x98   : > { %p10_p4 = scmp.ge.s32.totalorder %s13_s12, 4  }
  0x9a   :  { %12 = sbr.rel (!%p10_p4) target bundleno = 1 (0x1), region = 62 }

// kernel: conv3_forward.7
= control target key start
LH: loop header
LB: loop body
LE: loop exit
PB: predicated region body
PF: predicated region fallthrough
CT: control target
= control target key end

     0   :  { %s2346_s18 = smov 0   ;;  %s3922_s0 = inlined_call_operand.vmem [shape: f32[2,728,9], index: 0, kind: input, shape index: {}]   ;;  %s3923_s1 = inlined_call_operand.vmem [shape: f32[1,9,64], index: 1, kind: input, shape index: {}]   ;;  %s3924_s2 = inlined_call_operand.vmem [shape: f32[1,64], index: 2, kind: input, shape index: {}]   ;;  %s3925_s3 = inlined_call_operand.vmem [shape: f32[728,1], index: 3, kind: input, shape index: {}]   ;;  %s3926_s4 = inlined_call_operand.vmem [shape: f32[2,728,64], index: 4, kind: output, shape index: {0}]   ;;  %s3927_s5 = inlined_call_operand.vmem [shape: f32[2,2,64], index: 5, kind: output, shape index: {1}]  }
   0x1 LB: > { %s2184_s19 = sadd.s32 4294967295, %s2313_s18   ;;  %p2188_p0 = scmp.ge.s32.totalorder %s2313_s18, 1  ;;  %s2313_s18 = sphi %s2346_s18, %s16_s18  }
   0x2   : > { %p190_p1 = scmp.lt.s32.totalorder %s2313_s18, 3 }
   0x4   : > { %p191_p2 = pnand %p2188_p0, %p190_p1 }
   0x6   : > { %194 = sbr.rel (%p191_p2) target bundleno = 484 (0x1e4), region = 36 }
   0xb   : > { %v997_v0 = vld [vmem:[%s3925_s3 + $0x20] sm:$0xff]  ;;  %v995_v1 = vld [vmem:[%s3925_s3 + $0x10] sm:$0xff]  ;;  %p222_p3 = scmp.lt.s32.totalorder %s2184_s19, 1  ;;  %v2315_v3 = vmov 0   ;;  %v328_v4 = vld [vmem:[%s3923_s1 + $0x8] sm:$0x1] }
   0xc   : > { %v993_v2 = vld [vmem:[%s3925_s3] sm:$0xff]  ;;  %2304 = vset.pattern.permute.xlu2 %v2315_v3  ;;  %2303 = vset.pattern.permute.xlu1 %v2315_v3  ;;  %vm607_vm0 = vcmask 1040384   ;;  %vm333_vm1 = vcmask 72704   ;;  %v998_v6 = vld [vmem:[%s3925_s3 + $0x28] sm:$0xff]  ;;  %v996_v10 = vld [vmem:[%s3925_s3 + $0x18] sm:$0xff]  ;;  %vm901_vm2 = vcmask 523264  }
   0xd   : > { %2302 = vset.pattern.permute.xlu0 %v2315_v3  ;;  %1106 = vperm.xlu2 %2304, %v997_v0   ;;  %s4125_s19 = smov (!%p222_p3, %s2184_s19), 1  ;;  %v327_v5 = vld [vmem:[%s3923_s1] sm:$0xff]  ;;  %v994_v11 = vld [vmem:[%s3925_s3 + $0x8] sm:$0xff]  ;;  %v1000_v17 = vld [vmem:[%s3925_s3 + $0x38] sm:$0xff]  ;;  %vm2096_vm3 = vcmask 517120  }
   0xe   : > { %1096 = vperm.xlu1 %2303, %v995_v1   ;;  %1086 = vperm.xlu0 %2302, %v993_v2   ;;  %s2292_s30 = smul.u32 728, %s4125_s19  ;;  %v1001_v16 = vld [vmem:[%s3925_s3 + $0x40] sm:$0xff]  ;;  %v999_v18 = vld [vmem:[%s3925_s3 + $0x30] sm:$0xff]  ;;  %v1004_v23 = vld [vmem:[%s3925_s3 + $0x58] sm:$0xff] }
   0xf   : > { %2192 = vmatpush.msk.msra.mxu0 %vm607_vm0, %v328_v4  ;;  %2286 = vmatpush.msk.msra.mxu1 %vm607_vm0, %v328_v4  ;;  %v1003_v24 = vld [vmem:[%s3925_s3 + $0x50] sm:$0xff]  ;;  %v1002_v25 = vld [vmem:[%s3925_s3 + $0x48] sm:$0xff]  ;;  %v1005_v32 = vld [vmem:[%s3925_s3 + $0x60] sm:$0xff] }
  0x10   : > { %2287 = vmatpush.msk.msra.mxu2 %vm607_vm0, %v328_v4  ;;  %2288 = vmatpush.msk.msra.mxu3 %vm607_vm0, %v328_v4  ;;  %s2381_s8 = scalar_lea.vmem %s3922_s0, %s2292_s30  ;;  %v1007_v30 = vld [vmem:[%s3925_s3 + $0x70] sm:$0xff]  ;;  %v1006_v31 = vld [vmem:[%s3925_s3 + $0x68] sm:$0xff]  ;;  %v1009_v38 = vld [vmem:[%s3925_s3 + $0x80] sm:$0xff]  ;;  %s2667_s27 = scalar_lea.vmem %s3926_s4, %s2292_s30 }
  0x11   : > { %626 = vmatpush.msra.mxu0 %v327_v5  ;;  %2289 = vmatpush.msra.mxu1 %v327_v5  ;;  %v236_v7 = vld [vmem:[%s2381_s8] sm:$0xff]  ;;  %v259_v8 = vld [vmem:[%s2381_s8 + $0xb8] sm:$0xff]  ;;  %v282_v9 = vld [vmem:[%s2381_s8 + $0x170] sm:$0xff] }
  0x12   : > { %2290 = vmatpush.msra.mxu2 %v327_v5  ;;  %2291 = vmatpush.msra.mxu3 %v327_v5  ;;  %v305_v12 = vld [vmem:[%s2381_s8 + $0x228] sm:$0xff]  ;;  %v260_v14 = vld [vmem:[%s2381_s8 + $0xc0] sm:$0xff]  ;;  %v283_v15 = vld [vmem:[%s2381_s8 + $0x178] sm:$0xff] }
  0x13   : > { %2193 = vmatmul.msk.f32.vlgmr.msra.gmra.mxu0 %vm333_vm1, %v236_v7  ;;  %2216 = vmatmul.msk.f32.vlgmr.msra.gmra.mxu1 %vm333_vm1, %v259_v8  ;;  %v237_v13 = vld [vmem:[%s2381_s8 + $0x8] sm:$0xff]  ;;  %v306_v19 = vld [vmem:[%s2381_s8 + $0x230] sm:$0xff]  ;;  %v284_v22 = vld [vmem:[%s2381_s8 + $0x180] sm:$0xff] }
  0x14   : > { %2239 = vmatmul.msk.f32.vlgmr.msra.gmra.mxu2 %vm333_vm1, %v282_v9  ;;  %2262 = vmatmul.msk.f32.vlgmr.msra.gmra.mxu3 %vm333_vm1, %v305_v12  ;;  %v238_v20 = vld [vmem:[%s2381_s8 + $0x10] sm:$0xff]  ;;  %v261_v21 = vld [vmem:[%s2381_s8 + $0xc8] sm:$0xff]  ;;  %v307_v26 = vld [vmem:[%s2381_s8 + $0x238] sm:$0xff] }
  0x15   : > { %1111 = vperm.xlu2 %2304, %v998_v6   ;;  %v239_v27 = vld [vmem:[%s2381_s8 + $0x18] sm:$0xff]  ;;  %v262_v28 = vld [vmem:[%s2381_s8 + $0xd0] sm:$0xff]  ;;  %v285_v29 = vld [vmem:[%s2381_s8 + $0x188] sm:$0xff] }
  0x16   : > { %1101 = vperm.xlu1 %2303, %v996_v10   ;;  %1091 = vperm.xlu0 %2302, %v994_v11   ;;  %v308_v33 = vld [vmem:[%s2381_s8 + $0x240] sm:$0xff]  ;;  %v263_v35 = vld [vmem:[%s2381_s8 + $0xd8] sm:$0xff]  ;;  %v286_v36 = vld [vmem:[%s2381_s8 + $0x190] sm:$0xff] }
  0x17   : > { %v240_v34 = vld [vmem:[%s2381_s8 + $0x20] sm:$0xff]  ;;  %v1010_v37 = vld [vmem:[%s3925_s3 + $0x88] sm:$0xff]  ;;  %v1008_v39 = vld [vmem:[%s3925_s3 + $0x78] sm:$0xff] }
  0x18   : > { %v309_v40 = vld [vmem:[%s2381_s8 + $0x248] sm:$0xff]  ;;  %v264_v42 = vld [vmem:[%s2381_s8 + $0xe0] sm:$0xff]  ;;  %v287_v43 = vld [vmem:[%s2381_s8 + $0x198] sm:$0xff] }
  0x19   : > { %v241_v41 = vld [vmem:[%s2381_s8 + $0x28] sm:$0xff]  ;;  %v1013_v44 = vld [vmem:[%s3925_s3 + $0xa0] sm:$0xff]  ;;  %v1012_v45 = vld [vmem:[%s3925_s3 + $0x98] sm:$0xff] }
  0x1a   : > { %v1011_v46 = vld [vmem:[%s3925_s3 + $0x90] sm:$0xff]  ;;  %v265_v49 = vld [vmem:[%s2381_s8 + $0xe8] sm:$0xff]  ;;  %v288_v50 = vld [vmem:[%s2381_s8 + $0x1a0] sm:$0xff] }
  0x1b   : > { %2194 = vmatmul.msk.f32.gmra.mxu0 %vm333_vm1, %v237_v13  ;;  %2217 = vmatmul.msk.f32.gmra.mxu1 %vm333_vm1, %v260_v14  ;;  %v310_v47 = vld [vmem:[%s2381_s8 + $0x250] sm:$0xff]  ;;  %v1016_v51 = vld [vmem:[%s3925_s3 + $0xb8] sm:$0xff]  ;;  %v1014_v53 = vld [vmem:[%s3925_s3 + $0xa8] sm:$0xff] }
  0x1c   : > { %2240 = vmatmul.msk.f32.gmra.mxu2 %vm333_vm1, %v283_v15  ;;  %2263 = vmatmul.msk.f32.gmra.mxu3 %vm333_vm1, %v306_v19  ;;  %v242_v48 = vld [vmem:[%s2381_s8 + $0x30] sm:$0xff]  ;;  %v311_v54 = vld [vmem:[%s2381_s8 + $0x258] sm:$0xff]  ;;  %v289_v57 = vld [vmem:[%s2381_s8 + $0x1a8] sm:$0xff] }
  0x1d   : > { %1126 = vperm.xlu2 %2304, %v1001_v16   ;;  %v1015_v52 = vld [vmem:[%s3925_s3 + $0xb0] sm:$0xff]  ;;  %v243_v55 = vld [vmem:[%s2381_s8 + $0x38] sm:$0xff]  ;;  %v1018_v59 = vld [vmem:[%s3925_s3 + $0xc8] sm:$0xff] }
  0x1e   : > { %1121 = vperm.xlu1 %2303, %v1000_v17   ;;  %1116 = vperm.xlu0 %2302, %v999_v18   ;;  %v266_v56 = vld [vmem:[%s2381_s8 + $0xf0] sm:$0xff]  ;;  %v1017_v60 = vld [vmem:[%s3925_s3 + $0xc0] sm:$0xff]  ;;  %v267_v63 = vld [vmem:[%s2381_s8 + $0xf8] sm:$0xff] }
  0x1f   : > { %v1019_v58 = vld [vmem:[%s3925_s3 + $0xd0] sm:$0xff]  ;;  %v312_v61 = vld [vmem:[%s2381_s8 + $0x260] sm:$0xff]  ;;  %v1022_v1 = vld [vmem:[%s3925_s3 + $0xe8] sm:$0xff] }
  0x20   : > { %v244_v62 = vld [vmem:[%s2381_s8 + $0x40] sm:$0xff]  ;;  %v290_v0 = vld [vmem:[%s2381_s8 + $0x1b0] sm:$0xff]  ;;  %v1020_v3 = vld [vmem:[%s3925_s3 + $0xd8] sm:$0xff] }
  0x21   : > { %v1021_v2 = vld [vmem:[%s3925_s3 + $0xe0] sm:$0xff]  ;;  %v313_v4 = vld [vmem:[%s2381_s8 + $0x268] sm:$0xff]  ;;  %v291_v7 = vld [vmem:[%s2381_s8 + $0x1b8] sm:$0xff] }
  0x22   : > { %v245_v5 = vld [vmem:[%s2381_s8 + $0x48] sm:$0xff]  ;;  %v268_v6 = vld [vmem:[%s2381_s8 + $0x100] sm:$0xff]  ;;  %v1024_v9 = vld [vmem:[%s3925_s3 + $0xf8] sm:$0xff] }
  0x23   : > { %2195 = vmatmul.msk.f32.gmra.mxu0 %vm333_vm1, %v238_v20  ;;  %2218 = vmatmul.msk.f32.gmra.mxu1 %vm333_vm1, %v261_v21  ;;  %v1025_v8 = vld [vmem:[%s3925_s3 + $0x100] sm:$0xff]  ;;  %v1023_v10 = vld [vmem:[%s3925_s3 + $0xf0] sm:$0xff]  ;;  %v269_v13 = vld [vmem:[%s2381_s8 + $0x108] sm:$0xff] }
  0x24   : > { %2241 = vmatmul.msk.f32.gmra.mxu2 %vm333_vm1, %v284_v22  ;;  %2264 = vmatmul.msk.f32.gmra.mxu3 %vm333_vm1, %v307_v26  ;;  %v314_v11 = vld [vmem:[%s2381_s8 + $0x270] sm:$0xff]  ;;  %v292_v14 = vld [vmem:[%s2381_s8 + $0x1c0] sm:$0xff]  ;;  %v1028_v15 = vld [vmem:[%s3925_s3 + $0x118] sm:$0xff] }
  0x25   : > { %1141 = vperm.xlu2 %2304, %v1004_v23   ;;  %v246_v12 = vld [vmem:[%s2381_s8 + $0x50] sm:$0xff]  ;;  %v1026_v17 = vld [vmem:[%s3925_s3 + $0x108] sm:$0xff]  ;;  %v315_v18 = vld [vmem:[%s2381_s8 + $0x278] sm:$0xff] }
  0x26   : > { %1136 = vperm.xlu1 %2303, %v1003_v24   ;;  %1131 = vperm.xlu0 %2302, %v1002_v25   ;;  %v1027_v16 = vld [vmem:[%s3925_s3 + $0x110] sm:$0xff]  ;;  %v247_v19 = vld [vmem:[%s2381_s8 + $0x58] sm:$0xff]  ;;  %v293_v21 = vld [vmem:[%s2381_s8 + $0x1c8] sm:$0xff] }
  0x27   : > { %v270_v20 = vld [vmem:[%s2381_s8 + $0x110] sm:$0xff]  ;;  %v1030_v23 = vld [vmem:[%s3925_s3 + $0x128] sm:$0xff]  ;;  %v1029_v24 = vld [vmem:[%s3925_s3 + $0x120] sm:$0xff] }
  0x28   : > { %v1031_v22 = vld [vmem:[%s3925_s3 + $0x130] sm:$0xff]  ;;  %v316_v25 = vld [vmem:[%s2381_s8 + $0x280] sm:$0xff] }
  0x29   : > { %v248_v26 = vld [vmem:[%s2381_s8 + $0x60] sm:$0xff] }
  0x2b   : > { %2196 = vmatmul.msk.f32.gmra.mxu0 %vm333_vm1, %v239_v27  ;;  %2219 = vmatmul.msk.f32.gmra.mxu1 %vm333_vm1, %v262_v28  ;;  %v271_v27 = vld [vmem:[%s2381_s8 + $0x118] sm:$0xff]  ;;  %v294_v28 = vld [vmem:[%s2381_s8 + $0x1d0] sm:$0xff] }
  0x2c   : > { %2242 = vmatmul.msk.f32.gmra.mxu2 %vm333_vm1, %v285_v29  ;;  %2265 = vmatmul.msk.f32.gmra.mxu3 %vm333_vm1, %v308_v33  ;;  %v1034_v29 = vld [vmem:[%s3925_s3 + $0x148] sm:$0xff] }
  0x2d   : > { %1156 = vperm.xlu2 %2304, %v1007_v30   ;;  %v1033_v30 = vld [vmem:[%s3925_s3 + $0x140] sm:$0xff]  ;;  %v249_v33 = vld [vmem:[%s2381_s8 + $0x68] sm:$0xff] }
  0x2e   : > { %1151 = vperm.xlu1 %2303, %v1006_v31   ;;  %1146 = vperm.xlu0 %2302, %v1005_v32   ;;  %v1032_v31 = vld [vmem:[%s3925_s3 + $0x138] sm:$0xff]  ;;  %v317_v32 = vld [vmem:[%s2381_s8 + $0x288] sm:$0xff] }
  0x33   : > { %2197 = vmatmul.msk.f32.gmra.mxu0 %vm333_vm1, %v240_v34  ;;  %2220 = vmatmul.msk.f32.gmra.mxu1 %vm333_vm1, %v263_v35  ;;  %v272_v34 = vld [vmem:[%s2381_s8 + $0x120] sm:$0xff]  ;;  %v295_v35 = vld [vmem:[%s2381_s8 + $0x1d8] sm:$0xff] }
  0x34   : > { %2243 = vmatmul.msk.f32.gmra.mxu2 %vm333_vm1, %v286_v36  ;;  %2266 = vmatmul.msk.f32.gmra.mxu3 %vm333_vm1, %v309_v40  ;;  %v1037_v36 = vld [vmem:[%s3925_s3 + $0x160] sm:$0xff]  ;;  %v250_v40 = vld [vmem:[%s2381_s8 + $0x70] sm:$0xff] }
  0x35   : > { %1171 = vperm.xlu2 %2304, %v1010_v37   ;;  %v1036_v37 = vld [vmem:[%s3925_s3 + $0x158] sm:$0xff] }
  0x36   : > { %1166 = vperm.xlu1 %2303, %v1009_v38   ;;  %1161 = vperm.xlu0 %2302, %v1008_v39   ;;  %v1035_v38 = vld [vmem:[%s3925_s3 + $0x150] sm:$0xff] }
  0x37   : > { %v318_v39 = vld [vmem:[%s2381_s8 + $0x290] sm:$0xff] }
  0x3b   : > { %2198 = vmatmul.msk.f32.gmra.mxu0 %vm333_vm1, %v241_v41  ;;  %2221 = vmatmul.msk.f32.gmra.mxu1 %vm333_vm1, %v264_v42  ;;  %v273_v41 = vld [vmem:[%s2381_s8 + $0x128] sm:$0xff]  ;;  %v296_v42 = vld [vmem:[%s2381_s8 + $0x1e0] sm:$0xff] }
  0x3c   : > { %2244 = vmatmul.msk.f32.gmra.mxu2 %vm333_vm1, %v287_v43  ;;  %2267 = vmatmul.msk.f32.gmra.mxu3 %vm333_vm1, %v310_v47  ;;  %v1040_v43 = vld [vmem:[%s3925_s3 + $0x178] sm:$0xff] }
  0x3d   : > { %1186 = vperm.xlu2 %2304, %v1013_v44   ;;  %v1039_v44 = vld [vmem:[%s3925_s3 + $0x170] sm:$0xff]  ;;  %v251_v47 = vld [vmem:[%s2381_s8 + $0x78] sm:$0xff] }
  0x3e   : > { %1181 = vperm.xlu1 %2303, %v1012_v45   ;;  %1176 = vperm.xlu0 %2302, %v1011_v46   ;;  %v1038_v45 = vld [vmem:[%s3925_s3 + $0x168] sm:$0xff]  ;;  %v319_v46 = vld [vmem:[%s2381_s8 + $0x298] sm:$0xff] }
  0x43   : > { %2199 = vmatmul.msk.f32.gmra.mxu0 %vm333_vm1, %v242_v48  ;;  %2222 = vmatmul.msk.f32.gmra.mxu1 %vm333_vm1, %v265_v49  ;;  %v274_v48 = vld [vmem:[%s2381_s8 + $0x130] sm:$0xff]  ;;  %v297_v49 = vld [vmem:[%s2381_s8 + $0x1e8] sm:$0xff] }
  0x44   : > { %2245 = vmatmul.msk.f32.gmra.mxu2 %vm333_vm1, %v288_v50  ;;  %2268 = vmatmul.msk.f32.gmra.mxu3 %vm333_vm1, %v311_v54  ;;  %v1043_v50 = vld [vmem:[%s3925_s3 + $0x190] sm:$0xff]  ;;  %v2657_v54 = vld [vmem:[%s3924_s2] ss:$0 sm:$0xff] }
  0x45   : > { %1201 = vperm.xlu2 %2304, %v1016_v51   ;;  %v1042_v51 = vld [vmem:[%s3925_s3 + $0x188] sm:$0xff] }
  0x46   : > { %1196 = vperm.xlu1 %2303, %v1015_v52   ;;  %1191 = vperm.xlu0 %2302, %v1014_v53   ;;  %v1041_v52 = vld [vmem:[%s3925_s3 + $0x180] sm:$0xff] }
  0x47   : > { %v320_v53 = vld [vmem:[%s2381_s8 + $0x2a0] sm:$0xff] }
  0x4b   : > { %2200 = vmatmul.msk.f32.gmra.mxu0 %vm333_vm1, %v243_v55  ;;  %2223 = vmatmul.msk.f32.gmra.mxu1 %vm333_vm1, %v266_v56  ;;  %v252_v56 = vld [vmem:[%s2381_s8 + $0x80] sm:$0xff] }
  0x4c   : > { %2246 = vmatmul.msk.f32.gmra.mxu2 %vm333_vm1, %v289_v57  ;;  %2269 = vmatmul.msk.f32.gmra.mxu3 %vm333_vm1, %v312_v61  ;;  %v275_v57 = vld [vmem:[%s2381_s8 + $0x138] sm:$0xff] }
  0x4d   : > { %1216 = vperm.xlu2 %2304, %v1019_v58  }
  0x4e   : > { %1211 = vperm.xlu1 %2303, %v1018_v59   ;;  %1206 = vperm.xlu0 %2302, %v1017_v60   ;;  %v298_v60 = vld [vmem:[%s2381_s8 + $0x1f0] sm:$0xff] }
  0x53   : > { %2201 = vmatmul.msk.f32.gmra.mxu0 %vm333_vm1, %v244_v62  ;;  %2224 = vmatmul.msk.f32.gmra.mxu1 %vm333_vm1, %v267_v63  ;;  %v1046_v62 = vld [vmem:[%s3925_s3 + $0x1a8] sm:$0xff] }
  0x54   : > { %2247 = vmatmul.msk.f32.gmra.mxu2 %vm333_vm1, %v290_v0  ;;  %2270 = vmatmul.msk.f32.gmra.mxu3 %vm333_vm1, %v313_v4  ;;  %v1045_v0 = vld [vmem:[%s3925_s3 + $0x1a0] sm:$0xff] }
  0x55   : > { %1231 = vperm.xlu2 %2304, %v1022_v1   ;;  %v1044_v1 = vld [vmem:[%s3925_s3 + $0x198] sm:$0xff] }
  0x56   : > { %1226 = vperm.xlu1 %2303, %v1021_v2   ;;  %1221 = vperm.xlu0 %2302, %v1020_v3   ;;  %v321_v2 = vld [vmem:[%s2381_s8 + $0x2a8] sm:$0xff] }
  0x5b   : > { %2202 = vmatmul.msk.f32.gmra.mxu0 %vm333_vm1, %v245_v5  ;;  %2225 = vmatmul.msk.f32.gmra.mxu1 %vm333_vm1, %v268_v6  ;;  %v253_v6 = vld [vmem:[%s2381_s8 + $0x88] sm:$0xff] }
  0x5c   : > { %2248 = vmatmul.msk.f32.gmra.mxu2 %vm333_vm1, %v291_v7  ;;  %2271 = vmatmul.msk.f32.gmra.mxu3 %vm333_vm1, %v314_v11  ;;  %v276_v7 = vld [vmem:[%s2381_s8 + $0x140] sm:$0xff] }
  0x5d   : > { %1246 = vperm.xlu2 %2304, %v1025_v8  }
  0x5e   : > { %1241 = vperm.xlu1 %2303, %v1024_v9   ;;  %1236 = vperm.xlu0 %2302, %v1023_v10   ;;  %v299_v10 = vld [vmem:[%s2381_s8 + $0x1f8] sm:$0xff] }
  0x63   : > { %2203 = vmatmul.msk.f32.gmra.mxu0 %vm333_vm1, %v246_v12  ;;  %2226 = vmatmul.msk.f32.gmra.mxu1 %vm333_vm1, %v269_v13  ;;  %v1049_v12 = vld [vmem:[%s3925_s3 + $0x1c0] sm:$0xff] }
  0x64   : > { %2249 = vmatmul.msk.f32.gmra.mxu2 %vm333_vm1, %v292_v14  ;;  %2272 = vmatmul.msk.f32.gmra.mxu3 %vm333_vm1, %v315_v18 }
  0x65   : > { %1261 = vperm.xlu2 %2304, %v1028_v15  }
  0x66   : > { %1256 = vperm.xlu1 %2303, %v1027_v16   ;;  %1251 = vperm.xlu0 %2302, %v1026_v17   ;;  %v1048_v16 = vld [vmem:[%s3925_s3 + $0x1b8] sm:$0xff]  ;;  %v1047_v17 = vld [vmem:[%s3925_s3 + $0x1b0] sm:$0xff] }
  0x6b   : > { %2204 = vmatmul.msk.f32.gmra.mxu0 %vm333_vm1, %v247_v19  ;;  %2227 = vmatmul.msk.f32.gmra.mxu1 %vm333_vm1, %v270_v20 }
  0x6c   : > { %2250 = vmatmul.msk.f32.gmra.mxu2 %vm333_vm1, %v293_v21  ;;  %2273 = vmatmul.msk.f32.gmra.mxu3 %vm333_vm1, %v316_v25  ;;  %v322_v21 = vld [vmem:[%s2381_s8 + $0x2b0] sm:$0xff] }
  0x6d   : > { %1276 = vperm.xlu2 %2304, %v1031_v22  }
  0x6e   : > { %1271 = vperm.xlu1 %2303, %v1030_v23   ;;  %1266 = vperm.xlu0 %2302, %v1029_v24  }
  0x73   : > { %2205 = vmatmul.msk.f32.gmra.mxu0 %vm333_vm1, %v248_v26  ;;  %2228 = vmatmul.msk.f32.gmra.mxu1 %vm333_vm1, %v271_v27 }
  0x74   : > { %2251 = vmatmul.msk.f32.gmra.mxu2 %vm333_vm1, %v294_v28  ;;  %2274 = vmatmul.msk.f32.gmra.mxu3 %vm333_vm1, %v317_v32  ;;  %v277_v32 = vld [vmem:[%s2381_s8 + $0x148] sm:$0xff] }
  0x75   : > { %1291 = vperm.xlu2 %2304, %v1034_v29  }
  0x76   : > { %1286 = vperm.xlu1 %2303, %v1033_v30   ;;  %1281 = vperm.xlu0 %2302, %v1032_v31   ;;  %v254_v31 = vld [vmem:[%s2381_s8 + $0x90] sm:$0xff] }
  0x7b   : > { %2206 = vmatmul.msk.f32.gmra.mxu0 %vm333_vm1, %v249_v33  ;;  %2229 = vmatmul.msk.f32.gmra.mxu1 %vm333_vm1, %v272_v34 }
  0x7c   : > { %2252 = vmatmul.msk.f32.gmra.mxu2 %vm333_vm1, %v295_v35  ;;  %2275 = vmatmul.msk.f32.gmra.mxu3 %vm333_vm1, %v318_v39  ;;  %v1052_v39 = vld [vmem:[%s3925_s3 + $0x1d8] sm:$0xff] }
  0x7d   : > { %1306 = vperm.xlu2 %2304, %v1037_v36   ;;  %v300_v36 = vld [vmem:[%s2381_s8 + $0x200] sm:$0xff] }
  0x7e   : > { %1301 = vperm.xlu1 %2303, %v1036_v37   ;;  %1296 = vperm.xlu0 %2302, %v1035_v38   ;;  %v2741_v37 = vpop.permute.xlu2 %1106 }
  0x80   : > { %v1087_v55 = vpop.permute.xlu0 %1086  ;;  %v1097_v27 = vpop.permute.xlu1 %1096 }
  0x83   : > { %2207 = vmatmul.msk.f32.gmra.mxu0 %vm333_vm1, %v250_v40  ;;  %2230 = vmatmul.msk.f32.gmra.mxu1 %vm333_vm1, %v273_v41 }
  0x84   : > { %2253 = vmatmul.msk.f32.gmra.mxu2 %vm333_vm1, %v296_v42  ;;  %2276 = vmatmul.msk.f32.gmra.mxu3 %vm333_vm1, %v319_v46  ;;  %v1051_v42 = vld [vmem:[%s3925_s3 + $0x1d0] sm:$0xff]  ;;  %v323_v46 = vld [vmem:[%s2381_s8 + $0x2b8] sm:$0xff] }
  0x85   : > { %1321 = vperm.xlu2 %2304, %v1040_v43   ;;  %v1050_v43 = vld [vmem:[%s3925_s3 + $0x1c8] sm:$0xff] }
  0x86   : > { %1316 = vperm.xlu1 %2303, %v1039_v44   ;;  %1311 = vperm.xlu0 %2302, %v1038_v45  }
  0x88   : > { %v1092_v14 = vpop.permute.xlu0 %1091 }
  0x8b   : > { %2208 = vmatmul.msk.f32.gmra.mxu0 %vm333_vm1, %v251_v47  ;;  %2231 = vmatmul.msk.f32.gmra.mxu1 %vm333_vm1, %v274_v48 }
  0x8c   : > { %2254 = vmatmul.msk.f32.gmra.mxu2 %vm333_vm1, %v297_v49  ;;  %2277 = vmatmul.msk.f32.gmra.mxu3 %vm333_vm1, %v320_v53  ;;  %v255_v53 = vld [vmem:[%s2381_s8 + $0x98] sm:$0xff] }
  0x8d   : > { %1336 = vperm.xlu2 %2304, %v1043_v50  }
  0x8e   : > { %1331 = vperm.xlu1 %2303, %v1042_v51   ;;  %1326 = vperm.xlu0 %2302, %v1041_v52  }
  0x90   : > { %v628_v58 = vpop.f32.mrf.mxu0  ;;  %v697_v59 = vpop.f32.mrf.mxu1 }
  0x91   : > { %v629_v61 = vadd.f32 %v2657_v54, %v628_v58  ;;  %v2675_v63 = vadd.f32 %v2657_v54, %v697_v59  ;;  %v301_v59 = vld [vmem:[%s2381_s8 + $0x208] sm:$0xff] }
  0x93   : > { %2209 = vmatmul.msk.f32.gmra.mxu0 %vm333_vm1, %v252_v56  ;;  %2232 = vmatmul.msk.f32.gmra.mxu1 %vm333_vm1, %v275_v57  ;;  %902 = vst.msk [vmem:[%s2667_s27] sm:$0xff] %vm901_vm2, %v629_v61  ;;  %v1539_v4 = vmul.f32 %v1087_v55, %v629_v61  ;;  %v278_v55 = vld [vmem:[%s2381_s8 + $0x150] sm:$0xff] }
  0x94   : > { %2255 = vmatmul.msk.f32.gmra.mxu2 %vm333_vm1, %v298_v60  ;;  %925 = vst.msk [vmem:[%s2667_s27 + $0xb8] sm:$0xff] %vm901_vm2, %v2675_v63  ;;  %2278 = vmatmul.msk.f32.gmra.mxu3 %vm333_vm1, %v321_v2  ;;  %v1102_v60 = vpop.permute.xlu1 %1101  ;;  %v1054_v2 = vld [vmem:[%s3925_s3 + $0x1e8] sm:$0xff] }
  0x95   : > { %1351 = vperm.xlu2 %2304, %v1046_v62   ;;  %v1817_v19 = vmul.f32 %v1539_v4, %v629_v61  ;;  %v1630_v22 = vsel %vm901_vm2, %v1539_v4, 0.0  ;;  %v1055_v62 = vld [vmem:[%s3925_s3 + $0x1f0] sm:$0xff]  ;;  %v2801_v4 = vpop.permute.xlu2 %1111 }
  0x96   : > { %1346 = vperm.xlu1 %2303, %v1045_v0   ;;  %1341 = vperm.xlu0 %2302, %v1044_v1  }
  0x97   : > { %v766_v3 = vpop.f32.mrf.mxu2  ;;  %v835_v13 = vpop.f32.mrf.mxu3  ;;  %v1908_v28 = vsel %vm901_vm2, %v1817_v19, 0.0  ;;  %v279_v19 = vld [vmem:[%s2381_s8 + $0x158] sm:$0xff] }
  0x98   : > { %v2694_v5 = vadd.f32 %v2657_v54, %v766_v3  ;;  %v631_v8 = vpop.f32.mrf.mxu0  ;;  %v700_v9 = vpop.f32.mrf.mxu1  ;;  %v2718_v18 = vadd.f32 %v2657_v54, %v835_v13  ;;  %v1053_v3 = vld [vmem:[%s3925_s3 + $0x1e0] sm:$0xff] }
  0x99   : > { %v632_v11 = vadd.f32 %v2657_v54, %v631_v8  ;;  %v2707_v15 = vadd.f32 %v2657_v54, %v700_v9  ;;  %v324_v8 = vld [vmem:[%s2381_s8 + $0x2c0] sm:$0xff]  ;;  %v2813_v9 = vpop.permute.xlu0 %1116 }
  0x9a   : > { %4016 = vst [vmem:[#allocation2_spill] sm:$0xff] %v2694_v5 }
  0x9b   : > { %948 = vst.msk [vmem:[%s2667_s27 + $0x170] sm:$0xff] %vm901_vm2, %v2694_v5  ;;  %2210 = vmatmul.msk.f32.gmra.mxu0 %vm333_vm1, %v253_v6  ;;  %2233 = vmatmul.msk.f32.gmra.mxu1 %vm333_vm1, %v276_v7  ;;  %v1540_v20 = vmul.f32 %v1092_v14, %v632_v11 }
  0x9c   : > { %4017 = vst [vmem:[#allocation3_spill] sm:$0xff] %v2718_v18  ;;  %2256 = vmatmul.msk.f32.gmra.mxu2 %vm333_vm1, %v299_v10  ;;  %2279 = vmatmul.msk.f32.gmra.mxu3 %vm333_vm1, %v322_v21 }
  0x9d   : > { %903 = vst.msk [vmem:[%s2667_s27 + $0x8] sm:$0xff] %vm901_vm2, %v632_v11  ;;  %1366 = vperm.xlu2 %2304, %v1049_v12   ;;  %v1631_v23 = vsel %vm901_vm2, %v1540_v20, 0.0  ;;  %v1818_v24 = vmul.f32 %v1540_v20, %v632_v11 }
  0x9e   : > { %926 = vst.msk [vmem:[%s2667_s27 + $0xc0] sm:$0xff] %vm901_vm2, %v2707_v15  ;;  %1361 = vperm.xlu1 %2303, %v1048_v16   ;;  %1356 = vperm.xlu0 %2302, %v1047_v17   ;;  %v1632_v25 = vadd.f32 %v1631_v23, %v1630_v22  ;;  %v256_v17 = vld [vmem:[%s2381_s8 + $0xa0] sm:$0xff]  ;;  %v302_v23 = vld [vmem:[%s2381_s8 + $0x210] sm:$0xff] }
  0x9f   : > { %971 = vst.msk [vmem:[%s2667_s27 + $0x228] sm:$0xff] %vm901_vm2, %v2718_v18  ;;  %v769_v26 = vpop.f32.mrf.mxu2  ;;  %v1909_v29 = vsel %vm901_vm2, %v1818_v24, 0.0  ;;  %v838_v40 = vpop.f32.mrf.mxu3 }
  0xa0   : > { %v2736_v30 = vadd.f32 %v2657_v54, %v769_v26  ;;  %v1910_v33 = vadd.f32 %v1909_v29, %v1908_v28  ;;  %v634_v34 = vpop.f32.mrf.mxu0  ;;  %v703_v35 = vpop.f32.mrf.mxu1  ;;  %v2762_v44 = vadd.f32 %v2657_v54, %v838_v40  ;;  %v1057_v28 = vld [vmem:[%s3925_s3 + $0x200] sm:$0xff]  ;;  %v1056_v29 = vld [vmem:[%s3925_s3 + $0x1f8] sm:$0xff] }
  0xa1   : > { %v635_v38 = vadd.f32 %v2657_v54, %v634_v34  ;;  %v2751_v41 = vadd.f32 %v2657_v54, %v703_v35  ;;  %v325_v34 = vld [vmem:[%s2381_s8 + $0x2c8] sm:$0xff]  ;;  %v2858_v35 = vpop.permute.xlu2 %1126  ;;  %v2865_v40 = vpop.permute.xlu0 %1131 }
  0xa2   : > { %4018 = vst [vmem:[#allocation4_spill] sm:$0xff] %v2736_v30 }
  0xa3   : > { %949 = vst.msk [vmem:[%s2667_s27 + $0x178] sm:$0xff] %vm901_vm2, %v2736_v30  ;;  %2211 = vmatmul.msk.f32.gmra.mxu0 %vm333_vm1, %v254_v31  ;;  %2234 = vmatmul.msk.f32.gmra.mxu1 %vm333_vm1, %v277_v32  ;;  %v1541_v45 = vmul.f32 %v1097_v27, %v635_v38  ;;  %v2848_v32 = vpop.permute.xlu1 %1121 }
  0xa4   : > { %4019 = vst [vmem:[#allocation5_spill] sm:$0xff] %v2762_v44  ;;  %2257 = vmatmul.msk.f32.gmra.mxu2 %vm333_vm1, %v300_v36  ;;  %2280 = vmatmul.msk.f32.gmra.mxu3 %vm333_vm1, %v323_v46  ;;  %v280_v46 = vld [vmem:[%s2381_s8 + $0x160] sm:$0xff] }
  0xa5   : > { %904 = vst.msk [vmem:[%s2667_s27 + $0x10] sm:$0xff] %vm901_vm2, %v635_v38  ;;  %1381 = vperm.xlu2 %2304, %v1052_v39   ;;  %v1633_v47 = vsel %vm901_vm2, %v1541_v45, 0.0  ;;  %v1819_v48 = vmul.f32 %v1541_v45, %v635_v38  ;;  %v257_v45 = vld [vmem:[%s2381_s8 + $0xa8] sm:$0xff] }
  0xa6   : > { %927 = vst.msk [vmem:[%s2667_s27 + $0xc8] sm:$0xff] %vm901_vm2, %v2751_v41  ;;  %1376 = vperm.xlu1 %2303, %v1051_v42   ;;  %1371 = vperm.xlu0 %2302, %v1050_v43   ;;  %v1634_v49 = vadd.f32 %v1633_v47, %v1632_v25  ;;  %v1058_v25 = vld [vmem:[%s3925_s3 + $0x208] sm:$0xff] }
  0xa7   : > { %972 = vst.msk [vmem:[%s2667_s27 + $0x230] sm:$0xff] %vm901_vm2, %v2762_v44  ;;  %v772_v50 = vpop.f32.mrf.mxu2  ;;  %v1911_v51 = vsel %vm901_vm2, %v1819_v48, 0.0  ;;  %v841_v0 = vpop.f32.mrf.mxu3 }
  0xa8   : > { %v2778_v52 = vadd.f32 %v2657_v54, %v772_v50  ;;  %v1912_v56 = vadd.f32 %v1911_v51, %v1910_v33  ;;  %v637_v57 = vpop.f32.mrf.mxu0  ;;  %v706_v58 = vpop.f32.mrf.mxu1  ;;  %v2807_v7 = vadd.f32 %v2657_v54, %v841_v0  ;;  %v303_v50 = vld [vmem:[%s2381_s8 + $0x218] sm:$0xff] }
  0xa9   : > { %v638_v61 = vadd.f32 %v2657_v54, %v637_v57  ;;  %v2791_v1 = vadd.f32 %v2657_v54, %v706_v58  ;;  %v1060_v57 = vld [vmem:[%s3925_s3 + $0x218] sm:$0xff]  ;;  %v1059_v58 = vld [vmem:[%s3925_s3 + $0x210] sm:$0xff] }
  0xaa   : > { %4020 = vst [vmem:[#allocation6_spill] sm:$0xff] %v2778_v52 }
  0xab   : > { %950 = vst.msk [vmem:[%s2667_s27 + $0x180] sm:$0xff] %vm901_vm2, %v2778_v52  ;;  %2212 = vmatmul.msk.f32.gmra.mxu0 %vm333_vm1, %v255_v53  ;;  %2235 = vmatmul.msk.f32.gmra.mxu1 %vm333_vm1, %v278_v55  ;;  %v1542_v6 = vmul.f32 %v1102_v60, %v638_v61  ;;  %v1061_v53 = vld [vmem:[%s3925_s3 + $0x220] sm:$0xff] }
  0xac   : > { %905 = vst.msk [vmem:[%s2667_s27 + $0x18] sm:$0xff] %vm901_vm2, %v638_v61  ;;  %2258 = vmatmul.msk.f32.gmra.mxu2 %vm333_vm1, %v301_v59  ;;  %2281 = vmatmul.msk.f32.gmra.mxu3 %vm333_vm1, %v324_v8 }
  0xad   : > { %4021 = vst [vmem:[#allocation7_spill] sm:$0xff] %v2807_v7  ;;  %1396 = vperm.xlu2 %2304, %v1055_v62   ;;  %v1635_v10 = vsel %vm901_vm2, %v1542_v6, 0.0  ;;  %v1820_v11 = vmul.f32 %v1542_v6, %v638_v61  ;;  %v2902_v61 = vpop.permute.xlu1 %1136 }
  0xae   : > { %928 = vst.msk [vmem:[%s2667_s27 + $0xd0] sm:$0xff] %vm901_vm2, %v2791_v1  ;;  %1391 = vperm.xlu1 %2303, %v1054_v2   ;;  %1386 = vperm.xlu0 %2302, %v1053_v3   ;;  %v1636_v12 = vadd.f32 %v1635_v10, %v1634_v49  ;;  %v258_v10 = vld [vmem:[%s2381_s8 + $0xb0] sm:$0xff] }
  0xaf   : > { %973 = vst.msk [vmem:[%s2667_s27 + $0x238] sm:$0xff] %vm901_vm2, %v2807_v7  ;;  %v775_v13 = vpop.f32.mrf.mxu2  ;;  %v1913_v14 = vsel %vm901_vm2, %v1820_v11, 0.0  ;;  %v844_v26 = vpop.f32.mrf.mxu3  ;;  %v281_v11 = vld [vmem:[%s2381_s8 + $0x168] sm:$0xff] }
  0xb0   : > { %v2822_v16 = vadd.f32 %v2657_v54, %v775_v13  ;;  %v1914_v20 = vadd.f32 %v1913_v14, %v1912_v56  ;;  %v640_v21 = vpop.f32.mrf.mxu0  ;;  %v709_v22 = vpop.f32.mrf.mxu1  ;;  %v2846_v31 = vadd.f32 %v2657_v54, %v844_v26 }
  0xb1   : > { %v641_v24 = vadd.f32 %v2657_v54, %v640_v21  ;;  %v2835_v27 = vadd.f32 %v2657_v54, %v709_v22  ;;  %v1064_v21 = vld [vmem:[%s3925_s3 + $0x238] sm:$0xff] }
  0xb2   : > { %4022 = vst [vmem:[#allocation8_spill] sm:$0xff] %v2822_v16 }
  0xb3   : > { %951 = vst.msk [vmem:[%s2667_s27 + $0x188] sm:$0xff] %vm901_vm2, %v2822_v16  ;;  %2213 = vmatmul.msk.f32.gmra.mxu0 %vm333_vm1, %v256_v17  ;;  %2236 = vmatmul.msk.f32.gmra.mxu1 %vm333_vm1, %v279_v19  ;;  %v1543_v33 = vmul.f32 %v2741_v37, %v641_v24  ;;  %v304_v17 = vld [vmem:[%s2381_s8 + $0x220] sm:$0xff]  ;;  %v2917_v19 = vpop.permute.xlu0 %1146 }
  0xb4   : > { %4023 = vst [vmem:[#allocation9_spill] sm:$0xff] %v2846_v31  ;;  %2259 = vmatmul.msk.f32.gmra.mxu2 %vm333_vm1, %v302_v23  ;;  %2282 = vmatmul.msk.f32.gmra.mxu3 %vm333_vm1, %v325_v34 }
  0xb5   : > { %906 = vst.msk [vmem:[%s2667_s27 + $0x20] sm:$0xff] %vm901_vm2, %v641_v24  ;;  %1411 = vperm.xlu2 %2304, %v1058_v25   ;;  %v1637_v36 = vsel %vm901_vm2, %v1543_v33, 0.0  ;;  %v1821_v38 = vmul.f32 %v1543_v33, %v641_v24  ;;  %v1063_v24 = vld [vmem:[%s3925_s3 + $0x230] sm:$0xff]  ;;  %v1062_v25 = vld [vmem:[%s3925_s3 + $0x228] sm:$0xff] }
  0xb6   : > { %929 = vst.msk [vmem:[%s2667_s27 + $0xd8] sm:$0xff] %vm901_vm2, %v2835_v27  ;;  %1406 = vperm.xlu1 %2303, %v1057_v28   ;;  %1401 = vperm.xlu0 %2302, %v1056_v29   ;;  %v1638_v37 = vadd.f32 %v1637_v36, %v1636_v12  ;;  %v2951_v36 = vpop.permute.xlu1 %1151 }
  0xb7   : > { %974 = vst.msk [vmem:[%s2667_s27 + $0x240] sm:$0xff] %vm901_vm2, %v2846_v31  ;;  %v778_v39 = vpop.f32.mrf.mxu2  ;;  %v1915_v42 = vsel %vm901_vm2, %v1821_v38, 0.0  ;;  %v847_v55 = vpop.f32.mrf.mxu3 }
  0xb8   : > { %v2869_v43 = vadd.f32 %v2657_v54, %v778_v39  ;;  %v1916_v47 = vadd.f32 %v1915_v42, %v1914_v20  ;;  %v643_v48 = vpop.f32.mrf.mxu0  ;;  %v712_v49 = vpop.f32.mrf.mxu1  ;;  %v2897_v60 = vadd.f32 %v2657_v54, %v847_v55  ;;  %v1065_v55 = vld [vmem:[%s3925_s3 + $0x240] sm:$0xff] }
  0xb9   : > { %v644_v51 = vadd.f32 %v2657_v54, %v643_v48  ;;  %v2882_v56 = vadd.f32 %v2657_v54, %v712_v49  ;;  %v1067_v48 = vld [vmem:[%s3925_s3 + $0x250] sm:$0xff] }
  0xba   : > { %4024 = vst [vmem:[#allocation10_spill] sm:$0xff] %v2869_v43 }
  0xbb   : > { %952 = vst.msk [vmem:[%s2667_s27 + $0x190] sm:$0xff] %vm901_vm2, %v2869_v43  ;;  %2214 = vmatmul.msk.f32.gmra.mxu0 %vm333_vm1, %v257_v45  ;;  %2237 = vmatmul.msk.f32.gmra.mxu1 %vm333_vm1, %v280_v46  ;;  %v1544_v59 = vmul.f32 %v2801_v4, %v644_v51  ;;  %v2908_v4 = vpop.permute.xlu2 %1141 }
  0xbc   : > { %907 = vst.msk [vmem:[%s2667_s27 + $0x28] sm:$0xff] %vm901_vm2, %v644_v51  ;;  %2260 = vmatmul.msk.f32.gmra.mxu2 %vm333_vm1, %v303_v50  ;;  %v326_v50 = vld [vmem:[%s2381_s8 + $0x2d0] sm:$0xff] }
  0xbd   : > { %4025 = vst [vmem:[#allocation11_spill] sm:$0xff] %v2897_v60  ;;  %1426 = vperm.xlu2 %2304, %v1061_v53   ;;  %v1639_v62 = vsel %vm901_vm2, %v1544_v59, 0.0  ;;  %v1822_v0 = vmul.f32 %v1544_v59, %v644_v51  ;;  %v1066_v53 = vld [vmem:[%s3925_s3 + $0x248] sm:$0xff]  ;;  %2283 = vmatmul.msk.f32.gmra.mxu3 %vm333_vm1, %v326_v50  ;;  %v1073_v50 = vld [vmem:[%s3925_s3 + $0x280] sm:$0xff] }
  0xbe   : > { %930 = vst.msk [vmem:[%s2667_s27 + $0xe0] sm:$0xff] %vm901_vm2, %v2882_v56  ;;  %1421 = vperm.xlu1 %2303, %v1060_v57   ;;  %1416 = vperm.xlu0 %2302, %v1059_v58   ;;  %v1640_v2 = vadd.f32 %v1639_v62, %v1638_v37  ;;  %v2977_v57 = vpop.permute.xlu0 %1161 }
  0xbf   : > { %975 = vst.msk [vmem:[%s2667_s27 + $0x248] sm:$0xff] %vm901_vm2, %v2897_v60  ;;  %v781_v3 = vpop.f32.mrf.mxu2  ;;  %v1917_v6 = vsel %vm901_vm2, %v1822_v0, 0.0  ;;  %v850_v22 = vpop.f32.mrf.mxu3 }
  0xc0   : > { %v2912_v8 = vadd.f32 %v2657_v54, %v781_v3  ;;  %v1918_v12 = vadd.f32 %v1917_v6, %v1916_v47  ;;  %v646_v13 = vpop.f32.mrf.mxu0  ;;  %v715_v14 = vpop.f32.mrf.mxu1  ;;  %v2942_v28 = vadd.f32 %v2657_v54, %v850_v22  ;;  %v1069_v22 = vld [vmem:[%s3925_s3 + $0x260] sm:$0xff] }
  0xc1   : > { %v647_v20 = vadd.f32 %v2657_v54, %v646_v13  ;;  %v2927_v23 = vadd.f32 %v2657_v54, %v715_v14  ;;  %v2996_v13 = vpop.permute.xlu1 %1166 }
  0xc2   : > { %4026 = vst [vmem:[#allocation12_spill] sm:$0xff] %v2912_v8 }
  0xc3   : > { %953 = vst.msk [vmem:[%s2667_s27 + $0x198] sm:$0xff] %vm901_vm2, %v2912_v8  ;;  %2215 = vmatmul.msk.f32.gmra.mxu0 %vm333_vm1, %v258_v10  ;;  %2238 = vmatmul.msk.f32.gmra.mxu1 %vm333_vm1, %v281_v11  ;;  %v1545_v26 = vmul.f32 %v2813_v9, %v647_v20  ;;  %v2957_v46 = vpop.permute.xlu2 %1156 }
  0xc4   : > { %908 = vst.msk [vmem:[%s2667_s27 + $0x30] sm:$0xff] %vm901_vm2, %v647_v20  ;;  %2261 = vmatmul.msk.f32.gmra.mxu2 %vm333_vm1, %v304_v17  ;;  %v1070_v17 = vld [vmem:[%s3925_s3 + $0x268] sm:$0xff] }
  0xc5   : > { %4027 = vst [vmem:[#allocation13_spill] sm:$0xff] %v2942_v28  ;;  %1441 = vperm.xlu2 %2304, %v1064_v21   ;;  %v1641_v29 = vsel %vm901_vm2, %v1545_v26, 0.0  ;;  %v1823_v33 = vmul.f32 %v1545_v26, %v647_v20 }
  0xc6   : > { %931 = vst.msk [vmem:[%s2667_s27 + $0xe8] sm:$0xff] %vm901_vm2, %v2927_v23  ;;  %1436 = vperm.xlu1 %2303, %v1063_v24   ;;  %1431 = vperm.xlu0 %2302, %v1062_v25   ;;  %v1642_v9 = vadd.f32 %v1641_v29, %v1640_v2  ;;  %v1068_v24 = vld [vmem:[%s3925_s3 + $0x258] sm:$0xff] }
  0xc7   : > { %976 = vst.msk [vmem:[%s2667_s27 + $0x250] sm:$0xff] %vm901_vm2, %v2942_v28  ;;  %v784_v34 = vpop.f32.mrf.mxu2  ;;  %v1919_v38 = vsel %vm901_vm2, %v1823_v33, 0.0  ;;  %v853_v49 = vpop.f32.mrf.mxu3 }
  0xc8   : > { %v2955_v37 = vadd.f32 %v2657_v54, %v784_v34  ;;  %v1920_v39 = vadd.f32 %v1919_v38, %v1918_v12  ;;  %v649_v42 = vpop.f32.mrf.mxu0  ;;  %v718_v45 = vpop.f32.mrf.mxu1  ;;  %v2983_v59 = vadd.f32 %v2657_v54, %v853_v49 }
  0xc9   : > { %v650_v47 = vadd.f32 %v2657_v54, %v649_v42  ;;  %v2968_v51 = vadd.f32 %v2657_v54, %v718_v45  ;;  %v3025_v33 = vpop.permute.xlu0 %1176 }
  0xca   : > { %4028 = vst [vmem:[#allocation14_spill] sm:$0xff] %v2955_v37 }
  0xcb   : > { %954 = vst.msk [vmem:[%s2667_s27 + $0x1a0] sm:$0xff] %vm901_vm2, %v2955_v37  ;;  %v1546_v58 = vmul.f32 %v2848_v32, %v650_v47  ;;  %v3014_v25 = vpop.permute.xlu2 %1171 }
  0xcc   : > { %909 = vst.msk [vmem:[%s2667_s27 + $0x38] sm:$0xff] %vm901_vm2, %v650_v47 }
  0xcd   : > { %4029 = vst [vmem:[#allocation15_spill] sm:$0xff] %v2983_v59  ;;  %1456 = vperm.xlu2 %2304, %v1067_v48   ;;  %v1643_v62 = vsel %vm901_vm2, %v1546_v58, 0.0  ;;  %v1824_v0 = vmul.f32 %v1546_v58, %v650_v47  ;;  %v1072_v58 = vld [vmem:[%s3925_s3 + $0x278] sm:$0xff] }
  0xce   : > { %932 = vst.msk [vmem:[%s2667_s27 + $0xf0] sm:$0xff] %vm901_vm2, %v2968_v51  ;;  %1451 = vperm.xlu1 %2303, %v1066_v53   ;;  %1446 = vperm.xlu0 %2302, %v1065_v55   ;;  %v1644_v2 = vadd.f32 %v1643_v62, %v1642_v9  ;;  %v1071_v62 = vld [vmem:[%s3925_s3 + $0x270] sm:$0xff] }
  0xcf   : > { %977 = vst.msk [vmem:[%s2667_s27 + $0x258] sm:$0xff] %vm901_vm2, %v2983_v59  ;;  %v787_v3 = vpop.f32.mrf.mxu2  ;;  %v1921_v32 = vsel %vm901_vm2, %v1824_v0, 0.0  ;;  %v856_v20 = vpop.f32.mrf.mxu3 }
  0xd0   : > { %v2994_v6 = vadd.f32 %v2657_v54, %v787_v3  ;;  %v1922_v10 = vadd.f32 %v1921_v32, %v1920_v39  ;;  %v652_v11 = vpop.f32.mrf.mxu0  ;;  %v721_v12 = vpop.f32.mrf.mxu1  ;;  %v3020_v29 = vadd.f32 %v2657_v54, %v856_v20 }
  0xd1   : > { %v653_v14 = vadd.f32 %v2657_v54, %v652_v11  ;;  %v3006_v21 = vadd.f32 %v2657_v54, %v721_v12  ;;  %v3051_v0 = vpop.permute.xlu1 %1181 }
  0xd2   : > { %4030 = vst [vmem:[#allocation16_spill] sm:$0xff] %v2994_v6 }
  0xd3   : > { %955 = vst.msk [vmem:[%s2667_s27 + $0x1a8] sm:$0xff] %vm901_vm2, %v2994_v6  ;;  %v1547_v26 = vmul.f32 %v2858_v35, %v653_v14  ;;  %v3062_v32 = vpop.permute.xlu2 %1186 }
  0xd4   : > { %910 = vst.msk [vmem:[%s2667_s27 + $0x40] sm:$0xff] %vm901_vm2, %v653_v14 }
  0xd5   : > { %4031 = vst [vmem:[#allocation17_spill] sm:$0xff] %v3020_v29  ;;  %1471 = vperm.xlu2 %2304, %v1070_v17   ;;  %v1645_v9 = vsel %vm901_vm2, %v1547_v26, 0.0  ;;  %v1825_v34 = vmul.f32 %v1547_v26, %v653_v14  ;;  %v3068_v14 = vpop.permute.xlu0 %1191 }
  0xd6   : > { %933 = vst.msk [vmem:[%s2667_s27 + $0xf8] sm:$0xff] %vm901_vm2, %v3006_v21  ;;  %1466 = vperm.xlu1 %2303, %v1069_v22   ;;  %1461 = vperm.xlu0 %2302, %v1068_v24   ;;  %v1646_v35 = vadd.f32 %v1645_v9, %v1644_v2 }
  0xd7   : > { %978 = vst.msk [vmem:[%s2667_s27 + $0x260] sm:$0xff] %vm901_vm2, %v3020_v29  ;;  %v790_v38 = vpop.f32.mrf.mxu2  ;;  %v1923_v39 = vsel %vm901_vm2, %v1825_v34, 0.0  ;;  %v859_v53 = vpop.f32.mrf.mxu3  ;;  %v1076_v34 = vld [vmem:[%s3925_s3 + $0x298] sm:$0xff] }
  0xd8   : > { %v3033_v42 = vadd.f32 %v2657_v54, %v790_v38  ;;  %v1924_v45 = vadd.f32 %v1923_v39, %v1922_v10  ;;  %v655_v47 = vpop.f32.mrf.mxu0  ;;  %v724_v48 = vpop.f32.mrf.mxu1  ;;  %v3057_v3 = vadd.f32 %v2657_v54, %v859_v53  ;;  %v1075_v39 = vld [vmem:[%s3925_s3 + $0x290] sm:$0xff] }
  0xd9   : > { %v656_v49 = vadd.f32 %v2657_v54, %v655_v47  ;;  %v3043_v55 = vadd.f32 %v2657_v54, %v724_v48 }
  0xda   : > { %4032 = vst [vmem:[#allocation18_spill] sm:$0xff] %v3033_v42 }
  0xdb   : > { %956 = vst.msk [vmem:[%s2667_s27 + $0x1b0] sm:$0xff] %vm901_vm2, %v3033_v42  ;;  %v1548_v2 = vmul.f32 %v2865_v40, %v656_v49 }
  0xdc   : > { %911 = vst.msk [vmem:[%s2667_s27 + $0x48] sm:$0xff] %vm901_vm2, %v656_v49 }
  0xdd   : > { %4033 = vst [vmem:[#allocation19_spill] sm:$0xff] %v3057_v3  ;;  %1486 = vperm.xlu2 %2304, %v1073_v50   ;;  %v1647_v10 = vsel %vm901_vm2, %v1548_v2, 0.0  ;;  %v1826_v11 = vmul.f32 %v1548_v2, %v656_v49  ;;  %v3099_v49 = vpop.permute.xlu1 %1196 }
  0xde   : > { %934 = vst.msk [vmem:[%s2667_s27 + $0x100] sm:$0xff] %vm901_vm2, %v3043_v55  ;;  %1481 = vperm.xlu1 %2303, %v1072_v58   ;;  %1476 = vperm.xlu0 %2302, %v1071_v62   ;;  %v1648_v40 = vadd.f32 %v1647_v10, %v1646_v35  ;;  %v3105_v62 = vpop.permute.xlu2 %1201 }
  0xdf   : > { %979 = vst.msk [vmem:[%s2667_s27 + $0x268] sm:$0xff] %vm901_vm2, %v3057_v3  ;;  %v793_v12 = vpop.f32.mrf.mxu2  ;;  %v1925_v17 = vsel %vm901_vm2, %v1826_v11, 0.0  ;;  %v862_v35 = vpop.f32.mrf.mxu3 }
  0xe0   : > { %v3072_v20 = vadd.f32 %v2657_v54, %v793_v12  ;;  %v1926_v22 = vadd.f32 %v1925_v17, %v1924_v45  ;;  %v658_v24 = vpop.f32.mrf.mxu0  ;;  %v727_v26 = vpop.f32.mrf.mxu1  ;;  %v1074_v45 = vld [vmem:[%s3925_s3 + $0x288] sm:$0xff]  ;;  %v3094_v48 = vadd.f32 %v2657_v54, %v862_v35  ;;  %v1077_v35 = vld [vmem:[%s3925_s3 + $0x2a0] sm:$0xff] }
  0xe1   : > { %v659_v9 = vadd.f32 %v2657_v54, %v658_v24  ;;  %v3082_v38 = vadd.f32 %v2657_v54, %v727_v26  ;;  %v3111_v24 = vpop.permute.xlu0 %1206  ;;  %v1079_v26 = vld [vmem:[%s3925_s3 + $0x2b0] sm:$0xff] }
  0xe2   : > { %4034 = vst [vmem:[#allocation20_spill] sm:$0xff] %v3072_v20 }
  0xe3   : > { %957 = vst.msk [vmem:[%s2667_s27 + $0x1b8] sm:$0xff] %vm901_vm2, %v3072_v20  ;;  %v1549_v47 = vmul.f32 %v2902_v61, %v659_v9 }
  0xe4   : > { %912 = vst.msk [vmem:[%s2667_s27 + $0x50] sm:$0xff] %vm901_vm2, %v659_v9 }
  0xe5   : > { %4035 = vst [vmem:[#allocation21_spill] sm:$0xff] %v3094_v48  ;;  %1501 = vperm.xlu2 %2304, %v1076_v34   ;;  %v1649_v50 = vsel %vm901_vm2, %v1549_v47, 0.0  ;;  %v1827_v53 = vmul.f32 %v1549_v47, %v659_v9 }
  0xe6   : > { %935 = vst.msk [vmem:[%s2667_s27 + $0x108] sm:$0xff] %vm901_vm2, %v3082_v38  ;;  %1496 = vperm.xlu1 %2303, %v1075_v39   ;;  %1491 = vperm.xlu0 %2302, %v1074_v45   ;;  %v1650_v58 = vadd.f32 %v1649_v50, %v1648_v40 }
  0xe7   : > { %980 = vst.msk [vmem:[%s2667_s27 + $0x270] sm:$0xff] %vm901_vm2, %v3094_v48  ;;  %v796_v61 = vpop.f32.mrf.mxu2  ;;  %v1927_v2 = vsel %vm901_vm2, %v1827_v53, 0.0  ;;  %v865_v9 = vpop.f32.mrf.mxu3 }
  0xe8   : > { %v3109_v10 = vadd.f32 %v2657_v54, %v796_v61  ;;  %v1928_v11 = vadd.f32 %v1927_v2, %v1926_v22  ;;  %v661_v12 = vpop.f32.mrf.mxu0  ;;  %v730_v17 = vpop.f32.mrf.mxu1  ;;  %v1078_v22 = vld [vmem:[%s3925_s3 + $0x2a8] sm:$0xff]  ;;  %v3133_v45 = vadd.f32 %v2657_v54, %v865_v9 }
  0xe9   : > { %v662_v40 = vadd.f32 %v2657_v54, %v661_v12  ;;  %v3121_v34 = vadd.f32 %v2657_v54, %v730_v17  ;;  %v3150_v9 = vpop.permute.xlu2 %1216 }
  0xea   : > { %4036 = vst [vmem:[#allocation22_spill] sm:$0xff] %v3109_v10 }
  0xeb   : > { %958 = vst.msk [vmem:[%s2667_s27 + $0x1c0] sm:$0xff] %vm901_vm2, %v3109_v10  ;;  %v1550_v39 = vmul.f32 %v2908_v4, %v662_v40  ;;  %v3144_v4 = vpop.permute.xlu1 %1211 }
  0xec   : > { %913 = vst.msk [vmem:[%s2667_s27 + $0x58] sm:$0xff] %vm901_vm2, %v662_v40 }
  0xed   : > { %4037 = vst [vmem:[#allocation23_spill] sm:$0xff] %v3133_v45  ;;  %1516 = vperm.xlu2 %2304, %v1079_v26   ;;  %v1651_v47 = vsel %vm901_vm2, %v1550_v39, 0.0  ;;  %v1828_v50 = vmul.f32 %v1550_v39, %v662_v40 }
  0xee   : > { %936 = vst.msk [vmem:[%s2667_s27 + $0x110] sm:$0xff] %vm901_vm2, %v3121_v34  ;;  %1511 = vperm.xlu1 %2303, %v1078_v22   ;;  %1506 = vperm.xlu0 %2302, %v1077_v35   ;;  %v3142_v53 = vadd.f32 %v1651_v47, %v1650_v58  ;;  %v1082_v22 = vld [vmem:[%s3925_s3 + $0x2c8] sm:$0xff]  ;;  %v1080_v47 = vld [vmem:[%s3925_s3 + $0x2b8] sm:$0xff] }
  0xef   : > { %981 = vst.msk [vmem:[%s2667_s27 + $0x278] sm:$0xff] %vm901_vm2, %v3133_v45  ;;  %v799_v61 = vpop.f32.mrf.mxu2  ;;  %v1929_v2 = vsel %vm901_vm2, %v1828_v50, 0.0  ;;  %v868_v35 = vpop.f32.mrf.mxu3 }
  0xf0   : > { %v3148_v12 = vadd.f32 %v2657_v54, %v799_v61  ;;  %v1930_v17 = vadd.f32 %v1929_v2, %v1928_v11  ;;  %v664_v26 = vpop.f32.mrf.mxu0  ;;  %v733_v40 = vpop.f32.mrf.mxu1  ;;  %v1081_v11 = vld [vmem:[%s3925_s3 + $0x2c0] sm:$0xff]  ;;  %v3176_v2 = vadd.f32 %v2657_v54, %v868_v35 }
  0xf1   : > { %v665_v58 = vadd.f32 %v2657_v54, %v664_v26  ;;  %v3160_v39 = vadd.f32 %v2657_v54, %v733_v40  ;;  %v3168_v50 = vpop.permute.xlu0 %1221 }
  0xf2   : > { %4038 = vst [vmem:[#allocation24_spill] sm:$0xff] %v3148_v12 }
  0xf3   : > { %959 = vst.msk [vmem:[%s2667_s27 + $0x1c8] sm:$0xff] %vm901_vm2, %v3148_v12  ;;  %v3173_v61 = vmul.f32 %v2917_v19, %v665_v58  ;;  %v3191_v3 = vpop.permute.xlu1 %1226 }
  0xf4   : > { %914 = vst.msk [vmem:[%s2667_s27 + $0x60] sm:$0xff] %vm901_vm2, %v665_v58 }
  0xf5   : > { %4039 = vst [vmem:[#allocation25_spill] sm:$0xff] %v3176_v2  ;;  %1531 = vperm.xlu2 %2304, %v1082_v22   ;;  %v1829_v26 = vmul.f32 %v3173_v61, %v665_v58 }
  0xf6   : > { %937 = vst.msk [vmem:[%s2667_s27 + $0x118] sm:$0xff] %vm901_vm2, %v3160_v39  ;;  %1526 = vperm.xlu1 %2303, %v1081_v11   ;;  %1521 = vperm.xlu0 %2302, %v1080_v47  }
  0xf7   : > { %982 = vst.msk [vmem:[%s2667_s27 + $0x280] sm:$0xff] %vm901_vm2, %v3176_v2  ;;  %v802_v40 = vpop.f32.mrf.mxu2  ;;  %v1931_v19 = vsel %vm901_vm2, %v1829_v26, 0.0  ;;  %v871_v11 = vpop.f32.mrf.mxu3 }
  0xf8   : > { %v3187_v45 = vadd.f32 %v2657_v54, %v802_v40  ;;  %v3189_v35 = vadd.f32 %v1931_v19, %v1930_v17  ;;  %v667_v48 = vpop.f32.mrf.mxu0  ;;  %v736_v22 = vpop.f32.mrf.mxu1  ;;  %v1083_v17 = vld [vmem:[%s3925_s3 + $0x2d0] sm:$0xff]  ;;  %v3211_v40 = vadd.f32 %v2657_v54, %v871_v11 }
  0xf9   : > { %v3197_v58 = vadd.f32 %v2657_v54, %v667_v48  ;;  %v3200_v47 = vadd.f32 %v2657_v54, %v736_v22  ;;  %v3205_v26 = vpop.permute.xlu2 %1231  ;;  %v3216_v48 = vpop.permute.xlu0 %1236 }
  0xfa   : > { %4040 = vst [vmem:[#allocation26_spill] sm:$0xff] %v3187_v45 }
  0xfb   : > { %960 = vst.msk [vmem:[%s2667_s27 + $0x1d0] sm:$0xff] %vm901_vm2, %v3187_v45  ;;  %v3233_v28 = vpop.permute.xlu1 %1241 }
  0xfc   : > { %915 = vst.msk [vmem:[%s2667_s27 + $0x68] sm:$0xff] %vm901_vm2, %v3197_v58 }
  0xfd   : > { %4041 = vst [vmem:[#allocation27_spill] sm:$0xff] %v3211_v40 }
  0xfe   : > { %938 = vst.msk [vmem:[%s2667_s27 + $0x120] sm:$0xff] %vm901_vm2, %v3200_v47  ;;  %1536 = vperm.xlu0 %2302, %v1083_v17  }
  0xff   : > { %983 = vst.msk [vmem:[%s2667_s27 + $0x288] sm:$0xff] %vm901_vm2, %v3211_v40  ;;  %v805_v19 = vpop.f32.mrf.mxu2  ;;  %v874_v59 = vpop.f32.mrf.mxu3 }
 0x100   : > { %v3222_v22 = vadd.f32 %v2657_v54, %v805_v19  ;;  %v670_v2 = vpop.f32.mrf.mxu0  ;;  %v739_v29 = vpop.f32.mrf.mxu1  ;;  %v3242_v19 = vadd.f32 %v2657_v54, %v874_v59 }
 0x101   : > { %v3228_v11 = vadd.f32 %v2657_v54, %v670_v2  ;;  %v3231_v17 = vadd.f32 %v2657_v54, %v739_v29  ;;  %v3244_v2 = vpop.permute.xlu2 %1246  ;;  %v3249_v29 = vpop.permute.xlu0 %1251 }
 0x102   : > { %4042 = vst [vmem:[#allocation28_spill] sm:$0xff] %v3222_v22 }
 0x103   : > { %961 = vst.msk [vmem:[%s2667_s27 + $0x1d8] sm:$0xff] %vm901_vm2, %v3222_v22 }
 0x104   : > { %916 = vst.msk [vmem:[%s2667_s27 + $0x70] sm:$0xff] %vm901_vm2, %v3228_v11 }
 0x105   : > { %939 = vst.msk [vmem:[%s2667_s27 + $0x128] sm:$0xff] %vm901_vm2, %v3231_v17 }
 0x106   : > { %4043 = vst [vmem:[#allocation29_spill] sm:$0xff] %v3242_v19 }
 0x107   : > { %v808_v40 = vpop.f32.mrf.mxu2  ;;  %984 = vst.msk [vmem:[%s2667_s27 + $0x290] sm:$0xff] %vm901_vm2, %v3242_v19  ;;  %v877_v44 = vpop.f32.mrf.mxu3 }
 0x108   : > { %v3252_v60 = vadd.f32 %v2657_v54, %v808_v40  ;;  %v673_v31 = vpop.f32.mrf.mxu0  ;;  %v742_v7 = vpop.f32.mrf.mxu1  ;;  %v3267_v40 = vadd.f32 %v2657_v54, %v877_v44 }
 0x109   : > { %v3258_v59 = vadd.f32 %v2657_v54, %v673_v31  ;;  %v3261_v18 = vadd.f32 %v2657_v54, %v742_v7  ;;  %v3272_v19 = vpop.permute.xlu1 %1256  ;;  %v3277_v7 = vpop.permute.xlu2 %1261 }
 0x10a   : > { %4044 = vst [vmem:[#allocation30_spill] sm:$0xff] %v3252_v60  ;;  %v3282_v44 = vpop.permute.xlu0 %1266 }
 0x10b   : > { %962 = vst.msk [vmem:[%s2667_s27 + $0x1e0] sm:$0xff] %vm901_vm2, %v3252_v60 }
 0x10c   : > { %917 = vst.msk [vmem:[%s2667_s27 + $0x78] sm:$0xff] %vm901_vm2, %v3258_v59 }
 0x10d   : > { %4045 = vst [vmem:[#allocation31_spill] sm:$0xff] %v3267_v40 }
 0x10e   : > { %940 = vst.msk [vmem:[%s2667_s27 + $0x130] sm:$0xff] %vm901_vm2, %v3261_v18 }
 0x10f   : > { %985 = vst.msk [vmem:[%s2667_s27 + $0x298] sm:$0xff] %vm901_vm2, %v3267_v40  ;;  %v811_v31 = vpop.f32.mrf.mxu2  ;;  %v880_v10 = vpop.f32.mrf.mxu3 }
 0x110   : > { %v3280_v60 = vadd.f32 %v2657_v54, %v811_v31  ;;  %v676_v22 = vpop.f32.mrf.mxu0  ;;  %v745_v45 = vpop.f32.mrf.mxu1  ;;  %v3297_v31 = vadd.f32 %v2657_v54, %v880_v10 }
 0x111   : > { %v3288_v12 = vadd.f32 %v2657_v54, %v676_v22  ;;  %v3291_v40 = vadd.f32 %v2657_v54, %v745_v45  ;;  %v3310_v6 = vpop.permute.xlu2 %1276 }
 0x112   : > { %4046 = vst [vmem:[#allocation32_spill] sm:$0xff] %v3280_v60  ;;  %v3321_v8 = vpop.permute.xlu0 %1281 }
 0x113   : > { %963 = vst.msk [vmem:[%s2667_s27 + $0x1e8] sm:$0xff] %vm901_vm2, %v3280_v60  ;;  %v3305_v60 = vpop.permute.xlu1 %1271 }
 0x114   : > { %4047 = vst [vmem:[#allocation33_spill] sm:$0xff] %v3291_v40 }
 0x115   : > { %918 = vst.msk [vmem:[%s2667_s27 + $0x80] sm:$0xff] %vm901_vm2, %v3288_v12 }
 0x116   : > { %4048 = vst [vmem:[#allocation34_spill] sm:$0xff] %v3297_v31 }
 0x117   : > { %941 = vst.msk [vmem:[%s2667_s27 + $0x138] sm:$0xff] %vm901_vm2, %v3291_v40  ;;  %v814_v22 = vpop.f32.mrf.mxu2  ;;  %v883_v37 = vpop.f32.mrf.mxu3 }
 0x118   : > { %986 = vst.msk [vmem:[%s2667_s27 + $0x2a0] sm:$0xff] %vm901_vm2, %v3297_v31  ;;  %v3308_v45 = vadd.f32 %v2657_v54, %v814_v22  ;;  %v679_v20 = vpop.f32.mrf.mxu0  ;;  %v748_v42 = vpop.f32.mrf.mxu1  ;;  %v3330_v22 = vadd.f32 %v2657_v54, %v883_v37 }
 0x119   : > { %4050 = vst [vmem:[#allocation36_spill] sm:$0xff] %v3310_v6  ;;  %v3316_v10 = vadd.f32 %v2657_v54, %v679_v20  ;;  %v3319_v31 = vadd.f32 %v2657_v54, %v748_v42 }
 0x11a   : > { %4049 = vst [vmem:[#allocation35_spill] sm:$0xff] %v3308_v45 }
 0x11b   : > { %964 = vst.msk [vmem:[%s2667_s27 + $0x1f0] sm:$0xff] %vm901_vm2, %v3308_v45  ;;  %v3338_v16 = vpop.permute.xlu1 %1286  ;;  %v1556_v40 = vmul.f32 %v3014_v25, %v3316_v10 }
 0x11c   : > { %4051 = vst [vmem:[#allocation37_spill] sm:$0xff] %v3319_v31 }
 0x11d   : > { %4052 = vst [vmem:[#allocation38_spill] sm:$0xff] %v3321_v8 }
 0x11e   : > { %919 = vst.msk [vmem:[%s2667_s27 + $0x88] sm:$0xff] %vm901_vm2, %v3316_v10 }
 0x11f   : > { %942 = vst.msk [vmem:[%s2667_s27 + $0x140] sm:$0xff] %vm901_vm2, %v3319_v31  ;;  %v817_v20 = vpop.f32.mrf.mxu2  ;;  %v886_v37 = vpop.f32.mrf.mxu3 }
 0x120   : > { %4053 = vst [vmem:[#allocation39_spill] sm:$0xff] %v3330_v22  ;;  %v3336_v42 = vadd.f32 %v2657_v54, %v817_v20  ;;  %v682_v45 = vpop.f32.mrf.mxu0  ;;  %v751_v43 = vpop.f32.mrf.mxu1  ;;  %v3355_v20 = vadd.f32 %v2657_v54, %v886_v37 }
 0x121   : > { %987 = vst.msk [vmem:[%s2667_s27 + $0x2a8] sm:$0xff] %vm901_vm2, %v3330_v22  ;;  %v3344_v52 = vadd.f32 %v2657_v54, %v682_v45  ;;  %v3347_v30 = vadd.f32 %v2657_v54, %v751_v43  ;;  %v3349_v22 = vpop.permute.xlu2 %1291 }
 0x122   : > { %4054 = vst [vmem:[#allocation40_spill] sm:$0xff] %v3336_v42 }
 0x123   : > { %4055 = vst [vmem:[#allocation41_spill] sm:$0xff] %v3338_v16 }
 0x124   : > { %965 = vst.msk [vmem:[%s2667_s27 + $0x1f8] sm:$0xff] %vm901_vm2, %v3336_v42  ;;  %v3360_v42 = vpop.permute.xlu0 %1296 }
 0x125   : > { %4056 = vst [vmem:[#allocation42_spill] sm:$0xff] %v3347_v30 }
 0x126   : > { %4057 = vst [vmem:[#allocation43_spill] sm:$0xff] %v3349_v22 }
 0x127   : > { %920 = vst.msk [vmem:[%s2667_s27 + $0x90] sm:$0xff] %vm901_vm2, %v3344_v52  ;;  %v820_v43 = vpop.f32.mrf.mxu2  ;;  %v889_v16 = vpop.f32.mrf.mxu3 }
 0x128   : > { %4058 = vst [vmem:[#allocation44_spill] sm:$0xff] %v3355_v20  ;;  %v3366_v45 = vadd.f32 %v2657_v54, %v820_v43  ;;  %v685_v5 = vpop.f32.mrf.mxu0  ;;  %v754_v22 = vpop.f32.mrf.mxu1  ;;  %v3383_v43 = vadd.f32 %v2657_v54, %v889_v16 }
 0x129   : > { %943 = vst.msk [vmem:[%s2667_s27 + $0x148] sm:$0xff] %vm901_vm2, %v3347_v30  ;;  %v3372_v37 = vadd.f32 %v2657_v54, %v685_v5  ;;  %v3375_v30 = vadd.f32 %v2657_v54, %v754_v22  ;;  %v3390_v5 = vpop.permute.xlu2 %1306  ;;  %v1553_v22 = vmul.f32 %v2957_v46, %v3228_v11 }
 0x12a   : > { %4059 = vst [vmem:[#allocation45_spill] sm:$0xff] %v3360_v42  ;;  %v3377_v42 = vpop.permute.xlu1 %1301 }
 0x12b   : > { %988 = vst.msk [vmem:[%s2667_s27 + $0x2b0] sm:$0xff] %vm901_vm2, %v3355_v20  ;;  %v1552_v20 = vmul.f32 %v2951_v36, %v3197_v58  ;;  %v1653_v36 = vsel %vm901_vm2, %v3173_v61, 0.0  ;;  %v1831_v8 = vmul.f32 %v1553_v22, %v3228_v11  ;;  %v1555_v61 = vmul.f32 %v2996_v13, %v3288_v12 }
 0x12c   : > { %4060 = vst [vmem:[#allocation46_spill] sm:$0xff] %v3366_v45 }
 0x12d   : > { %966 = vst.msk [vmem:[%s2667_s27 + $0x200] sm:$0xff] %vm901_vm2, %v3366_v45  ;;  %v1935_v11 = vsel %vm901_vm2, %v1831_v8, 0.0  ;;  %v1833_v25 = vmul.f32 %v1555_v61, %v3288_v12  ;;  %v3445_v8 = vld [vmem:[%s3924_s2] ss:$0 sm:$0xff] }
 0x12e   : > { %4061 = vst [vmem:[#allocation47_spill] sm:$0xff] %v3375_v30 }
 0x12f   : > { %4062 = vst [vmem:[#allocation48_spill] sm:$0xff] %v3377_v42  ;;  %v823_v45 = vpop.f32.mrf.mxu2  ;;  %v3397_v42 = vpop.permute.xlu0 %1311 }
 0x130   : > { %921 = vst.msk [vmem:[%s2667_s27 + $0x98] sm:$0xff] %vm901_vm2, %v3372_v37  ;;  %v3400_v16 = vadd.f32 %v2657_v54, %v823_v45  ;;  %v757_v31 = vpop.f32.mrf.mxu1  ;;  %v1655_v45 = vsel %vm901_vm2, %v1552_v20, 0.0 }
 0x131   : > { %4063 = vst [vmem:[#allocation49_spill] sm:$0xff] %v3383_v43 }
 0x132   : > { %944 = vst.msk [vmem:[%s2667_s27 + $0x150] sm:$0xff] %vm901_vm2, %v3375_v30  ;;  %v1830_v30 = vmul.f32 %v1552_v20, %v3197_v58  ;;  %v3418_v58 = vadd.f32 %v2657_v54, %v757_v31  ;;  %v3431_v13 = vpop.permute.xlu1 %1316  ;;  %v1557_v31 = vmul.f32 %v3025_v33, %v3344_v52  ;;  %v1661_v33 = vsel %vm901_vm2, %v1555_v61, 0.0 }
 0x133   : > { %4064 = vst [vmem:[#allocation50_spill] sm:$0xff] %v3390_v5  ;;  %v1554_v5 = vmul.f32 %v2977_v57, %v3258_v59  ;;  %v1654_v57 = vadd.f32 %v1653_v36, %v3142_v53 }
 0x134   : > { %989 = vst.msk [vmem:[%s2667_s27 + $0x2b8] sm:$0xff] %vm901_vm2, %v3383_v43  ;;  %v688_v43 = vpop.f32.mrf.mxu0  ;;  %v1835_v61 = vmul.f32 %v1557_v31, %v3344_v52 }
 0x135   : > { %4065 = vst [vmem:[#allocation51_spill] sm:$0xff] %v3397_v42  ;;  %v689_v46 = vadd.f32 %v2657_v54, %v688_v43  ;;  %v3411_v42 = vpop.f32.mrf.mxu3  ;;  %v1933_v43 = vsel %vm901_vm2, %v1830_v30, 0.0  ;;  %v1832_v20 = vmul.f32 %v1554_v5, %v3258_v59  ;;  %v1656_v54 = vadd.f32 %v1655_v45, %v1654_v57 }
 0x136   : > { %4066 = vst [vmem:[#allocation52_spill] sm:$0xff] %v3400_v16  ;;  %v1659_v53 = vsel %vm901_vm2, %v1554_v5, 0.0  ;;  %v1934_v59 = vadd.f32 %v1933_v43, %v3189_v35  ;;  %v1558_v45 = vmul.f32 %v3051_v0, %v3372_v37 }
 0x137   : > { %967 = vst.msk [vmem:[%s2667_s27 + $0x208] sm:$0xff] %vm901_vm2, %v3400_v16  ;;  %v1657_v16 = vsel %vm901_vm2, %v1553_v22, 0.0  ;;  %v826_v30 = vpop.f32.mrf.mxu2  ;;  %v3438_v22 = vpop.permute.xlu2 %1321  ;;  %v1937_v12 = vsel %vm901_vm2, %v1832_v20, 0.0  ;;  %v1663_v20 = vsel %vm901_vm2, %v1556_v40, 0.0  ;;  %v1559_v0 = vmul.f32 %v3062_v32, %v689_v46 }
 0x138   : > { %4067 = vst [vmem:[#allocation53_spill] sm:$0xff] %v3418_v58  ;;  %v1658_v36 = vadd.f32 %v1657_v16, %v1656_v54  ;;  %v3448_v5 = vadd.f32 %v3445_v8, %v826_v30  ;;  %v760_v16 = vpop.f32.mrf.mxu1  ;;  %v3454_v57 = vpop.permute.xlu0 %1326  ;;  %v1939_v30 = vsel %vm901_vm2, %v1833_v25, 0.0 }
 0x139   : > { %922 = vst.msk [vmem:[%s2667_s27 + $0xa0] sm:$0xff] %vm901_vm2, %v689_v46 }
 0x13a   : > { %945 = vst.msk [vmem:[%s2667_s27 + $0x158] sm:$0xff] %vm901_vm2, %v3418_v58  ;;  %v1834_v58 = vmul.f32 %v1556_v40, %v3316_v10  ;;  %v1936_v10 = vadd.f32 %v1935_v11, %v1934_v59  ;;  %v1660_v43 = vadd.f32 %v1659_v53, %v1658_v36  ;;  %v1665_v53 = vsel %vm901_vm2, %v1557_v31, 0.0  ;;  %v3481_v31 = vpop.permute.xlu1 %1331 }
 0x13b   : > { %4068 = vst [vmem:[#allocation54_spill] sm:$0xff] %v3431_v13  ;;  %v1836_v59 = vmul.f32 %v1558_v45, %v3372_v37  ;;  %v3471_v40 = vadd.f32 %v3445_v8, %v760_v16 }
 0x13c   : > { %4069 = vst [vmem:[#allocation55_spill] sm:$0xff] %v3438_v22  ;;  %v691_v35 = vpop.f32.mrf.mxu0  ;;  %v1938_v13 = vadd.f32 %v1937_v12, %v1936_v10  ;;  %v1662_v6 = vadd.f32 %v1661_v33, %v1660_v43  ;;  %v1941_v11 = vsel %vm901_vm2, %v1834_v58, 0.0  ;;  %v1943_v12 = vsel %vm901_vm2, %v1835_v61, 0.0 }
 0x13d   : > { %968 = vst.msk [vmem:[%s2667_s27 + $0x210] sm:$0xff] %vm901_vm2, %v3448_v5  ;;  %v692_v54 = vadd.f32 %v3445_v8, %v691_v35  ;;  %v895_v22 = vpop.f32.mrf.mxu3  ;;  %v1667_v58 = vsel %vm901_vm2, %v1558_v45, 0.0  ;;  %v1837_v33 = vmul.f32 %v1559_v0, %v689_v46 }
 0x13e   : > { %v1940_v52 = vadd.f32 %v1939_v30, %v1938_v13  ;;  %v1664_v32 = vadd.f32 %v1663_v20, %v1662_v6  ;;  %v3474_v36 = vadd.f32 %v3445_v8, %v895_v22  ;;  %946 = vst.msk [vmem:[%s2667_s27 + $0x160] sm:$0xff] %vm901_vm2, %v3471_v40  ;;  %v1945_v6 = vsel %vm901_vm2, %v1836_v59, 0.0 }
 0x13f   : > { %923 = vst.msk [vmem:[%s2667_s27 + $0xa8] sm:$0xff] %vm901_vm2, %v692_v54  ;;  %v1560_v25 = vmul.f32 %v3068_v14, %v692_v54  ;;  %v829_v37 = vpop.f32.mrf.mxu2  ;;  %v1669_v22 = vsel %vm901_vm2, %v1559_v0, 0.0  ;;  %v3491_v16 = vpop.permute.xlu2 %1336  ;;  %v1562_v20 = vmul.f32 %v3105_v62, %v2675_v63  ;;  %v1947_v61 = vsel %vm901_vm2, %v1837_v33, 0.0 }
 0x140   : > { %v1942_v14 = vadd.f32 %v1941_v11, %v1940_v52  ;;  %v1666_v35 = vadd.f32 %v1665_v53, %v1664_v32  ;;  %v3484_v13 = vadd.f32 %v3445_v8, %v829_v37  ;;  %991 = vst.msk [vmem:[%s2667_s27 + $0x2c8] sm:$0xff] %vm901_vm2, %v3474_v36  ;;  %v763_v30 = vpop.f32.mrf.mxu1  ;;  %v3501_v0 = vpop.permute.xlu0 %1341  ;;  %v1563_v52 = vmul.f32 %v3111_v24, %v2707_v15 }
 0x141   : > { %v1838_v45 = vmul.f32 %v1560_v25, %v692_v54  ;;  %v1671_v11 = vsel %vm901_vm2, %v1560_v25, 0.0  ;;  %v1840_v33 = vmul.f32 %v1562_v20, %v2675_v63  ;;  %v1564_v37 = vmul.f32 %v3144_v4, %v2751_v41 }
 0x142   : > { %v1944_v10 = vadd.f32 %v1943_v12, %v1942_v14  ;;  %v1668_v43 = vadd.f32 %v1667_v58, %v1666_v35  ;;  %969 = vst.msk [vmem:[%s2667_s27 + $0x218] sm:$0xff] %vm901_vm2, %v3484_v13  ;;  %v3510_v12 = vadd.f32 %v3445_v8, %v763_v30  ;;  %v1565_v63 = vmul.f32 %v3150_v9, %v2791_v1 }
 0x143   : > { %v1949_v32 = vsel %vm901_vm2, %v1838_v45, 0.0  ;;  %v1675_v45 = vsel %vm901_vm2, %v1562_v20, 0.0  ;;  %v1841_v4 = vmul.f32 %v1563_v52, %v2707_v15  ;;  %v1953_v20 = vsel %vm901_vm2, %v1840_v33, 0.0 }
 0x144   : > { %v694_v46 = vpop.f32.mrf.mxu0  ;;  %v1946_v53 = vadd.f32 %v1945_v6, %v1944_v10  ;;  %v1670_v59 = vadd.f32 %v1669_v22, %v1668_v43  ;;  %947 = vst.msk [vmem:[%s2667_s27 + $0x168] sm:$0xff] %vm901_vm2, %v3510_v12  ;;  %v3527_v10 = vpop.permute.xlu1 %1346  ;;  %v1677_v9 = vsel %vm901_vm2, %v1563_v52, 0.0  ;;  %v1566_v15 = vmul.f32 %v3168_v50, %v2835_v27 }
 0x145   : > { %v695_v54 = vadd.f32 %v3445_v8, %v694_v46 }
 0x146   : > { %v1948_v25 = vadd.f32 %v1947_v61, %v1946_v53  ;;  %v1672_v58 = vadd.f32 %v1671_v11, %v1670_v59  ;;  %v3531_v61 = vadd.f32 %v3445_v8, %v3411_v42  ;;  %v1842_v11 = vmul.f32 %v1564_v37, %v2751_v41 }
 0x147   : > { %924 = vst.msk [vmem:[%s2667_s27 + $0xb0] sm:$0xff] %vm901_vm2, %v695_v54  ;;  %v1561_v62 = vmul.f32 %v3099_v49, %v695_v54  ;;  %v832_v35 = vpop.f32.mrf.mxu2  ;;  %v1843_v42 = vmul.f32 %v1565_v63, %v2791_v1  ;;  %v1567_v41 = vmul.f32 %v3191_v3, %v2882_v56  ;;  %v1844_v1 = vmul.f32 %v1566_v15, %v2835_v27 }
 0x148   : > { %v1950_v6 = vadd.f32 %v1949_v32, %v1948_v25  ;;  %v3520_v22 = vadd.f32 %v3445_v8, %v832_v35  ;;  %990 = vst.msk [vmem:[%s2667_s27 + $0x2c0] sm:$0xff] %vm901_vm2, %v3531_v61  ;;  %v1679_v32 = vsel %vm901_vm2, %v1564_v37, 0.0  ;;  %v3551_v52 = vpop.permute.xlu0 %1356  ;;  %v1957_v33 = vsel %vm901_vm2, %v1842_v11, 0.0 }
 0x149   : > { %v1673_v14 = vsel %vm901_vm2, %v1561_v62, 0.0  ;;  %v1839_v24 = vmul.f32 %v1561_v62, %v695_v54  ;;  %v3541_v54 = vpop.permute.xlu2 %1351  ;;  %v1955_v62 = vsel %vm901_vm2, %v1841_v4, 0.0  ;;  %v1959_v35 = vsel %vm901_vm2, %v1843_v42, 0.0  ;;  %v898_v4 = vpop.f32.mrf.mxu3 }
 0x14a   : > { %v1674_v49 = vadd.f32 %v1673_v14, %v1672_v58  ;;  %970 = vst.msk [vmem:[%s2667_s27 + $0x220] sm:$0xff] %vm901_vm2, %v3520_v22  ;;  %v1681_v58 = vsel %vm901_vm2, %v1565_v63, 0.0  ;;  %v1568_v14 = vmul.f32 %v3205_v26, %v2927_v23  ;;  %v1683_v3 = vsel %vm901_vm2, %v1566_v15, 0.0 }
 0x14b   : > { %v1951_v46 = vsel %vm901_vm2, %v1839_v24, 0.0  ;;  %v1685_v26 = vsel %vm901_vm2, %v1567_v41, 0.0  ;;  %v1961_v27 = vsel %vm901_vm2, %v1844_v1, 0.0  ;;  %v3571_v11 = vadd.f32 %v3445_v8, %v898_v4 }
 0x14c   : > { %v1676_v43 = vadd.f32 %v1675_v45, %v1674_v49  ;;  %v1952_v30 = vadd.f32 %v1951_v46, %v1950_v6  ;;  %v1845_v6 = vmul.f32 %v1567_v41, %v2882_v56  ;;  %v1569_v49 = vmul.f32 %v3216_v48, %v2968_v51 }
 0x14d   : > { %v1846_v46 = vmul.f32 %v1568_v14, %v2927_v23  ;;  %v1687_v48 = vsel %vm901_vm2, %v1568_v14, 0.0  ;;  %v1571_v15 = vmul.f32 %v3244_v2, %v3043_v55  ;;  %992 = vst.msk [vmem:[%s2667_s27 + $0x2d0] sm:$0xff] %vm901_vm2, %v3571_v11  ;;  %s2191_s27 = sshll.u32 %s4125_s19, 1 }
 0x14e   : > { %v1678_v53 = vadd.f32 %v1677_v9, %v1676_v43  ;;  %v1954_v59 = vadd.f32 %v1953_v20, %v1952_v30  ;;  %v1570_v43 = vmul.f32 %v3233_v28, %v3006_v21  ;;  %v3568_v30 = vpop.permute.xlu1 %1361  ;;  %v1963_v9 = vsel %vm901_vm2, %v1845_v6, 0.0  ;;  %s235_s25 = scalar_lea.vmem %s3927_s5, %s2191_s27 }
 0x14f   : > { %v1847_v23 = vmul.f32 %v1569_v49, %v2968_v51  ;;  %v1965_v42 = vsel %vm901_vm2, %v1846_v46, 0.0  ;;  %v1689_v8 = vsel %vm901_vm2, %v1569_v49, 0.0 }
 0x150   : > { %v1680_v25 = vadd.f32 %v1679_v32, %v1678_v53  ;;  %v1956_v50 = vadd.f32 %v1955_v62, %v1954_v59  ;;  %v1848_v32 = vmul.f32 %v1570_v43, %v3006_v21  ;;  %v1572_v62 = vmul.f32 %v3249_v29, %v3082_v38  ;;  %v3588_v51 = vpop.permute.xlu0 %1371 }
 0x151   : > { %v3578_v53 = vpop.permute.xlu2 %1366 }
 0x152   : > { %v1682_v24 = vadd.f32 %v1681_v58, %v1680_v25  ;;  %v1958_v37 = vadd.f32 %v1957_v33, %v1956_v50  ;;  %v1967_v25 = vsel %vm901_vm2, %v1847_v23, 0.0  ;;  %v1691_v50 = vsel %vm901_vm2, %v1570_v43, 0.0 }
 0x153   : > { %v1849_v58 = vmul.f32 %v1571_v15, %v3043_v55  ;;  %v1573_v33 = vmul.f32 %v3272_v19, %v3121_v34  ;;  %v1969_v21 = vsel %vm901_vm2, %v1848_v32, 0.0  ;;  %v1850_v29 = vmul.f32 %v1572_v62, %v3082_v38 }
 0x154   : > { %v1684_v45 = vadd.f32 %v1683_v3, %v1682_v24  ;;  %v1960_v63 = vadd.f32 %v1959_v35, %v1958_v37  ;;  %v1693_v24 = vsel %vm901_vm2, %v1571_v15, 0.0  ;;  %v1574_v37 = vmul.f32 %v3277_v7, %v3160_v39 }
 0x155   : > { %v1971_v3 = vsel %vm901_vm2, %v1849_v58, 0.0  ;;  %v1695_v55 = vsel %vm901_vm2, %v1572_v62, 0.0  ;;  %v1851_v49 = vmul.f32 %v1573_v33, %v3121_v34  ;;  %v1575_v19 = vmul.f32 %v3282_v44, %v3200_v47  ;;  %v4074_v58 = vld [vmem:[#allocation41_spill] sm:$0xff] }
 0x156   : > { %v1686_v56 = vadd.f32 %v1685_v26, %v1684_v45  ;;  %v1962_v20 = vadd.f32 %v1961_v27, %v1960_v63  ;;  %v3605_v45 = vpop.permute.xlu1 %1376  ;;  %v1973_v38 = vsel %vm901_vm2, %v1850_v29, 0.0  ;;  %v1697_v46 = vsel %vm901_vm2, %v1573_v33, 0.0  ;;  %v4075_v29 = vld [vmem:[#allocation42_spill] sm:$0xff] }
 0x157   : > { %v1852_v7 = vmul.f32 %v1574_v37, %v3160_v39  ;;  %v1576_v26 = vmul.f32 %v3305_v60, %v3231_v17  ;;  %v1699_v44 = vsel %vm901_vm2, %v1574_v37, 0.0  ;;  %v1701_v60 = vsel %vm901_vm2, %v1575_v19, 0.0  ;;  %v4076_v37 = vld [vmem:[#allocation43_spill] sm:$0xff] }
 0x158   : > { %v1688_v59 = vadd.f32 %v1687_v48, %v1686_v56  ;;  %v1964_v28 = vadd.f32 %v1963_v9, %v1962_v20  ;;  %v1975_v56 = vsel %vm901_vm2, %v1851_v49, 0.0  ;;  %v1853_v20 = vmul.f32 %v1575_v19, %v3200_v47  ;;  %v4070_v48 = vld [vmem:[#allocation36_spill] sm:$0xff]  ;;  %v3619_v23 = vpop.permute.xlu0 %1386 }
 0x159   : > { %v3612_v27 = vpop.permute.xlu2 %1381  ;;  %v1577_v9 = vmul.f32 %v4070_v48, %v3261_v18 }
 0x15a   : > { %v1690_v41 = vadd.f32 %v1689_v8, %v1688_v59  ;;  %v1966_v2 = vadd.f32 %v1965_v42, %v1964_v28  ;;  %v1977_v59 = vsel %vm901_vm2, %v1852_v7, 0.0  ;;  %v1854_v28 = vmul.f32 %v1576_v26, %v3231_v17  ;;  %v4071_v42 = vld [vmem:[#allocation33_spill] sm:$0xff]  ;;  %v4072_v8 = vld [vmem:[#allocation38_spill] sm:$0xff] }
 0x15b   : > { %v1578_v32 = vmul.f32 %v4072_v8, %v4071_v42  ;;  %v1979_v47 = vsel %vm901_vm2, %v1853_v20, 0.0  ;;  %v1705_v17 = vsel %vm901_vm2, %v1577_v9, 0.0  ;;  %v4080_v20 = vld [vmem:[#allocation48_spill] sm:$0xff] }
 0x15c   : > { %v1692_v14 = vadd.f32 %v1691_v50, %v1690_v41  ;;  %v1968_v1 = vadd.f32 %v1967_v25, %v1966_v2  ;;  %v1703_v2 = vsel %vm901_vm2, %v1576_v26, 0.0  ;;  %v1855_v25 = vmul.f32 %v1577_v9, %v3261_v18  ;;  %v4073_v50 = vld [vmem:[#allocation37_spill] sm:$0xff] }
 0x15d   : > { %v1579_v33 = vmul.f32 %v4074_v58, %v4073_v50  ;;  %v1707_v49 = vsel %vm901_vm2, %v1578_v32, 0.0 }
 0x15e   : > { %v1694_v35 = vadd.f32 %v1693_v24, %v1692_v14  ;;  %v1970_v6 = vadd.f32 %v1969_v21, %v1968_v1  ;;  %v1981_v21 = vsel %vm901_vm2, %v1854_v28, 0.0  ;;  %v1856_v24 = vmul.f32 %v1578_v32, %v4071_v42  ;;  %v4081_v42 = vld [vmem:[#allocation50_spill] sm:$0xff] }
 0x15f   : > { %v1983_v18 = vsel %vm901_vm2, %v1855_v25, 0.0  ;;  %v1857_v19 = vmul.f32 %v1579_v33, %v4073_v50  ;;  %v1583_v8 = vmul.f32 %v4081_v42, %v3471_v40  ;;  %v4082_v25 = vld [vmem:[#allocation51_spill] sm:$0xff] }
 0x160   : > { %v1696_v63 = vadd.f32 %v1695_v55, %v1694_v35  ;;  %v1972_v4 = vadd.f32 %v1971_v3, %v1970_v6  ;;  %v1580_v35 = vmul.f32 %v4076_v37, %v4075_v29  ;;  %v3636_v6 = vpop.permute.xlu1 %1391  ;;  %v3650_v9 = vpop.permute.xlu0 %1401  ;;  %v1584_v50 = vmul.f32 %v4082_v25, %v3510_v12 }
 0x162   : > { %v1974_v43 = vadd.f32 %v1973_v38, %v1972_v4  ;;  %v1698_v34 = vadd.f32 %v1697_v46, %v1696_v63  ;;  %v4077_v63 = vld [vmem:[#allocation47_spill] sm:$0xff]  ;;  %v4078_v4 = vld [vmem:[#allocation45_spill] sm:$0xff]  ;;  %v3643_v46 = vpop.permute.xlu2 %1396 }
 0x163   : > { %v1581_v38 = vmul.f32 %v4078_v4, %v4077_v63  ;;  %v1862_v4 = vmul.f32 %v1584_v50, %v3510_v12 }
 0x164   : > { %v1700_v15 = vadd.f32 %v1699_v44, %v1698_v34  ;;  %v1976_v39 = vadd.f32 %v1975_v56, %v1974_v43  ;;  %v1985_v43 = vsel %vm901_vm2, %v1856_v24, 0.0  ;;  %v1709_v34 = vsel %vm901_vm2, %v1579_v33, 0.0  ;;  %v4079_v44 = vld [vmem:[#allocation53_spill] sm:$0xff] }
 0x165   : > { %v1858_v56 = vmul.f32 %v1580_v35, %v4075_v29  ;;  %v1582_v48 = vmul.f32 %v4080_v20, %v4079_v44  ;;  %v1859_v28 = vmul.f32 %v1581_v38, %v4077_v63  ;;  %v1861_v29 = vmul.f32 %v1583_v8, %v3471_v40  ;;  %v4087_v40 = vld [vmem:[#allocation6_spill] sm:$0xff] }
 0x166   : > { %v1702_v62 = vadd.f32 %v1701_v60, %v1700_v15  ;;  %v1978_v41 = vadd.f32 %v1977_v59, %v1976_v39  ;;  %v1987_v59 = vsel %vm901_vm2, %v1857_v19, 0.0  ;;  %v1711_v60 = vsel %vm901_vm2, %v1580_v35, 0.0 }
 0x167   : > { %v1715_v24 = vsel %vm901_vm2, %v1582_v48, 0.0  ;;  %v1717_v63 = vsel %vm901_vm2, %v1583_v8, 0.0 }
 0x168   : > { %v1704_v14 = vadd.f32 %v1703_v2, %v1702_v62  ;;  %v1980_v1 = vadd.f32 %v1979_v47, %v1978_v41  ;;  %v1989_v41 = vsel %vm901_vm2, %v1858_v56, 0.0  ;;  %v1713_v47 = vsel %vm901_vm2, %v1581_v38, 0.0  ;;  %v3667_v37 = vpop.permute.xlu1 %1406  ;;  %v3681_v20 = vpop.permute.xlu0 %1416 }
 0x169   : > { %v1860_v2 = vmul.f32 %v1582_v48, %v4079_v44  ;;  %v1995_v56 = vsel %vm901_vm2, %v1861_v29, 0.0  ;;  %v1719_v44 = vsel %vm901_vm2, %v1584_v50, 0.0 }
 0x16a   : > { %v1706_v3 = vadd.f32 %v1705_v17, %v1704_v14  ;;  %v1982_v55 = vadd.f32 %v1981_v21, %v1980_v1  ;;  %v4083_v14 = vld [vmem:[#allocation2_spill] sm:$0xff]  ;;  %v1991_v17 = vsel %vm901_vm2, %v1859_v28, 0.0  ;;  %v3674_v38 = vpop.permute.xlu2 %1411  ;;  %v1997_v28 = vsel %vm901_vm2, %v1862_v4, 0.0 }
 0x16b   : > { %v4084_v1 = vld [vmem:[#allocation54_spill] sm:$0xff]  ;;  %v1993_v19 = vsel %vm901_vm2, %v1860_v2, 0.0 }
 0x16c   : > { %v1708_v7 = vadd.f32 %v1707_v49, %v1706_v3  ;;  %v1984_v26 = vadd.f32 %v1983_v18, %v1982_v55  ;;  %v1585_v21 = vmul.f32 %v4084_v1, %v4083_v14  ;;  %v4085_v55 = vld [vmem:[#allocation4_spill] sm:$0xff]  ;;  %v4086_v18 = vld [vmem:[#allocation55_spill] sm:$0xff] }
 0x16d   : > { %v1586_v49 = vmul.f32 %v4086_v18, %v4085_v55 }
 0x16e   : > { %v1710_v15 = vadd.f32 %v1709_v34, %v1708_v7  ;;  %v1986_v39 = vadd.f32 %v1985_v43, %v1984_v26  ;;  %v1863_v43 = vmul.f32 %v1585_v21, %v4083_v14  ;;  %v1587_v34 = vmul.f32 %v3454_v57, %v4087_v40 }
 0x16f   : > { %v1721_v12 = vsel %vm901_vm2, %v1585_v21, 0.0  ;;  %v1723_v57 = vsel %vm901_vm2, %v1586_v49, 0.0 }
 0x170   : > { %v1712_v32 = vadd.f32 %v1711_v60, %v1710_v15  ;;  %v1988_v62 = vadd.f32 %v1987_v59, %v1986_v39  ;;  %v1864_v39 = vmul.f32 %v1586_v49, %v4085_v55  ;;  %v4088_v59 = vld [vmem:[#allocation8_spill] sm:$0xff]  ;;  %v3698_v1 = vpop.permute.xlu1 %1421 }
 0x171   : > { %v1588_v60 = vmul.f32 %v3481_v31, %v4088_v59  ;;  %v1725_v31 = vsel %vm901_vm2, %v1587_v34, 0.0 }
 0x172   : > { %v1714_v58 = vadd.f32 %v1713_v47, %v1712_v32  ;;  %v1990_v33 = vadd.f32 %v1989_v41, %v1988_v62  ;;  %v4089_v32 = vld [vmem:[#allocation10_spill] sm:$0xff]  ;;  %v1999_v41 = vsel %vm901_vm2, %v1863_v43, 0.0  ;;  %v1865_v47 = vmul.f32 %v1587_v34, %v4087_v40  ;;  %v3705_v55 = vpop.permute.xlu2 %1426 }
 0x173   : > { %v1589_v62 = vmul.f32 %v3491_v16, %v4089_v32  ;;  %v2001_v50 = vsel %vm901_vm2, %v1864_v39, 0.0 }
 0x174   : > { %v1716_v35 = vadd.f32 %v1715_v24, %v1714_v58  ;;  %v1992_v3 = vadd.f32 %v1991_v17, %v1990_v33  ;;  %v1866_v58 = vmul.f32 %v1588_v60, %v4088_v59  ;;  %v4090_v33 = vld [vmem:[#allocation12_spill] sm:$0xff]  ;;  %v1727_v24 = vsel %vm901_vm2, %v1588_v60, 0.0 }
 0x175   : > { %v1590_v14 = vmul.f32 %v3501_v0, %v4090_v33  ;;  %v1867_v16 = vmul.f32 %v1589_v62, %v4089_v32  ;;  %v2003_v29 = vsel %vm901_vm2, %v1865_v47, 0.0  ;;  %v4092_v0 = vld [vmem:[#allocation16_spill] sm:$0xff]  ;;  %v4095_v32 = vld [vmem:[#allocation22_spill] sm:$0xff] }
 0x176   : > { %v1718_v7 = vadd.f32 %v1717_v63, %v1716_v35  ;;  %v1994_v26 = vadd.f32 %v1993_v19, %v1992_v3  ;;  %v4091_v35 = vld [vmem:[#allocation14_spill] sm:$0xff]  ;;  %v1729_v19 = vsel %vm901_vm2, %v1589_v62, 0.0  ;;  %v1592_v63 = vmul.f32 %v3541_v54, %v4092_v0  ;;  %v4094_v60 = vld [vmem:[#allocation20_spill] sm:$0xff] }
 0x177   : > { %v1591_v3 = vmul.f32 %v3527_v10, %v4091_v35  ;;  %v2005_v4 = vsel %vm901_vm2, %v1866_v58, 0.0  ;;  %v2007_v34 = vsel %vm901_vm2, %v1867_v16, 0.0  ;;  %v1595_v62 = vmul.f32 %v3578_v53, %v4095_v32 }
 0x178   : > { %v1720_v48 = vadd.f32 %v1719_v44, %v1718_v7  ;;  %v1996_v15 = vadd.f32 %v1995_v56, %v1994_v26  ;;  %v1868_v7 = vmul.f32 %v1590_v14, %v4090_v33  ;;  %v3712_v26 = vpop.permute.xlu0 %1431  ;;  %v1731_v56 = vsel %vm901_vm2, %v1590_v14, 0.0  ;;  %v4093_v44 = vld [vmem:[#allocation18_spill] sm:$0xff]  ;;  %v3729_v47 = vpop.permute.xlu1 %1436 }
 0x179   : > { %v1869_v10 = vmul.f32 %v1591_v3, %v4091_v35  ;;  %v1870_v54 = vmul.f32 %v1592_v63, %v4092_v0 }
 0x17a   : > { %v1722_v42 = vadd.f32 %v1721_v12, %v1720_v48  ;;  %v1998_v8 = vadd.f32 %v1997_v28, %v1996_v15  ;;  %v1593_v48 = vmul.f32 %v3551_v52, %v4093_v44  ;;  %v1733_v12 = vsel %vm901_vm2, %v1591_v3, 0.0  ;;  %v3736_v14 = vpop.permute.xlu2 %1441 }
 0x17b   : > { %v2009_v59 = vsel %vm901_vm2, %v1868_v7, 0.0  ;;  %v1594_v28 = vmul.f32 %v3568_v30, %v4094_v60  ;;  %v2011_v52 = vsel %vm901_vm2, %v1869_v10, 0.0  ;;  %v4099_v10 = vld [vmem:[#allocation30_spill] sm:$0xff] }
 0x17c   : > { %v1724_v2 = vadd.f32 %v1723_v57, %v1722_v42  ;;  %v2000_v25 = vadd.f32 %v1999_v41, %v1998_v8  ;;  %v1735_v57 = vsel %vm901_vm2, %v1592_v63, 0.0  ;;  %v1871_v41 = vmul.f32 %v1593_v48, %v4093_v44 }
 0x17d   : > { %v1872_v58 = vmul.f32 %v1594_v28, %v4094_v60  ;;  %v1737_v30 = vsel %vm901_vm2, %v1593_v48, 0.0  ;;  %v1739_v16 = vsel %vm901_vm2, %v1594_v28, 0.0 }
 0x17e   : > { %v1726_v21 = vadd.f32 %v1725_v31, %v1724_v2  ;;  %v2002_v17 = vadd.f32 %v2001_v50, %v2000_v25  ;;  %v2013_v50 = vsel %vm901_vm2, %v1870_v54, 0.0  ;;  %v4096_v31 = vld [vmem:[#allocation24_spill] sm:$0xff] }
 0x17f   : > { %v1596_v33 = vmul.f32 %v3588_v51, %v4096_v31  ;;  %v4098_v51 = vld [vmem:[#allocation28_spill] sm:$0xff]  ;;  %v2017_v63 = vsel %vm901_vm2, %v1872_v58, 0.0 }
 0x180   : > { %v1728_v18 = vadd.f32 %v1727_v24, %v1726_v21  ;;  %v2004_v49 = vadd.f32 %v2003_v29, %v2002_v17  ;;  %v1873_v17 = vmul.f32 %v1595_v62, %v4095_v32  ;;  %v2015_v24 = vsel %vm901_vm2, %v1871_v41, 0.0  ;;  %v4097_v29 = vld [vmem:[#allocation26_spill] sm:$0xff]  ;;  %v3743_v3 = vpop.permute.xlu0 %1446  ;;  %v4100_v54 = vld [vmem:[#allocation32_spill] sm:$0xff] }
 0x181   : > { %v1597_v35 = vmul.f32 %v3605_v45, %v4097_v29  ;;  %v1598_v0 = vmul.f32 %v3612_v27, %v4098_v51  ;;  %v1743_v45 = vsel %vm901_vm2, %v1596_v33, 0.0 }
 0x182   : > { %v1730_v43 = vadd.f32 %v1729_v19, %v1728_v18  ;;  %v2006_v40 = vadd.f32 %v2005_v4, %v2004_v49  ;;  %v1741_v19 = vsel %vm901_vm2, %v1595_v62, 0.0  ;;  %v1874_v4 = vmul.f32 %v1596_v33, %v4096_v31  ;;  %v3767_v62 = vpop.permute.xlu2 %1456 }
 0x183   : > { %v1745_v27 = vsel %vm901_vm2, %v1597_v35, 0.0 }
 0x184   : > { %v1732_v15 = vadd.f32 %v1731_v56, %v1730_v43  ;;  %v2008_v39 = vadd.f32 %v2007_v34, %v2006_v40  ;;  %v2019_v40 = vsel %vm901_vm2, %v1873_v17, 0.0  ;;  %v1875_v34 = vmul.f32 %v1597_v35, %v4097_v29  ;;  %v4103_v17 = vld [vmem:[#allocation46_spill] sm:$0xff] }
 0x185   : > { %v1599_v56 = vmul.f32 %v3619_v23, %v4099_v10 }
 0x186   : > { %v1734_v42 = vadd.f32 %v1733_v12, %v1732_v15  ;;  %v2010_v8 = vadd.f32 %v2009_v59, %v2008_v39  ;;  %v1876_v15 = vmul.f32 %v1598_v0, %v4098_v51  ;;  %v2021_v39 = vsel %vm901_vm2, %v1874_v4, 0.0  ;;  %v3760_v59 = vpop.permute.xlu1 %1451 }
 0x187   : > { %v1600_v12 = vmul.f32 %v3636_v6, %v4100_v54  ;;  %v1877_v32 = vmul.f32 %v1599_v56, %v4099_v10 }
 0x188   : > { %v1736_v2 = vadd.f32 %v1735_v57, %v1734_v42  ;;  %v2012_v25 = vadd.f32 %v2011_v52, %v2010_v8  ;;  %v1747_v42 = vsel %vm901_vm2, %v1598_v0, 0.0  ;;  %v4101_v8 = vld [vmem:[#allocation35_spill] sm:$0xff]  ;;  %v2023_v57 = vsel %vm901_vm2, %v1875_v34, 0.0 }
 0x189   : > { %v1601_v23 = vmul.f32 %v3643_v46, %v4101_v8  ;;  %v1878_v6 = vmul.f32 %v1600_v12, %v4100_v54  ;;  %v3774_v46 = vpop.permute.xlu0 %1461  ;;  %v1607_v54 = vmul.f32 %v3705_v55, %v3520_v22 }
 0x18a   : > { %v1738_v53 = vadd.f32 %v1737_v30, %v1736_v2  ;;  %v2014_v21 = vadd.f32 %v2013_v50, %v2012_v25  ;;  %v2025_v2 = vsel %vm901_vm2, %v1876_v15, 0.0  ;;  %v1749_v25 = vsel %vm901_vm2, %v1599_v56, 0.0  ;;  %v4102_v50 = vld [vmem:[#allocation40_spill] sm:$0xff] }
 0x18b   : > { %v1602_v58 = vmul.f32 %v3650_v9, %v4102_v50  ;;  %v1879_v33 = vmul.f32 %v1601_v23, %v4101_v8  ;;  %v1753_v35 = vsel %vm901_vm2, %v1601_v23, 0.0  ;;  %v1606_v56 = vmul.f32 %v3698_v1, %v3484_v13  ;;  %v4105_v8 = vld [vmem:[#allocation3_spill] sm:$0xff] }
 0x18c   : > { %v1740_v18 = vadd.f32 %v1739_v16, %v1738_v53  ;;  %v2016_v49 = vadd.f32 %v2015_v24, %v2014_v21  ;;  %v1751_v53 = vsel %vm901_vm2, %v1600_v12, 0.0  ;;  %v2027_v21 = vsel %vm901_vm2, %v1877_v32, 0.0 }
 0x18d   : > { %v1603_v16 = vmul.f32 %v3667_v37, %v4103_v17  ;;  %v1880_v9 = vmul.f32 %v1602_v58, %v4102_v50  ;;  %v1605_v37 = vmul.f32 %v3681_v20, %v3448_v5  ;;  %v1608_v23 = vmul.f32 %v3712_v26, %v4105_v8 }
 0x18e   : > { %v1742_v7 = vadd.f32 %v1741_v19, %v1740_v18  ;;  %v2018_v43 = vadd.f32 %v2017_v63, %v2016_v49  ;;  %v2029_v18 = vsel %vm901_vm2, %v1878_v6, 0.0  ;;  %v4104_v49 = vld [vmem:[#allocation52_spill] sm:$0xff]  ;;  %v2031_v63 = vsel %vm901_vm2, %v1879_v33, 0.0  ;;  %v3791_v34 = vpop.permute.xlu1 %1466 }
 0x18f   : > { %v1604_v19 = vmul.f32 %v3674_v38, %v4104_v49  ;;  %v1881_v4 = vmul.f32 %v1603_v16, %v4103_v17  ;;  %v2033_v10 = vsel %vm901_vm2, %v1880_v9, 0.0  ;;  %v1761_v1 = vsel %vm901_vm2, %v1605_v37, 0.0 }
 0x190   : > { %v2020_v44 = vadd.f32 %v2019_v40, %v2018_v43  ;;  %v1744_v48 = vadd.f32 %v1743_v45, %v1742_v7  ;;  %v1755_v7 = vsel %vm901_vm2, %v1602_v58, 0.0  ;;  %v1757_v45 = vsel %vm901_vm2, %v1603_v16, 0.0  ;;  %v4107_v58 = vld [vmem:[#allocation7_spill] sm:$0xff]  ;;  %v4108_v16 = vld [vmem:[#allocation9_spill] sm:$0xff] }
 0x191   : > { %v1882_v38 = vmul.f32 %v1604_v19, %v4104_v49  ;;  %v1759_v20 = vsel %vm901_vm2, %v1604_v19, 0.0  ;;  %v1885_v6 = vmul.f32 %v1607_v54, %v3520_v22  ;;  %v1886_v26 = vmul.f32 %v1608_v23, %v4105_v8  ;;  %v4109_v19 = vld [vmem:[#allocation11_spill] sm:$0xff] }
 0x192   : > { %v1746_v60 = vadd.f32 %v1745_v27, %v1744_v48  ;;  %v2022_v28 = vadd.f32 %v2021_v39, %v2020_v44  ;;  %v3798_v44 = vpop.permute.xlu2 %1471  ;;  %v2035_v27 = vsel %vm901_vm2, %v1881_v4, 0.0  ;;  %v1883_v39 = vmul.f32 %v1605_v37, %v3448_v5 }
 0x193   : > { %v1767_v17 = vsel %vm901_vm2, %v1608_v23, 0.0  ;;  %v1611_v22 = vmul.f32 %v3743_v3, %v4108_v16  ;;  %v2045_v49 = vsel %vm901_vm2, %v1886_v26, 0.0  ;;  %v4110_v3 = vld [vmem:[#allocation13_spill] sm:$0xff] }
 0x194   : > { %v1748_v52 = vadd.f32 %v1747_v42, %v1746_v60  ;;  %v2024_v41 = vadd.f32 %v2023_v57, %v2022_v28  ;;  %v3805_v28 = vpop.permute.xlu0 %1476  ;;  %v2037_v42 = vsel %vm901_vm2, %v1882_v38, 0.0  ;;  %v1884_v57 = vmul.f32 %v1606_v56, %v3484_v13 }
 0x195   : > { %v2039_v5 = vsel %vm901_vm2, %v1883_v39, 0.0  ;;  %v1613_v37 = vmul.f32 %v3767_v62, %v4110_v3 }
 0x196   : > { %v1750_v30 = vadd.f32 %v1749_v25, %v1748_v52  ;;  %v2026_v31 = vadd.f32 %v2025_v2, %v2024_v41  ;;  %v4106_v41 = vld [vmem:[#allocation5_spill] sm:$0xff]  ;;  %v1763_v2 = vsel %vm901_vm2, %v1606_v56, 0.0  ;;  %v2041_v13 = vsel %vm901_vm2, %v1884_v57, 0.0  ;;  %v4113_v57 = vld [vmem:[#allocation19_spill] sm:$0xff] }
 0x197   : > { %v1609_v55 = vmul.f32 %v3729_v47, %v4106_v41  ;;  %v1891_v39 = vmul.f32 %v1613_v37, %v4110_v3  ;;  %v1777_v23 = vsel %vm901_vm2, %v1613_v37, 0.0 }
 0x198   : > { %v1752_v24 = vadd.f32 %v1751_v53, %v1750_v30  ;;  %v2028_v29 = vadd.f32 %v2027_v21, %v2026_v31  ;;  %v1610_v30 = vmul.f32 %v3736_v14, %v4107_v58  ;;  %v1765_v31 = vsel %vm901_vm2, %v1607_v54, 0.0  ;;  %v1482_v21 = vpop.permute.xlu1 %1481 }
 0x199   : > { %v1887_v47 = vmul.f32 %v1609_v55, %v4106_v41  ;;  %v1769_v9 = vsel %vm901_vm2, %v1609_v55, 0.0 }
 0x19a   : > { %v1754_v51 = vadd.f32 %v1753_v35, %v1752_v24  ;;  %v2030_v0 = vadd.f32 %v2029_v18, %v2028_v29  ;;  %v2043_v24 = vsel %vm901_vm2, %v1885_v6, 0.0  ;;  %v1487_v29 = vpop.permute.xlu2 %1486  ;;  %v1888_v18 = vmul.f32 %v1610_v30, %v4107_v58 }
 0x19c   : > { %v1756_v43 = vadd.f32 %v1755_v7, %v1754_v51  ;;  %v2032_v40 = vadd.f32 %v2031_v63, %v2030_v0  ;;  %v1612_v51 = vmul.f32 %v3760_v59, %v4109_v19  ;;  %v1492_v4 = vpop.permute.xlu0 %1491  ;;  %v1771_v7 = vsel %vm901_vm2, %v1610_v30, 0.0 }
 0x19d   : > { %v2049_v38 = vsel %vm901_vm2, %v1888_v18, 0.0  ;;  %v1773_v59 = vsel %vm901_vm2, %v1611_v22, 0.0 }
 0x19e   : > { %v1758_v48 = vadd.f32 %v1757_v45, %v1756_v43  ;;  %v2034_v15 = vadd.f32 %v2033_v10, %v2032_v40  ;;  %v2047_v43 = vsel %vm901_vm2, %v1887_v47, 0.0  ;;  %v1889_v40 = vmul.f32 %v1611_v22, %v4108_v16  ;;  %v4116_v22 = vld [vmem:[#allocation25_spill] sm:$0xff] }
 0x19f   : > { %v1890_v56 = vmul.f32 %v1612_v51, %v4109_v19  ;;  %v1775_v62 = vsel %vm901_vm2, %v1612_v51, 0.0  ;;  %v4117_v51 = vld [vmem:[#allocation27_spill] sm:$0xff] }
 0x1a0   : > { %v1760_v12 = vadd.f32 %v1759_v20, %v1758_v48  ;;  %v2036_v60 = vadd.f32 %v2035_v27, %v2034_v15  ;;  %v4111_v48 = vld [vmem:[#allocation15_spill] sm:$0xff]  ;;  %v2051_v54 = vsel %vm901_vm2, %v1889_v40, 0.0  ;;  %v1497_v8 = vpop.permute.xlu1 %1496 }
 0x1a1   : > { %v1614_v15 = vmul.f32 %v3774_v46, %v4111_v48  ;;  %v2053_v46 = vsel %vm901_vm2, %v1890_v56, 0.0 }
 0x1a2   : > { %v1762_v32 = vadd.f32 %v1761_v1, %v1760_v12  ;;  %v2038_v52 = vadd.f32 %v2037_v42, %v2036_v60  ;;  %v4112_v12 = vld [vmem:[#allocation17_spill] sm:$0xff] }
 0x1a3   : > { %v1615_v60 = vmul.f32 %v3791_v34, %v4112_v12  ;;  %v1779_v34 = vsel %vm901_vm2, %v1614_v15, 0.0 }
 0x1a4   : > { %v1764_v25 = vadd.f32 %v1763_v2, %v1762_v32  ;;  %v2040_v50 = vadd.f32 %v2039_v5, %v2038_v52  ;;  %v1616_v32 = vmul.f32 %v3798_v44, %v4113_v57  ;;  %v1892_v52 = vmul.f32 %v1614_v15, %v4111_v48  ;;  %v1502_v5 = vpop.permute.xlu2 %1501  ;;  %v1507_v26 = vpop.permute.xlu0 %1506 }
 0x1a5   : > { %v2055_v2 = vsel %vm901_vm2, %v1891_v39, 0.0  ;;  %v1893_v6 = vmul.f32 %v1615_v60, %v4112_v12 }
 0x1a6   : > { %v1766_v33 = vadd.f32 %v1765_v31, %v1764_v25  ;;  %v2042_v53 = vadd.f32 %v2041_v13, %v2040_v50  ;;  %v4114_v25 = vld [vmem:[#allocation21_spill] sm:$0xff]  ;;  %v1894_v44 = vmul.f32 %v1616_v32, %v4113_v57  ;;  %v1781_v13 = vsel %vm901_vm2, %v1615_v60, 0.0  ;;  %v4120_v60 = vld [vmem:[#allocation34_spill] sm:$0xff] }
 0x1a7   : > { %v1617_v50 = vmul.f32 %v3805_v28, %v4114_v25  ;;  %v2057_v31 = vsel %vm901_vm2, %v1892_v52, 0.0  ;;  %v1783_v16 = vsel %vm901_vm2, %v1616_v32, 0.0 }
 0x1a8   : > { %v1768_v14 = vadd.f32 %v1767_v17, %v1766_v33  ;;  %v2044_v35 = vadd.f32 %v2043_v24, %v2042_v53  ;;  %v4115_v33 = vld [vmem:[#allocation23_spill] sm:$0xff]  ;;  %v1619_v24 = vmul.f32 %v1487_v29, %v4116_v22 }
 0x1a9   : > { %v1618_v53 = vmul.f32 %v1482_v21, %v4115_v33  ;;  %v1895_v28 = vmul.f32 %v1617_v50, %v4114_v25  ;;  %v1785_v19 = vsel %vm901_vm2, %v1617_v50, 0.0  ;;  %v1620_v21 = vmul.f32 %v1492_v4, %v4117_v51 }
 0x1aa   : > { %v1770_v0 = vadd.f32 %v1769_v9, %v1768_v14  ;;  %v2046_v63 = vadd.f32 %v2045_v49, %v2044_v35  ;;  %v2059_v14 = vsel %vm901_vm2, %v1893_v6, 0.0  ;;  %v2061_v9 = vsel %vm901_vm2, %v1894_v44, 0.0 }
 0x1ab   : > { %v1896_v49 = vmul.f32 %v1618_v53, %v4115_v33  ;;  %v1897_v3 = vmul.f32 %v1619_v24, %v4116_v22  ;;  %v1787_v29 = vsel %vm901_vm2, %v1618_v53, 0.0  ;;  %v2063_v37 = vsel %vm901_vm2, %v1895_v28, 0.0 }
 0x1ac   : > { %v2048_v45 = vadd.f32 %v2047_v43, %v2046_v63  ;;  %v1772_v10 = vadd.f32 %v1771_v7, %v1770_v0  ;;  %v1512_v7 = vpop.permute.xlu1 %1511  ;;  %v4118_v43 = vld [vmem:[#allocation29_spill] sm:$0xff]  ;;  %v1789_v56 = vsel %vm901_vm2, %v1619_v24, 0.0  ;;  %v1898_v15 = vmul.f32 %v1620_v21, %v4117_v51  ;;  %v1522_v39 = vpop.permute.xlu0 %1521 }
 0x1ad   : > { %v1621_v40 = vmul.f32 %v1497_v8, %v4118_v43  ;;  %v2065_v4 = vsel %vm901_vm2, %v1896_v49, 0.0  ;;  %v1791_v12 = vsel %vm901_vm2, %v1620_v21, 0.0 }
 0x1ae   : > { %v1774_v27 = vadd.f32 %v1773_v59, %v1772_v10  ;;  %v2050_v20 = vadd.f32 %v2049_v38, %v2048_v45  ;;  %v1517_v45 = vpop.permute.xlu2 %1516  ;;  %v4119_v59 = vld [vmem:[#allocation31_spill] sm:$0xff]  ;;  %v2069_v32 = vsel %vm901_vm2, %v1898_v15, 0.0 }
 0x1af   : > { %v1622_v48 = vmul.f32 %v1502_v5, %v4119_v59  ;;  %v1793_v57 = vsel %vm901_vm2, %v1621_v40, 0.0 }
 0x1b0   : > { %v1776_v42 = vadd.f32 %v1775_v62, %v1774_v27  ;;  %v2052_v1 = vadd.f32 %v2051_v54, %v2050_v20  ;;  %v2067_v62 = vsel %vm901_vm2, %v1897_v3, 0.0  ;;  %v1899_v54 = vmul.f32 %v1621_v40, %v4118_v43 }
 0x1b2   : > { %v1778_v41 = vadd.f32 %v1777_v23, %v1776_v42  ;;  %v2054_v55 = vadd.f32 %v2053_v46, %v2052_v1  ;;  %v1623_v42 = vmul.f32 %v1507_v26, %v4120_v60  ;;  %v1900_v23 = vmul.f32 %v1622_v48, %v4119_v59  ;;  %v4121_v46 = vld [vmem:[#allocation39_spill] sm:$0xff] }
 0x1b3   : > { %v1624_v52 = vmul.f32 %v1512_v7, %v4121_v46 }
 0x1b4   : > { %v1780_v58 = vadd.f32 %v1779_v34, %v1778_v41  ;;  %v2056_v30 = vadd.f32 %v2055_v2, %v2054_v55  ;;  %v1795_v55 = vsel %vm901_vm2, %v1622_v48, 0.0  ;;  %v4122_v2 = vld [vmem:[#allocation44_spill] sm:$0xff]  ;;  %v2071_v34 = vsel %vm901_vm2, %v1899_v54, 0.0 }
 0x1b5   : > { %v1625_v6 = vmul.f32 %v1517_v45, %v4122_v2  ;;  %v1901_v25 = vmul.f32 %v1623_v42, %v4120_v60  ;;  %v2073_v26 = vsel %vm901_vm2, %v1900_v23, 0.0  ;;  %v1902_v44 = vmul.f32 %v1624_v52, %v4121_v46 }
 0x1b6   : > { %v1782_v47 = vadd.f32 %v1781_v13, %v1780_v58  ;;  %v2058_v17 = vadd.f32 %v2057_v31, %v2056_v30  ;;  %v1527_v30 = vpop.permute.xlu1 %1526  ;;  %v1797_v13 = vsel %vm901_vm2, %v1623_v42, 0.0  ;;  %v4123_v31 = vld [vmem:[#allocation49_spill] sm:$0xff]  ;;  %v1532_v53 = vpop.permute.xlu2 %1531  ;;  %v1799_v22 = vsel %vm901_vm2, %v1624_v52, 0.0 }
 0x1b7   : > { %v1626_v33 = vmul.f32 %v1522_v39, %v4123_v31  ;;  %v2075_v24 = vsel %vm901_vm2, %v1901_v25, 0.0  ;;  %v1628_v49 = vmul.f32 %v1532_v53, %v3474_v36 }
 0x1b8   : > { %v2060_v35 = vadd.f32 %v2059_v14, %v2058_v17  ;;  %v1784_v18 = vadd.f32 %v1783_v16, %v1782_v47  ;;  %v1903_v16 = vmul.f32 %v1625_v6, %v4122_v2  ;;  %v1627_v14 = vmul.f32 %v1527_v30, %v3531_v61 }
 0x1b9   : > { %v1904_v51 = vmul.f32 %v1626_v33, %v4123_v31  ;;  %v1803_v3 = vsel %vm901_vm2, %v1626_v33, 0.0  ;;  %v1906_v40 = vmul.f32 %v1628_v49, %v3474_v36  ;;  %v1807_v59 = vsel %vm901_vm2, %v1628_v49, 0.0 }
 0x1ba   : > { %v1786_v0 = vadd.f32 %v1785_v19, %v1784_v18  ;;  %v2062_v63 = vadd.f32 %v2061_v9, %v2060_v35  ;;  %v1537_v18 = vpop.permute.xlu0 %1536  ;;  %v1801_v9 = vsel %vm901_vm2, %v1625_v6, 0.0  ;;  %v2077_v19 = vsel %vm901_vm2, %v1902_v44, 0.0 }
 0x1bb   : > { %v1905_v7 = vmul.f32 %v1627_v14, %v3531_v61  ;;  %v1805_v45 = vsel %vm901_vm2, %v1627_v14, 0.0 }
 0x1bc   : > { %v1788_v10 = vadd.f32 %v1787_v29, %v1786_v0  ;;  %v2064_v38 = vadd.f32 %v2063_v37, %v2062_v63  ;;  %v2079_v63 = vsel %vm901_vm2, %v1903_v16, 0.0  ;;  %v1629_v29 = vmul.f32 %v1537_v18, %v3571_v11 }
 0x1bd   : > { %v2083_v48 = vsel %vm901_vm2, %v1905_v7, 0.0 }
 0x1be   : > { %v2066_v27 = vadd.f32 %v2065_v4, %v2064_v38  ;;  %v1790_v20 = vadd.f32 %v1789_v56, %v1788_v10  ;;  %v2081_v10 = vsel %vm901_vm2, %v1904_v51, 0.0  ;;  %v1907_v61 = vmul.f32 %v1629_v29, %v3571_v11 }
 0x1c0   : > { %v1792_v1 = vadd.f32 %v1791_v12, %v1790_v20  ;;  %v2068_v8 = vadd.f32 %v2067_v62, %v2066_v27  ;;  %v2085_v27 = vsel %vm901_vm2, %v1906_v40, 0.0  ;;  %v1809_v20 = vsel %vm901_vm2, %v1629_v29, 0.0 }
 0x1c1   : > { %v2087_v62 = vsel %vm901_vm2, %v1907_v61, 0.0 }
 0x1c2   : > { %v1794_v5 = vadd.f32 %v1793_v57, %v1792_v1  ;;  %v2070_v41 = vadd.f32 %v2069_v32, %v2068_v8 }
 0x1c4   : > { %v2072_v50 = vadd.f32 %v2071_v34, %v2070_v41  ;;  %v1796_v58 = vadd.f32 %v1795_v55, %v1794_v5 }
 0x1c6   : > { %v1798_v47 = vadd.f32 %v1797_v13, %v1796_v58  ;;  %v2074_v17 = vadd.f32 %v2073_v26, %v2072_v50 }
 0x1c8   : > { %v1800_v28 = vadd.f32 %v1799_v22, %v1798_v47  ;;  %v2076_v35 = vadd.f32 %v2075_v24, %v2074_v17 }
 0x1ca   : > { %v2078_v21 = vadd.f32 %v2077_v19, %v2076_v35  ;;  %v1802_v0 = vadd.f32 %v1801_v9, %v1800_v28 }
 0x1cc   : > { %v1804_v37 = vadd.f32 %v1803_v3, %v1802_v0  ;;  %v2080_v43 = vadd.f32 %v2079_v63, %v2078_v21 }
 0x1ce   : > { %v1806_v38 = vadd.f32 %v1805_v45, %v1804_v37  ;;  %v2082_v56 = vadd.f32 %v2081_v10, %v2080_v43 }
 0x1d0   : > { %v2084_v4 = vadd.f32 %v2083_v48, %v2082_v56  ;;  %v1808_v15 = vadd.f32 %v1807_v59, %v1806_v38 }
 0x1d2   : > { %v1810_v36 = vadd.f32 %v1809_v20, %v1808_v15  ;;  %v2086_v39 = vadd.f32 %v2085_v27, %v2084_v4 }
 0x1d4   : > { %v1811_v54 = vrot.slane %v1810_v36, 4  ;;  %v2088_v12 = vadd.f32 %v2087_v62, %v2086_v39 }
 0x1d6   : > { %v1812_v60 = vadd.f32 %v1811_v54, %v1810_v36  ;;  %v2089_v42 = vrot.slane %v2088_v12, 4 }
 0x1d8   : > { %v1813_v1 = vrot.slane %v1812_v60, 2  ;;  %v2090_v8 = vadd.f32 %v2089_v42, %v2088_v12 }
 0x1da   : > { %v1814_v23 = vadd.f32 %v1813_v1, %v1812_v60  ;;  %v2091_v57 = vrot.slane %v2090_v8, 2 }
 0x1dc   : > { %v1815_v11 = vrot.slane %v1814_v23, 1  ;;  %v2092_v32 = vadd.f32 %v2091_v57, %v2090_v8 }
 0x1de   : > { %v2093_v46 = vrot.slane %v2092_v32, 1  ;;  %v1816_v52 = vadd.f32 %v1815_v11, %v1814_v23 }
 0x1e0   : > { %v2094_v5 = vadd.f32 %v2093_v46, %v2092_v32 }
 0x1e2   : > { %v2095_v41 = vsel %vm607_vm0, %v1816_v52, %v2094_v5 }
 0x1e3   : > { %2097 = vst.msk [vmem:[%s235_s25] sm:$0x3] %vm2096_vm3, %v2095_v41 }
 0x1e4 PF: > { %s16_s18 = sadd.s32 1, %s2313_s18  }
 0x1e5   : > { %p13_p4 = scmp.ge.s32.totalorder %s16_s18, 4  }
 0x1e7   :  { %15 = sbr.rel (!%p13_p4) target bundleno = 1 (0x1), region = 78 }

// kernel: conv3_forward.10
= control target key start
LH: loop header
LB: loop body
LE: loop exit
PB: predicated region body
PF: predicated region fallthrough
CT: control target
= control target key end

     0   :  { %s431_s12 = smov 0   ;;  %s551_s0 = inlined_call_operand.vmem [shape: f32[2,11,13,64], index: 0, kind: input, shape index: {}]   ;;  %s552_s1 = inlined_call_operand.vmem [shape: f32[1,64], index: 1, kind: input, shape index: {}]   ;;  %s553_s2 = inlined_call_operand.vmem [shape: f32[1,64], index: 2, kind: input, shape index: {}]   ;;  %s554_s3 = inlined_call_operand.vmem [shape: f32[2,5,12,64], index: 3, kind: output, shape index: {}]  }
   0x1 LB: > { %s382_s13 = sadd.s32 4294967295, %s409_s12   ;;  %p386_p0 = scmp.ge.s32.totalorder %s409_s12, 1  ;;  %s409_s12 = sphi %s431_s12, %s13_s12  }
   0x2   : > { %p137_p1 = scmp.lt.s32.totalorder %s409_s12, 3 }
   0x4   : > { %p138_p2 = pnand %p386_p0, %p137_p1 }
   0x5   : > { %p161_p3 = scmp.lt.s32.totalorder (!%p138_p2), %s382_s13, 1 }
   0x6   : > { %141 = sbr.rel (%p138_p2) target bundleno = 48 (0x30), region = 32 }
   0xb   : > { %s556_s13 = smov (!%p161_p3, %s382_s13), 1  ;;  %v445_v0 = vld [vmem:[%s552_s1] ss:$0 sm:$0xff]  ;;  %vm279_vm0 = vcmask 1046528   ;;  %vm317_vm1 = vcmask 519168   ;;  %vm315_vm2 = vcmask 523264  }
   0xc   : > { %s391_s14 = smul.u32 176, %s556_s13  ;;  %v455_v1 = vld [vmem:[%s553_s2] ss:$0 sm:$0xff] }
   0xd   : > { %s392_s22 = smul.u32 80, %s556_s13 }
   0xe   : > { %s450_s19 = scalar_lea.vmem %s551_s0, %s391_s14 }
   0xf   : > { %v171_v2 = vld [vmem:[%s450_s19] sm:$0xff]  ;;  %v172_v3 = vld [vmem:[%s450_s19 + $0x8] sm:$0x1f]  ;;  %v173_v4 = vld [vmem:[%s450_s19 + $0x10] sm:$0xff]  ;;  %s500_s25 = scalar_lea.vmem %s554_s3, %s392_s22 }
  0x10   : > { %v174_v5 = vld [vmem:[%s450_s19 + $0x18] sm:$0x1f]  ;;  %v195_v6 = vmul.f32 %v445_v0, %v171_v2  ;;  %v196_v7 = vmul.f32 %v445_v0, %v172_v3  ;;  %v197_v8 = vmul.f32 %v445_v0, %v173_v4  ;;  %v175_v9 = vld [vmem:[%s450_s19 + $0x20] sm:$0xff]  ;;  %v176_v10 = vld [vmem:[%s450_s19 + $0x28] sm:$0x1f] }
  0x11   : > { %v198_v11 = vmul.f32 %v445_v0, %v174_v5  ;;  %v177_v12 = vld [vmem:[%s450_s19 + $0x30] sm:$0xff]  ;;  %v178_v13 = vld [vmem:[%s450_s19 + $0x38] sm:$0x1f]  ;;  %v199_v14 = vmul.f32 %v445_v0, %v175_v9  ;;  %v200_v15 = vmul.f32 %v445_v0, %v176_v10  ;;  %v179_v24 = vld [vmem:[%s450_s19 + $0x40] sm:$0xff] }
  0x12   : > { %v219_v16 = vadd.f32 %v455_v1, %v195_v6  ;;  %v220_v17 = vadd.f32 %v455_v1, %v196_v7  ;;  %v221_v18 = vadd.f32 %v455_v1, %v197_v8  ;;  %v201_v19 = vmul.f32 %v445_v0, %v177_v12  ;;  %v180_v25 = vld [vmem:[%s450_s19 + $0x48] sm:$0x1f]  ;;  %v181_v30 = vld [vmem:[%s450_s19 + $0x50] sm:$0xff]  ;;  %v182_v31 = vld [vmem:[%s450_s19 + $0x58] sm:$0x1f] }
  0x13   : > { %v222_v20 = vadd.f32 %v455_v1, %v198_v11  ;;  %v202_v21 = vmul.f32 %v445_v0, %v178_v13  ;;  %v223_v22 = vadd.f32 %v455_v1, %v199_v14  ;;  %v224_v23 = vadd.f32 %v455_v1, %v200_v15  ;;  %v183_v44 = vld [vmem:[%s450_s19 + $0x60] sm:$0xff]  ;;  %v184_v53 = vld [vmem:[%s450_s19 + $0x68] sm:$0x1f]  ;;  %v185_v54 = vld [vmem:[%s450_s19 + $0x70] sm:$0xff] }
  0x14   : > { %v239_v26 = vmax.f32 %v219_v16, 0.0  ;;  %v240_v27 = vmax.f32 %v220_v17, 0.0  ;;  %v241_v28 = vmax.f32 %v221_v18, 0.0  ;;  %v225_v29 = vadd.f32 %v455_v1, %v201_v19  ;;  %v186_v58 = vld [vmem:[%s450_s19 + $0x78] sm:$0x1f]  ;;  %v187_v6 = vld [vmem:[%s450_s19 + $0x80] sm:$0xff] }
  0x15   : > { %v242_v32 = vmax.f32 %v222_v20, 0.0  ;;  %v226_v33 = vadd.f32 %v455_v1, %v202_v21  ;;  %v243_v34 = vmax.f32 %v223_v22, 0.0  ;;  %v244_v35 = vmax.f32 %v224_v23, 0.0  ;;  %v188_v11 = vld [vmem:[%s450_s19 + $0x88] sm:$0x1f]  ;;  %v189_v16 = vld [vmem:[%s450_s19 + $0x90] sm:$0xff] }
  0x16   : > { %v259_v36 = vmax.f32 %v239_v26, %v241_v28  ;;  %v245_v37 = vmax.f32 %v225_v29, 0.0  ;;  %v203_v38 = vmul.f32 %v445_v0, %v179_v24  ;;  %v204_v39 = vmul.f32 %v445_v0, %v180_v25  ;;  %v190_v17 = vld [vmem:[%s450_s19 + $0x98] sm:$0x1f] }
  0x17   : > { %v260_v40 = vmax.f32 %v240_v27, %v242_v32  ;;  %v246_v41 = vmax.f32 %v226_v33, 0.0  ;;  %v205_v42 = vmul.f32 %v445_v0, %v181_v30  ;;  %v206_v43 = vmul.f32 %v445_v0, %v182_v31 }
  0x18   : > { %v280_v45 = vrot.slane %v259_v36, 1  ;;  %v261_v46 = vmax.f32 %v243_v34, %v245_v37  ;;  %v227_v47 = vadd.f32 %v455_v1, %v203_v38  ;;  %v228_v48 = vadd.f32 %v455_v1, %v204_v39 }
  0x19   : > { %v281_v49 = vrot.slane %v260_v40, 1  ;;  %v262_v50 = vmax.f32 %v244_v35, %v246_v41  ;;  %v229_v51 = vadd.f32 %v455_v1, %v205_v42  ;;  %v230_v52 = vadd.f32 %v455_v1, %v206_v43 }
  0x1a   : > { %v283_v55 = vrot.slane %v261_v46, 1  ;;  %v247_v56 = vmax.f32 %v227_v47, 0.0  ;;  %v248_v57 = vmax.f32 %v228_v48, 0.0  ;;  %v207_v59 = vmul.f32 %v445_v0, %v183_v44 }
  0x1b   : > { %v282_v60 = vsel %vm279_vm0, %v280_v45, %v281_v49  ;;  %v306_v61 = vmax.f32 %v260_v40, %v281_v49  ;;  %v284_v62 = vrot.slane %v262_v50, 1  ;;  %v249_v63 = vmax.f32 %v229_v51, 0.0 }
  0x1c   : > { %v305_v2 = vmax.f32 %v259_v36, %v282_v60  ;;  %v250_v3 = vmax.f32 %v230_v52, 0.0  ;;  %v208_v4 = vmul.f32 %v445_v0, %v184_v53  ;;  %v209_v5 = vmul.f32 %v445_v0, %v185_v54 }
  0x1d   : > { %318 = vst.msk [vmem:[%s500_s25 + $0x8] sm:$0xf] %vm317_vm1, %v306_v61  ;;  %v285_v7 = vsel %vm279_vm0, %v283_v55, %v284_v62  ;;  %v308_v8 = vmax.f32 %v262_v50, %v284_v62  ;;  %v263_v9 = vmax.f32 %v247_v56, %v249_v63  ;;  %v210_v10 = vmul.f32 %v445_v0, %v186_v58 }
  0x1e   : > { %316 = vst.msk [vmem:[%s500_s25] sm:$0xff] %vm315_vm2, %v305_v2  ;;  %v307_v12 = vmax.f32 %v261_v46, %v285_v7  ;;  %v264_v13 = vmax.f32 %v248_v57, %v250_v3  ;;  %v231_v14 = vadd.f32 %v455_v1, %v207_v59  ;;  %v232_v15 = vadd.f32 %v455_v1, %v208_v4 }
  0x1f   : > { %320 = vst.msk [vmem:[%s500_s25 + $0x18] sm:$0xf] %vm317_vm1, %v308_v8  ;;  %v286_v18 = vrot.slane %v263_v9, 1  ;;  %v233_v19 = vadd.f32 %v455_v1, %v209_v5  ;;  %v234_v20 = vadd.f32 %v455_v1, %v210_v10  ;;  %v211_v21 = vmul.f32 %v445_v0, %v187_v6 }
  0x20   : > { %319 = vst.msk [vmem:[%s500_s25 + $0x10] sm:$0xff] %vm315_vm2, %v307_v12  ;;  %v287_v22 = vrot.slane %v264_v13, 1  ;;  %v251_v23 = vmax.f32 %v231_v14, 0.0  ;;  %v252_v24 = vmax.f32 %v232_v15, 0.0  ;;  %v212_v25 = vmul.f32 %v445_v0, %v188_v11 }
  0x21   : > { %v253_v26 = vmax.f32 %v233_v19, 0.0  ;;  %v254_v27 = vmax.f32 %v234_v20, 0.0  ;;  %v213_v28 = vmul.f32 %v445_v0, %v189_v16  ;;  %v214_v29 = vmul.f32 %v445_v0, %v190_v17 }
  0x22   : > { %v288_v30 = vsel %vm279_vm0, %v286_v18, %v287_v22  ;;  %v310_v31 = vmax.f32 %v264_v13, %v287_v22  ;;  %v235_v32 = vadd.f32 %v455_v1, %v211_v21  ;;  %v236_v33 = vadd.f32 %v455_v1, %v212_v25 }
  0x23   : > { %v309_v34 = vmax.f32 %v263_v9, %v288_v30  ;;  %v265_v35 = vmax.f32 %v251_v23, %v253_v26  ;;  %v266_v36 = vmax.f32 %v252_v24, %v254_v27  ;;  %v237_v37 = vadd.f32 %v455_v1, %v213_v28 }
  0x24   : > { %322 = vst.msk [vmem:[%s500_s25 + $0x28] sm:$0xf] %vm317_vm1, %v310_v31  ;;  %v238_v38 = vadd.f32 %v455_v1, %v214_v29  ;;  %v255_v39 = vmax.f32 %v235_v32, 0.0  ;;  %v256_v0 = vmax.f32 %v236_v33, 0.0 }
  0x25   : > { %321 = vst.msk [vmem:[%s500_s25 + $0x20] sm:$0xff] %vm315_vm2, %v309_v34  ;;  %v289_v40 = vrot.slane %v265_v35, 1  ;;  %v290_v41 = vrot.slane %v266_v36, 1  ;;  %v257_v42 = vmax.f32 %v237_v37, 0.0 }
  0x26   : > { %v258_v43 = vmax.f32 %v238_v38, 0.0 }
  0x27   : > { %v291_v44 = vsel %vm279_vm0, %v289_v40, %v290_v41  ;;  %v312_v45 = vmax.f32 %v266_v36, %v290_v41  ;;  %v267_v46 = vmax.f32 %v255_v39, %v257_v42 }
  0x28   : > { %v311_v47 = vmax.f32 %v265_v35, %v291_v44  ;;  %v268_v48 = vmax.f32 %v256_v0, %v258_v43 }
  0x29   : > { %324 = vst.msk [vmem:[%s500_s25 + $0x38] sm:$0xf] %vm317_vm1, %v312_v45  ;;  %v292_v49 = vrot.slane %v267_v46, 1 }
  0x2a   : > { %323 = vst.msk [vmem:[%s500_s25 + $0x30] sm:$0xff] %vm315_vm2, %v311_v47  ;;  %v293_v1 = vrot.slane %v268_v48, 1 }
  0x2c   : > { %v294_v50 = vsel %vm279_vm0, %v292_v49, %v293_v1  ;;  %v314_v51 = vmax.f32 %v268_v48, %v293_v1 }
  0x2d   : > { %v313_v52 = vmax.f32 %v267_v46, %v294_v50 }
  0x2e   : > { %326 = vst.msk [vmem:[%s500_s25 + $0x48] sm:$0xf] %vm317_vm1, %v314_v51 }
  0x2f   : > { %325 = vst.msk [vmem:[%s500_s25 + $0x40] sm:$0xff] %vm315_vm2, %v313_v52 }
  0x30 PF: > { %s13_s12 = sadd.s32 1, %s409_s12  }
  0x31   : > { %p10_p4 = scmp.ge.s32.totalorder %s13_s12, 4  }
  0x33   :  { %12 = sbr.rel (!%p10_p4) target bundleno = 1 (0x1), region = 62 }

// kernel: conv3_forward.11
= control target key start
LH: loop header
LB: loop body
LE: loop exit
PB: predicated region body
PF: predicated region fallthrough
CT: control target
= control target key end

     0   :  { %s896_s18 = smov 0   ;;  %s1187_s0 = inlined_call_operand.vmem [shape: f32[2,33,64], index: 0, kind: input, shape index: {}]   ;;  %s1188_s1 = inlined_call_operand.vmem [shape: f32[9,64,64], index: 1, kind: input, shape index: {}]   ;;  %s1189_s2 = inlined_call_operand.vmem [shape: f32[1,64], index: 2, kind: input, shape index: {}]   ;;  %s1190_s3 = inlined_call_operand.vmem [shape: f32[15,1], index: 3, kind: input, shape index: {}]   ;;  %s1191_s4 = inlined_call_operand.vmem [shape: f32[2,15,64], index: 4, kind: output, shape index: {0}]   ;;  %s1192_s5 = inlined_call_operand.vmem [shape: f32[2,2,64], index: 5, kind: output, shape index: {1}]  }
   0x1 LB: > { %s743_s19 = sadd.s32 4294967295, %s863_s18   ;;  %p747_p0 = scmp.ge.s32.totalorder %s863_s18, 1  ;;  %s863_s18 = sphi %s896_s18, %s16_s18  }
   0x2   : > { %p190_p1 = scmp.lt.s32.totalorder %s863_s18, 3 }
   0x4   : > { %p191_p2 = pnand %p747_p0, %p190_p1 }
   0x5   : > { %p222_p3 = scmp.lt.s32.totalorder (!%p191_p2), %s743_s19, 1 }
   0x6   : > { %194 = sbr.rel (%p191_p2) target bundleno = 218 (0xda), region = 36 }
   0xb   : > { %v759_v0 = vld [vmem:[%s1188_s1 + $0x78] sm:$0xff]  ;;  %v758_v2 = vld [vmem:[%s1188_s1 + $0x70] sm:$0xff]  ;;  %v757_v6 = vld [vmem:[%s1188_s1 + $0x68] sm:$0xff]  ;;  %s1194_s19 = smov (!%p222_p3, %s743_s19), 1  ;;  %vm257_vm0 = vcmask 523264   ;;  %vm617_vm1 = vcmask 522240  }
   0xc   : > { %v771_v1 = vld [vmem:[%s1188_s1 + $0xb8] sm:$0xff]  ;;  %272 = vmatpush.msra.mxu0 %v759_v0  ;;  %v770_v4 = vld [vmem:[%s1188_s1 + $0xb0] sm:$0xff]  ;;  %v769_v8 = vld [vmem:[%s1188_s1 + $0xa8] sm:$0xff]  ;;  %s845_s8 = smul.u32 40, %s1194_s19  ;;  %s751_s20 = sshll.u32 %s1194_s19, 1  ;;  %vm653_vm2 = vcmask 1040384  }
   0xd   : > { %341 = vmatpush.msra.mxu2 %v771_v1  ;;  %v245_v3 = vld [vmem:[%s1188_s1 + $0x38] sm:$0xff]  ;;  %v244_v7 = vld [vmem:[%s1188_s1 + $0x30] sm:$0xff]  ;;  %v243_v10 = vld [vmem:[%s1188_s1 + $0x28] sm:$0xff]  ;;  %s235_s23 = scalar_lea.vmem %s1192_s5, %s751_s20  ;;  %vm655_vm3 = vcmask 517120  }
   0xe   : > { %v781_v5 = vld [vmem:[%s1188_s1 + $0xf8] sm:$0xff]  ;;  %301 = vmatpush.msra.mxu1 %v245_v3  ;;  %273 = vmatpush.msra.mxu0 %v758_v2  ;;  %v780_v9 = vld [vmem:[%s1188_s1 + $0xf0] sm:$0xff]  ;;  %v756_v11 = vld [vmem:[%s1188_s1 + $0x60] sm:$0xff]  ;;  %s988_s29 = scalar_lea.vmem %s1187_s0, %s845_s8 }
   0xf   : > { %383 = vmatpush.msra.mxu3 %v781_v5  ;;  %342 = vmatpush.msra.mxu2 %v770_v4  ;;  %v768_v12 = vld [vmem:[%s1188_s1 + $0xa0] sm:$0xff]  ;;  %v779_v13 = vld [vmem:[%s1188_s1 + $0xe8] sm:$0xff]  ;;  %v755_v16 = vld [vmem:[%s1188_s1 + $0x58] sm:$0xff] }
  0x10   : > { %302 = vmatpush.msra.mxu1 %v244_v7  ;;  %274 = vmatpush.msra.mxu0 %v757_v6  ;;  %v242_v14 = vld [vmem:[%s1188_s1 + $0x20] sm:$0xff]  ;;  %v767_v17 = vld [vmem:[%s1188_s1 + $0x98] sm:$0xff]  ;;  %v754_v20 = vld [vmem:[%s1188_s1 + $0x50] sm:$0xff] }
  0x11   : > { %384 = vmatpush.msra.mxu3 %v780_v9  ;;  %343 = vmatpush.msra.mxu2 %v769_v8  ;;  %v778_v15 = vld [vmem:[%s1188_s1 + $0xe0] sm:$0xff]  ;;  %v241_v18 = vld [vmem:[%s1188_s1 + $0x18] sm:$0xff]  ;;  %v766_v21 = vld [vmem:[%s1188_s1 + $0x90] sm:$0xff] }
  0x12   : > { %303 = vmatpush.msra.mxu1 %v243_v10  ;;  %275 = vmatpush.msra.mxu0 %v756_v11  ;;  %v777_v19 = vld [vmem:[%s1188_s1 + $0xd8] sm:$0xff]  ;;  %v240_v22 = vld [vmem:[%s1188_s1 + $0x10] sm:$0xff]  ;;  %v753_v24 = vld [vmem:[%s1188_s1 + $0x48] sm:$0xff] }
  0x13   : > { %385 = vmatpush.msra.mxu3 %v779_v13  ;;  %344 = vmatpush.msra.mxu2 %v768_v12  ;;  %v776_v23 = vld [vmem:[%s1188_s1 + $0xd0] sm:$0xff]  ;;  %v765_v25 = vld [vmem:[%s1188_s1 + $0x88] sm:$0xff]  ;;  %v752_v28 = vld [vmem:[%s1188_s1 + $0x40] sm:$0xff] }
  0x14   : > { %304 = vmatpush.msra.mxu1 %v242_v14  ;;  %276 = vmatpush.msra.mxu0 %v755_v16  ;;  %v239_v26 = vld [vmem:[%s1188_s1 + $0x8] sm:$0xff]  ;;  %v764_v29 = vld [vmem:[%s1188_s1 + $0x80] sm:$0xff]  ;;  %v811_v32 = vld [vmem:[%s1188_s1 + $0x1b8] sm:$0xff]  ;;  %v865_v16 = vmov 0  }
  0x15   : > { %386 = vmatpush.msra.mxu3 %v778_v15  ;;  %345 = vmatpush.msra.mxu2 %v767_v17  ;;  %v775_v27 = vld [vmem:[%s1188_s1 + $0xc8] sm:$0xff]  ;;  %v238_v33 = vld [vmem:[%s1188_s1] sm:$0xff]  ;;  %v791_v35 = vld [vmem:[%s1188_s1 + $0x138] sm:$0xff] }
  0x16   : > { %305 = vmatpush.msra.mxu1 %v241_v18  ;;  %277 = vmatpush.msra.mxu0 %v754_v20  ;;  %v246_v30 = vld [vmem:[%s988_s29 + $0x1] sm:$0xff]  ;;  %v801_v38 = vld [vmem:[%s1188_s1 + $0x178] sm:$0xff]  ;;  %v810_v39 = vld [vmem:[%s1188_s1 + $0x1b0] sm:$0xff] }
  0x17   : > { %387 = vmatpush.msra.mxu3 %v777_v19  ;;  %346 = vmatpush.msra.mxu2 %v766_v21  ;;  %v316_v31 = vld [vmem:[%s988_s29 + $0x2] sm:$0xff]  ;;  %v821_v40 = vld [vmem:[%s1188_s1 + $0x1f8] sm:$0xff]  ;;  %v790_v41 = vld [vmem:[%s1188_s1 + $0x130] sm:$0xff] }
  0x18   : > { %306 = vmatpush.msra.mxu1 %v240_v22  ;;  %278 = vmatpush.msra.mxu0 %v753_v24  ;;  %v774_v34 = vld [vmem:[%s1188_s1 + $0xc0] sm:$0xff]  ;;  %v800_v42 = vld [vmem:[%s1188_s1 + $0x170] sm:$0xff]  ;;  %v809_v43 = vld [vmem:[%s1188_s1 + $0x1a8] sm:$0xff] }
  0x19   : > { %388 = vmatpush.msra.mxu3 %v776_v23  ;;  %347 = vmatpush.msra.mxu2 %v765_v25  ;;  %v236_v36 = vld [vmem:[%s988_s29] sm:$0xff]  ;;  %v820_v44 = vld [vmem:[%s1188_s1 + $0x1f0] sm:$0xff]  ;;  %v789_v45 = vld [vmem:[%s1188_s1 + $0x128] sm:$0xff] }
  0x1a   : > { %307 = vmatpush.msra.mxu1 %v239_v26  ;;  %279 = vmatpush.msra.mxu0 %v752_v28  ;;  %v358_v37 = vld [vmem:[%s988_s29 + $0x5] sm:$0xff]  ;;  %v807_v53 = vld [vmem:[%s1188_s1 + $0x198] sm:$0xff]  ;;  %v359_v57 = vld [vmem:[%s988_s29 + $0xd] sm:$0x7f] }
  0x1b   : > { %389 = vmatpush.msra.mxu3 %v775_v27  ;;  %348 = vmatpush.msra.mxu2 %v764_v29  ;;  %v799_v46 = vld [vmem:[%s1188_s1 + $0x168] sm:$0xff]  ;;  %v808_v47 = vld [vmem:[%s1188_s1 + $0x1a0] sm:$0xff]  ;;  %v787_v55 = vld [vmem:[%s1188_s1 + $0x118] sm:$0xff] }
  0x1c   : > { %760 = vmatmul.msk.f32.vlgmr.msra.gmra.mxu0 %vm257_vm0, %v246_v30  ;;  %772 = vmatmul.msk.f32.vlgmr.msra.gmra.mxu2 %vm257_vm0, %v316_v31  ;;  %v819_v48 = vld [vmem:[%s1188_s1 + $0x1e8] sm:$0xff]  ;;  %v788_v49 = vld [vmem:[%s1188_s1 + $0x120] sm:$0xff]  ;;  %v797_v58 = vld [vmem:[%s1188_s1 + $0x158] sm:$0xff] }
  0x1d   : > { %509 = vmatpush.msrb.mxu2 %v811_v32  ;;  %308 = vmatpush.msra.mxu1 %v238_v33  ;;  %v247_v50 = vld [vmem:[%s988_s29 + $0x9] sm:$0x7f]  ;;  %v798_v52 = vld [vmem:[%s1188_s1 + $0x160] sm:$0xff]  ;;  %v806_v59 = vld [vmem:[%s1188_s1 + $0x190] sm:$0xff] }
  0x1e   : > { %390 = vmatpush.msra.mxu3 %v774_v34  ;;  %425 = vmatpush.msrb.mxu0 %v791_v35  ;;  %v317_v51 = vld [vmem:[%s988_s29 + $0xa] sm:$0x7f]  ;;  %v818_v54 = vld [vmem:[%s1188_s1 + $0x1e0] sm:$0xff]  ;;  %v817_v60 = vld [vmem:[%s1188_s1 + $0x1d8] sm:$0xff] }
  0x1f   : > { %762 = vmatmul.msk.f32.vlgmr.msra.gmra.mxu1 %vm257_vm0, %v236_v36  ;;  %782 = vmatmul.msk.f32.vlgmr.msra.gmra.mxu3 %vm257_vm0, %v358_v37  ;;  %v237_v56 = vld [vmem:[%s988_s29 + $0x8] sm:$0x7f]  ;;  %v786_v61 = vld [vmem:[%s1188_s1 + $0x110] sm:$0xff]  ;;  %v804_v3 = vld [vmem:[%s1188_s1 + $0x180] sm:$0xff] }
  0x20   : > { %467 = vmatpush.msrb.mxu1 %v801_v38  ;;  %510 = vmatpush.msrb.mxu2 %v810_v39  ;;  %v796_v62 = vld [vmem:[%s1188_s1 + $0x150] sm:$0xff]  ;;  %v805_v63 = vld [vmem:[%s1188_s1 + $0x188] sm:$0xff]  ;;  %v784_v5 = vld [vmem:[%s1188_s1 + $0x100] sm:$0xff] }
  0x21   : > { %551 = vmatpush.msrb.mxu3 %v821_v40  ;;  %426 = vmatpush.msrb.mxu0 %v790_v41  ;;  %v816_v0 = vld [vmem:[%s1188_s1 + $0x1d0] sm:$0xff]  ;;  %v785_v1 = vld [vmem:[%s1188_s1 + $0x108] sm:$0xff]  ;;  %v794_v7 = vld [vmem:[%s1188_s1 + $0x140] sm:$0xff] }
  0x22   : > { %468 = vmatpush.msrb.mxu1 %v800_v42  ;;  %511 = vmatpush.msrb.mxu2 %v809_v43  ;;  %v795_v2 = vld [vmem:[%s1188_s1 + $0x148] sm:$0xff]  ;;  %v814_v9 = vld [vmem:[%s1188_s1 + $0x1c0] sm:$0xff]  ;;  %v831_v10 = vld [vmem:[%s1188_s1 + $0x238] sm:$0xff] }
  0x23   : > { %552 = vmatpush.msrb.mxu3 %v820_v44  ;;  %427 = vmatpush.msrb.mxu0 %v789_v45  ;;  %v815_v4 = vld [vmem:[%s1188_s1 + $0x1c8] sm:$0xff]  ;;  %v830_v13 = vld [vmem:[%s1188_s1 + $0x230] sm:$0xff]  ;;  %v619_v14 = vld [vmem:[%s1190_s3] sm:$0xff] }
  0x24   : > { %469 = vmatpush.msrb.mxu1 %v799_v46  ;;  %512 = vmatpush.msrb.mxu2 %v808_v47  ;;  %v400_v6 = vld [vmem:[%s988_s29 + $0x6] sm:$0xff]  ;;  %v401_v18 = vld [vmem:[%s988_s29 + $0xe] sm:$0x7f]  ;;  %v827_v20 = vld [vmem:[%s1188_s1 + $0x218] sm:$0xff] }
  0x25   : > { %553 = vmatpush.msrb.mxu3 %v819_v48  ;;  %428 = vmatpush.msrb.mxu0 %v788_v49  ;;  %v484_v8 = vld [vmem:[%s988_s29 + $0xa] sm:$0xff]  ;;  %v828_v17 = vld [vmem:[%s1188_s1 + $0x220] sm:$0xff]  ;;  %v485_v19 = vld [vmem:[%s988_s29 + $0x12] sm:$0x7f] }
  0x26   : > { %761 = vmatmul.msk.f32.gmra.mxu0 %vm257_vm0, %v247_v50  ;;  %773 = vmatmul.msk.f32.gmra.mxu2 %vm257_vm0, %v317_v51  ;;  %v442_v11 = vld [vmem:[%s988_s29 + $0x7] sm:$0xff]  ;;  %v443_v21 = vld [vmem:[%s988_s29 + $0xf] sm:$0x7f] }
  0x27   : > { %470 = vmatpush.msrb.mxu1 %v798_v52  ;;  %513 = vmatpush.msrb.mxu2 %v807_v53  ;;  %v526_v12 = vld [vmem:[%s988_s29 + $0xb] sm:$0xff]  ;;  %v527_v22 = vld [vmem:[%s988_s29 + $0x13] sm:$0x7f]  ;;  %v824_v26 = vld [vmem:[%s1188_s1 + $0x200] sm:$0xff] }
  0x28   : > { %554 = vmatpush.msrb.mxu3 %v818_v54  ;;  %429 = vmatpush.msrb.mxu0 %v787_v55  ;;  %v829_v15 = vld [vmem:[%s1188_s1 + $0x228] sm:$0xff]  ;;  %v826_v23 = vld [vmem:[%s1188_s1 + $0x210] sm:$0xff] }
  0x29   : > { %763 = vmatmul.msk.f32.gmra.mxu1 %vm257_vm0, %v237_v56  ;;  %783 = vmatmul.msk.f32.gmra.mxu3 %vm257_vm0, %v359_v57  ;;  %v620_v24 = vld [vmem:[%s1190_s3 + $0x8] sm:$0x7f]  ;;  %v569_v28 = vld [vmem:[%s988_s29 + $0x14] sm:$0x7f] }
  0x2a   : > { %471 = vmatpush.msrb.mxu1 %v797_v58  ;;  %514 = vmatpush.msrb.mxu2 %v806_v59  ;;  %v825_v25 = vld [vmem:[%s1188_s1 + $0x208] sm:$0xff]  ;;  %v856_v58 = vld [vmem:[%s1189_s2] ss:$0 sm:$0xff] }
  0x2b   : > { %555 = vmatpush.msrb.mxu3 %v817_v60  ;;  %430 = vmatpush.msrb.mxu0 %v786_v61  ;;  %v568_v27 = vld [vmem:[%s988_s29 + $0xc] sm:$0xff]  ;;  %s836_s29 = sshll.u32 %s1194_s19, 4 }
  0x2c   : > { %472 = vmatpush.msrb.mxu1 %v796_v62  ;;  %515 = vmatpush.msrb.mxu2 %v805_v63  ;;  %s231_s17 = scalar_lea.vmem %s1191_s4, %s836_s29 }
  0x2d   : > { %556 = vmatpush.msrb.mxu3 %v816_v0  ;;  %431 = vmatpush.msrb.mxu0 %v785_v1 }
  0x2e   : > { %473 = vmatpush.msrb.mxu1 %v795_v2  ;;  %516 = vmatpush.msrb.mxu2 %v804_v3 }
  0x2f   : > { %557 = vmatpush.msrb.mxu3 %v815_v4  ;;  %432 = vmatpush.msrb.mxu0 %v784_v5 }
  0x30   : > { %792 = vmatmul.msk.f32.vlgmr.msrb.gmra.mxu0 %vm257_vm0, %v400_v6  ;;  %474 = vmatpush.msrb.mxu1 %v794_v7 }
  0x31   : > { %812 = vmatmul.msk.f32.vlgmr.msrb.gmra.mxu2 %vm257_vm0, %v484_v8  ;;  %558 = vmatpush.msrb.mxu3 %v814_v9 }
  0x32   : > { %593 = vmatpush.msra.mxu0 %v831_v10  ;;  %802 = vmatmul.msk.f32.vlgmr.msrb.gmra.mxu1 %vm257_vm0, %v442_v11 }
  0x33   : > { %822 = vmatmul.msk.f32.vlgmr.msrb.gmra.mxu3 %vm257_vm0, %v526_v12  ;;  %837 = vmatpush.msra.mxu1 %v831_v10 }
  0x34   : > { %594 = vmatpush.msra.mxu0 %v830_v13  ;;  %855 = vset.pattern.permute.xlu0 %v865_v16 }
  0x35   : > { %838 = vmatpush.msra.mxu1 %v830_v13  ;;  %623 = vperm.xlu0 %855, %v619_v14  }
  0x36   : > { %595 = vmatpush.msra.mxu0 %v829_v15 }
  0x37   : > { %839 = vmatpush.msra.mxu1 %v829_v15 }
  0x38   : > { %596 = vmatpush.msra.mxu0 %v828_v17 }
  0x39   : > { %793 = vmatmul.msk.f32.gmra.mxu0 %vm257_vm0, %v401_v18  ;;  %813 = vmatmul.msk.f32.gmra.mxu2 %vm257_vm0, %v485_v19 }
  0x3a   : > { %840 = vmatpush.msra.mxu1 %v828_v17  ;;  %597 = vmatpush.msra.mxu0 %v827_v20 }
  0x3b   : > { %803 = vmatmul.msk.f32.gmra.mxu1 %vm257_vm0, %v443_v21  ;;  %823 = vmatmul.msk.f32.gmra.mxu3 %vm257_vm0, %v527_v22 }
  0x3c   : > { %841 = vmatpush.msra.mxu1 %v827_v20  ;;  %598 = vmatpush.msra.mxu0 %v826_v23 }
  0x3d   : > { %628 = vperm.xlu0 %855, %v620_v24  }
  0x3e   : > { %842 = vmatpush.msra.mxu1 %v826_v23  ;;  %599 = vmatpush.msra.mxu0 %v825_v25 }
  0x40   : > { %843 = vmatpush.msra.mxu1 %v825_v25  ;;  %600 = vmatpush.msra.mxu0 %v824_v26 }
  0x41   : > { %832 = vmatmul.msk.f32.vlgmr.msra.gmra.mxu0 %vm257_vm0, %v568_v27 }
  0x42   : > { %844 = vmatpush.msra.mxu1 %v824_v26 }
  0x43   : > { %833 = vmatmul.msk.f32.vlgmr.msra.gmra.mxu1 %vm257_vm0, %v569_v28 }
  0x99   : > { %v281_v29 = vpop.f32.mrf.mxu0 }
  0x9c   : > { %v310_v30 = vpop.f32.mrf.mxu1 }
  0x9d   : > { %v311_v36 = vadd.f32 %v310_v30, %v281_v29 }
  0x9f   : > { %v350_v31 = vpop.f32.mrf.mxu2 }
  0xa0   : > { %v356_v38 = vadd.f32 %v350_v31, %v311_v36 }
  0xa2   : > { %v392_v32 = vpop.f32.mrf.mxu3 }
  0xa3   : > { %v284_v33 = vpop.f32.mrf.mxu0  ;;  %v398_v42 = vadd.f32 %v392_v32, %v356_v38 }
  0xa6   : > { %v313_v34 = vpop.f32.mrf.mxu1 }
  0xa7   : > { %v314_v40 = vadd.f32 %v313_v34, %v284_v33  ;;  %v624_v53 = vpop.permute.xlu0 %623 }
  0xa9   : > { %v353_v35 = vpop.f32.mrf.mxu2 }
  0xaa   : > { %v357_v43 = vadd.f32 %v353_v35, %v314_v40 }
  0xac   : > { %v395_v37 = vpop.f32.mrf.mxu3 }
  0xad   : > { %v434_v39 = vpop.f32.mrf.mxu0  ;;  %v399_v46 = vadd.f32 %v395_v37, %v357_v43 }
  0xae   : > { %v440_v44 = vadd.f32 %v434_v39, %v398_v42 }
  0xaf   : > { %v476_v41 = vpop.f32.mrf.mxu1  ;;  %v629_v4 = vpop.permute.xlu0 %628 }
  0xb0   : > { %v482_v49 = vadd.f32 %v476_v41, %v440_v44 }
  0xb4   : > { %v518_v45 = vpop.f32.mrf.mxu2 }
  0xb5   : > { %v524_v52 = vadd.f32 %v518_v45, %v482_v49 }
  0xb6   : > { %v437_v47 = vpop.f32.mrf.mxu0  ;;  %v560_v48 = vpop.f32.mrf.mxu3 }
  0xb7   : > { %v441_v50 = vadd.f32 %v437_v47, %v399_v46  ;;  %v566_v56 = vadd.f32 %v560_v48, %v524_v52 }
  0xb8   : > { %v479_v51 = vpop.f32.mrf.mxu1 }
  0xb9   : > { %v483_v54 = vadd.f32 %v479_v51, %v441_v50 }
  0xbc   : > { %v521_v55 = vpop.f32.mrf.mxu2 }
  0xbd   : > { %v525_v57 = vadd.f32 %v521_v55, %v483_v54 }
  0xbe   : > { %v563_v59 = vpop.f32.mrf.mxu3  ;;  %v602_v60 = vpop.f32.mrf.mxu0 }
  0xbf   : > { %v567_v61 = vadd.f32 %v563_v59, %v525_v57  ;;  %v608_v62 = vadd.f32 %v602_v60, %v566_v56 }
  0xc0   : > { %v605_v63 = vpop.f32.mrf.mxu1 }
  0xc1   : > { %v614_v0 = vadd.f32 %v856_v58, %v608_v62  ;;  %v609_v1 = vadd.f32 %v605_v63, %v567_v61 }
  0xc3   : > { %616 = vst.msk [vmem:[%s231_s17] sm:$0xff] %vm257_vm0, %v614_v0  ;;  %v631_v2 = vmul.f32 %v624_v53, %v614_v0  ;;  %v615_v3 = vadd.f32 %v856_v58, %v609_v1 }
  0xc5   : > { %v642_v5 = vmul.f32 %v631_v2, %v614_v0  ;;  %618 = vst.msk [vmem:[%s231_s17 + $0x8] sm:$0x7f] %vm617_vm1, %v615_v3  ;;  %v632_v6 = vmul.f32 %v629_v4, %v615_v3  ;;  %v633_v7 = vsel %vm257_vm0, %v631_v2, 0.0 }
  0xc7   : > { %v634_v8 = vsel %vm617_vm1, %v632_v6, 0.0  ;;  %v643_v9 = vmul.f32 %v632_v6, %v615_v3  ;;  %v644_v11 = vsel %vm257_vm0, %v642_v5, 0.0 }
  0xc8   : > { %v635_v10 = vadd.f32 %v634_v8, %v633_v7 }
  0xc9   : > { %v645_v12 = vsel %vm617_vm1, %v643_v9, 0.0 }
  0xca   : > { %v636_v13 = vrot.slane %v635_v10, 4  ;;  %v646_v14 = vadd.f32 %v645_v12, %v644_v11 }
  0xcc   : > { %v637_v15 = vadd.f32 %v636_v13, %v635_v10  ;;  %v647_v16 = vrot.slane %v646_v14, 4 }
  0xce   : > { %v638_v17 = vrot.slane %v637_v15, 2  ;;  %v648_v18 = vadd.f32 %v647_v16, %v646_v14 }
  0xd0   : > { %v639_v19 = vadd.f32 %v638_v17, %v637_v15  ;;  %v649_v20 = vrot.slane %v648_v18, 2 }
  0xd2   : > { %v640_v21 = vrot.slane %v639_v19, 1  ;;  %v650_v22 = vadd.f32 %v649_v20, %v648_v18 }
  0xd4   : > { %v651_v23 = vrot.slane %v650_v22, 1  ;;  %v641_v24 = vadd.f32 %v640_v21, %v639_v19 }
  0xd6   : > { %v652_v25 = vadd.f32 %v651_v23, %v650_v22 }
  0xd8   : > { %v654_v26 = vsel %vm653_vm2, %v641_v24, %v652_v25 }
  0xd9   : > { %656 = vst.msk [vmem:[%s235_s23] sm:$0x3] %vm655_vm3, %v654_v26 }
  0xda PF: > { %s16_s18 = sadd.s32 1, %s863_s18  }
  0xdb   : > { %p13_p4 = scmp.ge.s32.totalorder %s16_s18, 4  }
  0xdd   :  { %15 = sbr.rel (!%p13_p4) target bundleno = 1 (0x1), region = 86 }

// kernel: conv3_forward.12
= control target key start
LH: loop header
LB: loop body
LE: loop exit
PB: predicated region body
PF: predicated region fallthrough
CT: control target
= control target key end

     0   :  { %s293_s12 = smov 0   ;;  %s316_s0 = inlined_call_operand.vmem [shape: f32[2,3,5,64], index: 0, kind: input, shape index: {}]   ;;  %s317_s1 = inlined_call_operand.vmem [shape: f32[1,64], index: 1, kind: input, shape index: {}]   ;;  %s318_s2 = inlined_call_operand.vmem [shape: f32[1,64], index: 2, kind: input, shape index: {}]   ;;  %s319_s3 = inlined_call_operand.vmem [shape: f32[2,1,4,64], index: 3, kind: output, shape index: {}]  }
   0x1 LB: > { %s245_s13 = sadd.s32 4294967295, %s271_s12   ;;  %p249_p0 = scmp.ge.s32.totalorder %s271_s12, 1  ;;  %s271_s12 = sphi %s293_s12, %s13_s12  }
   0x2   : > { %p137_p1 = scmp.lt.s32.totalorder %s271_s12, 3 }
   0x4   : > { %p138_p2 = pnand %p249_p0, %p137_p1 }
   0x5   : > { %p160_p3 = scmp.lt.s32.totalorder (!%p138_p2), %s245_s13, 1 }
   0x6   : > { %141 = sbr.rel (%p138_p2) target bundleno = 29 (0x1d), region = 32 }
   0xb   : > { %s321_s13 = smov (!%p160_p3, %s245_s13), 1  ;;  %v263_v0 = vld [vmem:[%s317_s1] ss:$0 sm:$0xff]  ;;  %vm190_vm0 = vcmask 519168  }
   0xc   : > { %s254_s14 = smul.u32 24, %s321_s13  ;;  %v264_v1 = vld [vmem:[%s318_s2] ss:$0 sm:$0xff]  ;;  %s251_s22 = sshll.u32 %s321_s13, 2 }
   0xd   : > { %s168_s25 = scalar_lea.vmem %s319_s3, %s251_s22 }
   0xe   : > { %s164_s19 = scalar_lea.vmem %s316_s0, %s254_s14 }
   0xf   : > { %v169_v2 = vld [vmem:[%s164_s19] sm:$0x1f]  ;;  %v170_v3 = vld [vmem:[%s164_s19 + $0x8] sm:$0x1f] }
  0x10   : > { %v175_v4 = vmul.f32 %v263_v0, %v169_v2  ;;  %v176_v5 = vmul.f32 %v263_v0, %v170_v3 }
  0x12   : > { %v181_v6 = vadd.f32 %v264_v1, %v175_v4  ;;  %v182_v7 = vadd.f32 %v264_v1, %v176_v5 }
  0x14   : > { %v183_v8 = vmax.f32 %v181_v6, 0.0  ;;  %v184_v9 = vmax.f32 %v182_v7, 0.0 }
  0x16   : > { %v185_v10 = vmax.f32 %v183_v8, %v184_v9 }
  0x18   : > { %v187_v11 = vrot.slane %v185_v10, 1 }
  0x1a   : > { %v189_v12 = vmax.f32 %v185_v10, %v187_v11 }
  0x1c   : > { %191 = vst.msk [vmem:[%s168_s25] sm:$0xf] %vm190_vm0, %v189_v12 }
  0x1d PF: > { %s13_s12 = sadd.s32 1, %s271_s12  }
  0x1e   : > { %p10_p4 = scmp.ge.s32.totalorder %s13_s12, 4  }
  0x20   :  { %12 = sbr.rel (!%p10_p4) target bundleno = 1 (0x1), region = 62 }

// kernel: conv3_forward.9
= control target key start
LH: loop header
LB: loop body
LE: loop exit
PB: predicated region body
PF: predicated region fallthrough
CT: control target
= control target key end

     0   :  { %s2401_s18 = smov 0   ;;  %s3266_s0 = inlined_call_operand.vmem [shape: f32[2,177,64], index: 0, kind: input, shape index: {}]   ;;  %s3267_s1 = inlined_call_operand.vmem [shape: f32[9,64,64], index: 1, kind: input, shape index: {}]   ;;  %s3268_s2 = inlined_call_operand.vmem [shape: f32[1,64], index: 2, kind: input, shape index: {}]   ;;  %s3269_s3 = inlined_call_operand.vmem [shape: f32[143,1], index: 3, kind: input, shape index: {}]   ;;  %s3270_s4 = inlined_call_operand.vmem [shape: f32[2,143,64], index: 4, kind: output, shape index: {0}]   ;;  %s3271_s5 = inlined_call_operand.vmem [shape: f32[2,2,64], index: 5, kind: output, shape index: {1}]  }
   0x1 LB: > { %s2087_s19 = sadd.s32 4294967295, %s2368_s18   ;;  %p2091_p0 = scmp.ge.s32.totalorder %s2368_s18, 1  ;;  %s2368_s18 = sphi %s2401_s18, %s16_s18  }
   0x2   : > { %p190_p1 = scmp.lt.s32.totalorder %s2368_s18, 3 }
   0x4   : > { %p191_p2 = pnand %p2091_p0, %p190_p1 }
   0x5   : > { %p222_p3 = scmp.lt.s32.totalorder (!%p191_p2), %s2087_s19, 1 }
   0x6   : > { %194 = sbr.rel (%p191_p2) target bundleno = 508 (0x1fc), region = 36 }
   0xb   : > { %v2102_v0 = vld [vmem:[%s3267_s1 + $0x78] sm:$0xff]  ;;  %v2101_v1 = vld [vmem:[%s3267_s1 + $0x70] sm:$0xff]  ;;  %v2100_v2 = vld [vmem:[%s3267_s1 + $0x68] sm:$0xff]  ;;  %s3273_s19 = smov (!%p222_p3, %s2087_s19), 1  ;;  %vm289_vm0 = vcmask 523264   ;;  %vm1769_vm1 = vcmask 522240  }
   0xc   : > { %2323 = vmatpush.msra.mxu1 %v2102_v0  ;;  %2324 = vmatpush.msra.mxu2 %v2102_v0  ;;  %v2099_v3 = vld [vmem:[%s3267_s1 + $0x60] sm:$0xff]  ;;  %v2098_v4 = vld [vmem:[%s3267_s1 + $0x58] sm:$0xff]  ;;  %s2347_s30 = smul.u32 184, %s3273_s19  ;;  %v2097_v5 = vld [vmem:[%s3267_s1 + $0x50] sm:$0xff]  ;;  %vm1997_vm2 = vcmask 1040384   ;;  %vm1999_vm3 = vcmask 517120  }
   0xd   : > { %352 = vmatpush.msra.mxu0 %v2102_v0  ;;  %2325 = vmatpush.msra.mxu3 %v2102_v0  ;;  %v2096_v6 = vld [vmem:[%s3267_s1 + $0x48] sm:$0xff]  ;;  %v2095_v7 = vld [vmem:[%s3267_s1 + $0x40] sm:$0xff]  ;;  %v2146_v10 = vld [vmem:[%s3267_s1 + $0xb8] sm:$0xff]  ;;  %s2348_s27 = smul.u32 144, %s3273_s19 }
   0xe   : > { %2326 = vmatpush.msra.mxu1 %v2101_v1  ;;  %2327 = vmatpush.msra.mxu2 %v2101_v1  ;;  %s2436_s12 = scalar_lea.vmem %s3266_s0, %s2347_s30  ;;  %v261_v11 = vld [vmem:[%s3267_s1 + $0x38] sm:$0xff]  ;;  %v2145_v12 = vld [vmem:[%s3267_s1 + $0xb0] sm:$0xff]  ;;  %v2144_v16 = vld [vmem:[%s3267_s1 + $0xa8] sm:$0xff] }
   0xf   : > { %353 = vmatpush.msra.mxu0 %v2101_v1  ;;  %2328 = vmatpush.msra.mxu3 %v2101_v1  ;;  %v267_v8 = vld [vmem:[%s2436_s12 + $0x29] sm:$0xff]  ;;  %v272_v9 = vld [vmem:[%s2436_s12 + $0x51] sm:$0xff]  ;;  %v262_v14 = vld [vmem:[%s2436_s12 + $0x1] sm:$0xff]  ;;  %s3151_s7 = scalar_lea.vmem %s3270_s4, %s2348_s27 }
  0x10   : > { %2329 = vmatpush.msra.mxu1 %v2100_v2  ;;  %2330 = vmatpush.msra.mxu2 %v2100_v2  ;;  %v260_v13 = vld [vmem:[%s3267_s1 + $0x30] sm:$0xff]  ;;  %v277_v15 = vld [vmem:[%s2436_s12 + $0x79] sm:$0xff]  ;;  %v259_v18 = vld [vmem:[%s3267_s1 + $0x28] sm:$0xff] }
  0x11   : > { %354 = vmatpush.msra.mxu0 %v2100_v2  ;;  %2331 = vmatpush.msra.mxu3 %v2100_v2  ;;  %v2198_v17 = vld [vmem:[%s3267_s1 + $0x138] sm:$0xff]  ;;  %v2143_v20 = vld [vmem:[%s3267_s1 + $0xa0] sm:$0xff]  ;;  %v2197_v21 = vld [vmem:[%s3267_s1 + $0x130] sm:$0xff] }
  0x12   : > { %2332 = vmatpush.msra.mxu1 %v2099_v3  ;;  %2333 = vmatpush.msra.mxu2 %v2099_v3  ;;  %v2172_v19 = vld [vmem:[%s3267_s1 + $0xf8] sm:$0xff]  ;;  %v258_v24 = vld [vmem:[%s3267_s1 + $0x20] sm:$0xff]  ;;  %v2196_v26 = vld [vmem:[%s3267_s1 + $0x128] sm:$0xff] }
  0x13   : > { %355 = vmatpush.msra.mxu0 %v2099_v3  ;;  %2334 = vmatpush.msra.mxu3 %v2099_v3  ;;  %v268_v22 = vld [vmem:[%s2436_s12 + $0x31] sm:$0xff]  ;;  %v273_v23 = vld [vmem:[%s2436_s12 + $0x59] sm:$0xff]  ;;  %v263_v30 = vld [vmem:[%s2436_s12 + $0x9] sm:$0xff] }
  0x14   : > { %2335 = vmatpush.msra.mxu1 %v2098_v4  ;;  %2336 = vmatpush.msra.mxu2 %v2098_v4  ;;  %v2142_v25 = vld [vmem:[%s3267_s1 + $0x98] sm:$0xff]  ;;  %v2171_v27 = vld [vmem:[%s3267_s1 + $0xf0] sm:$0xff]  ;;  %v2170_v31 = vld [vmem:[%s3267_s1 + $0xe8] sm:$0xff] }
  0x15   : > { %356 = vmatpush.msra.mxu0 %v2098_v4  ;;  %2337 = vmatpush.msra.mxu3 %v2098_v4  ;;  %v257_v28 = vld [vmem:[%s3267_s1 + $0x18] sm:$0xff]  ;;  %v2141_v29 = vld [vmem:[%s3267_s1 + $0x90] sm:$0xff]  ;;  %v2195_v32 = vld [vmem:[%s3267_s1 + $0x120] sm:$0xff] }
  0x16   : > { %2338 = vmatpush.msra.mxu1 %v2097_v5  ;;  %2339 = vmatpush.msra.mxu2 %v2097_v5  ;;  %v278_v33 = vld [vmem:[%s2436_s12 + $0x81] sm:$0xff]  ;;  %v256_v35 = vld [vmem:[%s3267_s1 + $0x10] sm:$0xff]  ;;  %v2194_v37 = vld [vmem:[%s3267_s1 + $0x118] sm:$0xff] }
  0x17   : > { %357 = vmatpush.msra.mxu0 %v2097_v5  ;;  %2340 = vmatpush.msra.mxu3 %v2097_v5  ;;  %v2169_v34 = vld [vmem:[%s3267_s1 + $0xe0] sm:$0xff]  ;;  %v2140_v36 = vld [vmem:[%s3267_s1 + $0x88] sm:$0xff]  ;;  %v2168_v40 = vld [vmem:[%s3267_s1 + $0xd8] sm:$0xff] }
  0x18   : > { %2341 = vmatpush.msra.mxu1 %v2096_v6  ;;  %2342 = vmatpush.msra.mxu2 %v2096_v6  ;;  %v269_v38 = vld [vmem:[%s2436_s12 + $0x39] sm:$0xff]  ;;  %v274_v39 = vld [vmem:[%s2436_s12 + $0x61] sm:$0xff]  ;;  %v2193_v43 = vld [vmem:[%s3267_s1 + $0x110] sm:$0xff] }
  0x19   : > { %358 = vmatpush.msra.mxu0 %v2096_v6  ;;  %2343 = vmatpush.msra.mxu3 %v2096_v6  ;;  %v255_v41 = vld [vmem:[%s3267_s1 + $0x8] sm:$0xff]  ;;  %v2139_v42 = vld [vmem:[%s3267_s1 + $0x80] sm:$0xff]  ;;  %v2167_v44 = vld [vmem:[%s3267_s1 + $0xd0] sm:$0xff] }
  0x1a   : > { %2344 = vmatpush.msra.mxu1 %v2095_v7  ;;  %2345 = vmatpush.msra.mxu2 %v2095_v7  ;;  %v254_v45 = vld [vmem:[%s3267_s1] sm:$0xff]  ;;  %v264_v46 = vld [vmem:[%s2436_s12 + $0x11] sm:$0xff]  ;;  %v279_v48 = vld [vmem:[%s2436_s12 + $0x89] sm:$0x7f] }
  0x1b   : > { %2108 = vmatmul.msk.f32.vlgmr.msra.gmra.mxu1 %vm289_vm0, %v267_v8  ;;  %2113 = vmatmul.msk.f32.vlgmr.msra.gmra.mxu2 %vm289_vm0, %v272_v9  ;;  %v2250_v47 = vld [vmem:[%s3267_s1 + $0x1b8] sm:$0xff]  ;;  %v2192_v49 = vld [vmem:[%s3267_s1 + $0x108] sm:$0xff]  ;;  %v2191_v52 = vld [vmem:[%s3267_s1 + $0x100] sm:$0xff] }
  0x1c   : > { %629 = vmatpush.msrb.mxu2 %v2146_v10  ;;  %477 = vmatpush.msrb.mxu1 %v261_v11  ;;  %v2166_v50 = vld [vmem:[%s3267_s1 + $0xc8] sm:$0xff]  ;;  %v2224_v51 = vld [vmem:[%s3267_s1 + $0x178] sm:$0xff]  ;;  %v2165_v55 = vld [vmem:[%s3267_s1 + $0xc0] sm:$0xff] }
  0x1d   : > { %359 = vmatpush.msra.mxu0 %v2095_v7  ;;  %2346 = vmatpush.msra.mxu3 %v2095_v7  ;;  %v270_v53 = vld [vmem:[%s2436_s12 + $0x41] sm:$0xff]  ;;  %v275_v54 = vld [vmem:[%s2436_s12 + $0x69] sm:$0xff]  ;;  %v2302_v56 = vld [vmem:[%s3267_s1 + $0x238] sm:$0xff] }
  0x1e   : > { %630 = vmatpush.msrb.mxu2 %v2145_v12  ;;  %478 = vmatpush.msrb.mxu1 %v260_v13  ;;  %v2276_v57 = vld [vmem:[%s3267_s1 + $0x1f8] sm:$0xff]  ;;  %v2249_v58 = vld [vmem:[%s3267_s1 + $0x1b0] sm:$0xff]  ;;  %v266_v2 = vld [vmem:[%s2436_s12 + $0x21] sm:$0xff] }
  0x1f   : > { %2103 = vmatmul.msk.f32.vlgmr.msra.gmra.mxu0 %vm289_vm0, %v262_v14  ;;  %2118 = vmatmul.msk.f32.vlgmr.msra.gmra.mxu3 %vm289_vm0, %v277_v15  ;;  %v265_v59 = vld [vmem:[%s2436_s12 + $0x19] sm:$0xff]  ;;  %v2275_v60 = vld [vmem:[%s3267_s1 + $0x1f0] sm:$0xff]  ;;  %v540_v5 = vld [vmem:[%s2436_s12 + $0x2] sm:$0xff] }
  0x20   : > { %631 = vmatpush.msrb.mxu2 %v2144_v16  ;;  %969 = vmatpush.msrb.mxu0 %v2198_v17  ;;  %v2223_v61 = vld [vmem:[%s3267_s1 + $0x170] sm:$0xff]  ;;  %v236_v4 = vld [vmem:[%s2436_s12] sm:$0xff]  ;;  %v2248_v6 = vld [vmem:[%s3267_s1 + $0x1a8] sm:$0xff] }
  0x21   : > { %479 = vmatpush.msrb.mxu1 %v259_v18  ;;  %799 = vmatpush.msrb.mxu3 %v2172_v19  ;;  %v710_v62 = vld [vmem:[%s2436_s12 + $0xd] sm:$0xff]  ;;  %v711_v3 = vld [vmem:[%s2436_s12 + $0x15] sm:$0xff]  ;;  %v712_v9 = vld [vmem:[%s2436_s12 + $0x1d] sm:$0xff] }
  0x22   : > { %632 = vmatpush.msrb.mxu2 %v2143_v20  ;;  %970 = vmatpush.msrb.mxu0 %v2197_v21  ;;  %v271_v63 = vld [vmem:[%s2436_s12 + $0x49] sm:$0xff]  ;;  %v276_v0 = vld [vmem:[%s2436_s12 + $0x71] sm:$0xff]  ;;  %v2247_v18 = vld [vmem:[%s3267_s1 + $0x1a0] sm:$0xff] }
  0x23   : > { %2109 = vmatmul.msk.f32.gmra.mxu1 %vm289_vm0, %v268_v22  ;;  %2114 = vmatmul.msk.f32.gmra.mxu2 %vm289_vm0, %v273_v23  ;;  %v2301_v1 = vld [vmem:[%s3267_s1 + $0x230] sm:$0xff]  ;;  %v2274_v8 = vld [vmem:[%s3267_s1 + $0x1e8] sm:$0xff]  ;;  %v882_v19 = vld [vmem:[%s2436_s12 + $0x1e] sm:$0xff] }
  0x24   : > { %480 = vmatpush.msrb.mxu1 %v258_v24  ;;  %633 = vmatpush.msrb.mxu2 %v2142_v25  ;;  %v880_v7 = vld [vmem:[%s2436_s12 + $0xe] sm:$0xff]  ;;  %v881_v13 = vld [vmem:[%s2436_s12 + $0x16] sm:$0xff]  ;;  %v713_v15 = vld [vmem:[%s2436_s12 + $0x25] sm:$0xff] }
  0x25   : > { %971 = vmatpush.msrb.mxu0 %v2196_v26  ;;  %800 = vmatpush.msrb.mxu3 %v2171_v27  ;;  %v237_v10 = vld [vmem:[%s2436_s12 + $0x8] sm:$0xff]  ;;  %v238_v16 = vld [vmem:[%s2436_s12 + $0x10] sm:$0xff]  ;;  %v239_v21 = vld [vmem:[%s2436_s12 + $0x18] sm:$0xff] }
  0x26   : > { %481 = vmatpush.msrb.mxu1 %v257_v28  ;;  %634 = vmatpush.msrb.mxu2 %v2141_v29  ;;  %v541_v11 = vld [vmem:[%s2436_s12 + $0xa] sm:$0xff]  ;;  %v542_v17 = vld [vmem:[%s2436_s12 + $0x12] sm:$0xff]  ;;  %v2641_v22 = vld [vmem:[%s2436_s12 + $0x1a] sm:$0xff] }
  0x27   : > { %2104 = vmatmul.msk.f32.gmra.mxu0 %vm289_vm0, %v263_v30  ;;  %801 = vmatpush.msrb.mxu3 %v2170_v31  ;;  %v2222_v12 = vld [vmem:[%s3267_s1 + $0x168] sm:$0xff]  ;;  %v2273_v23 = vld [vmem:[%s3267_s1 + $0x1e0] sm:$0xff]  ;;  %v715_v26 = vld [vmem:[%s2436_s12 + $0x35] sm:$0xff] }
  0x28   : > { %972 = vmatpush.msrb.mxu0 %v2195_v32  ;;  %2119 = vmatmul.msk.f32.gmra.mxu3 %vm289_vm0, %v278_v33  ;;  %v2300_v14 = vld [vmem:[%s3267_s1 + $0x228] sm:$0xff]  ;;  %v2221_v25 = vld [vmem:[%s3267_s1 + $0x160] sm:$0xff] }
  0x29   : > { %802 = vmatpush.msrb.mxu3 %v2169_v34  ;;  %482 = vmatpush.msrb.mxu1 %v256_v35  ;;  %v714_v20 = vld [vmem:[%s2436_s12 + $0x2d] sm:$0xff]  ;;  %v240_v27 = vld [vmem:[%s2436_s12 + $0x20] sm:$0xff]  ;;  %v2246_v34 = vld [vmem:[%s3267_s1 + $0x198] sm:$0xff] }
  0x2a   : > { %635 = vmatpush.msrb.mxu2 %v2140_v36  ;;  %973 = vmatpush.msrb.mxu0 %v2194_v37  ;;  %v883_v24 = vld [vmem:[%s2436_s12 + $0x26] sm:$0xff]  ;;  %v884_v30 = vld [vmem:[%s2436_s12 + $0x2e] sm:$0xff]  ;;  %v716_v31 = vld [vmem:[%s2436_s12 + $0x3d] sm:$0xff] }
  0x2b   : > { %2110 = vmatmul.msk.f32.gmra.mxu1 %vm289_vm0, %v269_v38  ;;  %2115 = vmatmul.msk.f32.gmra.mxu2 %vm289_vm0, %v274_v39  ;;  %v2658_v28 = vld [vmem:[%s2436_s12 + $0x22] sm:$0xff]  ;;  %v2672_v33 = vld [vmem:[%s2436_s12 + $0x2a] sm:$0xff]  ;;  %v885_v35 = vld [vmem:[%s2436_s12 + $0x36] sm:$0xff] }
  0x2c   : > { %803 = vmatpush.msrb.mxu3 %v2168_v40  ;;  %483 = vmatpush.msrb.mxu1 %v255_v41  ;;  %v2299_v29 = vld [vmem:[%s3267_s1 + $0x220] sm:$0xff]  ;;  %v241_v32 = vld [vmem:[%s2436_s12 + $0x28] sm:$0xff]  ;;  %v2272_v36 = vld [vmem:[%s3267_s1 + $0x1d8] sm:$0xff] }
  0x2d   : > { %636 = vmatpush.msrb.mxu2 %v2139_v42  ;;  %974 = vmatpush.msrb.mxu0 %v2193_v43  ;;  %v2220_v37 = vld [vmem:[%s3267_s1 + $0x158] sm:$0xff]  ;;  %v717_v38 = vld [vmem:[%s2436_s12 + $0x45] sm:$0xff]  ;;  %v242_v39 = vld [vmem:[%s2436_s12 + $0x30] sm:$0xff] }
  0x2e   : > { %804 = vmatpush.msrb.mxu3 %v2167_v44  ;;  %484 = vmatpush.msrb.mxu1 %v254_v45  ;;  %v2692_v40 = vld [vmem:[%s2436_s12 + $0x32] sm:$0xff]  ;;  %v886_v42 = vld [vmem:[%s2436_s12 + $0x3e] sm:$0xff] }
  0x2f   : > { %2105 = vmatmul.msk.f32.gmra.mxu0 %vm289_vm0, %v264_v46  ;;  %1309 = vmatpush.msra.mxu2 %v2250_v47  ;;  %v2298_v41 = vld [vmem:[%s3267_s1 + $0x218] sm:$0xff]  ;;  %v718_v43 = vld [vmem:[%s2436_s12 + $0x4d] sm:$0xff] }
  0x30   : > { %2120 = vmatmul.msk.f32.gmra.mxu3 %vm289_vm0, %v279_v48  ;;  %975 = vmatpush.msrb.mxu0 %v2192_v49  ;;  %v243_v44 = vld [vmem:[%s2436_s12 + $0x38] sm:$0xff]  ;;  %v2245_v46 = vld [vmem:[%s3267_s1 + $0x190] sm:$0xff]  ;;  %v887_v47 = vld [vmem:[%s2436_s12 + $0x46] sm:$0xff] }
  0x31   : > { %805 = vmatpush.msrb.mxu3 %v2166_v50  ;;  %1139 = vmatpush.msra.mxu1 %v2224_v51  ;;  %v2706_v45 = vld [vmem:[%s2436_s12 + $0x3a] sm:$0xff]  ;;  %v2271_v49 = vld [vmem:[%s3267_s1 + $0x1d0] sm:$0xff]  ;;  %v2723_v51 = vld [vmem:[%s2436_s12 + $0x42] sm:$0xff] }
  0x32   : > { %976 = vmatpush.msrb.mxu0 %v2191_v52  ;;  %1310 = vmatpush.msra.mxu2 %v2249_v58  ;;  %v719_v48 = vld [vmem:[%s2436_s12 + $0x55] sm:$0xff]  ;;  %v244_v50 = vld [vmem:[%s2436_s12 + $0x40] sm:$0xff] }
  0x33   : > { %2111 = vmatmul.msk.f32.gmra.mxu1 %vm289_vm0, %v270_v53  ;;  %2116 = vmatmul.msk.f32.gmra.mxu2 %vm289_vm0, %v275_v54  ;;  %v2219_v52 = vld [vmem:[%s3267_s1 + $0x150] sm:$0xff]  ;;  %v720_v54 = vld [vmem:[%s2436_s12 + $0x5d] sm:$0xff] }
  0x34   : > { %806 = vmatpush.msrb.mxu3 %v2165_v55  ;;  %1649 = vmatpush.msra.mxu0 %v2302_v56  ;;  %v888_v53 = vld [vmem:[%s2436_s12 + $0x4e] sm:$0xff]  ;;  %v889_v58 = vld [vmem:[%s2436_s12 + $0x56] sm:$0xff] }
  0x35   : > { %1140 = vmatpush.msra.mxu1 %v2223_v61  ;;  %1311 = vmatpush.msra.mxu2 %v2248_v6  ;;  %v2297_v55 = vld [vmem:[%s3267_s1 + $0x210] sm:$0xff]  ;;  %v245_v56 = vld [vmem:[%s2436_s12 + $0x48] sm:$0xff] }
  0x36   : > { %1479 = vmatpush.msra.mxu3 %v2276_v57  ;;  %1650 = vmatpush.msra.mxu0 %v2301_v1  ;;  %v2740_v57 = vld [vmem:[%s2436_s12 + $0x4a] sm:$0xff]  ;;  %v890_v1 = vld [vmem:[%s2436_s12 + $0x5e] sm:$0xff] }
  0x37   : > { %2106 = vmatmul.msk.f32.gmra.mxu0 %vm289_vm0, %v265_v59  ;;  %1141 = vmatpush.msra.mxu1 %v2222_v12  ;;  %v721_v59 = vld [vmem:[%s2436_s12 + $0x65] sm:$0xff]  ;;  %v246_v61 = vld [vmem:[%s2436_s12 + $0x50] sm:$0xff] }
  0x38   : > { %1480 = vmatpush.msra.mxu3 %v2275_v60  ;;  %1651 = vmatpush.msra.mxu0 %v2300_v14  ;;  %v2244_v60 = vld [vmem:[%s3267_s1 + $0x188] sm:$0xff]  ;;  %v248_v12 = vld [vmem:[%s2436_s12 + $0x60] sm:$0xff] }
  0x39   : > { %2173 = vmatmul.msk.f32.vlgmr.msrb.gmra.mxu3 %vm289_vm0, %v710_v62  ;;  %1312 = vmatpush.msra.mxu2 %v2247_v18  ;;  %v2754_v62 = vld [vmem:[%s2436_s12 + $0x52] sm:$0xff]  ;;  %v2296_v6 = vld [vmem:[%s3267_s1 + $0x208] sm:$0xff]  ;;  %v2243_v14 = vld [vmem:[%s3267_s1 + $0x180] sm:$0xff] }
  0x3a   : > { %1481 = vmatpush.msra.mxu3 %v2274_v8  ;;  %1142 = vmatpush.msra.mxu1 %v2221_v25  ;;  %v891_v8 = vld [vmem:[%s2436_s12 + $0x66] sm:$0xff]  ;;  %v892_v18 = vld [vmem:[%s2436_s12 + $0x6e] sm:$0xff] }
  0x3b   : > { %2112 = vmatmul.msk.f32.gmra.mxu1 %vm289_vm0, %v271_v63  ;;  %2117 = vmatmul.msk.f32.gmra.mxu2 %vm289_vm0, %v276_v0  ;;  %v2270_v63 = vld [vmem:[%s3267_s1 + $0x1c8] sm:$0xff] }
  0x3c   : > { %1482 = vmatpush.msra.mxu3 %v2273_v23  ;;  %1652 = vmatpush.msra.mxu0 %v2299_v29  ;;  %v2218_v0 = vld [vmem:[%s3267_s1 + $0x148] sm:$0xff] }
  0x3d   : > { %1313 = vmatpush.msra.mxu2 %v2246_v34  ;;  %1143 = vmatpush.msra.mxu1 %v2220_v37  ;;  %v2821_v25 = vld [vmem:[%s2436_s12 + $0x6a] sm:$0xff] }
  0x3e   : > { %1483 = vmatpush.msra.mxu3 %v2272_v36  ;;  %1653 = vmatpush.msra.mxu0 %v2298_v41  ;;  %v2843_v36 = vld [vmem:[%s2436_s12 + $0x72] sm:$0xff] }
  0x3f   : > { %2107 = vmatmul.msk.f32.gmra.mxu0 %vm289_vm0, %v266_v2  ;;  %1314 = vmatpush.msra.mxu2 %v2245_v46  ;;  %v722_v2 = vld [vmem:[%s2436_s12 + $0x6d] sm:$0xff]  ;;  %v2862_v46 = vld [vmem:[%s2436_s12 + $0x7a] sm:$0xff] }
  0x40   : > { %1484 = vmatpush.msra.mxu3 %v2271_v49  ;;  %1144 = vmatpush.msra.mxu1 %v2219_v52  ;;  %v726_v41 = vld [vmem:[%s2436_s12 + $0x8d] sm:$0xff] }
  0x41   : > { %2174 = vmatmul.msk.f32.gmra.mxu3 %vm289_vm0, %v711_v3  ;;  %1654 = vmatpush.msra.mxu0 %v2297_v55  ;;  %v895_v49 = vld [vmem:[%s2436_s12 + $0x86] sm:$0xff] }
  0x42   : > { %1315 = vmatpush.msra.mxu2 %v2244_v60  ;;  %1485 = vmatpush.msra.mxu3 %v2270_v63  ;;  %v2877_v55 = vld [vmem:[%s2436_s12 + $0x82] sm:$0xff] }
  0x43   : > { %2121 = vmatmul.msk.f32.vlgmr.msrb.gmra.mxu1 %vm289_vm0, %v236_v4  ;;  %2147 = vmatmul.msk.f32.vlgmr.msrb.gmra.mxu2 %vm289_vm0, %v540_v5  ;;  %v247_v4 = vld [vmem:[%s2436_s12 + $0x58] sm:$0xff] }
  0x44   : > { %1145 = vmatpush.msra.mxu1 %v2218_v0  ;;  %v2773_v5 = vld [vmem:[%s2436_s12 + $0x5a] sm:$0xff]  ;;  %1655 = vmatpush.msra.mxu0 %v2296_v6 }
  0x45   : > { %1316 = vmatpush.msra.mxu2 %v2243_v14  ;;  %v897_v14 = vld [vmem:[%s2436_s12 + $0x96] sm:$0x7f] }
  0x47   : > { %2199 = vmatmul.msk.f32.vlgmr.msrb.gmra.mxu0 %vm289_vm0, %v880_v7 }
  0x49   : > { %2175 = vmatmul.msk.f32.gmra.mxu3 %vm289_vm0, %v712_v9  ;;  %v723_v9 = vld [vmem:[%s2436_s12 + $0x75] sm:$0xff] }
  0x4b   : > { %2122 = vmatmul.msk.f32.gmra.mxu1 %vm289_vm0, %v237_v10  ;;  %2148 = vmatmul.msk.f32.gmra.mxu2 %vm289_vm0, %v541_v11 }
  0x4f   : > { %2200 = vmatmul.msk.f32.gmra.mxu0 %vm289_vm0, %v881_v13  ;;  %v2793_v13 = vld [vmem:[%s2436_s12 + $0x62] sm:$0xff] }
  0x51   : > { %2176 = vmatmul.msk.f32.gmra.mxu3 %vm289_vm0, %v713_v15 }
  0x53   : > { %2123 = vmatmul.msk.f32.gmra.mxu1 %vm289_vm0, %v238_v16  ;;  %2149 = vmatmul.msk.f32.gmra.mxu2 %vm289_vm0, %v542_v17  ;;  %v2269_v16 = vld [vmem:[%s3267_s1 + $0x1c0] sm:$0xff] }
  0x54   : > { %1486 = vmatpush.msra.mxu3 %v2269_v16  ;;  %v2370_v16 = vmov 0  }
  0x55   : > { %2358 = vset.pattern.permute.xlu0 %v2370_v16  ;;  %2359 = vset.pattern.permute.xlu1 %v2370_v16 }
  0x56   : > { %2360 = vset.pattern.permute.xlu2 %v2370_v16 }
  0x57   : > { %2201 = vmatmul.msk.f32.gmra.mxu0 %vm289_vm0, %v882_v19  ;;  %v2217_v19 = vld [vmem:[%s3267_s1 + $0x140] sm:$0xff] }
  0x58   : > { %1146 = vmatpush.msra.mxu1 %v2217_v19  ;;  %v1391_v19 = vld [vmem:[%s2436_s12 + $0x23] sm:$0xff] }
  0x59   : > { %2177 = vmatmul.msk.f32.gmra.mxu3 %vm289_vm0, %v714_v20  ;;  %v724_v20 = vld [vmem:[%s2436_s12 + $0x7d] sm:$0xff] }
  0x5b   : > { %2124 = vmatmul.msk.f32.gmra.mxu1 %vm289_vm0, %v239_v21  ;;  %2150 = vmatmul.msk.f32.gmra.mxu2 %vm289_vm0, %v2641_v22 }
  0x5f   : > { %2202 = vmatmul.msk.f32.gmra.mxu0 %vm289_vm0, %v883_v24  ;;  %v249_v24 = vld [vmem:[%s2436_s12 + $0x68] sm:$0xff] }
  0x61   : > { %2178 = vmatmul.msk.f32.gmra.mxu3 %vm289_vm0, %v715_v26 }
  0x63   : > { %2125 = vmatmul.msk.f32.gmra.mxu1 %vm289_vm0, %v240_v27  ;;  %2151 = vmatmul.msk.f32.gmra.mxu2 %vm289_vm0, %v2658_v28  ;;  %v2295_v27 = vld [vmem:[%s3267_s1 + $0x200] sm:$0xff] }
  0x64   : > { %1656 = vmatpush.msra.mxu0 %v2295_v27 }
  0x67   : > { %2203 = vmatmul.msk.f32.gmra.mxu0 %vm289_vm0, %v884_v30  ;;  %v893_v30 = vld [vmem:[%s2436_s12 + $0x76] sm:$0xff] }
  0x69   : > { %2179 = vmatmul.msk.f32.gmra.mxu3 %vm289_vm0, %v716_v31  ;;  %v725_v31 = vld [vmem:[%s2436_s12 + $0x85] sm:$0xff] }
  0x6b   : > { %2126 = vmatmul.msk.f32.gmra.mxu1 %vm289_vm0, %v241_v32  ;;  %2152 = vmatmul.msk.f32.gmra.mxu2 %vm289_vm0, %v2672_v33 }
  0x6f   : > { %2204 = vmatmul.msk.f32.gmra.mxu0 %vm289_vm0, %v885_v35  ;;  %v250_v35 = vld [vmem:[%s2436_s12 + $0x70] sm:$0xff] }
  0x71   : > { %2180 = vmatmul.msk.f32.gmra.mxu3 %vm289_vm0, %v717_v38 }
  0x73   : > { %2127 = vmatmul.msk.f32.gmra.mxu1 %vm289_vm0, %v242_v39  ;;  %2153 = vmatmul.msk.f32.gmra.mxu2 %vm289_vm0, %v2692_v40  ;;  %v894_v39 = vld [vmem:[%s2436_s12 + $0x7e] sm:$0xff] }
  0x77   : > { %2205 = vmatmul.msk.f32.gmra.mxu0 %vm289_vm0, %v886_v42 }
  0x79   : > { %2181 = vmatmul.msk.f32.gmra.mxu3 %vm289_vm0, %v718_v43 }
  0x7b   : > { %2128 = vmatmul.msk.f32.gmra.mxu1 %vm289_vm0, %v243_v44  ;;  %2154 = vmatmul.msk.f32.gmra.mxu2 %vm289_vm0, %v2706_v45  ;;  %v251_v44 = vld [vmem:[%s2436_s12 + $0x78] sm:$0xff] }
  0x7f   : > { %2206 = vmatmul.msk.f32.gmra.mxu0 %vm289_vm0, %v887_v47 }
  0x81   : > { %2182 = vmatmul.msk.f32.gmra.mxu3 %vm289_vm0, %v719_v48 }
  0x83   : > { %2129 = vmatmul.msk.f32.gmra.mxu1 %vm289_vm0, %v244_v50  ;;  %2155 = vmatmul.msk.f32.gmra.mxu2 %vm289_vm0, %v2723_v51  ;;  %v727_v50 = vld [vmem:[%s2436_s12 + $0x95] sm:$0x7f] }
  0x87   : > { %2207 = vmatmul.msk.f32.gmra.mxu0 %vm289_vm0, %v888_v53 }
  0x89   : > { %2183 = vmatmul.msk.f32.gmra.mxu3 %vm289_vm0, %v720_v54  ;;  %v252_v54 = vld [vmem:[%s2436_s12 + $0x80] sm:$0xff] }
  0x8b   : > { %2130 = vmatmul.msk.f32.gmra.mxu1 %vm289_vm0, %v245_v56  ;;  %2156 = vmatmul.msk.f32.gmra.mxu2 %vm289_vm0, %v2740_v57 }
  0x8f   : > { %2208 = vmatmul.msk.f32.gmra.mxu0 %vm289_vm0, %v889_v58 }
  0x91   : > { %2184 = vmatmul.msk.f32.gmra.mxu3 %vm289_vm0, %v721_v59  ;;  %v896_v59 = vld [vmem:[%s2436_s12 + $0x8e] sm:$0xff] }
  0x93   : > { %2131 = vmatmul.msk.f32.gmra.mxu1 %vm289_vm0, %v246_v61  ;;  %2157 = vmatmul.msk.f32.gmra.mxu2 %vm289_vm0, %v2754_v62  ;;  %v1390_v61 = vld [vmem:[%s2436_s12 + $0x1b] sm:$0xff] }
  0x97   : > { %2209 = vmatmul.msk.f32.gmra.mxu0 %vm289_vm0, %v890_v1 }
  0x98   : > { %v2769_v3 = vpop.f32.mrf.mxu1 }
  0x99   : > { %2185 = vmatmul.msk.f32.gmra.mxu3 %vm289_vm0, %v722_v2  ;;  %v253_v2 = vld [vmem:[%s2436_s12 + $0x88] sm:$0x7f] }
  0x9b   : > { %2132 = vmatmul.msk.f32.gmra.mxu1 %vm289_vm0, %v247_v4  ;;  %2158 = vmatmul.msk.f32.gmra.mxu2 %vm289_vm0, %v2773_v5  ;;  %v557_v4 = vld [vmem:[%s2436_s12 + $0x8a] sm:$0x7f] }
  0x9c   : > { %v2782_v7 = vpop.f32.mrf.mxu0 }
  0x9e   : > { %v2786_v10 = vpop.f32.mrf.mxu2 }
  0x9f   : > { %2210 = vmatmul.msk.f32.gmra.mxu0 %vm289_vm0, %v891_v8 }
  0xa0   : > { %v2789_v11 = vpop.f32.mrf.mxu1 }
  0xa1   : > { %2186 = vmatmul.msk.f32.gmra.mxu3 %vm289_vm0, %v723_v9  ;;  %v1771_v9 = vld [vmem:[%s3269_s3] sm:$0xff] }
  0xa2   : > { %v2799_v15 = vpop.f32.mrf.mxu3  ;;  %1791 = vperm.xlu0 %2358, %v1771_v9   ;;  %v1774_v9 = vld [vmem:[%s3269_s3 + $0x18] sm:$0xff] }
  0xa3   : > { %2133 = vmatmul.msk.f32.gmra.mxu1 %vm289_vm0, %v248_v12  ;;  %2159 = vmatmul.msk.f32.gmra.mxu2 %vm289_vm0, %v2793_v13 }
  0xa4   : > { %v2807_v17 = vpop.f32.mrf.mxu0 }
  0xa6   : > { %v2814_v21 = vpop.f32.mrf.mxu2 }
  0xa7   : > { %2211 = vmatmul.msk.f32.gmra.mxu0 %vm289_vm0, %v892_v18 }
  0xa8   : > { %v2817_v23 = vpop.f32.mrf.mxu1 }
  0xa9   : > { %2187 = vmatmul.msk.f32.gmra.mxu3 %vm289_vm0, %v724_v20 }
  0xab   : > { %2134 = vmatmul.msk.f32.gmra.mxu1 %vm289_vm0, %v249_v24  ;;  %2160 = vmatmul.msk.f32.gmra.mxu2 %vm289_vm0, %v2821_v25  ;;  %v2827_v26 = vpop.f32.mrf.mxu3 }
  0xac   : > { %v2832_v29 = vpop.f32.mrf.mxu0 }
  0xae   : > { %v2836_v32 = vpop.f32.mrf.mxu2 }
  0xaf   : > { %2212 = vmatmul.msk.f32.gmra.mxu0 %vm289_vm0, %v893_v30  ;;  %v1050_v30 = vld [vmem:[%s2436_s12 + $0xf] sm:$0xff] }
  0xb0   : > { %v2839_v34 = vpop.f32.mrf.mxu1 }
  0xb1   : > { %2188 = vmatmul.msk.f32.gmra.mxu3 %vm289_vm0, %v725_v31 }
  0xb3   : > { %2135 = vmatmul.msk.f32.gmra.mxu1 %vm289_vm0, %v250_v35  ;;  %2161 = vmatmul.msk.f32.gmra.mxu2 %vm289_vm0, %v2843_v36  ;;  %v2849_v37 = vpop.f32.mrf.mxu3 }
  0xb4   : > { %v2851_v38 = vpop.f32.mrf.mxu0 }
  0xb6   : > { %v2855_v42 = vpop.f32.mrf.mxu2 }
  0xb7   : > { %2213 = vmatmul.msk.f32.gmra.mxu0 %vm289_vm0, %v894_v39  ;;  %v1772_v39 = vld [vmem:[%s3269_s3 + $0x8] sm:$0xff] }
  0xb8   : > { %v2858_v43 = vpop.f32.mrf.mxu1  ;;  %1796 = vperm.xlu0 %2358, %v1772_v39  }
  0xb9   : > { %2189 = vmatmul.msk.f32.gmra.mxu3 %vm289_vm0, %v726_v41 }
  0xbb   : > { %2136 = vmatmul.msk.f32.gmra.mxu1 %vm289_vm0, %v251_v44  ;;  %2162 = vmatmul.msk.f32.gmra.mxu2 %vm289_vm0, %v2862_v46  ;;  %v1560_v44 = vld [vmem:[%s2436_s12 + $0x1c] sm:$0xff] }
  0xbc   : > { %v808_v47 = vpop.f32.mrf.mxu3  ;;  %v2868_v48 = vpop.f32.mrf.mxu0 }
  0xbe   : > { %v2872_v52 = vpop.f32.mrf.mxu2 }
  0xbf   : > { %2214 = vmatmul.msk.f32.gmra.mxu0 %vm289_vm0, %v895_v49  ;;  %v1392_v49 = vld [vmem:[%s2436_s12 + $0x2b] sm:$0xff] }
  0xc0   : > { %v486_v53 = vpop.f32.mrf.mxu1 }
  0xc1   : > { %2190 = vmatmul.msk.f32.gmra.mxu3 %vm289_vm0, %v727_v50  ;;  %v487_v60 = vadd.f32 %v486_v53, %v2782_v7 }
  0xc3   : > { %2137 = vmatmul.msk.f32.gmra.mxu1 %vm289_vm0, %v252_v54  ;;  %2163 = vmatmul.msk.f32.gmra.mxu2 %vm289_vm0, %v2877_v55 }
  0xc4   : > { %v811_v56 = vpop.f32.mrf.mxu3  ;;  %v978_v58 = vpop.f32.mrf.mxu0 }
  0xc6   : > { %v638_v63 = vpop.f32.mrf.mxu2 }
  0xc7   : > { %v692_v0 = vadd.f32 %v638_v63, %v487_v60  ;;  %2215 = vmatmul.msk.f32.gmra.mxu0 %vm289_vm0, %v896_v59  ;;  %v1773_v59 = vld [vmem:[%s3269_s3 + $0x10] sm:$0xff] }
  0xc8   : > { %v489_v1 = vpop.f32.mrf.mxu1  ;;  %1801 = vperm.xlu1 %2359, %v1773_v59  }
  0xc9   : > { %2277 = vmatmul.msk.f32.vlgmr.msra.gmra.mxu3 %vm289_vm0, %v1390_v61  ;;  %v862_v6 = vadd.f32 %v808_v47, %v692_v0  ;;  %v490_v18 = vadd.f32 %v489_v1, %v2807_v17  ;;  %v1561_v61 = vld [vmem:[%s2436_s12 + $0x24] sm:$0xff]  ;;  %v1393_v0 = vld [vmem:[%s2436_s12 + $0x33] sm:$0xff] }
  0xcb   : > { %v2890_v8 = vadd.f32 %v978_v58, %v862_v6  ;;  %2138 = vmatmul.msk.f32.gmra.mxu1 %vm289_vm0, %v253_v2  ;;  %2164 = vmatmul.msk.f32.gmra.mxu2 %vm289_vm0, %v557_v4  ;;  %v1052_v6 = vld [vmem:[%s2436_s12 + $0x1f] sm:$0xff] }
  0xcc   : > { %v814_v7 = vpop.f32.mrf.mxu3  ;;  %v981_v12 = vpop.f32.mrf.mxu0 }
  0xce   : > { %v641_v20 = vpop.f32.mrf.mxu2 }
  0xcf   : > { %v693_v24 = vadd.f32 %v641_v20, %v490_v18  ;;  %2216 = vmatmul.msk.f32.gmra.mxu0 %vm289_vm0, %v897_v14  ;;  %v1562_v14 = vld [vmem:[%s2436_s12 + $0x2c] sm:$0xff]  ;;  %v1394_v18 = vld [vmem:[%s2436_s12 + $0x3b] sm:$0xff] }
  0xd0   : > { %v492_v27 = vpop.f32.mrf.mxu1  ;;  %1806 = vperm.xlu1 %2359, %v1774_v9  }
  0xd1   : > { %2278 = vmatmul.msk.f32.gmra.mxu3 %vm289_vm0, %v1391_v19  ;;  %v863_v31 = vadd.f32 %v811_v56, %v693_v24  ;;  %v493_v47 = vadd.f32 %v492_v27, %v2832_v29  ;;  %v1051_v56 = vld [vmem:[%s2436_s12 + $0x17] sm:$0xff] }
  0xd3   : > { %v2903_v35 = vadd.f32 %v981_v12, %v863_v31  ;;  %2225 = vmatmul.msk.f32.vlgmr.msra.gmra.mxu1 %vm289_vm0, %v1050_v30  ;;  %2251 = vmatmul.msk.f32.vlgmr.msra.gmra.mxu2 %vm289_vm0, %v2641_v22 }
  0xd4   : > { %v817_v17 = vpop.f32.mrf.mxu3  ;;  %v984_v41 = vpop.f32.mrf.mxu0 }
  0xd6   : > { %v644_v50 = vpop.f32.mrf.mxu2 }
  0xd7   : > { %v694_v53 = vadd.f32 %v644_v50, %v493_v47  ;;  %2303 = vmatmul.msk.f32.vlgmr.msra.gmra.mxu0 %vm289_vm0, %v1560_v44  ;;  %v1054_v50 = vld [vmem:[%s2436_s12 + $0x2f] sm:$0xff] }
  0xd8   : > { %v495_v54 = vpop.f32.mrf.mxu1 }
  0xd9   : > { %2279 = vmatmul.msk.f32.gmra.mxu3 %vm289_vm0, %v1392_v49  ;;  %v864_v22 = vadd.f32 %v814_v7, %v694_v53  ;;  %v496_v63 = vadd.f32 %v495_v54, %v2851_v38 }
  0xdb   : > { %v2917_v58 = vadd.f32 %v984_v41, %v864_v22  ;;  %2226 = vmatmul.msk.f32.gmra.mxu1 %vm289_vm0, %v1051_v56  ;;  %2252 = vmatmul.msk.f32.gmra.mxu2 %vm289_vm0, %v2658_v28  ;;  %v1395_v41 = vld [vmem:[%s2436_s12 + $0x43] sm:$0xff] }
  0xdc   : > { %v820_v29 = vpop.f32.mrf.mxu3  ;;  %v987_v60 = vpop.f32.mrf.mxu0  ;;  %v1564_v56 = vld [vmem:[%s2436_s12 + $0x3c] sm:$0xff] }
  0xde   : > { %v647_v1 = vpop.f32.mrf.mxu2 }
  0xdf   : > { %v695_v2 = vadd.f32 %v647_v1, %v496_v63  ;;  %2304 = vmatmul.msk.f32.gmra.mxu0 %vm289_vm0, %v1561_v61  ;;  %v1055_v63 = vld [vmem:[%s2436_s12 + $0x37] sm:$0xff] }
  0xe0   : > { %v498_v4 = vpop.f32.mrf.mxu1 }
  0xe1   : > { %2280 = vmatmul.msk.f32.gmra.mxu3 %vm289_vm0, %v1393_v0  ;;  %v865_v28 = vadd.f32 %v817_v17, %v695_v2  ;;  %v499_v16 = vadd.f32 %v498_v4, %v2868_v48  ;;  %v1563_v17 = vld [vmem:[%s2436_s12 + $0x34] sm:$0xff]  ;;  %v1565_v4 = vld [vmem:[%s2436_s12 + $0x44] sm:$0xff] }
  0xe3   : > { %v2931_v7 = vadd.f32 %v987_v60, %v865_v28  ;;  %2227 = vmatmul.msk.f32.gmra.mxu1 %vm289_vm0, %v1052_v6  ;;  %2253 = vmatmul.msk.f32.gmra.mxu2 %vm289_vm0, %v2672_v33  ;;  %v1053_v33 = vld [vmem:[%s2436_s12 + $0x27] sm:$0xff]  ;;  %v1397_v28 = vld [vmem:[%s2436_s12 + $0x53] sm:$0xff] }
  0xe4   : > { %v823_v38 = vpop.f32.mrf.mxu3  ;;  %v990_v12 = vpop.f32.mrf.mxu0 }
  0xe6   : > { %v650_v19 = vpop.f32.mrf.mxu2 }
  0xe7   : > { %v696_v20 = vadd.f32 %v650_v19, %v499_v16  ;;  %2305 = vmatmul.msk.f32.gmra.mxu0 %vm289_vm0, %v1562_v14  ;;  %v1056_v14 = vld [vmem:[%s2436_s12 + $0x3f] sm:$0xff] }
  0xe8   : > { %v501_v24 = vpop.f32.mrf.mxu1  ;;  %v1778_v19 = vld [vmem:[%s3269_s3 + $0x38] sm:$0xff] }
  0xe9   : > { %2281 = vmatmul.msk.f32.gmra.mxu3 %vm289_vm0, %v1394_v18  ;;  %v866_v27 = vadd.f32 %v820_v29, %v696_v20  ;;  %v502_v39 = vadd.f32 %v501_v24, %v2769_v3  ;;  %v1396_v29 = vld [vmem:[%s2436_s12 + $0x4b] sm:$0xff]  ;;  %v1775_v18 = vld [vmem:[%s3269_s3 + $0x20] sm:$0xff]  ;;  %1826 = vperm.xlu1 %2359, %v1778_v19  }
  0xea   : > { %v1566_v24 = vld [vmem:[%s2436_s12 + $0x4c] sm:$0xff]  ;;  %1811 = vperm.xlu2 %2360, %v1775_v18   ;;  %v1783_v18 = vld [vmem:[%s3269_s3 + $0x60] sm:$0xff] }
  0xeb   : > { %v2945_v30 = vadd.f32 %v990_v12, %v866_v27  ;;  %2228 = vmatmul.msk.f32.gmra.mxu1 %vm289_vm0, %v1053_v33  ;;  %2254 = vmatmul.msk.f32.gmra.mxu2 %vm289_vm0, %v2692_v40  ;;  %v1398_v27 = vld [vmem:[%s2436_s12 + $0x5b] sm:$0xff] }
  0xec   : > { %v826_v48 = vpop.f32.mrf.mxu3  ;;  %v993_v31 = vpop.f32.mrf.mxu0 }
  0xee   : > { %v653_v44 = vpop.f32.mrf.mxu2 }
  0xef   : > { %v697_v47 = vadd.f32 %v653_v44, %v502_v39  ;;  %2306 = vmatmul.msk.f32.gmra.mxu0 %vm289_vm0, %v1563_v17  ;;  %v1057_v17 = vld [vmem:[%s2436_s12 + $0x47] sm:$0xff] }
  0xf0   : > { %v504_v49 = vpop.f32.mrf.mxu1  ;;  %v1776_v44 = vld [vmem:[%s3269_s3 + $0x28] sm:$0xff] }
  0xf1   : > { %2282 = vmatmul.msk.f32.gmra.mxu3 %vm289_vm0, %v1395_v41  ;;  %v867_v53 = vadd.f32 %v823_v38, %v697_v47  ;;  %v505_v22 = vadd.f32 %v504_v49, %v2789_v11  ;;  %v1777_v11 = vld [vmem:[%s3269_s3 + $0x30] sm:$0xff] }
  0xf2   : > { %1821 = vperm.xlu0 %2358, %v1777_v11   ;;  %v1567_v49 = vld [vmem:[%s2436_s12 + $0x54] sm:$0xff]  ;;  %1816 = vperm.xlu2 %2360, %v1776_v44  }
  0xf3   : > { %v2956_v54 = vadd.f32 %v993_v31, %v867_v53  ;;  %2229 = vmatmul.msk.f32.gmra.mxu1 %vm289_vm0, %v1054_v50  ;;  %2255 = vmatmul.msk.f32.gmra.mxu2 %vm289_vm0, %v2706_v45  ;;  %v1399_v53 = vld [vmem:[%s2436_s12 + $0x63] sm:$0xff] }
  0xf4   : > { %v829_v40 = vpop.f32.mrf.mxu3  ;;  %v996_v3 = vpop.f32.mrf.mxu0 }
  0xf6   : > { %v656_v59 = vpop.f32.mrf.mxu2 }
  0xf7   : > { %v698_v60 = vadd.f32 %v656_v59, %v505_v22  ;;  %2307 = vmatmul.msk.f32.gmra.mxu0 %vm289_vm0, %v1564_v56  ;;  %v1058_v22 = vld [vmem:[%s2436_s12 + $0x4f] sm:$0xff] }
  0xf8   : > { %v507_v61 = vpop.f32.mrf.mxu1  ;;  %v1780_v59 = vld [vmem:[%s3269_s3 + $0x48] sm:$0xff] }
  0xf9   : > { %2283 = vmatmul.msk.f32.gmra.mxu3 %vm289_vm0, %v1396_v29  ;;  %v868_v0 = vadd.f32 %v826_v48, %v698_v60  ;;  %v508_v6 = vadd.f32 %v507_v61, %v2817_v23  ;;  %v1568_v61 = vld [vmem:[%s2436_s12 + $0x5c] sm:$0xff] }
  0xfa   : > { %1836 = vperm.xlu0 %2358, %v1780_v59  }
  0xfb   : > { %v2967_v1 = vadd.f32 %v996_v3, %v868_v0  ;;  %2230 = vmatmul.msk.f32.gmra.mxu1 %vm289_vm0, %v1055_v63  ;;  %2256 = vmatmul.msk.f32.gmra.mxu2 %vm289_vm0, %v2723_v51  ;;  %v1400_v0 = vld [vmem:[%s2436_s12 + $0x6b] sm:$0xff] }
  0xfc   : > { %v832_v45 = vpop.f32.mrf.mxu3  ;;  %v999_v2 = vpop.f32.mrf.mxu0 }
  0xfe   : > { %v659_v38 = vpop.f32.mrf.mxu2 }
  0xff   : > { %v699_v9 = vadd.f32 %v659_v38, %v508_v6  ;;  %2308 = vmatmul.msk.f32.gmra.mxu0 %vm289_vm0, %v1565_v4  ;;  %v1059_v4 = vld [vmem:[%s2436_s12 + $0x57] sm:$0xff] }
 0x100   : > { %v510_v12 = vpop.f32.mrf.mxu1  ;;  %v1781_v6 = vld [vmem:[%s3269_s3 + $0x50] sm:$0xff] }
 0x101   : > { %2284 = vmatmul.msk.f32.gmra.mxu3 %vm289_vm0, %v1397_v28  ;;  %v869_v51 = vadd.f32 %v829_v40, %v699_v9  ;;  %v511_v33 = vadd.f32 %v510_v12, %v2839_v34  ;;  %1841 = vperm.xlu1 %2359, %v1781_v6   ;;  %v1569_v9 = vld [vmem:[%s2436_s12 + $0x64] sm:$0xff] }
 0x102   : > { %1851 = vperm.xlu0 %2358, %v1783_v18  }
 0x103   : > { %v2981_v16 = vadd.f32 %v999_v2, %v869_v51  ;;  %2231 = vmatmul.msk.f32.gmra.mxu1 %vm289_vm0, %v1056_v14  ;;  %2257 = vmatmul.msk.f32.gmra.mxu2 %vm289_vm0, %v2740_v57  ;;  %v1401_v14 = vld [vmem:[%s2436_s12 + $0x73] sm:$0xff] }
 0x104   : > { %v835_v23 = vpop.f32.mrf.mxu3  ;;  %v1002_v20 = vpop.f32.mrf.mxu0 }
 0x106   : > { %v662_v48 = vpop.f32.mrf.mxu2 }
 0x107   : > { %v700_v57 = vadd.f32 %v662_v48, %v511_v33  ;;  %2309 = vmatmul.msk.f32.gmra.mxu0 %vm289_vm0, %v1566_v24 }
 0x108   : > { %v513_v31 = vpop.f32.mrf.mxu1 }
 0x109   : > { %2285 = vmatmul.msk.f32.gmra.mxu3 %vm289_vm0, %v1398_v27  ;;  %v870_v39 = vadd.f32 %v832_v45, %v700_v57  ;;  %v514_v50 = vadd.f32 %v513_v31, %v2858_v43  ;;  %v1779_v27 = vld [vmem:[%s3269_s3 + $0x40] sm:$0xff]  ;;  %v1570_v57 = vld [vmem:[%s2436_s12 + $0x6c] sm:$0xff] }
 0x10a   : > { %1831 = vperm.xlu2 %2360, %v1779_v27   ;;  %v1788_v27 = vld [vmem:[%s3269_s3 + $0x88] sm:$0x7f] }
 0x10b   : > { %v2998_v41 = vadd.f32 %v1002_v20, %v870_v39  ;;  %2232 = vmatmul.msk.f32.gmra.mxu1 %vm289_vm0, %v1057_v17  ;;  %2258 = vmatmul.msk.f32.gmra.mxu2 %vm289_vm0, %v2754_v62  ;;  %v1060_v20 = vld [vmem:[%s2436_s12 + $0x5f] sm:$0xff] }
 0x10c   : > { %v838_v34 = vpop.f32.mrf.mxu3  ;;  %v1005_v47 = vpop.f32.mrf.mxu0  ;;  %v1402_v17 = vld [vmem:[%s2436_s12 + $0x7b] sm:$0xff] }
 0x10e   : > { %v665_v40 = vpop.f32.mrf.mxu2 }
 0x10f   : > { %v701_v3 = vadd.f32 %v665_v40, %v514_v50  ;;  %2310 = vmatmul.msk.f32.gmra.mxu0 %vm289_vm0, %v1567_v49 }
 0x110   : > { %v516_v56 = vpop.f32.mrf.mxu1 }
 0x111   : > { %2286 = vmatmul.msk.f32.gmra.mxu3 %vm289_vm0, %v1399_v53  ;;  %v871_v62 = vadd.f32 %v835_v23, %v701_v3  ;;  %v517_v63 = vadd.f32 %v516_v56, %v2786_v10  ;;  %v1571_v3 = vld [vmem:[%s2436_s12 + $0x74] sm:$0xff] }
 0x113   : > { %v3012_v29 = vadd.f32 %v1005_v47, %v871_v62  ;;  %2233 = vmatmul.msk.f32.gmra.mxu1 %vm289_vm0, %v1058_v22  ;;  %2259 = vmatmul.msk.f32.gmra.mxu2 %vm289_vm0, %v2773_v5  ;;  %v1061_v47 = vld [vmem:[%s2436_s12 + $0x67] sm:$0xff] }
 0x114   : > { %v841_v43 = vpop.f32.mrf.mxu3  ;;  %v1008_v60 = vpop.f32.mrf.mxu0  ;;  %v1403_v22 = vld [vmem:[%s2436_s12 + $0x83] sm:$0xff] }
 0x116   : > { %v668_v45 = vpop.f32.mrf.mxu2 }
 0x117   : > { %v702_v11 = vadd.f32 %v668_v45, %v517_v63  ;;  %2311 = vmatmul.msk.f32.gmra.mxu0 %vm289_vm0, %v1568_v61  ;;  %v1572_v45 = vld [vmem:[%s2436_s12 + $0x7c] sm:$0xff] }
 0x118   : > { %v519_v2 = vpop.f32.mrf.mxu1 }
 0x119   : > { %2287 = vmatmul.msk.f32.gmra.mxu3 %vm289_vm0, %v1400_v0  ;;  %v872_v5 = vadd.f32 %v838_v34, %v702_v11  ;;  %v520_v12 = vadd.f32 %v519_v2, %v2814_v21  ;;  %v1784_v21 = vld [vmem:[%s3269_s3 + $0x68] sm:$0xff] }
 0x11a   : > { %1856 = vperm.xlu1 %2359, %v1784_v21   ;;  %v1404_v2 = vld [vmem:[%s2436_s12 + $0x8b] sm:$0xff] }
 0x11b   : > { %v3029_v28 = vadd.f32 %v1008_v60, %v872_v5  ;;  %2234 = vmatmul.msk.f32.gmra.mxu1 %vm289_vm0, %v1059_v4  ;;  %2260 = vmatmul.msk.f32.gmra.mxu2 %vm289_vm0, %v2793_v13  ;;  %v1062_v60 = vld [vmem:[%s2436_s12 + $0x6f] sm:$0xff] }
 0x11c   : > { %v844_v10 = vpop.f32.mrf.mxu3  ;;  %v1011_v38 = vpop.f32.mrf.mxu0 }
 0x11e   : > { %v671_v51 = vpop.f32.mrf.mxu2 }
 0x11f   : > { %v703_v23 = vadd.f32 %v671_v51, %v520_v12  ;;  %2312 = vmatmul.msk.f32.gmra.mxu0 %vm289_vm0, %v1569_v9  ;;  %v1785_v9 = vld [vmem:[%s3269_s3 + $0x70] sm:$0xff] }
 0x120   : > { %v522_v19 = vpop.f32.mrf.mxu1 }
 0x121   : > { %2288 = vmatmul.msk.f32.gmra.mxu3 %vm289_vm0, %v1401_v14  ;;  %v873_v13 = vadd.f32 %v841_v43, %v703_v23  ;;  %v523_v31 = vadd.f32 %v522_v19, %v2836_v32  ;;  %v1787_v32 = vld [vmem:[%s3269_s3 + $0x80] sm:$0xff]  ;;  %v1405_v23 = vld [vmem:[%s2436_s12 + $0x93] sm:$0xff] }
 0x122   : > { %1871 = vperm.xlu1 %2359, %v1787_v32   ;;  %v1573_v14 = vld [vmem:[%s2436_s12 + $0x84] sm:$0xff] }
 0x123   : > { %v3046_v24 = vadd.f32 %v1011_v38, %v873_v13  ;;  %2235 = vmatmul.msk.f32.gmra.mxu1 %vm289_vm0, %v1060_v20  ;;  %2261 = vmatmul.msk.f32.gmra.mxu2 %vm289_vm0, %v2821_v25  ;;  %v1786_v25 = vld [vmem:[%s3269_s3 + $0x78] sm:$0xff] }
 0x124   : > { %v847_v33 = vpop.f32.mrf.mxu3  ;;  %v1014_v48 = vpop.f32.mrf.mxu0  ;;  %1866 = vperm.xlu0 %2358, %v1786_v25   ;;  %v1064_v13 = vld [vmem:[%s2436_s12 + $0x7f] sm:$0xff] }
 0x126   : > { %v674_v39 = vpop.f32.mrf.mxu2 }
 0x127   : > { %v704_v34 = vadd.f32 %v674_v39, %v523_v31  ;;  %2313 = vmatmul.msk.f32.gmra.mxu0 %vm289_vm0, %v1570_v57  ;;  %v1574_v57 = vld [vmem:[%s2436_s12 + $0x8c] sm:$0xff] }
 0x128   : > { %v525_v44 = vpop.f32.mrf.mxu1 }
 0x129   : > { %2289 = vmatmul.msk.f32.gmra.mxu3 %vm289_vm0, %v1402_v17  ;;  %v874_v49 = vadd.f32 %v844_v10, %v704_v34  ;;  %v526_v56 = vadd.f32 %v525_v44, %v2855_v42  ;;  %v1782_v42 = vld [vmem:[%s3269_s3 + $0x58] sm:$0xff]  ;;  %v1065_v44 = vld [vmem:[%s2436_s12 + $0x87] sm:$0xff] }
 0x12a   : > { %1846 = vperm.xlu2 %2360, %v1782_v42   ;;  %v1063_v10 = vld [vmem:[%s2436_s12 + $0x77] sm:$0xff] }
 0x12b   : > { %v3066_v50 = vadd.f32 %v1014_v48, %v874_v49  ;;  %2236 = vmatmul.msk.f32.gmra.mxu1 %vm289_vm0, %v1061_v47  ;;  %2262 = vmatmul.msk.f32.gmra.mxu2 %vm289_vm0, %v2843_v36  ;;  %v1406_v17 = vld [vmem:[%s2436_s12 + $0x9b] sm:$0xff]  ;;  %v1235_v47 = vld [vmem:[%s2436_s12 + $0x92] sm:$0xff] }
 0x12c   : > { %v850_v53 = vpop.f32.mrf.mxu3  ;;  %v1017_v40 = vpop.f32.mrf.mxu0 }
 0x12e   : > { %v677_v62 = vpop.f32.mrf.mxu2 }
 0x12f   : > { %v705_v43 = vadd.f32 %v677_v62, %v526_v56  ;;  %2314 = vmatmul.msk.f32.gmra.mxu0 %vm289_vm0, %v1571_v3  ;;  %v1407_v56 = vld [vmem:[%s2436_s12 + $0xa3] sm:$0x7f] }
 0x130   : > { %v528_v59 = vpop.f32.mrf.mxu1 }
 0x131   : > { %2290 = vmatmul.msk.f32.gmra.mxu3 %vm289_vm0, %v1403_v22  ;;  %v875_v61 = vadd.f32 %v847_v33, %v705_v43  ;;  %v529_v11 = vadd.f32 %v528_v59, %v2872_v52  ;;  %v1066_v59 = vld [vmem:[%s2436_s12 + $0x8f] sm:$0xff] }
 0x132   : > { %1861 = vperm.xlu2 %2360, %v1785_v9  }
 0x133   : > { %v3077_v63 = vadd.f32 %v1017_v40, %v875_v61  ;;  %2237 = vmatmul.msk.f32.gmra.mxu1 %vm289_vm0, %v1062_v60  ;;  %2263 = vmatmul.msk.f32.gmra.mxu2 %vm289_vm0, %v2862_v46  ;;  %v1575_v40 = vld [vmem:[%s2436_s12 + $0x94] sm:$0xff] }
 0x134   : > { %v853_v36 = vpop.f32.mrf.mxu3  ;;  %v1020_v0 = vpop.f32.mrf.mxu0  ;;  %v1236_v60 = vld [vmem:[%s2436_s12 + $0x9a] sm:$0xff] }
 0x136   : > { %v680_v4 = vpop.f32.mrf.mxu2 }
 0x137   : > { %v706_v5 = vadd.f32 %v680_v4, %v529_v11  ;;  %2315 = vmatmul.msk.f32.gmra.mxu0 %vm289_vm0, %v1572_v45 }
 0x138   : > { %v531_v6 = vpop.f32.mrf.mxu1 }
 0x139   : > { %2291 = vmatmul.msk.f32.gmra.mxu3 %vm289_vm0, %v1404_v2  ;;  %v876_v46 = vadd.f32 %v850_v53, %v706_v5  ;;  %v532_v51 = vadd.f32 %v531_v6, %v2799_v15  ;;  %v1067_v5 = vld [vmem:[%s2436_s12 + $0x97] sm:$0x7f]  ;;  %v1237_v6 = vld [vmem:[%s2436_s12 + $0xa2] sm:$0x7f] }
 0x13a   : > { %1876 = vperm.xlu2 %2360, %v1788_v27  }
 0x13b   : > { %v3091_v38 = vadd.f32 %v1020_v0, %v876_v46  ;;  %2238 = vmatmul.msk.f32.gmra.mxu1 %vm289_vm0, %v1063_v10  ;;  %2264 = vmatmul.msk.f32.gmra.mxu2 %vm289_vm0, %v2877_v55  ;;  %v1234_v55 = vld [vmem:[%s2436_s12 + $0x8a] sm:$0xff]  ;;  %v1576_v0 = vld [vmem:[%s2436_s12 + $0x9c] sm:$0xff] }
 0x13c   : > { %v856_v52 = vpop.f32.mrf.mxu3  ;;  %v1023_v12 = vpop.f32.mrf.mxu0  ;;  %v3144_v46 = vld [vmem:[%s3268_s2] ss:$0 sm:$0xff] }
 0x13e   : > { %v683_v18 = vpop.f32.mrf.mxu2 }
 0x13f   : > { %v707_v19 = vadd.f32 %v683_v18, %v532_v51  ;;  %2316 = vmatmul.msk.f32.gmra.mxu0 %vm289_vm0, %v1573_v14  ;;  %v1577_v14 = vld [vmem:[%s2436_s12 + $0xa4] sm:$0x7f]  ;;  %s2094_s12 = sshll.u32 %s3273_s19, 1 }
 0x140   : > { %v534_v20 = vpop.f32.mrf.mxu1  ;;  %s235_s10 = scalar_lea.vmem %s3271_s5, %s2094_s12 }
 0x141   : > { %2292 = vmatmul.msk.f32.gmra.mxu3 %vm289_vm0, %v1405_v23  ;;  %v877_v21 = vadd.f32 %v853_v36, %v707_v19  ;;  %v535_v31 = vadd.f32 %v534_v20, %v2827_v26 }
 0x143   : > { %v3106_v33 = vadd.f32 %v1023_v12, %v877_v21  ;;  %2239 = vmatmul.msk.f32.gmra.mxu1 %vm289_vm0, %v1064_v13  ;;  %2265 = vmatmul.msk.f32.gmra.mxu2 %vm289_vm0, %v1234_v55 }
 0x144   : > { %v859_v15 = vpop.f32.mrf.mxu3  ;;  %v1026_v48 = vpop.f32.mrf.mxu0 }
 0x146   : > { %v686_v39 = vpop.f32.mrf.mxu2 }
 0x147   : > { %v708_v34 = vadd.f32 %v686_v39, %v535_v31  ;;  %2317 = vmatmul.msk.f32.gmra.mxu0 %vm289_vm0, %v1574_v57 }
 0x148   : > { %v537_v25 = vpop.f32.mrf.mxu1 }
 0x149   : > { %2293 = vmatmul.msk.f32.gmra.mxu3 %vm289_vm0, %v1406_v17  ;;  %v878_v49 = vadd.f32 %v856_v52, %v708_v34  ;;  %v538_v3 = vadd.f32 %v537_v25, %v2849_v37  ;;  %v1792_v52 = vpop.permute.xlu0 %1791 }
 0x14b   : > { %v3120_v32 = vadd.f32 %v1026_v48, %v878_v49  ;;  %2240 = vmatmul.msk.f32.gmra.mxu1 %vm289_vm0, %v1065_v44  ;;  %2266 = vmatmul.msk.f32.gmra.mxu2 %vm289_vm0, %v1235_v47 }
 0x14c   : > { %v1488_v26 = vpop.f32.mrf.mxu3  ;;  %v1029_v53 = vpop.f32.mrf.mxu0 }
 0x14e   : > { %v689_v22 = vpop.f32.mrf.mxu2 }
 0x14f   : > { %v709_v62 = vadd.f32 %v689_v22, %v538_v3  ;;  %2318 = vmatmul.msk.f32.gmra.mxu0 %vm289_vm0, %v1575_v40  ;;  %v1802_v40 = vpop.permute.xlu1 %1801 }
 0x150   : > { %v1148_v43 = vpop.f32.mrf.mxu1 }
 0x151   : > { %2294 = vmatmul.msk.f32.gmra.mxu3 %vm289_vm0, %v1407_v56  ;;  %v879_v61 = vadd.f32 %v859_v15, %v709_v62  ;;  %v1202_v45 = vadd.f32 %v1148_v43, %v2890_v8  ;;  %v1797_v27 = vpop.permute.xlu0 %1796 }
 0x153   : > { %v3131_v36 = vadd.f32 %v1029_v53, %v879_v61  ;;  %2241 = vmatmul.msk.f32.gmra.mxu1 %vm289_vm0, %v1066_v59  ;;  %2267 = vmatmul.msk.f32.gmra.mxu2 %vm289_vm0, %v1236_v60 }
 0x154   : > { %v1491_v37 = vpop.f32.mrf.mxu3  ;;  %v1658_v42 = vpop.f32.mrf.mxu0 }
 0x156   : > { %v1318_v11 = vpop.f32.mrf.mxu2 }
 0x157   : > { %v1372_v2 = vadd.f32 %v1318_v11, %v1202_v45  ;;  %2319 = vmatmul.msk.f32.gmra.mxu0 %vm289_vm0, %v1576_v0 }
 0x158   : > { %v1151_v4 = vpop.f32.mrf.mxu1 }
 0x159   : > { %v1542_v10 = vadd.f32 %v1488_v26, %v1372_v2  ;;  %v1203_v51 = vadd.f32 %v1151_v4, %v2903_v35 }
 0x15b   : > { %v1712_v9 = vadd.f32 %v1658_v42, %v1542_v10  ;;  %2242 = vmatmul.msk.f32.gmra.mxu1 %vm289_vm0, %v1067_v5  ;;  %2268 = vmatmul.msk.f32.gmra.mxu2 %vm289_vm0, %v1237_v6 }
 0x15c   : > { %v1494_v8 = vpop.f32.mrf.mxu3  ;;  %v1661_v12 = vpop.f32.mrf.mxu0 }
 0x15d   : > { %v1734_v23 = vadd.f32 %v3144_v46, %v1712_v9 }
 0x15e   : > { %v1321_v18 = vpop.f32.mrf.mxu2 }
 0x15f   : > { %1752 = vst.msk [vmem:[%s3151_s7] sm:$0xff] %vm289_vm0, %v1734_v23  ;;  %v1373_v19 = vadd.f32 %v1321_v18, %v1203_v51  ;;  %2320 = vmatmul.msk.f32.gmra.mxu0 %vm289_vm0, %v1577_v14  ;;  %v1879_v55 = vmul.f32 %v1792_v52, %v1734_v23 }
 0x160   : > { %v1154_v20 = vpop.f32.mrf.mxu1 }
 0x161   : > { %v1543_v13 = vadd.f32 %v1491_v37, %v1373_v19  ;;  %v1204_v57 = vadd.f32 %v1154_v20, %v2917_v58  ;;  %v1938_v17 = vmul.f32 %v1879_v55, %v1734_v23  ;;  %v1897_v44 = vsel %vm289_vm0, %v1879_v55, 0.0 }
 0x163   : > { %v1713_v21 = vadd.f32 %v1661_v12, %v1543_v13  ;;  %v1956_v58 = vsel %vm289_vm0, %v1938_v17, 0.0 }
 0x164   : > { %v1497_v15 = vpop.f32.mrf.mxu3  ;;  %v1664_v48 = vpop.f32.mrf.mxu0 }
 0x165   : > { %v1735_v35 = vadd.f32 %v3144_v46, %v1713_v21  ;;  %v1812_v21 = vpop.permute.xlu2 %1811 }
 0x166   : > { %v1324_v31 = vpop.f32.mrf.mxu2 }
 0x167   : > { %1753 = vst.msk [vmem:[%s3151_s7 + $0x8] sm:$0xff] %vm289_vm0, %v1735_v35  ;;  %v1880_v39 = vmul.f32 %v1797_v27, %v1735_v35  ;;  %v1374_v34 = vadd.f32 %v1324_v31, %v1204_v57 }
 0x168   : > { %v1157_v25 = vpop.f32.mrf.mxu1 }
 0x169   : > { %v1898_v47 = vsel %vm289_vm0, %v1880_v39, 0.0  ;;  %v1939_v49 = vmul.f32 %v1880_v39, %v1735_v35  ;;  %v1544_v26 = vadd.f32 %v1494_v8, %v1374_v34  ;;  %v1205_v59 = vadd.f32 %v1157_v25, %v2931_v7  ;;  %v1807_v7 = vpop.permute.xlu1 %1806 }
 0x16a   : > { %v1899_v53 = vadd.f32 %v1898_v47, %v1897_v44 }
 0x16b   : > { %v1957_v3 = vsel %vm289_vm0, %v1939_v49, 0.0  ;;  %v1714_v56 = vadd.f32 %v1664_v48, %v1544_v26 }
 0x16c   : > { %v1500_v22 = vpop.f32.mrf.mxu3  ;;  %v1958_v62 = vadd.f32 %v1957_v3, %v1956_v58  ;;  %v1667_v43 = vpop.f32.mrf.mxu0 }
 0x16d   : > { %v1736_v60 = vadd.f32 %v3144_v46, %v1714_v56 }
 0x16e   : > { %v1327_v61 = vpop.f32.mrf.mxu2 }
 0x16f   : > { %1754 = vst.msk [vmem:[%s3151_s7 + $0x10] sm:$0xff] %vm289_vm0, %v1736_v60  ;;  %v1881_v37 = vmul.f32 %v1802_v40, %v1736_v60  ;;  %v1375_v42 = vadd.f32 %v1327_v61, %v1205_v59 }
 0x170   : > { %v1160_v0 = vpop.f32.mrf.mxu1 }
 0x171   : > { %v1900_v45 = vsel %vm289_vm0, %v1881_v37, 0.0  ;;  %v1940_v11 = vmul.f32 %v1881_v37, %v1736_v60  ;;  %v1545_v2 = vadd.f32 %v1497_v15, %v1375_v42  ;;  %v1206_v8 = vadd.f32 %v1160_v0, %v2945_v30 }
 0x172   : > { %v1901_v4 = vadd.f32 %v1900_v45, %v1899_v53 }
 0x173   : > { %v1959_v5 = vsel %vm289_vm0, %v1940_v11, 0.0  ;;  %v1715_v6 = vadd.f32 %v1667_v43, %v1545_v2 }
 0x174   : > { %v1503_v10 = vpop.f32.mrf.mxu3  ;;  %v1960_v52 = vadd.f32 %v1959_v5, %v1958_v62  ;;  %v1670_v9 = vpop.f32.mrf.mxu0 }
 0x175   : > { %v1737_v12 = vadd.f32 %v3144_v46, %v1715_v6 }
 0x176   : > { %v1330_v14 = vpop.f32.mrf.mxu2 }
 0x177   : > { %1755 = vst.msk [vmem:[%s3151_s7 + $0x18] sm:$0xff] %vm289_vm0, %v1737_v12  ;;  %v1882_v51 = vmul.f32 %v1807_v7, %v1737_v12  ;;  %v1376_v23 = vadd.f32 %v1330_v14, %v1206_v8 }
 0x178   : > { %v1163_v18 = vpop.f32.mrf.mxu1 }
 0x179   : > { %v1902_v19 = vsel %vm289_vm0, %v1882_v51, 0.0  ;;  %v1941_v20 = vmul.f32 %v1882_v51, %v1737_v12  ;;  %v1546_v13 = vadd.f32 %v1500_v22, %v1376_v23  ;;  %v1207_v35 = vadd.f32 %v1163_v18, %v2956_v54  ;;  %v1817_v54 = vpop.permute.xlu2 %1816 }
 0x17a   : > { %v1903_v55 = vadd.f32 %v1902_v19, %v1901_v4 }
 0x17b   : > { %v1961_v15 = vsel %vm289_vm0, %v1941_v20, 0.0  ;;  %v1716_v27 = vadd.f32 %v1670_v9, %v1546_v13 }
 0x17c   : > { %v1506_v48 = vpop.f32.mrf.mxu3  ;;  %v1962_v30 = vadd.f32 %v1961_v15, %v1960_v52  ;;  %v1673_v57 = vpop.f32.mrf.mxu0 }
 0x17d   : > { %v1738_v31 = vadd.f32 %v3144_v46, %v1716_v27 }
 0x17e   : > { %v1333_v17 = vpop.f32.mrf.mxu2 }
 0x17f   : > { %1756 = vst.msk [vmem:[%s3151_s7 + $0x20] sm:$0xff] %vm289_vm0, %v1738_v31  ;;  %v1883_v39 = vmul.f32 %v1812_v21, %v1738_v31  ;;  %v1377_v34 = vadd.f32 %v1333_v17, %v1207_v35 }
 0x180   : > { %v1166_v25 = vpop.f32.mrf.mxu1 }
 0x181   : > { %v1904_v44 = vsel %vm289_vm0, %v1883_v39, 0.0  ;;  %v1942_v47 = vmul.f32 %v1883_v39, %v1738_v31  ;;  %v1547_v49 = vadd.f32 %v1503_v10, %v1377_v34  ;;  %v1208_v22 = vadd.f32 %v1166_v25, %v2967_v1  ;;  %v1822_v1 = vpop.permute.xlu0 %1821 }
 0x182   : > { %v1905_v26 = vadd.f32 %v1904_v44, %v1903_v55 }
 0x183   : > { %v1963_v53 = vsel %vm289_vm0, %v1942_v47, 0.0  ;;  %v1717_v40 = vadd.f32 %v1673_v57, %v1547_v49 }
 0x184   : > { %v1509_v58 = vpop.f32.mrf.mxu3  ;;  %v1964_v3 = vadd.f32 %v1963_v53, %v1962_v30  ;;  %v1676_v56 = vpop.f32.mrf.mxu0 }
 0x185   : > { %v1739_v62 = vadd.f32 %v3144_v46, %v1717_v40 }
 0x186   : > { %v1336_v43 = vpop.f32.mrf.mxu2 }
 0x187   : > { %1757 = vst.msk [vmem:[%s3151_s7 + $0x28] sm:$0xff] %vm289_vm0, %v1739_v62  ;;  %v1884_v59 = vmul.f32 %v1817_v54, %v1739_v62  ;;  %v1378_v60 = vadd.f32 %v1336_v43, %v1208_v22 }
 0x188   : > { %v1169_v61 = vpop.f32.mrf.mxu1 }
 0x189   : > { %v1906_v37 = vsel %vm289_vm0, %v1884_v59, 0.0  ;;  %v1943_v42 = vmul.f32 %v1884_v59, %v1739_v62  ;;  %v1548_v0 = vadd.f32 %v1506_v48, %v1378_v60  ;;  %v1209_v10 = vadd.f32 %v1169_v61, %v2981_v16  ;;  %v1827_v16 = vpop.permute.xlu1 %1826 }
 0x18a   : > { %v1907_v45 = vadd.f32 %v1906_v37, %v1905_v26 }
 0x18b   : > { %v1965_v11 = vsel %vm289_vm0, %v1943_v42, 0.0  ;;  %v1718_v2 = vadd.f32 %v1676_v56, %v1548_v0 }
 0x18c   : > { %v1512_v4 = vpop.f32.mrf.mxu3  ;;  %v1966_v5 = vadd.f32 %v1965_v11, %v1964_v3  ;;  %v1679_v6 = vpop.f32.mrf.mxu0 }
 0x18d   : > { %v1740_v52 = vadd.f32 %v3144_v46, %v1718_v2 }
 0x18e   : > { %v1339_v7 = vpop.f32.mrf.mxu2 }
 0x18f   : > { %1758 = vst.msk [vmem:[%s3151_s7 + $0x30] sm:$0xff] %vm289_vm0, %v1740_v52  ;;  %v1885_v9 = vmul.f32 %v1822_v1, %v1740_v52  ;;  %v1379_v8 = vadd.f32 %v1339_v7, %v1209_v10 }
 0x190   : > { %v1172_v12 = vpop.f32.mrf.mxu1 }
 0x191   : > { %v1908_v14 = vsel %vm289_vm0, %v1885_v9, 0.0  ;;  %v1944_v51 = vmul.f32 %v1885_v9, %v1740_v52  ;;  %v1549_v23 = vadd.f32 %v1509_v58, %v1379_v8  ;;  %v1210_v15 = vadd.f32 %v1172_v12, %v2998_v41  ;;  %v1832_v41 = vpop.permute.xlu2 %1831 }
 0x192   : > { %v1909_v18 = vadd.f32 %v1908_v14, %v1907_v45 }
 0x193   : > { %v1967_v19 = vsel %vm289_vm0, %v1944_v51, 0.0  ;;  %v1719_v20 = vadd.f32 %v1679_v6, %v1549_v23 }
 0x194   : > { %v1515_v13 = vpop.f32.mrf.mxu3  ;;  %v1968_v55 = vadd.f32 %v1967_v19, %v1966_v5  ;;  %v1682_v21 = vpop.f32.mrf.mxu0 }
 0x195   : > { %v1741_v27 = vadd.f32 %v3144_v46, %v1719_v20 }
 0x196   : > { %v1342_v48 = vpop.f32.mrf.mxu2 }
 0x197   : > { %1759 = vst.msk [vmem:[%s3151_s7 + $0x38] sm:$0xff] %vm289_vm0, %v1741_v27  ;;  %v1886_v30 = vmul.f32 %v1827_v16, %v1741_v27  ;;  %v1380_v57 = vadd.f32 %v1342_v48, %v1210_v15 }
 0x198   : > { %v1175_v35 = vpop.f32.mrf.mxu1 }
 0x199   : > { %v1910_v31 = vsel %vm289_vm0, %v1886_v30, 0.0  ;;  %v1945_v17 = vmul.f32 %v1886_v30, %v1741_v27  ;;  %v1550_v39 = vadd.f32 %v1512_v4, %v1380_v57  ;;  %v1211_v53 = vadd.f32 %v1175_v35, %v3012_v29  ;;  %v1837_v29 = vpop.permute.xlu0 %1836  ;;  %v1847_v35 = vpop.permute.xlu2 %1846 }
 0x19a   : > { %v1911_v34 = vadd.f32 %v1910_v31, %v1909_v18  ;;  %v1842_v18 = vpop.permute.xlu1 %1841 }
 0x19b   : > { %v1969_v25 = vsel %vm289_vm0, %v1945_v17, 0.0  ;;  %v1720_v44 = vadd.f32 %v1682_v21, %v1550_v39 }
 0x19c   : > { %v1518_v47 = vpop.f32.mrf.mxu3  ;;  %v1970_v49 = vadd.f32 %v1969_v25, %v1968_v55  ;;  %v1685_v26 = vpop.f32.mrf.mxu0 }
 0x19d   : > { %v1742_v40 = vadd.f32 %v3144_v46, %v1720_v44 }
 0x19e   : > { %v1345_v58 = vpop.f32.mrf.mxu2 }
 0x19f   : > { %1760 = vst.msk [vmem:[%s3151_s7 + $0x40] sm:$0xff] %vm289_vm0, %v1742_v40  ;;  %v1887_v3 = vmul.f32 %v1832_v41, %v1742_v40  ;;  %v1381_v54 = vadd.f32 %v1345_v58, %v1211_v53 }
 0x1a0   : > { %v1178_v56 = vpop.f32.mrf.mxu1 }
 0x1a1   : > { %v1912_v22 = vsel %vm289_vm0, %v1887_v3, 0.0  ;;  %v1946_v62 = vmul.f32 %v1887_v3, %v1742_v40  ;;  %v1551_v43 = vadd.f32 %v1515_v13, %v1381_v54  ;;  %v1212_v45 = vadd.f32 %v1178_v56, %v3029_v28 }
 0x1a2   : > { %v1913_v59 = vadd.f32 %v1912_v22, %v1911_v34  ;;  %v1852_v22 = vpop.permute.xlu0 %1851 }
 0x1a3   : > { %v1971_v60 = vsel %vm289_vm0, %v1946_v62, 0.0  ;;  %v1721_v61 = vadd.f32 %v1685_v26, %v1551_v43 }
 0x1a4   : > { %v1521_v37 = vpop.f32.mrf.mxu3  ;;  %v1972_v42 = vadd.f32 %v1971_v60, %v1970_v49  ;;  %v1688_v0 = vpop.f32.mrf.mxu0 }
 0x1a5   : > { %v1743_v11 = vadd.f32 %v3144_v46, %v1721_v61 }
 0x1a6   : > { %v1348_v2 = vpop.f32.mrf.mxu2 }
 0x1a7   : > { %1761 = vst.msk [vmem:[%s3151_s7 + $0x48] sm:$0xff] %vm289_vm0, %v1743_v11  ;;  %v1888_v4 = vmul.f32 %v1837_v29, %v1743_v11  ;;  %v1382_v5 = vadd.f32 %v1348_v2, %v1212_v45 }
 0x1a8   : > { %v1181_v1 = vpop.f32.mrf.mxu1 }
 0x1a9   : > { %v1914_v6 = vsel %vm289_vm0, %v1888_v4, 0.0  ;;  %v1947_v10 = vmul.f32 %v1888_v4, %v1743_v11  ;;  %v1552_v52 = vadd.f32 %v1518_v47, %v1382_v5  ;;  %v1213_v51 = vadd.f32 %v1181_v1, %v3046_v24  ;;  %v1857_v1 = vpop.permute.xlu1 %1856 }
 0x1aa   : > { %v1915_v7 = vadd.f32 %v1914_v6, %v1913_v59 }
 0x1ab   : > { %v1973_v9 = vsel %vm289_vm0, %v1947_v10, 0.0  ;;  %v1722_v8 = vadd.f32 %v1688_v0, %v1552_v52 }
 0x1ac   : > { %v1974_v12 = vadd.f32 %v1973_v9, %v1972_v42  ;;  %v1691_v14 = vpop.f32.mrf.mxu0  ;;  %v1524_v28 = vpop.f32.mrf.mxu3 }
 0x1ad   : > { %v1744_v23 = vadd.f32 %v3144_v46, %v1722_v8 }
 0x1ae   : > { %v1351_v19 = vpop.f32.mrf.mxu2 }
 0x1af   : > { %1762 = vst.msk [vmem:[%s3151_s7 + $0x50] sm:$0xff] %vm289_vm0, %v1744_v23  ;;  %v1889_v20 = vmul.f32 %v1842_v18, %v1744_v23  ;;  %v1383_v13 = vadd.f32 %v1351_v19, %v1213_v51 }
 0x1b0   : > { %v1184_v55 = vpop.f32.mrf.mxu1 }
 0x1b1   : > { %v1916_v16 = vsel %vm289_vm0, %v1889_v20, 0.0  ;;  %v1948_v21 = vmul.f32 %v1889_v20, %v1744_v23  ;;  %v1553_v15 = vadd.f32 %v1521_v37, %v1383_v13  ;;  %v1214_v31 = vadd.f32 %v1184_v55, %v3066_v50  ;;  %v1862_v13 = vpop.permute.xlu2 %1861 }
 0x1b2   : > { %v1917_v27 = vadd.f32 %v1916_v16, %v1915_v7 }
 0x1b3   : > { %v1975_v48 = vsel %vm289_vm0, %v1948_v21, 0.0  ;;  %v1723_v30 = vadd.f32 %v1691_v14, %v1553_v15 }
 0x1b4   : > { %v1976_v57 = vadd.f32 %v1975_v48, %v1974_v12  ;;  %v1694_v24 = vpop.f32.mrf.mxu0  ;;  %v1527_v34 = vpop.f32.mrf.mxu3 }
 0x1b5   : > { %v1745_v17 = vadd.f32 %v3144_v46, %v1723_v30 }
 0x1b6   : > { %v1354_v39 = vpop.f32.mrf.mxu2 }
 0x1b7   : > { %1763 = vst.msk [vmem:[%s3151_s7 + $0x58] sm:$0xff] %vm289_vm0, %v1745_v17  ;;  %v1890_v25 = vmul.f32 %v1847_v35, %v1745_v17  ;;  %v1384_v44 = vadd.f32 %v1354_v39, %v1214_v31 }
 0x1b8   : > { %v1187_v47 = vpop.f32.mrf.mxu1 }
 0x1b9   : > { %v1918_v49 = vsel %vm289_vm0, %v1890_v25, 0.0  ;;  %v1949_v41 = vmul.f32 %v1890_v25, %v1745_v17  ;;  %v1554_v26 = vadd.f32 %v1524_v28, %v1384_v44  ;;  %v1215_v54 = vadd.f32 %v1187_v47, %v3077_v63  ;;  %v1867_v17 = vpop.permute.xlu0 %1866 }
 0x1ba   : > { %v1919_v53 = vadd.f32 %v1918_v49, %v1917_v27 }
 0x1bb   : > { %v1977_v40 = vsel %vm289_vm0, %v1949_v41, 0.0  ;;  %v1724_v58 = vadd.f32 %v1694_v24, %v1554_v26 }
 0x1bc   : > { %v1978_v3 = vadd.f32 %v1977_v40, %v1976_v57  ;;  %v1697_v50 = vpop.f32.mrf.mxu0  ;;  %v1530_v61 = vpop.f32.mrf.mxu3 }
 0x1bd   : > { %v1746_v56 = vadd.f32 %v3144_v46, %v1724_v58 }
 0x1be   : > { %v1357_v62 = vpop.f32.mrf.mxu2 }
 0x1bf   : > { %1764 = vst.msk [vmem:[%s3151_s7 + $0x60] sm:$0xff] %vm289_vm0, %v1746_v56  ;;  %v1891_v43 = vmul.f32 %v1852_v22, %v1746_v56  ;;  %v1385_v59 = vadd.f32 %v1357_v62, %v1215_v54 }
 0x1c0   : > { %v1190_v60 = vpop.f32.mrf.mxu1 }
 0x1c1   : > { %v1920_v37 = vsel %vm289_vm0, %v1891_v43, 0.0  ;;  %v1950_v42 = vmul.f32 %v1891_v43, %v1746_v56  ;;  %v1555_v29 = vadd.f32 %v1527_v34, %v1385_v59  ;;  %v1216_v4 = vadd.f32 %v1190_v60, %v3091_v38 }
 0x1c2   : > { %v1921_v0 = vadd.f32 %v1920_v37, %v1919_v53 }
 0x1c3   : > { %v1979_v45 = vsel %vm289_vm0, %v1950_v42, 0.0  ;;  %v1725_v11 = vadd.f32 %v1697_v50, %v1555_v29 }
 0x1c4   : > { %v1980_v63 = vadd.f32 %v1979_v45, %v1978_v3  ;;  %v1700_v2 = vpop.f32.mrf.mxu0  ;;  %v1533_v28 = vpop.f32.mrf.mxu3 }
 0x1c5   : > { %v1747_v5 = vadd.f32 %v3144_v46, %v1725_v11 }
 0x1c6   : > { %v1360_v6 = vpop.f32.mrf.mxu2 }
 0x1c7   : > { %1765 = vst.msk [vmem:[%s3151_s7 + $0x68] sm:$0xff] %vm289_vm0, %v1747_v5  ;;  %v1892_v10 = vmul.f32 %v1857_v1, %v1747_v5  ;;  %v1386_v52 = vadd.f32 %v1360_v6, %v1216_v4 }
 0x1c8   : > { %v1193_v7 = vpop.f32.mrf.mxu1 }
 0x1c9   : > { %v1922_v9 = vsel %vm289_vm0, %v1892_v10, 0.0  ;;  %v1951_v8 = vmul.f32 %v1892_v10, %v1747_v5  ;;  %v1556_v12 = vadd.f32 %v1530_v61, %v1386_v52  ;;  %v1217_v19 = vadd.f32 %v1193_v7, %v3106_v33 }
 0x1ca   : > { %v1923_v14 = vadd.f32 %v1922_v9, %v1921_v0 }
 0x1cb   : > { %v1981_v51 = vsel %vm289_vm0, %v1951_v8, 0.0  ;;  %v1726_v23 = vadd.f32 %v1700_v2, %v1556_v12  ;;  %v1877_v2 = vpop.permute.xlu2 %1876 }
 0x1cc   : > { %v1982_v38 = vadd.f32 %v1981_v51, %v1980_v63  ;;  %v1703_v18 = vpop.f32.mrf.mxu0  ;;  %v1536_v33 = vpop.f32.mrf.mxu3 }
 0x1cd   : > { %v1748_v20 = vadd.f32 %v3144_v46, %v1726_v23 }
 0x1ce   : > { %v1363_v55 = vpop.f32.mrf.mxu2 }
 0x1cf   : > { %1766 = vst.msk [vmem:[%s3151_s7 + $0x70] sm:$0xff] %vm289_vm0, %v1748_v20  ;;  %v1893_v16 = vmul.f32 %v1862_v13, %v1748_v20  ;;  %v1387_v21 = vadd.f32 %v1363_v55, %v1217_v19 }
 0x1d0   : > { %v1196_v15 = vpop.f32.mrf.mxu1 }
 0x1d1   : > { %v1924_v27 = vsel %vm289_vm0, %v1893_v16, 0.0  ;;  %v1952_v48 = vmul.f32 %v1893_v16, %v1748_v20  ;;  %v1557_v30 = vadd.f32 %v1533_v28, %v1387_v21  ;;  %v1218_v39 = vadd.f32 %v1196_v15, %v3120_v32  ;;  %v1872_v32 = vpop.permute.xlu1 %1871 }
 0x1d2   : > { %v1925_v57 = vadd.f32 %v1924_v27, %v1923_v14 }
 0x1d3   : > { %v1983_v24 = vsel %vm289_vm0, %v1952_v48, 0.0  ;;  %v1727_v35 = vadd.f32 %v1703_v18, %v1557_v30 }
 0x1d4   : > { %v1984_v31 = vadd.f32 %v1983_v24, %v1982_v38  ;;  %v1706_v44 = vpop.f32.mrf.mxu0  ;;  %v1539_v43 = vpop.f32.mrf.mxu3 }
 0x1d5   : > { %v1749_v34 = vadd.f32 %v3144_v46, %v1727_v35 }
 0x1d6   : > { %v1366_v25 = vpop.f32.mrf.mxu2 }
 0x1d7   : > { %1767 = vst.msk [vmem:[%s3151_s7 + $0x78] sm:$0xff] %vm289_vm0, %v1749_v34  ;;  %v1894_v47 = vmul.f32 %v1867_v17, %v1749_v34  ;;  %v1388_v49 = vadd.f32 %v1366_v25, %v1218_v39 }
 0x1d8   : > { %v1199_v58 = vpop.f32.mrf.mxu1 }
 0x1d9   : > { %v1926_v41 = vsel %vm289_vm0, %v1894_v47, 0.0  ;;  %v1953_v26 = vmul.f32 %v1894_v47, %v1749_v34  ;;  %v1558_v53 = vadd.f32 %v1536_v33, %v1388_v49  ;;  %v1219_v56 = vadd.f32 %v1199_v58, %v3131_v36 }
 0x1da   : > { %v1927_v40 = vadd.f32 %v1926_v41, %v1925_v57 }
 0x1db   : > { %v1985_v3 = vsel %vm289_vm0, %v1953_v26, 0.0  ;;  %v1728_v50 = vadd.f32 %v1706_v44, %v1558_v53 }
 0x1dc   : > { %v1986_v54 = vadd.f32 %v1985_v3, %v1984_v31  ;;  %v1709_v61 = vpop.f32.mrf.mxu0 }
 0x1dd   : > { %v1750_v22 = vadd.f32 %v3144_v46, %v1728_v50 }
 0x1de   : > { %v1369_v62 = vpop.f32.mrf.mxu2 }
 0x1df   : > { %1768 = vst.msk [vmem:[%s3151_s7 + $0x80] sm:$0xff] %vm289_vm0, %v1750_v22  ;;  %v1895_v59 = vmul.f32 %v1872_v32, %v1750_v22  ;;  %v1389_v60 = vadd.f32 %v1369_v62, %v1219_v56 }
 0x1e1   : > { %v1928_v37 = vsel %vm289_vm0, %v1895_v59, 0.0  ;;  %v1954_v42 = vmul.f32 %v1895_v59, %v1750_v22  ;;  %v1559_v29 = vadd.f32 %v1539_v43, %v1389_v60 }
 0x1e2   : > { %v1929_v0 = vadd.f32 %v1928_v37, %v1927_v40 }
 0x1e3   : > { %v1987_v45 = vsel %vm289_vm0, %v1954_v42, 0.0  ;;  %v1729_v11 = vadd.f32 %v1709_v61, %v1559_v29 }
 0x1e4   : > { %v1988_v63 = vadd.f32 %v1987_v45, %v1986_v54 }
 0x1e5   : > { %v1751_v36 = vadd.f32 %v3144_v46, %v1729_v11 }
 0x1e7   : > { %1770 = vst.msk [vmem:[%s3151_s7 + $0x88] sm:$0x7f] %vm1769_vm1, %v1751_v36  ;;  %v1896_v4 = vmul.f32 %v1877_v2, %v1751_v36 }
 0x1e9   : > { %v1930_v5 = vsel %vm1769_vm1, %v1896_v4, 0.0  ;;  %v1955_v1 = vmul.f32 %v1896_v4, %v1751_v36 }
 0x1ea   : > { %v1931_v6 = vadd.f32 %v1930_v5, %v1929_v0 }
 0x1eb   : > { %v1989_v10 = vsel %vm1769_vm1, %v1955_v1, 0.0 }
 0x1ec   : > { %v1932_v52 = vrot.slane %v1931_v6, 4  ;;  %v1990_v7 = vadd.f32 %v1989_v10, %v1988_v63 }
 0x1ee   : > { %v1933_v9 = vadd.f32 %v1932_v52, %v1931_v6  ;;  %v1991_v8 = vrot.slane %v1990_v7, 4 }
 0x1f0   : > { %v1934_v12 = vrot.slane %v1933_v9, 2  ;;  %v1992_v14 = vadd.f32 %v1991_v8, %v1990_v7 }
 0x1f2   : > { %v1935_v28 = vadd.f32 %v1934_v12, %v1933_v9  ;;  %v1993_v51 = vrot.slane %v1992_v14, 2 }
 0x1f4   : > { %v1936_v23 = vrot.slane %v1935_v28, 1  ;;  %v1994_v38 = vadd.f32 %v1993_v51, %v1992_v14 }
 0x1f6   : > { %v1995_v46 = vrot.slane %v1994_v38, 1  ;;  %v1937_v18 = vadd.f32 %v1936_v23, %v1935_v28 }
 0x1f8   : > { %v1996_v19 = vadd.f32 %v1995_v46, %v1994_v38 }
 0x1fa   : > { %v1998_v20 = vsel %vm1997_vm2, %v1937_v18, %v1996_v19 }
 0x1fb   : > { %2000 = vst.msk [vmem:[%s235_s10] sm:$0x3] %vm1999_vm3, %v1998_v20 }
 0x1fc PF: > { %s16_s18 = sadd.s32 1, %s2368_s18  }
 0x1fd   : > { %p13_p4 = scmp.ge.s32.totalorder %s16_s18, 4  }
 0x1ff   :  { %15 = sbr.rel (!%p13_p4) target bundleno = 1 (0x1), region = 86 }

// kernel: conv3_forward.13
= control target key start
LH: loop header
LB: loop body
LE: loop exit
PB: predicated region body
PF: predicated region fallthrough
CT: control target
= control target key end

     0   :  { %s153_s0 = inlined_call_operand.vmem [shape: f32[2,64], index: 0, kind: input, shape index: {}]   ;;  %s154_s1 = inlined_call_operand.vmem [shape: f32[64,5], index: 1, kind: input, shape index: {}]   ;;  %s155_s2 = inlined_call_operand.vmem [shape: f32[1,5], index: 2, kind: input, shape index: {}]   ;;  %s156_s3 = inlined_call_operand.hbm [shape: f32[2,5], index: 3, kind: output, shape index: {}]  }
   0x1   :  { %v23_v0 = vld [vmem:[%s154_s1 + $0x38] sm:$0xff]  ;;  %v22_v1 = vld [vmem:[%s154_s1 + $0x30] sm:$0xff]  ;;  %v21_v2 = vld [vmem:[%s154_s1 + $0x28] sm:$0xff] }
   0x2   :  { %40 = vmatpush.msra.mxu0 %v23_v0 }
   0x4   :  { %41 = vmatpush.msra.mxu0 %v22_v1 }
   0x5   :  { %8 = vsyncpa [#allocation3], 0  ;;  %v20_v3 = vld [vmem:[%s154_s1 + $0x20] sm:$0xff]  ;;  %v19_v4 = vld [vmem:[%s154_s1 + $0x18] sm:$0xff]  ;;  %vm28_vm0 = vcmask 523264   ;;  %s99_s5 = smov [#allocation2]  }
   0x6   :  { %42 = vmatpush.msra.mxu0 %v21_v2  ;;  %v18_v5 = vld [vmem:[%s154_s1 + $0x10] sm:$0xff]  ;;  %v17_v6 = vld [vmem:[%s154_s1 + $0x8] sm:$0xff]  ;;  %v16_v7 = vld [vmem:[%s154_s1] sm:$0xff]  ;;  %s59_s6 = sshll.u32 %s99_s5, 4  ;;  %s61_s9 = sshll.u32 %s156_s3, 4  ;;  %vm52_vm1 = vcmask 33792   ;;  %s60_s6 = int_to_ptr.vmem [resolvable:$true] %s59_s6  ;;  %s62_s9 = int_to_ptr.hbm [resolvable:$true] %s61_s9 }
   0x7   :  { %v15_v8 = vld [vmem:[%s153_s0] sm:$0x3] }
   0x8   :  { %43 = vmatpush.msra.mxu0 %v20_v3  ;;  %v72_v9 = vld [vmem:[%s155_s2] ss:$0 sm:$0xff] }
   0xa   :  { %44 = vmatpush.msra.mxu0 %v19_v4 }
   0xc   :  { %45 = vmatpush.msra.mxu0 %v18_v5 }
   0xe   :  { %46 = vmatpush.msra.mxu0 %v17_v6 }
  0x10   :  { %47 = vmatpush.msra.mxu0 %v16_v7 }
  0x11   :  { %70 = vmatmul.msk.f32.vlgmr.msra.gmra.mxu0 %vm28_vm0, %v15_v8 }
  0x8e   :  { %v49_v10 = vpop.f32.mrf.mxu0 }
  0x8f   :  { %v50_v11 = vadd.f32 %v72_v9, %v49_v10 }
  0x91   :  { %53 = vst.msk [vmem:[#allocation2] sm:$0x3] %vm52_vm1, %v50_v11 }
  0x92   :  { %64 = dma.vmem_to_hbm [thread:$0]  %s60_s6, 32, %s62_s9, [#allocation3]  }
  0x93   :  { %97 = dma.done.wait [#allocation3], 32  }
  0x94   :  { %98 = vsyncadd [#allocation3], 4294967264 }
  0x95   :  { %69 = vsyncpa [#allocation3], 1 }

</bundles_post_ra>
